<compile_context>
chip_gen: v5e
topology: v5e:2x2
jax: 0.10.0
libtpu: 0.0.40
codegen_flags: <defaults>
</compile_context>

<pallas_src>
import functools

import jax
import jax.numpy as jnp
import numpy as np
from jax.experimental import pallas as pl
from jax.experimental.pallas import tpu as pltpu


# --------------------------------------------------------------------------
# Pallas kernel: folded conv stack + TGCN GRU cell for all periods at once,
# attention-weighted accumulation, then ReLU -> linear1 -> ReLU -> linear2.
# --------------------------------------------------------------------------
def _stacked_a3tgcn_kernel(
    probs_ref,                     # SMEM (T,)          f32  softmax(attention)
    x_ref,                         # VMEM (T*N, F)      f32  periods flattened into rows
    acat_ref,                      # VMEM (2*T*N, T*N)  f32  [kron(I_T, A^5) ; kron(I_T, A)]
    wx5_ref,                       # VMEM (F, C)        f32  W1@W2@W3@W4@W5 (conv-stack fold)
    bblk_ref,                      # VMEM (T*N, C)      f32  folded conv-stack bias, tiled over T
    wg_ref, bg_ref,                # VMEM (F, 3C) f32, (1, 3C) f32  gate X-path folds [z|r|h]
    wzr_hbm, wh_hbm, wl1_hbm,      # ANY/HBM bf16: (C, 2C), (C, C), (C, Hd)  -> manual DMA
    bl1_ref,                       # VMEM (1, Hd) f32
    wl2_ref, bl2_ref,              # VMEM (Hd, O) bf16, (1, O) f32
    out_ref,                       # VMEM (N, O) f32
    hid_ref,                       # VMEM (N, C) f32
    wzr_buf, wh_buf, wl1_buf,      # VMEM scratch (bf16) for the manually DMA'd weights
    sems,                          # DMA semaphores (3,)
):
    TN, C = bblk_ref.shape
    N = hid_ref.shape[0]
    T = TN // N

    # Kick off HBM->VMEM DMA of the late-use GRU / head weights so their
    # transfer overlaps the (tiny) adjacency / X-path matmuls below.
    cp_zr = pltpu.make_async_copy(wzr_hbm, wzr_buf, sems.at[0])
    cp_h = pltpu.make_async_copy(wh_hbm, wh_buf, sems.at[1])
    cp_l1 = pltpu.make_async_copy(wl1_hbm, wl1_buf, sems.at[2])
    cp_zr.start()
    cp_h.start()
    cp_l1.start()

    def mm_f32(a, b):
        return jnp.dot(a, b, preferred_element_type=jnp.float32)

    def mm_bf16(a, b):
        # bf16 operands, f32 accumulation on the MXU (b is already bf16).
        return jnp.dot(a.astype(jnp.bfloat16), b, preferred_element_type=jnp.float32)

    # [A^5 ; A] applied to X in a single matmul (adjacency kept in f32).
    axc = mm_f32(acat_ref[...], x_ref[...])                 # (2TN, F)
    ax5 = axc[:TN, :]                                       # A^5 X
    ax1 = axc[TN:, :]                                       # A   X

    # conv1..conv5 collapsed (linear stack):  h5 = A^5 X (W1..W5) + B_eff.
    h5 = mm_f32(ax5, wx5_ref[...]) + bblk_ref[...]          # (TN, C)

    # TGCN gate X-paths (conv_g -> linear_g[:C] pre-folded), computed late so
    # the (TN, 3C) temporary is only live across the GRU matmuls.
    gx = mm_f32(ax1, wg_ref[...]) + bg_ref[...]             # (TN, 3C)

    # GRU-style TGCN cell with hidden state H = h5.
    cp_zr.wait()
    zr = gx[:, :2 * C] + mm_bf16(h5, wzr_buf[...])          # (TN, 2C)
    z = jax.nn.sigmoid(zr[:, :C])
    r = jax.nn.sigmoid(zr[:, C:])
    cp_h.wait()
    h_tilde = jnp.tanh(gx[:, 2 * C:] + mm_bf16(h5 * r, wh_buf[...]))
    h_new = z * h5 + (1.0 - z) * h_tilde                    # (TN, C)

    # Attention-weighted sum over periods (scalar probs read from SMEM).
    acc = jnp.zeros((N, C), jnp.float32)
    for t in range(T):
        acc = acc + probs_ref[t] * h_new[t * N:(t + 1) * N, :]
    hid_ref[...] = acc                                      # out_hidden (pre-ReLU)

    # ReLU -> linear1 -> ReLU -> linear2 head.
    cp_l1.wait()
    hr = jnp.maximum(acc, 0.0)
    h1 = jnp.maximum(mm_bf16(hr, wl1_buf[...]) + bl1_ref[...], 0.0)
    out_ref[...] = mm_bf16(h1, wl2_ref[...]) + bl2_ref[...]


# --------------------------------------------------------------------------
# Glue: normalized adjacency (PyG gcn_norm), parameter init, one-time weight
# folding, and the jitted per-call wrapper.
# --------------------------------------------------------------------------
def build_norm_adj(edge_index, edge_weight, num_nodes,
                   improved=False, add_self_loops=True):
    src = edge_index[0]
    dst = edge_index[1]
    if edge_weight is None:
        edge_weight = jnp.ones((src.shape[0],), jnp.float32)
    edge_weight = edge_weight.astype(jnp.float32)
    if add_self_loops:
        fill = 2.0 if improved else 1.0
        loop = jnp.arange(num_nodes, dtype=src.dtype)
        src = jnp.concatenate([src, loop])
        dst = jnp.concatenate([dst, loop])
        edge_weight = jnp.concatenate(
            [edge_weight, jnp.full((num_nodes,), fill, jnp.float32)])
    deg = jnp.zeros((num_nodes,), jnp.float32).at[dst].add(edge_weight)
    dinv = jnp.where(deg > 0, jax.lax.rsqrt(deg), 0.0)
    norm = dinv[src] * edge_weight * dinv[dst]
    # out[i] = sum over edges (j -> i) of norm * x[j]  =>  A_hat[i, j] = norm
    return jnp.zeros((num_nodes, num_nodes), jnp.float32).at[dst, src].add(norm)


def init_params(key, F, C, T, Hd, O):
    ks = jax.random.split(key, 13)

    def u(k, shape, fan_in):
        return (jax.random.uniform(k, shape, jnp.float32, -1.0, 1.0)
                / np.sqrt(float(fan_in)))

    p = {}
    p["w1"] = u(ks[0], (F, C), F)
    p["b1"] = u(ks[1], (1, C), C)
    p["wst"] = u(ks[2], (4, C, C), C)          # conv2..conv5
    p["bst"] = u(ks[3], (4, 1, C), C)
    p["wg"] = u(ks[4], (3, F, C), F)           # TGCN conv_z / conv_r / conv_h
    p["bg"] = u(ks[5], (3, 1, C), C)
    p["wl"] = u(ks[6], (3, 2 * C, C), 2 * C)   # TGCN linear_z / _r / _h
    p["bl"] = u(ks[7], (3, 1, C), 2 * C)
    p["wl1"] = u(ks[8], (C, Hd), C)            # ConvStackedTemporalGCN.linear1
    p["bl1"] = u(ks[9], (1, Hd), C)
    p["wl2"] = u(ks[10], (Hd, O), Hd)          # ConvStackedTemporalGCN.linear2
    p["bl2"] = u(ks[11], (1, O), Hd)
    p["attention"] = jax.random.uniform(ks[12], (T,), jnp.float32)
    return p
    # TODO(synk): ConvStackedA3TGCN.linear (Linear(512*5, 512)) is never used
    # in forward(), so it is intentionally not instantiated.


def prepare_folded(params, edge_index, edge_attr, num_nodes, periods):
    """One-time fold/cast of weights + adjacency (f32 / HIGHEST precision).

    The returned dict of device arrays is cached by the caller and reused on
    every forward call, so none of this work sits in the per-call path.
    """
    f32, bf16 = jnp.float32, jnp.bfloat16
    hp = jax.lax.Precision.HIGHEST
    dot = functools.partial(jnp.dot, precision=hp)

    N, T = num_nodes, periods
    C = params["w1"].shape[1]

    a = build_norm_adj(edge_index, edge_attr, N)           # (N, N) f32
    a2 = dot(a, a)
    a3 = dot(a2, a)
    a4 = dot(a2, a2)
    a5 = dot(a4, a)

    # conv1..conv5 stack fold:  h5 = A^5 X (W1..W5) + B_eff.
    w_list = [params["w1"]] + [params["wst"][l] for l in range(4)]   # W1..W5
    b_list = [params["b1"]] + [params["bst"][l] for l in range(4)]   # b1..b5
    suffix = [None] * 5
    suffix[4] = jnp.eye(C, dtype=f32)
    for i in range(3, -1, -1):
        suffix[i] = dot(w_list[i + 1], suffix[i + 1])       # W_{i+2}..W5
    w_x5 = dot(w_list[0], suffix[0])                        # (F, C)

    ones = jnp.ones((N, 1), f32)
    apow = [dot(a4, ones), dot(a3, ones), dot(a2, ones), dot(a, ones), ones]
    b_full = sum(apow[i] * dot(b_list[i], suffix[i]) for i in range(5))  # (N, C)
    b_blk = jnp.tile(b_full, (T, 1))                        # (TN, C)

    # Block-diagonal adjacency powers, stacked so the kernel applies both in
    # one matmul.
    # TODO(synk): for large N apply A_hat per period (reshape/einsum) instead
    # of the dense kron, which grows as (T*N)^2.
    eye_t = jnp.eye(T, dtype=f32)
    a_cat = jnp.concatenate(
        [jnp.kron(eye_t, a5), jnp.kron(eye_t, a)], axis=0)  # (2TN, TN)

    # TGCN gate X-path folds: conv_g -> linear_g[:C].
    wl_top = params["wl"][:, :C, :]                         # (3, C, C)
    wl_bot = params["wl"][:, C:, :]                         # (3, C, C)
    w_geff = jnp.einsum("gfc,gcd->gfd", params["wg"], wl_top, precision=hp)
    b_geff = (jnp.einsum("goc,gcd->god", params["bg"], wl_top, precision=hp)
              + params["bl"])
    w_gcat = jnp.concatenate([w_geff[0], w_geff[1], w_geff[2]], axis=1)  # (F, 3C)
    b_gcat = jnp.concatenate([b_geff[0], b_geff[1], b_geff[2]], axis=1)  # (1, 3C)
    w_zr = jnp.concatenate([wl_bot[0], wl_bot[1]], axis=1)               # (C, 2C)
    w_h = wl_bot[2]                                                       # (C, C)

    probs = jax.nn.softmax(params["attention"]).astype(f32)

    return {
        "probs": probs,
        "a_cat": a_cat.astype(f32),
        "w_x5": w_x5.astype(f32),
        "b_blk": b_blk.astype(f32),
        "w_gcat": w_gcat.astype(f32),
        "b_gcat": b_gcat.astype(f32),
        "w_zr": w_zr.astype(bf16),
        "w_h": w_h.astype(bf16),
        "wl1": params["wl1"].astype(bf16),
        "bl1": params["bl1"].astype(f32),
        "wl2": params["wl2"].astype(bf16),
        "bl2": params["bl2"].astype(f32),
    }


@jax.jit
def conv_stacked_temporal_gcn(x, folded):
    """x: [N, F, T] (PyTorch layout); returns (out [N, O], out_hidden [N, C])."""
    N, F, T = x.shape
    C = folded["w_h"].shape[0]
    Hd = folded["wl1"].shape[1]
    O = folded["wl2"].shape[1]
    TN = T * N
    f32 = jnp.float32

    x_flat = jnp.transpose(x, (2, 0, 1)).reshape(TN, F).astype(f32)   # (T*N, F)

    vmem = pl.BlockSpec(memory_space=pltpu.MemorySpace.VMEM)
    smem = pl.BlockSpec(memory_space=pltpu.MemorySpace.SMEM)
    hbm = pl.BlockSpec(memory_space=pl.ANY)

    # TODO(synk): if multiple graphs / windows are ever batched, add a leading
    # parallel grid axis (and stack rows) to fill the MXU and both v7x cores.
    out, hidden = pl.pallas_call(
        _stacked_a3tgcn_kernel,
        out_shape=(jax.ShapeDtypeStruct((N, O), f32),
                   jax.ShapeDtypeStruct((N, C), f32)),
        in_specs=[smem, vmem, vmem, vmem, vmem, vmem, vmem,
                  hbm, hbm, hbm, vmem, vmem, vmem],
        out_specs=(vmem, vmem),
        scratch_shapes=[
            pltpu.VMEM((C, 2 * C), jnp.bfloat16),   # W_zr
            pltpu.VMEM((C, C), jnp.bfloat16),       # W_h
            pltpu.VMEM((C, Hd), jnp.bfloat16),      # W_l1
            pltpu.SemaphoreType.DMA((3,)),
        ],
        compiler_params=pltpu.CompilerParams(
            vmem_limit_bytes=32 * 1024 * 1024),
    )(folded["probs"], x_flat, folded["a_cat"], folded["w_x5"],
      folded["b_blk"], folded["w_gcat"], folded["b_gcat"],
      folded["w_zr"], folded["w_h"], folded["wl1"],
      folded["bl1"], folded["wl2"], folded["bl2"])
    return out, hidden


# Pure-JAX reference (original per-period module math, HIGHEST precision).
def reference(x, edge_index, edge_attr, params):
    N, F, T = x.shape
    C = params["w1"].shape[1]
    a = build_norm_adj(edge_index, edge_attr, N)
    probs = jax.nn.softmax(params["attention"])
    dot = functools.partial(jnp.dot, precision=jax.lax.Precision.HIGHEST)

    def gcn(xx, w, b):
        return dot(a, dot(xx, w)) + b

    acc = jnp.zeros((N, C), jnp.float32)
    for t in range(T):
        xt = x[:, :, t]
        h = gcn(xt, params["w1"], params["b1"])
        for l in range(params["wst"].shape[0]):
            h = gcn(h, params["wst"][l], params["bst"][l])

        def gate(g, hpart):
            c = gcn(xt, params["wg"][g], params["bg"][g])
            return (dot(c, params["wl"][g, :C]) + dot(hpart, params["wl"][g, C:])
                    + params["bl"][g])

        z = jax.nn.sigmoid(gate(0, h))
        r = jax.nn.sigmoid(gate(1, h))
        ht = jnp.tanh(gate(2, h * r))
        acc = acc + probs[t] * (z * h + (1.0 - z) * ht)

    hid = acc
    hr = jnp.maximum(acc, 0.0)
    h1 = jnp.maximum(dot(hr, params["wl1"]) + params["bl1"], 0.0)
    out = dot(h1, params["wl2"]) + params["bl2"]
    return out, hid


if __name__ == "__main__":
    key = jax.random.PRNGKey(0)
    kx, ke, kp = jax.random.split(key, 3)

    # Small synthetic problem: 16 nodes, 8 node features, 4 periods, 8 outputs.
    # C=512 and hidden=256 are hard-coded by the module definition.
    N, F, T = 16, 8, 4
    C, Hd, O = 512, 256, 8

    x = jax.random.normal(kx, (N, F, T), jnp.float32)          # [N, F, T]
    src = jnp.arange(N, dtype=jnp.int32)
    dst = (src + 1) % N
    edge_index = jnp.stack([jnp.concatenate([src, dst]),
                            jnp.concatenate([dst, src])])       # [2, 32]
    edge_attr = jax.random.uniform(ke, (edge_index.shape[1],), jnp.float32,
                                   0.5, 1.5)                    # [32]
    params = init_params(kp, F, C, T, Hd, O)

    # One-time fold/cast of weights + adjacency (cached, reused every call).
    folded = prepare_folded(params, edge_index, edge_attr, N, T)
    jax.block_until_ready(folded)

    out, hidden = conv_stacked_temporal_gcn(x, folded)
    jax.block_until_ready((out, hidden))

    ref_out, ref_hidden = reference(x, edge_index, edge_attr, params)
    np.testing.assert_allclose(np.asarray(out), np.asarray(ref_out),
                               rtol=2e-2, atol=2e-2)
    np.testing.assert_allclose(np.asarray(hidden), np.asarray(ref_hidden),
                               rtol=2e-2, atol=2e-2)
    print("KERNEL_OK")
</pallas_src>

<mosaic_0001>
module attributes {stable_mosaic.version = 11 : i64} {
  func.func @_stacked_a3tgcn_kernel(%arg0: memref<4xf32, #tpu.memory_space<smem>>, %arg1: memref<64x8xf32, #tpu.memory_space<vmem>>, %arg2: memref<128x64xf32, #tpu.memory_space<vmem>>, %arg3: memref<8x512xf32, #tpu.memory_space<vmem>>, %arg4: memref<64x512xf32, #tpu.memory_space<vmem>>, %arg5: memref<8x1536xf32, #tpu.memory_space<vmem>>, %arg6: memref<1x1536xf32, #tpu.memory_space<vmem>>, %arg7: memref<512x1024xbf16, #tpu.memory_space<any>>, %arg8: memref<512x512xbf16, #tpu.memory_space<any>>, %arg9: memref<512x256xbf16, #tpu.memory_space<any>>, %arg10: memref<1x256xf32, #tpu.memory_space<vmem>>, %arg11: memref<256x8xbf16, #tpu.memory_space<vmem>>, %arg12: memref<1x8xf32, #tpu.memory_space<vmem>>, %arg13: memref<16x8xf32, #tpu.memory_space<vmem>>, %arg14: memref<16x512xf32, #tpu.memory_space<vmem>>, %arg15: memref<512x1024xbf16, #tpu.memory_space<vmem>>, %arg16: memref<512x512xbf16, #tpu.memory_space<vmem>>, %arg17: memref<512x256xbf16, #tpu.memory_space<vmem>>, %arg18: memref<3x!tpu.dma_semaphore, #tpu.memory_space<semaphore_mem>>) attributes {dimension_semantics = [], scalar_prefetch = 0 : i64, scratch_operands = 4 : i64, tpu.core_type = #tpu.core_type<tc>} {
    %c0_i32 = arith.constant 0 : i32
    %0 = tpu.memref_slice %arg18[%c0_i32] : memref<3x!tpu.dma_semaphore, #tpu.memory_space<semaphore_mem>> -> memref<1x!tpu.dma_semaphore, #tpu.memory_space<semaphore_mem>>
    %1 = tpu.memref_squeeze %0 : memref<1x!tpu.dma_semaphore, #tpu.memory_space<semaphore_mem>> -> memref<!tpu.dma_semaphore, #tpu.memory_space<semaphore_mem>>
    tpu.enqueue_dma source(%arg7 : memref<512x1024xbf16, #tpu.memory_space<any>>) target(%arg15 : memref<512x1024xbf16, #tpu.memory_space<vmem>>) target_semaphore(%1 : memref<!tpu.dma_semaphore, #tpu.memory_space<semaphore_mem>>)
    %c1_i32 = arith.constant 1 : i32
    %2 = tpu.memref_slice %arg18[%c1_i32] : memref<3x!tpu.dma_semaphore, #tpu.memory_space<semaphore_mem>> -> memref<1x!tpu.dma_semaphore, #tpu.memory_space<semaphore_mem>>
    %3 = tpu.memref_squeeze %2 : memref<1x!tpu.dma_semaphore, #tpu.memory_space<semaphore_mem>> -> memref<!tpu.dma_semaphore, #tpu.memory_space<semaphore_mem>>
    tpu.enqueue_dma source(%arg8 : memref<512x512xbf16, #tpu.memory_space<any>>) target(%arg16 : memref<512x512xbf16, #tpu.memory_space<vmem>>) target_semaphore(%3 : memref<!tpu.dma_semaphore, #tpu.memory_space<semaphore_mem>>)
    %c2_i32 = arith.constant 2 : i32
    %4 = tpu.memref_slice %arg18[%c2_i32] : memref<3x!tpu.dma_semaphore, #tpu.memory_space<semaphore_mem>> -> memref<1x!tpu.dma_semaphore, #tpu.memory_space<semaphore_mem>>
    %5 = tpu.memref_squeeze %4 : memref<1x!tpu.dma_semaphore, #tpu.memory_space<semaphore_mem>> -> memref<!tpu.dma_semaphore, #tpu.memory_space<semaphore_mem>>
    tpu.enqueue_dma source(%arg9 : memref<512x256xbf16, #tpu.memory_space<any>>) target(%arg17 : memref<512x256xbf16, #tpu.memory_space<vmem>>) target_semaphore(%5 : memref<!tpu.dma_semaphore, #tpu.memory_space<semaphore_mem>>)
    %c0 = arith.constant 0 : index
    %c0_0 = arith.constant 0 : index
    %6 = vector.load %arg2[%c0, %c0_0] : memref<128x64xf32, #tpu.memory_space<vmem>>, vector<128x64xf32>
    %c0_1 = arith.constant 0 : index
    %c0_2 = arith.constant 0 : index
    %7 = vector.load %arg1[%c0_1, %c0_2] : memref<64x8xf32, #tpu.memory_space<vmem>>, vector<64x8xf32>
    %cst = arith.constant dense<0.000000e+00> : vector<128x8xf32>
    %8 = tpu.matmul %6, %7, %cst {dimension_numbers = #tpu.dot_dimension_numbers<[1], [0], [0], [1], [0, 0, 1, 1], [], []>} : vector<128x64xf32>, vector<64x8xf32>, vector<128x8xf32> -> vector<128x8xf32>
    %9 = vector.extract_strided_slice %8 {offsets = [0, 0], sizes = [64, 8], strides = [1, 1]} : vector<128x8xf32> to vector<64x8xf32>
    %10 = vector.extract_strided_slice %8 {offsets = [64, 0], sizes = [64, 8], strides = [1, 1]} : vector<128x8xf32> to vector<64x8xf32>
    %c0_3 = arith.constant 0 : index
    %c0_4 = arith.constant 0 : index
    %11 = vector.load %arg3[%c0_3, %c0_4] : memref<8x512xf32, #tpu.memory_space<vmem>>, vector<8x512xf32>
    %cst_5 = arith.constant dense<0.000000e+00> : vector<64x512xf32>
    %12 = tpu.matmul %9, %11, %cst_5 {dimension_numbers = #tpu.dot_dimension_numbers<[1], [0], [0], [1], [0, 0, 1, 1], [], []>} : vector<64x8xf32>, vector<8x512xf32>, vector<64x512xf32> -> vector<64x512xf32>
    %c0_6 = arith.constant 0 : index
    %c0_7 = arith.constant 0 : index
    %13 = vector.load %arg4[%c0_6, %c0_7] : memref<64x512xf32, #tpu.memory_space<vmem>>, vector<64x512xf32>
    %14 = arith.addf %12, %13 : vector<64x512xf32>
    %c0_8 = arith.constant 0 : index
    %c0_9 = arith.constant 0 : index
    %15 = vector.load %arg5[%c0_8, %c0_9] : memref<8x1536xf32, #tpu.memory_space<vmem>>, vector<8x1536xf32>
    %cst_10 = arith.constant dense<0.000000e+00> : vector<64x1536xf32>
    %16 = tpu.matmul %10, %15, %cst_10 {dimension_numbers = #tpu.dot_dimension_numbers<[1], [0], [0], [1], [0, 0, 1, 1], [], []>} : vector<64x8xf32>, vector<8x1536xf32>, vector<64x1536xf32> -> vector<64x1536xf32>
    %c0_11 = arith.constant 0 : index
    %c0_12 = arith.constant 0 : index
    %17 = vector.load %arg6[%c0_11, %c0_12] : memref<1x1536xf32, #tpu.memory_space<vmem>>, vector<1x1536xf32>
    %18 = vector.broadcast %17 : vector<1x1536xf32> to vector<64x1536xf32>
    %19 = arith.addf %16, %18 : vector<64x1536xf32>
    %c0_i32_13 = arith.constant 0 : i32
    %20 = tpu.memref_slice %arg18[%c0_i32_13] : memref<3x!tpu.dma_semaphore, #tpu.memory_space<semaphore_mem>> -> memref<1x!tpu.dma_semaphore, #tpu.memory_space<semaphore_mem>>
    %21 = tpu.memref_squeeze %20 : memref<1x!tpu.dma_semaphore, #tpu.memory_space<semaphore_mem>> -> memref<!tpu.dma_semaphore, #tpu.memory_space<semaphore_mem>>
    tpu.wait_dma2 semaphore(%21 : memref<!tpu.dma_semaphore, #tpu.memory_space<semaphore_mem>>) src(%arg7 : memref<512x1024xbf16, #tpu.memory_space<any>>) dst(%arg15 : memref<512x1024xbf16, #tpu.memory_space<vmem>>)
    %22 = vector.extract_strided_slice %19 {offsets = [0, 0], sizes = [64, 1024], strides = [1, 1]} : vector<64x1536xf32> to vector<64x1024xf32>
    %c0_14 = arith.constant 0 : index
    %c0_15 = arith.constant 0 : index
    %23 = vector.load %arg15[%c0_14, %c0_15] : memref<512x1024xbf16, #tpu.memory_space<vmem>>, vector<512x1024xbf16>
    %24 = arith.truncf %14 : vector<64x512xf32> to vector<64x512xbf16>
    %cst_16 = arith.constant dense<0.000000e+00> : vector<64x1024xf32>
    %25 = tpu.matmul %24, %23, %cst_16 {dimension_numbers = #tpu.dot_dimension_numbers<[1], [0], [0], [1], [0, 0, 1, 1], [], []>} : vector<64x512xbf16>, vector<512x1024xbf16>, vector<64x1024xf32> -> vector<64x1024xf32>
    %26 = arith.addf %22, %25 : vector<64x1024xf32>
    %27 = vector.extract_strided_slice %26 {offsets = [0, 0], sizes = [64, 512], strides = [1, 1]} : vector<64x1024xf32> to vector<64x512xf32>
    %28 = arith.negf %27 : vector<64x512xf32>
    %29 = math.exp %28 : vector<64x512xf32>
    %cst_17 = arith.constant 1.000000e+00 : f32
    %30 = vector.broadcast %cst_17 : f32 to vector<64x512xf32>
    %31 = arith.addf %30, %29 : vector<64x512xf32>
    %32 = arith.divf %30, %31 : vector<64x512xf32>
    %33 = vector.extract_strided_slice %26 {offsets = [0, 512], sizes = [64, 512], strides = [1, 1]} : vector<64x1024xf32> to vector<64x512xf32>
    %34 = arith.negf %33 : vector<64x512xf32>
    %35 = math.exp %34 : vector<64x512xf32>
    %cst_18 = arith.constant 1.000000e+00 : f32
    %36 = vector.broadcast %cst_18 : f32 to vector<64x512xf32>
    %37 = arith.addf %36, %35 : vector<64x512xf32>
    %38 = arith.divf %36, %37 : vector<64x512xf32>
    %c1_i32_19 = arith.constant 1 : i32
    %39 = tpu.memref_slice %arg18[%c1_i32_19] : memref<3x!tpu.dma_semaphore, #tpu.memory_space<semaphore_mem>> -> memref<1x!tpu.dma_semaphore, #tpu.memory_space<semaphore_mem>>
    %40 = tpu.memref_squeeze %39 : memref<1x!tpu.dma_semaphore, #tpu.memory_space<semaphore_mem>> -> memref<!tpu.dma_semaphore, #tpu.memory_space<semaphore_mem>>
    tpu.wait_dma2 semaphore(%40 : memref<!tpu.dma_semaphore, #tpu.memory_space<semaphore_mem>>) src(%arg8 : memref<512x512xbf16, #tpu.memory_space<any>>) dst(%arg16 : memref<512x512xbf16, #tpu.memory_space<vmem>>)
    %41 = vector.extract_strided_slice %19 {offsets = [0, 1024], sizes = [64, 512], strides = [1, 1]} : vector<64x1536xf32> to vector<64x512xf32>
    %42 = arith.mulf %14, %38 : vector<64x512xf32>
    %c0_20 = arith.constant 0 : index
    %c0_21 = arith.constant 0 : index
    %43 = vector.load %arg16[%c0_20, %c0_21] : memref<512x512xbf16, #tpu.memory_space<vmem>>, vector<512x512xbf16>
    %44 = arith.truncf %42 : vector<64x512xf32> to vector<64x512xbf16>
    %cst_22 = arith.constant dense<0.000000e+00> : vector<64x512xf32>
    %45 = tpu.matmul %44, %43, %cst_22 {dimension_numbers = #tpu.dot_dimension_numbers<[1], [0], [0], [1], [0, 0, 1, 1], [], []>} : vector<64x512xbf16>, vector<512x512xbf16>, vector<64x512xf32> -> vector<64x512xf32>
    %46 = arith.addf %41, %45 : vector<64x512xf32>
    %47 = math.tanh %46 : vector<64x512xf32>
    %48 = arith.mulf %32, %14 : vector<64x512xf32>
    %cst_23 = arith.constant 1.000000e+00 : f32
    %49 = vector.broadcast %cst_23 : f32 to vector<64x512xf32>
    %50 = arith.subf %49, %32 : vector<64x512xf32>
    %51 = arith.mulf %50, %47 : vector<64x512xf32>
    %52 = arith.addf %48, %51 : vector<64x512xf32>
    %cst_24 = arith.constant 0.000000e+00 : f32
    %53 = vector.broadcast %cst_24 : f32 to vector<16x512xf32>
    %c0_25 = arith.constant 0 : index
    %54 = memref.load %arg0[%c0_25] : memref<4xf32, #tpu.memory_space<smem>>
    %55 = vector.extract_strided_slice %52 {offsets = [0, 0], sizes = [16, 512], strides = [1, 1]} : vector<64x512xf32> to vector<16x512xf32>
    %56 = vector.broadcast %54 : f32 to vector<16x512xf32>
    %57 = arith.mulf %56, %55 : vector<16x512xf32>
    %58 = arith.addf %53, %57 : vector<16x512xf32>
    %c1 = arith.constant 1 : index
    %59 = memref.load %arg0[%c1] : memref<4xf32, #tpu.memory_space<smem>>
    %60 = vector.extract_strided_slice %52 {offsets = [16, 0], sizes = [16, 512], strides = [1, 1]} : vector<64x512xf32> to vector<16x512xf32>
    %61 = vector.broadcast %59 : f32 to vector<16x512xf32>
    %62 = arith.mulf %61, %60 : vector<16x512xf32>
    %63 = arith.addf %58, %62 : vector<16x512xf32>
    %c2 = arith.constant 2 : index
    %64 = memref.load %arg0[%c2] : memref<4xf32, #tpu.memory_space<smem>>
    %65 = vector.extract_strided_slice %52 {offsets = [32, 0], sizes = [16, 512], strides = [1, 1]} : vector<64x512xf32> to vector<16x512xf32>
    %66 = vector.broadcast %64 : f32 to vector<16x512xf32>
    %67 = arith.mulf %66, %65 : vector<16x512xf32>
    %68 = arith.addf %63, %67 : vector<16x512xf32>
    %c3 = arith.constant 3 : index
    %69 = memref.load %arg0[%c3] : memref<4xf32, #tpu.memory_space<smem>>
    %70 = vector.extract_strided_slice %52 {offsets = [48, 0], sizes = [16, 512], strides = [1, 1]} : vector<64x512xf32> to vector<16x512xf32>
    %71 = vector.broadcast %69 : f32 to vector<16x512xf32>
    %72 = arith.mulf %71, %70 : vector<16x512xf32>
    %73 = arith.addf %68, %72 : vector<16x512xf32>
    %c0_26 = arith.constant 0 : index
    %c0_27 = arith.constant 0 : index
    %74 = vector.load %arg14[%c0_26, %c0_27] : memref<16x512xf32, #tpu.memory_space<vmem>>, vector<16x512xf32>
    tpu.vector_store %arg14[%c0_26, %c0_27], %73 {strides = array<i32>} : memref<16x512xf32, #tpu.memory_space<vmem>>, vector<16x512xf32>,
    %c2_i32_28 = arith.constant 2 : i32
    %75 = tpu.memref_slice %arg18[%c2_i32_28] : memref<3x!tpu.dma_semaphore, #tpu.memory_space<semaphore_mem>> -> memref<1x!tpu.dma_semaphore, #tpu.memory_space<semaphore_mem>>
    %76 = tpu.memref_squeeze %75 : memref<1x!tpu.dma_semaphore, #tpu.memory_space<semaphore_mem>> -> memref<!tpu.dma_semaphore, #tpu.memory_space<semaphore_mem>>
    tpu.wait_dma2 semaphore(%76 : memref<!tpu.dma_semaphore, #tpu.memory_space<semaphore_mem>>) src(%arg9 : memref<512x256xbf16, #tpu.memory_space<any>>) dst(%arg17 : memref<512x256xbf16, #tpu.memory_space<vmem>>)
    %cst_29 = arith.constant 0.000000e+00 : f32
    %77 = vector.broadcast %cst_29 : f32 to vector<16x512xf32>
    %78 = arith.maximumf %73, %77 : vector<16x512xf32>
    %c0_30 = arith.constant 0 : index
    %c0_31 = arith.constant 0 : index
    %79 = vector.load %arg17[%c0_30, %c0_31] : memref<512x256xbf16, #tpu.memory_space<vmem>>, vector<512x256xbf16>
    %80 = arith.truncf %78 : vector<16x512xf32> to vector<16x512xbf16>
    %cst_32 = arith.constant dense<0.000000e+00> : vector<16x256xf32>
    %81 = tpu.matmul %80, %79, %cst_32 {dimension_numbers = #tpu.dot_dimension_numbers<[1], [0], [0], [1], [0, 0, 1, 1], [], []>} : vector<16x512xbf16>, vector<512x256xbf16>, vector<16x256xf32> -> vector<16x256xf32>
    %c0_33 = arith.constant 0 : index
    %c0_34 = arith.constant 0 : index
    %82 = vector.load %arg10[%c0_33, %c0_34] : memref<1x256xf32, #tpu.memory_space<vmem>>, vector<1x256xf32>
    %83 = vector.broadcast %82 : vector<1x256xf32> to vector<16x256xf32>
    %84 = arith.addf %81, %83 : vector<16x256xf32>
    %cst_35 = arith.constant 0.000000e+00 : f32
    %85 = vector.broadcast %cst_35 : f32 to vector<16x256xf32>
    %86 = arith.maximumf %84, %85 : vector<16x256xf32>
    %c0_36 = arith.constant 0 : index
    %c0_37 = arith.constant 0 : index
    %87 = vector.load %arg11[%c0_36, %c0_37] : memref<256x8xbf16, #tpu.memory_space<vmem>>, vector<256x8xbf16>
    %88 = arith.truncf %86 : vector<16x256xf32> to vector<16x256xbf16>
    %cst_38 = arith.constant dense<0.000000e+00> : vector<16x8xf32>
    %89 = tpu.matmul %88, %87, %cst_38 {dimension_numbers = #tpu.dot_dimension_numbers<[1], [0], [0], [1], [0, 0, 1, 1], [], []>} : vector<16x256xbf16>, vector<256x8xbf16>, vector<16x8xf32> -> vector<16x8xf32>
    %c0_39 = arith.constant 0 : index
    %c0_40 = arith.constant 0 : index
    %90 = vector.load %arg12[%c0_39, %c0_40] : memref<1x8xf32, #tpu.memory_space<vmem>>, vector<1x8xf32>
    %91 = vector.broadcast %90 : vector<1x8xf32> to vector<16x8xf32>
    %92 = arith.addf %89, %91 : vector<16x8xf32>
    %c0_41 = arith.constant 0 : index
    %c0_42 = arith.constant 0 : index
    %93 = vector.load %arg13[%c0_41, %c0_42] : memref<16x8xf32, #tpu.memory_space<vmem>>, vector<16x8xf32>
    tpu.vector_store %arg13[%c0_41, %c0_42], %92 {strides = array<i32>} : memref<16x8xf32, #tpu.memory_space<vmem>>, vector<16x8xf32>,
    return
  }
}

</mosaic_0001>

<bundles_post_ra>
// kernel: conv_stacked_temporal_gcn.1
= control target key start
LH: loop header
LB: loop body
LE: loop exit
PB: predicated region body
PF: predicated region fallthrough
CT: control target
= control target key end

     0   :  { %20 = vsyncpa [#allocation9], 0  ;;  %s12499_s0 = inlined_call_operand.vmem [shape: f32[4], index: 0, kind: input, shape index: {}]   ;;  %s12500_s1 = inlined_call_operand.vmem [shape: f32[64,8], index: 1, kind: input, shape index: {}]   ;;  %s12501_s2 = inlined_call_operand.vmem [shape: f32[128,64], index: 2, kind: input, shape index: {}]   ;;  %s12502_s3 = inlined_call_operand.hbm [shape: f32[8,512], index: 3, kind: input, shape index: {}]   ;;  %s12503_s4 = inlined_call_operand.vmem [shape: f32[64,512], index: 4, kind: input, shape index: {}]   ;;  %s12504_s5 = inlined_call_operand.vmem [shape: f32[8,1536], index: 5, kind: input, shape index: {}]   ;;  %s12505_s6 = inlined_call_operand.hbm [shape: f32[1,1536], index: 6, kind: input, shape index: {}]   ;;  %s12506_s7 = inlined_call_operand.hbm [shape: bf16[512,1024], index: 7, kind: input, shape index: {}]   ;;  %s12507_s8 = inlined_call_operand.hbm [shape: bf16[512,512], index: 8, kind: input, shape index: {}]   ;;  %s12508_s9 = inlined_call_operand.hbm [shape: bf16[512,256], index: 9, kind: input, shape index: {}]   ;;  %s12509_s10 = inlined_call_operand.vmem [shape: f32[1,256], index: 10, kind: input, shape index: {}]   ;;  %s12510_s11 = inlined_call_operand.vmem [shape: bf16[256,8], index: 11, kind: input, shape index: {}]   ;;  %s12511_s12 = inlined_call_operand.vmem [shape: f32[1,8], index: 12, kind: input, shape index: {}]   ;;  %s12512_s13 = inlined_call_operand.vmem [shape: f32[16,8], index: 13, kind: output, shape index: {0}]   ;;  %s12513_s14 = inlined_call_operand.hbm [shape: f32[16,512], index: 14, kind: output, shape index: {1}]  }
   0x1   :  { %21 = vsyncpa [#allocation7], 0 }
   0x2   :  { %22 = vsyncpa [#allocation12], 0 }
   0x3   :  { %23 = vsyncpa [#allocation8], 0  ;;  %s29_s15 = sshll.u32 %s12499_s0, 4  ;;  %s42_s18 = sshll.u32 %s12502_s3, 4  ;;  %s30_s15 = int_to_ptr.vmem [resolvable:$true] %s29_s15  ;;  %s43_s18 = int_to_ptr.hbm [resolvable:$true] %s42_s18 }
   0x4   :  { %s10127_s19 = smov [#allocation6]   ;;  %s10128_s20 = smov [#allocation10]  }
   0x5   :  { %32 = dma.vmem_to_smem %s30_s15, 16, %s10127_s19, [#allocation9]  }
   0x6   :  { %s44_s21 = sshll.u32 %s10128_s20, 4  ;;  %s57_s24 = sshll.u32 %s12505_s6, 4  ;;  %s45_s21 = int_to_ptr.vmem [resolvable:$true] %s44_s21  ;;  %s58_s24 = int_to_ptr.hbm [resolvable:$true] %s57_s24 }
   0x7   :  { %47 = dma.hbm_to_vmem [thread:$0]  %s43_s18, 512, %s45_s21, [#allocation7]  }
   0x8   :  { %s10129_s25 = smov [#allocation11]  }
   0x9   :  { %s59_s26 = sshll.u32 %s10129_s25, 4  ;;  %s60_s26 = int_to_ptr.vmem [resolvable:$true] %s59_s26 }
   0xa   :  { %62 = dma.hbm_to_vmem [thread:$0]  %s58_s24, 192, %s60_s26, [#allocation12]  }
   0xb   :  { %10113 = dma.done.wait [#allocation9], 16  }
   0xc   :  { %10114 = vsyncadd [#allocation9], 4294967280 }
   0xd   :  { %10115 = dma.done.wait [#allocation7], 512  }
   0xe   :  { %10116 = vsyncadd [#allocation7], 4294966784 }
   0xf   :  { %10117 = dma.done.wait [#allocation12], 192  }
  0x10   :  { %10118 = vsyncadd [#allocation12], 4294967104 }
  0x11   :  { %81 = sfence }
  0x12   :  { %v146_v0 = vld [vmem:[%s12500_s1 + $0x38] sm:$0xff]  ;;  %v145_v1 = vld [vmem:[%s12500_s1 + $0x30] sm:$0xff]  ;;  %v144_v2 = vld [vmem:[%s12500_s1 + $0x28] sm:$0xff]  ;;  %vm147_vm0 = vcmask 523264   ;;  %vm297_vm1 = vcmask 64512   ;;  %s89_s18 = sshll.u32 %s12506_s7, 4  ;;  %s90_s18 = int_to_ptr.hbm [resolvable:$true] %s89_s18 }
  0x13   :  { %204 = vmatpush.msra.mxu0 %v146_v0  ;;  %v143_v3 = vld [vmem:[%s12500_s1 + $0x20] sm:$0xff]  ;;  %v142_v4 = vld [vmem:[%s12500_s1 + $0x18] sm:$0xff]  ;;  %v141_v5 = vld [vmem:[%s12500_s1 + $0x10] sm:$0xff]  ;;  %s10130_s19 = smov [#allocation2]   ;;  %s103_s23 = sshll.u32 %s12507_s8, 4  ;;  %s104_s23 = int_to_ptr.hbm [resolvable:$true] %s103_s23 }
  0x14   :  { %v140_v6 = vld [vmem:[%s12500_s1 + $0x8] sm:$0xff]  ;;  %v139_v7 = vld [vmem:[%s12500_s1] sm:$0xff]  ;;  %v125_v10 = vld [vmem:[%s12501_s2 + $0x10] sm:$0xff]  ;;  %s91_s20 = sshll.u32 %s10130_s19, 4  ;;  %s10131_s24 = smov [#allocation3]   ;;  %s92_s20 = int_to_ptr.vmem [resolvable:$true] %s91_s20 }
  0x15   :  { %205 = vmatpush.msra.mxu0 %v145_v1  ;;  %v123_v8 = vld [vmem:[%s12501_s2] sm:$0xff]  ;;  %v124_v9 = vld [vmem:[%s12501_s2 + $0x8] sm:$0xff]  ;;  %v126_v11 = vld [vmem:[%s12501_s2 + $0x18] sm:$0xff]  ;;  %94 = dma.hbm_to_vmem [thread:$0]  %s90_s18, 32768, %s92_s20, [#allocation5] }
  0x16   :  { %v127_v12 = vld [vmem:[%s12501_s2 + $0x20] sm:$0xff]  ;;  %v128_v13 = vld [vmem:[%s12501_s2 + $0x28] sm:$0xff]  ;;  %v129_v14 = vld [vmem:[%s12501_s2 + $0x30] sm:$0xff]  ;;  %s105_s7 = sshll.u32 %s10131_s24, 4  ;;  %s117_s26 = sshll.u32 %s12508_s9, 4  ;;  %s106_s7 = int_to_ptr.vmem [resolvable:$true] %s105_s7  ;;  %s118_s26 = int_to_ptr.hbm [resolvable:$true] %s117_s26 }
  0x17   :  { %206 = vmatpush.msra.mxu0 %v144_v2  ;;  %v130_v15 = vld [vmem:[%s12501_s2 + $0x38] sm:$0xff]  ;;  %v131_v16 = vld [vmem:[%s12501_s2 + $0x40] sm:$0xff]  ;;  %v132_v17 = vld [vmem:[%s12501_s2 + $0x48] sm:$0xff]  ;;  %108 = dma.hbm_to_vmem [thread:$0]  %s104_s23, 16384, %s106_s7, [#allocation5 + $0x1] }
  0x18   :  { %v133_v18 = vld [vmem:[%s12501_s2 + $0x50] sm:$0xff]  ;;  %v134_v19 = vld [vmem:[%s12501_s2 + $0x58] sm:$0xff]  ;;  %v261_v20 = vld [vmem:[#allocation10] sm:$0xff]  ;;  %s10132_s8 = smov [#allocation4]  }
  0x19   :  { %207 = vmatpush.msra.mxu0 %v143_v3  ;;  %v262_v21 = vld [vmem:[#allocation10 + $0x8] sm:$0xff]  ;;  %v135_v22 = vld [vmem:[%s12501_s2 + $0x60] sm:$0xff]  ;;  %337 = vmatpush.msra.mxu1 %v261_v20  ;;  %v137_v24 = vld [vmem:[%s12501_s2 + $0x70] sm:$0xff]  ;;  %s119_s0 = sshll.u32 %s10132_s8, 4  ;;  %s120_s0 = int_to_ptr.vmem [resolvable:$true] %s119_s0 }
  0x1a   :  { %378 = vmatpush.msra.mxu2 %v262_v21  ;;  %9625 = vmatpush.msra.mxu3 %v261_v20  ;;  %v136_v23 = vld [vmem:[%s12501_s2 + $0x68] sm:$0xff]  ;;  %v486_v25 = vld [vmem:[%s12504_s5] sm:$0xff]  ;;  %v264_v26 = vld [vmem:[#allocation10 + $0x18] sm:$0xff]  ;;  %122 = dma.hbm_to_vmem [thread:$0]  %s118_s26, 8192, %s120_s0, [#allocation5 + $0x2] }
  0x1b   :  { %208 = vmatpush.msra.mxu0 %v142_v4  ;;  %460 = vmatpush.msrb.mxu1 %v264_v26  ;;  %v138_v27 = vld [vmem:[%s12501_s2 + $0x78] sm:$0xff]  ;;  %v491_v32 = vld [vmem:[%s12504_s5 + $0x28] sm:$0xff]  ;;  %v488_v36 = vld [vmem:[%s12504_s5 + $0x10] sm:$0xff] }
  0x1c   :  { %9626 = vmatpush.msrb.mxu3 %v262_v21  ;;  %565 = vmatpush.msrb.mxu2 %v486_v25  ;;  %v489_v35 = vld [vmem:[%s12504_s5 + $0x18] sm:$0xff]  ;;  %v263_v38 = vld [vmem:[#allocation10 + $0x10] sm:$0xff]  ;;  %v487_v41 = vld [vmem:[%s12504_s5 + $0x8] sm:$0xff] }
  0x1d   :  { %209 = vmatpush.msra.mxu0 %v141_v5  ;;  %v495_v45 = vld [vmem:[%s12504_s5 + $0x48] sm:$0xff]  ;;  %v490_v48 = vld [vmem:[%s12504_s5 + $0x20] sm:$0xff]  ;;  %v493_v49 = vld [vmem:[%s12504_s5 + $0x38] sm:$0xff] }
  0x1e   :  { %v492_v50 = vld [vmem:[%s12504_s5 + $0x30] sm:$0xff]  ;;  %v265_v53 = vld [vmem:[%s12503_s4] sm:$0xff]  ;;  %v266_v56 = vld [vmem:[%s12503_s4 + $0x8] sm:$0xff] }
  0x1f   :  { %210 = vmatpush.msra.mxu0 %v140_v6  ;;  %v269_v58 = vld [vmem:[%s12503_s4 + $0x20] sm:$0xff]  ;;  %v270_v62 = vld [vmem:[%s12503_s4 + $0x28] sm:$0xff] }
  0x20   :  { %v273_v0 = vld [vmem:[%s12503_s4 + $0x40] sm:$0xff]  ;;  %v274_v4 = vld [vmem:[%s12503_s4 + $0x48] sm:$0xff] }
  0x21   :  { %211 = vmatpush.msra.mxu0 %v139_v7  ;;  %v277_v6 = vld [vmem:[%s12503_s4 + $0x60] sm:$0xff] }
  0x22   :  { %7091 = vmatmul.msk.f32.vlgmr.msra.gmra.mxu0 %vm147_vm0, %v123_v8  ;;  %v289_v26 = vld [vmem:[%s12503_s4 + $0xc0] sm:$0xff] }
  0x23   :  { %770 = vmatpush.msrb.mxu0 %v491_v32 }
  0x25   :  { %934 = vmatpush.msra.mxu0 %v495_v45 }
  0x2a   :  { %7092 = vmatmul.msk.f32.gmra.mxu0 %vm147_vm0, %v124_v9 }
  0x32   :  { %7093 = vmatmul.msk.f32.gmra.mxu0 %vm147_vm0, %v125_v10  ;;  %v278_v10 = vld [vmem:[%s12503_s4 + $0x68] sm:$0xff] }
  0x3a   :  { %7094 = vmatmul.msk.f32.gmra.mxu0 %vm147_vm0, %v126_v11 }
  0x42   :  { %7095 = vmatmul.msk.f32.gmra.mxu0 %vm147_vm0, %v127_v12  ;;  %v281_v12 = vld [vmem:[%s12503_s4 + $0x80] sm:$0xff] }
  0x4a   :  { %7096 = vmatmul.msk.f32.gmra.mxu0 %vm147_vm0, %v128_v13 }
  0x52   :  { %7097 = vmatmul.msk.f32.gmra.mxu0 %vm147_vm0, %v129_v14 }
  0x5a   :  { %7098 = vmatmul.msk.f32.gmra.mxu0 %vm147_vm0, %v130_v15 }
  0x62   :  { %7099 = vmatmul.msk.f32.gmra.mxu0 %vm147_vm0, %v131_v16  ;;  %v282_v16 = vld [vmem:[%s12503_s4 + $0x88] sm:$0xff] }
  0x6a   :  { %7100 = vmatmul.msk.f32.gmra.mxu0 %vm147_vm0, %v132_v17 }
  0x72   :  { %7101 = vmatmul.msk.f32.gmra.mxu0 %vm147_vm0, %v133_v18  ;;  %v285_v18 = vld [vmem:[%s12503_s4 + $0xa0] sm:$0xff] }
  0x7a   :  { %7102 = vmatmul.msk.f32.gmra.mxu0 %vm147_vm0, %v134_v19 }
  0x82   :  { %7103 = vmatmul.msk.f32.gmra.mxu0 %vm147_vm0, %v135_v22  ;;  %v286_v22 = vld [vmem:[%s12503_s4 + $0xa8] sm:$0xff] }
  0x8a   :  { %7104 = vmatmul.msk.f32.gmra.mxu0 %vm147_vm0, %v136_v23  ;;  %v494_v23 = vld [vmem:[%s12504_s5 + $0x40] sm:$0xff] }
  0x92   :  { %7105 = vmatmul.msk.f32.gmra.mxu0 %vm147_vm0, %v137_v24  ;;  %v497_v24 = vld [vmem:[%s12504_s5 + $0x58] sm:$0xff] }
  0x9a   :  { %7106 = vmatmul.msk.f32.gmra.mxu0 %vm147_vm0, %v138_v27 }
  0x9f   :  { %v213_v28 = vpop.f32.mrf.mxu0 }
  0xa0   :  { %7107 = vmatmul.msk.f32.vlgmr.msra.gmra.mxu1 %vm297_vm1, %v213_v28  ;;  %7115 = vmatmul.msk.f32.vlgmr.msra.gmra.mxu2 %vm297_vm1, %v213_v28 }
  0xa1   :  { %688 = vmatpush.msra.mxu2 %v489_v35  ;;  %647 = vmatpush.msra.mxu1 %v488_v36 }
  0xa7   :  { %v216_v29 = vpop.f32.mrf.mxu0 }
  0xa8   :  { %7108 = vmatmul.msk.f32.gmra.mxu1 %vm297_vm1, %v216_v29  ;;  %7116 = vmatmul.msk.f32.gmra.mxu2 %vm297_vm1, %v216_v29 }
  0xaf   :  { %v219_v30 = vpop.f32.mrf.mxu0 }
  0xb0   :  { %7109 = vmatmul.msk.f32.gmra.mxu1 %vm297_vm1, %v219_v30  ;;  %7117 = vmatmul.msk.f32.gmra.mxu2 %vm297_vm1, %v219_v30 }
  0xb7   :  { %v222_v31 = vpop.f32.mrf.mxu0 }
  0xb8   :  { %7110 = vmatmul.msk.f32.gmra.mxu1 %vm297_vm1, %v222_v31  ;;  %7118 = vmatmul.msk.f32.gmra.mxu2 %vm297_vm1, %v222_v31 }
  0xbf   :  { %v225_v33 = vpop.f32.mrf.mxu0 }
  0xc0   :  { %7111 = vmatmul.msk.f32.gmra.mxu1 %vm297_vm1, %v225_v33  ;;  %7119 = vmatmul.msk.f32.gmra.mxu2 %vm297_vm1, %v225_v33 }
  0xc7   :  { %v228_v34 = vpop.f32.mrf.mxu0 }
  0xc8   :  { %7112 = vmatmul.msk.f32.gmra.mxu1 %vm297_vm1, %v228_v34  ;;  %7120 = vmatmul.msk.f32.gmra.mxu2 %vm297_vm1, %v228_v34 }
  0xcf   :  { %v231_v37 = vpop.f32.mrf.mxu0 }
  0xd0   :  { %7113 = vmatmul.msk.f32.gmra.mxu1 %vm297_vm1, %v231_v37  ;;  %7121 = vmatmul.msk.f32.gmra.mxu2 %vm297_vm1, %v231_v37 }
  0xd7   :  { %v234_v39 = vpop.f32.mrf.mxu0 }
  0xd8   :  { %7114 = vmatmul.msk.f32.vlgmr.msra.gmra.mxu3 %vm297_vm1, %v234_v39  ;;  %7131 = vmatmul.msk.f32.vlgmr.msrb.gmra.mxu1 %vm297_vm1, %v213_v28 }
  0xd9   :  { %419 = vmatpush.msra.mxu3 %v263_v38  ;;  %811 = vmatpush.msrb.mxu1 %v492_v50  ;;  %v293_v38 = vld [vmem:[%s12503_s4 + $0xe0] sm:$0xff] }
  0xdf   :  { %v10336_v40 = vpop.f32.mrf.mxu0 }
  0xe0   :  { %7122 = vmatmul.msk.f32.vlgmr.msrb.gmra.mxu3 %vm297_vm1, %v234_v39  ;;  %7132 = vmatmul.msk.f32.gmra.mxu1 %vm297_vm1, %v216_v29 }
  0xe1   :  { %7139 = vmatmul.msk.f32.vlgmr.msrb.gmra.mxu2 %vm297_vm1, %v10336_v40  ;;  %7179 = vmatmul.msk.f32.vlgmr.msrb.gmra.mxu0 %vm297_vm1, %v10336_v40 }
  0xe2   :  { %606 = vmatpush.msrb.mxu3 %v487_v41  ;;  %852 = vmatpush.msrb.mxu2 %v493_v49  ;;  %v272_v41 = vld [vmem:[%s12503_s4 + $0x38] sm:$0xff] }
  0xe7   :  { %v10347_v42 = vpop.f32.mrf.mxu0 }
  0xe8   :  { %7123 = vmatmul.msk.f32.vlgmr.msra.gmra.mxu3 %vm297_vm1, %v213_v28  ;;  %7133 = vmatmul.msk.f32.gmra.mxu1 %vm297_vm1, %v219_v30 }
  0xe9   :  { %7140 = vmatmul.msk.f32.gmra.mxu2 %vm297_vm1, %v10347_v42  ;;  %7180 = vmatmul.msk.f32.gmra.mxu0 %vm297_vm1, %v10347_v42 }
  0xea   :  { %729 = vmatpush.msra.mxu3 %v490_v48 }
  0xef   :  { %v10355_v43 = vpop.f32.mrf.mxu0 }
  0xf0   :  { %7124 = vmatmul.msk.f32.gmra.mxu3 %vm297_vm1, %v216_v29  ;;  %7134 = vmatmul.msk.f32.gmra.mxu1 %vm297_vm1, %v222_v31 }
  0xf1   :  { %7141 = vmatmul.msk.f32.gmra.mxu2 %vm297_vm1, %v10355_v43  ;;  %7181 = vmatmul.msk.f32.gmra.mxu0 %vm297_vm1, %v10355_v43 }
  0xf7   :  { %v10363_v44 = vpop.f32.mrf.mxu0 }
  0xf8   :  { %7125 = vmatmul.msk.f32.gmra.mxu3 %vm297_vm1, %v219_v30  ;;  %7135 = vmatmul.msk.f32.gmra.mxu1 %vm297_vm1, %v225_v33  ;;  %v496_v30 = vld [vmem:[%s12504_s5 + $0x50] sm:$0xff] }
  0xf9   :  { %7142 = vmatmul.msk.f32.gmra.mxu2 %vm297_vm1, %v10363_v44  ;;  %7182 = vmatmul.msk.f32.gmra.mxu0 %vm297_vm1, %v10363_v44 }
  0xff   :  { %v10374_v46 = vpop.f32.mrf.mxu0 }
 0x100   :  { %7126 = vmatmul.msk.f32.gmra.mxu3 %vm297_vm1, %v222_v31  ;;  %7136 = vmatmul.msk.f32.gmra.mxu1 %vm297_vm1, %v228_v34  ;;  %v290_v31 = vld [vmem:[%s12503_s4 + $0xc8] sm:$0xff] }
 0x101   :  { %7143 = vmatmul.msk.f32.gmra.mxu2 %vm297_vm1, %v10374_v46  ;;  %7183 = vmatmul.msk.f32.gmra.mxu0 %vm297_vm1, %v10374_v46 }
 0x107   :  { %v10382_v47 = vpop.f32.mrf.mxu0 }
 0x108   :  { %7127 = vmatmul.msk.f32.gmra.mxu3 %vm297_vm1, %v225_v33  ;;  %7137 = vmatmul.msk.f32.gmra.mxu1 %vm297_vm1, %v231_v37  ;;  %v268_v33 = vld [vmem:[%s12503_s4 + $0x18] sm:$0xff] }
 0x109   :  { %7144 = vmatmul.msk.f32.gmra.mxu2 %vm297_vm1, %v10382_v47  ;;  %7184 = vmatmul.msk.f32.gmra.mxu0 %vm297_vm1, %v10382_v47 }
 0x10f   :  { %v10399_v51 = vpop.f32.mrf.mxu0 }
 0x110   :  { %7128 = vmatmul.msk.f32.gmra.mxu3 %vm297_vm1, %v228_v34  ;;  %7138 = vmatmul.msk.f32.gmra.mxu1 %vm297_vm1, %v234_v39 }
 0x111   :  { %7145 = vmatmul.msk.f32.gmra.mxu2 %vm297_vm1, %v10399_v51  ;;  %7185 = vmatmul.msk.f32.gmra.mxu0 %vm297_vm1, %v10399_v51 }
 0x117   :  { %v10407_v52 = vpop.f32.mrf.mxu0 }
 0x118   :  { %7129 = vmatmul.msk.f32.gmra.mxu3 %vm297_vm1, %v231_v37  ;;  %7155 = vmatmul.msk.f32.vlgmr.msra.gmra.mxu1 %vm297_vm1, %v10336_v40  ;;  %v10559_v37 = vld [vmem:[#allocation11] sm:$0xff] }
 0x119   :  { %7146 = vmatmul.msk.f32.gmra.mxu2 %vm297_vm1, %v10407_v52  ;;  %7186 = vmatmul.msk.f32.gmra.mxu0 %vm297_vm1, %v10407_v52  ;;  %v10572_v45 = vperm.slane %v10559_v37, 5 }
 0x11a   :  { %975 = vmatpush.msra.mxu1 %v496_v30 }
 0x11d   :  { %v339_v54 = vpop.f32.mrf.mxu1 }
 0x11e   :  { %v10419_v55 = vadd.f32 %v339_v54, %v265_v53 }
 0x120   :  { %7130 = vmatmul.msk.f32.gmra.mxu3 %vm297_vm1, %v234_v39  ;;  %7156 = vmatmul.msk.f32.gmra.mxu1 %vm297_vm1, %v10347_v42 }
 0x121   :  { %7163 = vmatmul.msk.f32.vlgmr.msra.gmra.mxu2 %vm297_vm1, %v10336_v40  ;;  %7211 = vmatmul.msk.f32.vlgmr.msra.gmra.mxu0 %vm297_vm1, %v10336_v40 }
 0x122   :  { %1016 = vmatpush.msra.mxu2 %v497_v24 }
 0x123   :  { %v380_v57 = vpop.f32.mrf.mxu2 }
 0x124   :  { %v10434_v59 = vadd.f32 %v380_v57, %v266_v56  ;;  %v294_v56 = vld [vmem:[%s12503_s4 + $0xe8] sm:$0xff]  ;;  %v10591_v57 = vperm.slane %v10559_v37, 0 }
 0x125   :  { %v342_v60 = vpop.f32.mrf.mxu1 }
 0x126   :  { %v10436_v61 = vadd.f32 %v342_v60, %v269_v58  ;;  %v276_v60 = vld [vmem:[%s12503_s4 + $0x58] sm:$0xff] }
 0x128   :  { %7147 = vmatmul.msk.f32.vlgmr.msrb.gmra.mxu3 %vm297_vm1, %v10336_v40  ;;  %7157 = vmatmul.msk.f32.gmra.mxu1 %vm297_vm1, %v10355_v43 }
 0x129   :  { %7164 = vmatmul.msk.f32.gmra.mxu2 %vm297_vm1, %v10347_v42  ;;  %7212 = vmatmul.msk.f32.gmra.mxu0 %vm297_vm1, %v10347_v42 }
 0x12a   :  { %893 = vmatpush.msrb.mxu3 %v494_v23  ;;  %v271_v23 = vld [vmem:[%s12503_s4 + $0x30] sm:$0xff] }
 0x12b   :  { %v383_v63 = vpop.f32.mrf.mxu2 }
 0x12c   :  { %v10452_v1 = vadd.f32 %v383_v63, %v270_v62 }
 0x12d   :  { %v345_v2 = vpop.f32.mrf.mxu1 }
 0x12e   :  { %12589 = vst [vmem:[#allocation29_spill] sm:$0xff] %v10452_v1  ;;  %v10454_v3 = vadd.f32 %v345_v2, %v273_v0 }
 0x130   :  { %7148 = vmatmul.msk.f32.gmra.mxu3 %vm297_vm1, %v10347_v42  ;;  %7158 = vmatmul.msk.f32.gmra.mxu1 %vm297_vm1, %v10363_v44 }
 0x131   :  { %7165 = vmatmul.msk.f32.gmra.mxu2 %vm297_vm1, %v10355_v43  ;;  %7213 = vmatmul.msk.f32.gmra.mxu0 %vm297_vm1, %v10355_v43 }
 0x133   :  { %v386_v5 = vpop.f32.mrf.mxu2 }
 0x134   :  { %v10470_v7 = vadd.f32 %v386_v5, %v274_v4 }
 0x135   :  { %v348_v8 = vpop.f32.mrf.mxu1 }
 0x136   :  { %v10472_v9 = vadd.f32 %v348_v8, %v277_v6  ;;  %v267_v8 = vld [vmem:[%s12503_s4 + $0x10] sm:$0xff] }
 0x138   :  { %7149 = vmatmul.msk.f32.gmra.mxu3 %vm297_vm1, %v10355_v43  ;;  %7159 = vmatmul.msk.f32.gmra.mxu1 %vm297_vm1, %v10374_v46 }
 0x139   :  { %7166 = vmatmul.msk.f32.gmra.mxu2 %vm297_vm1, %v10363_v44  ;;  %7214 = vmatmul.msk.f32.gmra.mxu0 %vm297_vm1, %v10363_v44 }
 0x13b   :  { %v389_v11 = vpop.f32.mrf.mxu2 }
 0x13c   :  { %v10488_v13 = vadd.f32 %v389_v11, %v278_v10  ;;  %v280_v11 = vld [vmem:[%s12503_s4 + $0x78] sm:$0xff] }
 0x13d   :  { %v351_v14 = vpop.f32.mrf.mxu1 }
 0x13e   :  { %12590 = vst [vmem:[#allocation30_spill] sm:$0xff] %v10488_v13  ;;  %v10490_v15 = vadd.f32 %v351_v14, %v281_v12 }
 0x140   :  { %7150 = vmatmul.msk.f32.gmra.mxu3 %vm297_vm1, %v10363_v44  ;;  %7160 = vmatmul.msk.f32.gmra.mxu1 %vm297_vm1, %v10382_v47 }
 0x141   :  { %7167 = vmatmul.msk.f32.gmra.mxu2 %vm297_vm1, %v10374_v46  ;;  %7215 = vmatmul.msk.f32.gmra.mxu0 %vm297_vm1, %v10374_v46 }
 0x143   :  { %v392_v17 = vpop.f32.mrf.mxu2 }
 0x144   :  { %v10506_v19 = vadd.f32 %v392_v17, %v282_v16 }
 0x145   :  { %v354_v20 = vpop.f32.mrf.mxu1 }
 0x146   :  { %12591 = vst [vmem:[#allocation31_spill] sm:$0xff] %v10506_v19  ;;  %v10508_v21 = vadd.f32 %v354_v20, %v285_v18 }
 0x148   :  { %12592 = vst [vmem:[#allocation32_spill] sm:$0xff] %v10508_v21  ;;  %7151 = vmatmul.msk.f32.gmra.mxu3 %vm297_vm1, %v10374_v46  ;;  %7161 = vmatmul.msk.f32.gmra.mxu1 %vm297_vm1, %v10399_v51 }
 0x149   :  { %7168 = vmatmul.msk.f32.gmra.mxu2 %vm297_vm1, %v10382_v47  ;;  %7216 = vmatmul.msk.f32.gmra.mxu0 %vm297_vm1, %v10382_v47 }
 0x14b   :  { %v395_v25 = vpop.f32.mrf.mxu2 }
 0x14c   :  { %v10530_v27 = vadd.f32 %v395_v25, %v286_v22  ;;  %v284_v25 = vld [vmem:[%s12503_s4 + $0x98] sm:$0xff] }
 0x14d   :  { %v357_v28 = vpop.f32.mrf.mxu1 }
 0x14e   :  { %12593 = vst [vmem:[#allocation33_spill] sm:$0xff] %v10530_v27  ;;  %v10532_v29 = vadd.f32 %v357_v28, %v289_v26 }
 0x150   :  { %12594 = vst [vmem:[#allocation34_spill] sm:$0xff] %v10532_v29  ;;  %7152 = vmatmul.msk.f32.gmra.mxu3 %vm297_vm1, %v10382_v47  ;;  %7162 = vmatmul.msk.f32.gmra.mxu1 %vm297_vm1, %v10407_v52 }
 0x151   :  { %7169 = vmatmul.msk.f32.gmra.mxu2 %vm297_vm1, %v10399_v51  ;;  %7217 = vmatmul.msk.f32.gmra.mxu0 %vm297_vm1, %v10399_v51 }
 0x153   :  { %v398_v32 = vpop.f32.mrf.mxu2 }
 0x154   :  { %v10551_v34 = vadd.f32 %v398_v32, %v290_v31 }
 0x155   :  { %v462_v35 = vpop.f32.mrf.mxu1 }
 0x156   :  { %12595 = vst [vmem:[#allocation35_spill] sm:$0xff] %v10551_v34  ;;  %v10553_v36 = vadd.f32 %v462_v35, %v268_v33 }
 0x158   :  { %12596 = vst [vmem:[#allocation36_spill] sm:$0xff] %v10553_v36  ;;  %7153 = vmatmul.msk.f32.gmra.mxu3 %vm297_vm1, %v10399_v51  ;;  %7187 = vmatmul.msk.f32.vlgmr.msrb.gmra.mxu1 %vm297_vm1, %v10336_v40 }
 0x159   :  { %7170 = vmatmul.msk.f32.gmra.mxu2 %vm297_vm1, %v10407_v52  ;;  %7218 = vmatmul.msk.f32.gmra.mxu0 %vm297_vm1, %v10407_v52 }
 0x15b   :  { %v360_v39 = vpop.f32.mrf.mxu3 }
 0x15c   :  { %v10574_v48 = vadd.f32 %v360_v39, %v293_v38  ;;  %v275_v38 = vld [vmem:[%s12503_s4 + $0x50] sm:$0xff] }
 0x15d   :  { %v465_v49 = vpop.f32.mrf.mxu1 }
 0x15e   :  { %12597 = vst [vmem:[#allocation37_spill] sm:$0xff] %v10574_v48  ;;  %v10576_v50 = vadd.f32 %v465_v49, %v272_v41  ;;  %v772_v53 = vpop.f32.mrf.mxu0  ;;  %v288_v41 = vld [vmem:[%s12503_s4 + $0xb8] sm:$0xff] }
 0x15f   :  { %v10579_v54 = vadd.f32 %v772_v53, %v10572_v45 }
 0x160   :  { %12598 = vst [vmem:[#allocation38_spill] sm:$0xff] %v10576_v50  ;;  %7154 = vmatmul.msk.f32.gmra.mxu3 %vm297_vm1, %v10407_v52  ;;  %7188 = vmatmul.msk.f32.gmra.mxu1 %vm297_vm1, %v10347_v42 }
 0x161   :  { %12599 = vst [vmem:[#allocation39_spill] sm:$0xff] %v10579_v54  ;;  %7195 = vmatmul.msk.f32.vlgmr.msrb.gmra.mxu2 %vm297_vm1, %v10336_v40 }
 0x163   :  { %v401_v58 = vpop.f32.mrf.mxu3 }
 0x164   :  { %v10596_v62 = vadd.f32 %v401_v58, %v294_v56  ;;  %v567_v63 = vpop.f32.mrf.mxu2 }
 0x165   :  { %v10599_v0 = vadd.f32 %v567_v63, %v10591_v57  ;;  %v468_v2 = vpop.f32.mrf.mxu1 }
 0x166   :  { %12600 = vst [vmem:[#allocation40_spill] sm:$0xff] %v10596_v62  ;;  %v10601_v4 = vadd.f32 %v468_v2, %v276_v60  ;;  %v775_v5 = vpop.f32.mrf.mxu0 }
 0x167   :  { %v10604_v6 = vadd.f32 %v775_v5, %v10572_v45  ;;  %v279_v5 = vld [vmem:[%s12503_s4 + $0x70] sm:$0xff] }
 0x168   :  { %12601 = vst [vmem:[#allocation41_spill] sm:$0xff] %v10601_v4  ;;  %7171 = vmatmul.msk.f32.vlgmr.msra.gmra.mxu3 %vm297_vm1, %v10336_v40  ;;  %7189 = vmatmul.msk.f32.gmra.mxu1 %vm297_vm1, %v10355_v43 }
 0x169   :  { %12602 = vst [vmem:[#allocation42_spill] sm:$0xff] %v10604_v6  ;;  %7196 = vmatmul.msk.f32.gmra.mxu2 %vm297_vm1, %v10347_v42 }
 0x16b   :  { %v421_v10 = vpop.f32.mrf.mxu3 }
 0x16c   :  { %v10618_v12 = vadd.f32 %v421_v10, %v267_v8  ;;  %v570_v14 = vpop.f32.mrf.mxu2  ;;  %v292_v10 = vld [vmem:[%s12503_s4 + $0xd8] sm:$0xff] }
 0x16d   :  { %v10621_v16 = vadd.f32 %v570_v14, %v10591_v57  ;;  %v471_v17 = vpop.f32.mrf.mxu1 }
 0x16e   :  { %12603 = vst [vmem:[#allocation43_spill] sm:$0xff] %v10618_v12  ;;  %v10623_v18 = vadd.f32 %v471_v17, %v280_v11  ;;  %v778_v20 = vpop.f32.mrf.mxu0 }
 0x16f   :  { %v10626_v22 = vadd.f32 %v778_v20, %v10572_v45 }
 0x170   :  { %12604 = vst [vmem:[#allocation44_spill] sm:$0xff] %v10623_v18  ;;  %7172 = vmatmul.msk.f32.gmra.mxu3 %vm297_vm1, %v10347_v42  ;;  %7190 = vmatmul.msk.f32.gmra.mxu1 %vm297_vm1, %v10363_v44 }
 0x171   :  { %12605 = vst [vmem:[#allocation45_spill] sm:$0xff] %v10626_v22  ;;  %7197 = vmatmul.msk.f32.gmra.mxu2 %vm297_vm1, %v10355_v43 }
 0x173   :  { %v424_v24 = vpop.f32.mrf.mxu3 }
 0x174   :  { %v10640_v26 = vadd.f32 %v424_v24, %v271_v23  ;;  %v573_v28 = vpop.f32.mrf.mxu2 }
 0x175   :  { %v10643_v30 = vadd.f32 %v573_v28, %v10591_v57  ;;  %v474_v31 = vpop.f32.mrf.mxu1  ;;  %v283_v28 = vld [vmem:[%s12503_s4 + $0x90] sm:$0xff] }
 0x176   :  { %12606 = vst [vmem:[#allocation46_spill] sm:$0xff] %v10640_v26  ;;  %v10645_v32 = vadd.f32 %v474_v31, %v284_v25  ;;  %v781_v33 = vpop.f32.mrf.mxu0 }
 0x177   :  { %v10648_v35 = vadd.f32 %v781_v33, %v10572_v45  ;;  %v296_v33 = vld [vmem:[%s12503_s4 + $0xf8] sm:$0xff] }
 0x178   :  { %12607 = vst [vmem:[#allocation47_spill] sm:$0xff] %v10645_v32  ;;  %7173 = vmatmul.msk.f32.gmra.mxu3 %vm297_vm1, %v10355_v43  ;;  %7191 = vmatmul.msk.f32.gmra.mxu1 %vm297_vm1, %v10374_v46 }
 0x179   :  { %12608 = vst [vmem:[#allocation48_spill] sm:$0xff] %v10648_v35  ;;  %7198 = vmatmul.msk.f32.gmra.mxu2 %vm297_vm1, %v10363_v44 }
 0x17b   :  { %v427_v39 = vpop.f32.mrf.mxu3 }
 0x17c   :  { %v10662_v49 = vadd.f32 %v427_v39, %v275_v38  ;;  %v576_v53 = vpop.f32.mrf.mxu2 }
 0x17d   :  { %v10665_v56 = vadd.f32 %v576_v53, %v10591_v57  ;;  %v477_v58 = vpop.f32.mrf.mxu1 }
 0x17e   :  { %12609 = vst [vmem:[#allocation49_spill] sm:$0xff] %v10662_v49  ;;  %v10667_v60 = vadd.f32 %v477_v58, %v288_v41  ;;  %v784_v63 = vpop.f32.mrf.mxu0 }
 0x17f   :  { %v10670_v2 = vadd.f32 %v784_v63, %v10572_v45 }
 0x180   :  { %12610 = vst [vmem:[#allocation50_spill] sm:$0xff] %v10667_v60  ;;  %7174 = vmatmul.msk.f32.gmra.mxu3 %vm297_vm1, %v10363_v44  ;;  %7192 = vmatmul.msk.f32.gmra.mxu1 %vm297_vm1, %v10382_v47 }
 0x181   :  { %12611 = vst [vmem:[#allocation51_spill] sm:$0xff] %v10670_v2  ;;  %7199 = vmatmul.msk.f32.gmra.mxu2 %vm297_vm1, %v10374_v46 }
 0x183   :  { %v430_v8 = vpop.f32.mrf.mxu3 }
 0x184   :  { %v10684_v11 = vadd.f32 %v430_v8, %v279_v5  ;;  %v579_v14 = vpop.f32.mrf.mxu2  ;;  %v287_v8 = vld [vmem:[%s12503_s4 + $0xb0] sm:$0xff] }
 0x185   :  { %v10687_v17 = vadd.f32 %v579_v14, %v10591_v57  ;;  %v480_v20 = vpop.f32.mrf.mxu1 }
 0x186   :  { %12612 = vst [vmem:[#allocation52_spill] sm:$0xff] %v10684_v11  ;;  %v10689_v23 = vadd.f32 %v480_v20, %v292_v10  ;;  %v787_v24 = vpop.f32.mrf.mxu0  ;;  %v10726_v10 = vperm.slane %v10559_v37, 2 }
 0x187   :  { %v10692_v25 = vadd.f32 %v787_v24, %v10572_v45 }
 0x188   :  { %12613 = vst [vmem:[#allocation53_spill] sm:$0xff] %v10689_v23  ;;  %7175 = vmatmul.msk.f32.gmra.mxu3 %vm297_vm1, %v10374_v46  ;;  %7193 = vmatmul.msk.f32.gmra.mxu1 %vm297_vm1, %v10399_v51 }
 0x189   :  { %12614 = vst [vmem:[#allocation54_spill] sm:$0xff] %v10692_v25  ;;  %7200 = vmatmul.msk.f32.gmra.mxu2 %vm297_vm1, %v10382_v47 }
 0x18b   :  { %v433_v31 = vpop.f32.mrf.mxu3 }
 0x18c   :  { %v10706_v38 = vadd.f32 %v433_v31, %v283_v28  ;;  %v582_v39 = vpop.f32.mrf.mxu2 }
 0x18d   :  { %v10709_v41 = vadd.f32 %v582_v39, %v10591_v57  ;;  %v483_v53 = vpop.f32.mrf.mxu1 }
 0x18e   :  { %12615 = vst [vmem:[#allocation55_spill] sm:$0xff] %v10706_v38  ;;  %v10711_v58 = vadd.f32 %v483_v53, %v296_v33  ;;  %v790_v63 = vpop.f32.mrf.mxu0 }
 0x18f   :  { %12616 = vst [vmem:[#allocation56_spill] sm:$0xff] %v10709_v41  ;;  %v10714_v5 = vadd.f32 %v790_v63, %v10572_v45  ;;  %v10743_v63 = vld [vmem:[#allocation11 + $0x8] sm:$0xf] }
 0x190   :  { %12617 = vst [vmem:[#allocation57_spill] sm:$0xff] %v10711_v58  ;;  %7176 = vmatmul.msk.f32.gmra.mxu3 %vm297_vm1, %v10382_v47  ;;  %7194 = vmatmul.msk.f32.gmra.mxu1 %vm297_vm1, %v10407_v52 }
 0x191   :  { %12618 = vst [vmem:[#allocation58_spill] sm:$0xff] %v10714_v5  ;;  %7201 = vmatmul.msk.f32.gmra.mxu2 %vm297_vm1, %v10399_v51 }
 0x193   :  { %v436_v14 = vpop.f32.mrf.mxu3 }
 0x194   :  { %v10728_v20 = vadd.f32 %v436_v14, %v287_v8  ;;  %v585_v24 = vpop.f32.mrf.mxu2  ;;  %v291_v8 = vld [vmem:[%s12503_s4 + $0xd0] sm:$0xff] }
 0x195   :  { %v10731_v28 = vadd.f32 %v585_v24, %v10591_v57  ;;  %v649_v31 = vpop.f32.mrf.mxu1  ;;  %v10751_v24 = vperm.slane %v10743_v63, 1 }
 0x196   :  { %12619 = vst [vmem:[#allocation59_spill] sm:$0xff] %v10728_v20  ;;  %v10734_v33 = vadd.f32 %v649_v31, %v10726_v10  ;;  %v793_v39 = vpop.f32.mrf.mxu0 }
 0x197   :  { %12620 = vst [vmem:[#allocation60_spill] sm:$0xff] %v10731_v28  ;;  %v10737_v53 = vadd.f32 %v793_v39, %v10572_v45 }
 0x198   :  { %12621 = vst [vmem:[#allocation61_spill] sm:$0xff] %v10734_v33  ;;  %7177 = vmatmul.msk.f32.gmra.mxu3 %vm297_vm1, %v10399_v51  ;;  %7219 = vmatmul.msk.f32.vlgmr.msra.gmra.mxu1 %vm297_vm1, %v10336_v40 }
 0x199   :  { %12622 = vst [vmem:[#allocation62_spill] sm:$0xff] %v10737_v53  ;;  %7202 = vmatmul.msk.f32.gmra.mxu2 %vm297_vm1, %v10407_v52 }
 0x19b   :  { %v439_v14 = vpop.f32.mrf.mxu3 }
 0x19c   :  { %v10753_v45 = vadd.f32 %v439_v14, %v291_v8  ;;  %v588_v31 = vpop.f32.mrf.mxu2 }
 0x19d   :  { %v10756_v39 = vadd.f32 %v588_v31, %v10591_v57  ;;  %v652_v53 = vpop.f32.mrf.mxu1  ;;  %v295_v57 = vld [vmem:[%s12503_s4 + $0xf0] sm:$0xff] }
 0x19e   :  { %12623 = vst [vmem:[#allocation63_spill] sm:$0xff] %v10753_v45  ;;  %v10759_v5 = vadd.f32 %v652_v53, %v10726_v10  ;;  %v936_v25 = vpop.f32.mrf.mxu0  ;;  %v10774_v53 = vperm.slane %v10559_v37, 3 }
 0x19f   :  { %12624 = vst [vmem:[#allocation64_spill] sm:$0xff] %v10756_v39  ;;  %v10762_v2 = vadd.f32 %v936_v25, %v10751_v24 }
 0x1a0   :  { %12625 = vst [vmem:[#allocation65_spill] sm:$0xff] %v10759_v5  ;;  %7178 = vmatmul.msk.f32.gmra.mxu3 %vm297_vm1, %v10407_v52  ;;  %7220 = vmatmul.msk.f32.gmra.mxu1 %vm297_vm1, %v10347_v42 }
 0x1a1   :  { %12626 = vst [vmem:[#allocation66_spill] sm:$0xff] %v10762_v2  ;;  %7227 = vmatmul.msk.f32.vlgmr.msra.gmra.mxu2 %vm297_vm1, %v10336_v40 }
 0x1a3   :  { %v442_v8 = vpop.f32.mrf.mxu3 }
 0x1a4   :  { %v10776_v14 = vadd.f32 %v442_v8, %v295_v57  ;;  %v690_v25 = vpop.f32.mrf.mxu2  ;;  %v10792_v57 = vperm.slane %v10559_v37, 1 }
 0x1a5   :  { %v10779_v31 = vadd.f32 %v690_v25, %v10774_v53  ;;  %v655_v2 = vpop.f32.mrf.mxu1 }
 0x1a6   :  { %12627 = vst [vmem:[#allocation67_spill] sm:$0xff] %v10776_v14  ;;  %v10782_v35 = vadd.f32 %v655_v2, %v10726_v10  ;;  %v939_v22 = vpop.f32.mrf.mxu0 }
 0x1a7   :  { %12628 = vst [vmem:[#allocation68_spill] sm:$0xff] %v10779_v31  ;;  %v10785_v6 = vadd.f32 %v939_v22, %v10751_v24 }
 0x1a8   :  { %12629 = vst [vmem:[#allocation69_spill] sm:$0xff] %v10782_v35  ;;  %7203 = vmatmul.msk.f32.vlgmr.msrb.gmra.mxu3 %vm297_vm1, %v10336_v40  ;;  %7221 = vmatmul.msk.f32.gmra.mxu1 %vm297_vm1, %v10355_v43 }
 0x1a9   :  { %12630 = vst [vmem:[#allocation70_spill] sm:$0xff] %v10785_v6  ;;  %7228 = vmatmul.msk.f32.gmra.mxu2 %vm297_vm1, %v10347_v42 }
 0x1ab   :  { %v608_v8 = vpop.f32.mrf.mxu3 }
 0x1ac   :  { %v10797_v2 = vadd.f32 %v608_v8, %v10792_v57  ;;  %v693_v25 = vpop.f32.mrf.mxu2 }
 0x1ad   :  { %v10800_v22 = vadd.f32 %v693_v25, %v10774_v53  ;;  %v658_v6 = vpop.f32.mrf.mxu1 }
 0x1ae   :  { %12631 = vst [vmem:[#allocation71_spill] sm:$0xff] %v10797_v2  ;;  %v10803_v40 = vadd.f32 %v658_v6, %v10726_v10  ;;  %v942_v54 = vpop.f32.mrf.mxu0 }
 0x1af   :  { %12632 = vst [vmem:[#allocation72_spill] sm:$0xff] %v10800_v22  ;;  %v10806_v31 = vadd.f32 %v942_v54, %v10751_v24 }
 0x1b0   :  { %12633 = vst [vmem:[#allocation73_spill] sm:$0xff] %v10803_v40  ;;  %7204 = vmatmul.msk.f32.gmra.mxu3 %vm297_vm1, %v10347_v42  ;;  %7222 = vmatmul.msk.f32.gmra.mxu1 %vm297_vm1, %v10363_v44 }
 0x1b1   :  { %12634 = vst [vmem:[#allocation74_spill] sm:$0xff] %v10806_v31  ;;  %7229 = vmatmul.msk.f32.gmra.mxu2 %vm297_vm1, %v10355_v43 }
 0x1b3   :  { %v611_v8 = vpop.f32.mrf.mxu3 }
 0x1b4   :  { %v10815_v25 = vadd.f32 %v611_v8, %v10792_v57  ;;  %v696_v22 = vpop.f32.mrf.mxu2 }
 0x1b5   :  { %v10818_v6 = vadd.f32 %v696_v22, %v10774_v53  ;;  %v661_v40 = vpop.f32.mrf.mxu1 }
 0x1b6   :  { %12635 = vst [vmem:[#allocation75_spill] sm:$0xff] %v10815_v25  ;;  %v10821_v54 = vadd.f32 %v661_v40, %v10726_v10  ;;  %v945_v31 = vpop.f32.mrf.mxu0 }
 0x1b7   :  { %12636 = vst [vmem:[#allocation76_spill] sm:$0xff] %v10818_v6  ;;  %v10824_v42 = vadd.f32 %v945_v31, %v10751_v24 }
 0x1b8   :  { %12637 = vst [vmem:[#allocation77_spill] sm:$0xff] %v10821_v54  ;;  %7205 = vmatmul.msk.f32.gmra.mxu3 %vm297_vm1, %v10355_v43  ;;  %7223 = vmatmul.msk.f32.gmra.mxu1 %vm297_vm1, %v10374_v46 }
 0x1b9   :  { %12638 = vst [vmem:[#allocation78_spill] sm:$0xff] %v10824_v42  ;;  %7230 = vmatmul.msk.f32.gmra.mxu2 %vm297_vm1, %v10363_v44 }
 0x1bb   :  { %v614_v8 = vpop.f32.mrf.mxu3 }
 0x1bc   :  { %v10833_v22 = vadd.f32 %v614_v8, %v10792_v57  ;;  %v699_v6 = vpop.f32.mrf.mxu2 }
 0x1bd   :  { %v10836_v40 = vadd.f32 %v699_v6, %v10774_v53  ;;  %v664_v54 = vpop.f32.mrf.mxu1 }
 0x1be   :  { %12639 = vst [vmem:[#allocation79_spill] sm:$0xff] %v10833_v22  ;;  %v10839_v31 = vadd.f32 %v664_v54, %v10726_v10  ;;  %v948_v42 = vpop.f32.mrf.mxu0 }
 0x1bf   :  { %12640 = vst [vmem:[#allocation80_spill] sm:$0xff] %v10836_v40  ;;  %v10842_v43 = vadd.f32 %v948_v42, %v10751_v24 }
 0x1c0   :  { %12641 = vst [vmem:[#allocation81_spill] sm:$0xff] %v10839_v31  ;;  %7206 = vmatmul.msk.f32.gmra.mxu3 %vm297_vm1, %v10363_v44  ;;  %7224 = vmatmul.msk.f32.gmra.mxu1 %vm297_vm1, %v10382_v47 }
 0x1c1   :  { %12642 = vst [vmem:[#allocation82_spill] sm:$0xff] %v10842_v43  ;;  %7231 = vmatmul.msk.f32.gmra.mxu2 %vm297_vm1, %v10374_v46 }
 0x1c3   :  { %v617_v8 = vpop.f32.mrf.mxu3 }
 0x1c4   :  { %v10851_v6 = vadd.f32 %v617_v8, %v10792_v57  ;;  %v702_v40 = vpop.f32.mrf.mxu2 }
 0x1c5   :  { %v10854_v54 = vadd.f32 %v702_v40, %v10774_v53  ;;  %v667_v31 = vpop.f32.mrf.mxu1 }
 0x1c6   :  { %12643 = vst [vmem:[#allocation83_spill] sm:$0xff] %v10851_v6  ;;  %v10857_v42 = vadd.f32 %v667_v31, %v10726_v10  ;;  %v951_v43 = vpop.f32.mrf.mxu0 }
 0x1c7   :  { %12644 = vst [vmem:[#allocation84_spill] sm:$0xff] %v10854_v54  ;;  %v10860_v44 = vadd.f32 %v951_v43, %v10751_v24 }
 0x1c8   :  { %12645 = vst [vmem:[#allocation85_spill] sm:$0xff] %v10857_v42  ;;  %7207 = vmatmul.msk.f32.gmra.mxu3 %vm297_vm1, %v10374_v46  ;;  %7225 = vmatmul.msk.f32.gmra.mxu1 %vm297_vm1, %v10399_v51 }
 0x1c9   :  { %12646 = vst [vmem:[#allocation86_spill] sm:$0xff] %v10860_v44  ;;  %7232 = vmatmul.msk.f32.gmra.mxu2 %vm297_vm1, %v10382_v47 }
 0x1cb   :  { %v620_v8 = vpop.f32.mrf.mxu3 }
 0x1cc   :  { %v10869_v40 = vadd.f32 %v620_v8, %v10792_v57  ;;  %v705_v54 = vpop.f32.mrf.mxu2 }
 0x1cd   :  { %v10872_v31 = vadd.f32 %v705_v54, %v10774_v53  ;;  %v670_v42 = vpop.f32.mrf.mxu1  ;;  %v10887_v54 = vperm.slane %v10559_v37, 6 }
 0x1ce   :  { %12647 = vst [vmem:[#allocation87_spill] sm:$0xff] %v10869_v40  ;;  %v10875_v43 = vadd.f32 %v670_v42, %v10726_v10  ;;  %v954_v44 = vpop.f32.mrf.mxu0 }
 0x1cf   :  { %12648 = vst [vmem:[#allocation88_spill] sm:$0xff] %v10872_v31  ;;  %v10878_v46 = vadd.f32 %v954_v44, %v10751_v24 }
 0x1d0   :  { %12649 = vst [vmem:[#allocation89_spill] sm:$0xff] %v10875_v43  ;;  %7208 = vmatmul.msk.f32.gmra.mxu3 %vm297_vm1, %v10382_v47  ;;  %7226 = vmatmul.msk.f32.gmra.mxu1 %vm297_vm1, %v10407_v52 }
 0x1d1   :  { %12650 = vst [vmem:[#allocation90_spill] sm:$0xff] %v10878_v46  ;;  %7233 = vmatmul.msk.f32.gmra.mxu2 %vm297_vm1, %v10399_v51 }
 0x1d3   :  { %v623_v8 = vpop.f32.mrf.mxu3 }
 0x1d4   :  { %v10890_v10 = vadd.f32 %v623_v8, %v10792_v57  ;;  %v708_v42 = vpop.f32.mrf.mxu2 }
 0x1d5   :  { %v10893_v44 = vadd.f32 %v708_v42, %v10774_v53  ;;  %v813_v46 = vpop.f32.mrf.mxu1 }
 0x1d6   :  { %12651 = vst [vmem:[#allocation91_spill] sm:$0xff] %v10890_v10  ;;  %v10896_v47 = vadd.f32 %v813_v46, %v10887_v54  ;;  %v957_v31 = vpop.f32.mrf.mxu0 }
 0x1d7   :  { %12652 = vst [vmem:[#allocation92_spill] sm:$0xff] %v10893_v44  ;;  %v10899_v43 = vadd.f32 %v957_v31, %v10751_v24 }
 0x1d8   :  { %12653 = vst [vmem:[#allocation93_spill] sm:$0xff] %v10896_v47  ;;  %7209 = vmatmul.msk.f32.gmra.mxu3 %vm297_vm1, %v10399_v51  ;;  %v509_v51 = vperm.slane %v10559_v37, 7 }
 0x1d9   :  { %12654 = vst [vmem:[#allocation94_spill] sm:$0xff] %v10899_v43  ;;  %7234 = vmatmul.msk.f32.gmra.mxu2 %vm297_vm1, %v10407_v52  ;;  %v506_v43 = vperm.slane %v10559_v37, 4 }
 0x1db   :  { %v626_v8 = vpop.f32.mrf.mxu3 }
 0x1dc   :  { %v10906_v35 = vadd.f32 %v626_v8, %v10792_v57  ;;  %v711_v42 = vpop.f32.mrf.mxu2 }
 0x1dd   :  { %v10909_v44 = vadd.f32 %v711_v42, %v10774_v53  ;;  %v816_v46 = vpop.f32.mrf.mxu1 }
 0x1de   :  { %12655 = vst [vmem:[#allocation95_spill] sm:$0xff] %v10906_v35  ;;  %v10915_v24 = vadd.f32 %v816_v46, %v10887_v54 }
 0x1df   :  { %12656 = vst [vmem:[#allocation96_spill] sm:$0xff] %v10909_v44 }
 0x1e0   :  { %12657 = vst [vmem:[#allocation97_spill] sm:$0xff] %v10915_v24  ;;  %7210 = vmatmul.msk.f32.gmra.mxu3 %vm297_vm1, %v10407_v52 }
 0x1e3   :  { %v629_v53 = vpop.f32.mrf.mxu3 }
 0x1e4   :  { %v10927_v31 = vadd.f32 %v629_v53, %v10792_v57  ;;  %v854_v8 = vpop.f32.mrf.mxu2 }
 0x1e5   :  { %v10929_v42 = vadd.f32 %v854_v8, %v509_v51  ;;  %v819_v52 = vpop.f32.mrf.mxu1 }
 0x1e6   :  { %12658 = vst [vmem:[#allocation98_spill] sm:$0xff] %v10927_v31  ;;  %v10932_v46 = vadd.f32 %v819_v52, %v10887_v54 }
 0x1e7   :  { %12659 = vst [vmem:[#allocation99_spill] sm:$0xff] %v10929_v42 }
 0x1e8   :  { %12660 = vst [vmem:[#allocation100_spill] sm:$0xff] %v10932_v46 }
 0x1eb   :  { %v731_v24 = vpop.f32.mrf.mxu3 }
 0x1ec   :  { %v10935_v47 = vadd.f32 %v731_v24, %v506_v43  ;;  %v857_v57 = vpop.f32.mrf.mxu2 }
 0x1ed   :  { %v10937_v53 = vadd.f32 %v857_v57, %v509_v51  ;;  %v822_v44 = vpop.f32.mrf.mxu1 }
 0x1ee   :  { %12661 = vst [vmem:[#allocation101_spill] sm:$0xff] %v10935_v47  ;;  %v10940_v8 = vadd.f32 %v822_v44, %v10887_v54 }
 0x1ef   :  { %12662 = vst [vmem:[#allocation102_spill] sm:$0xff] %v10937_v53 }
 0x1f0   :  { %12663 = vst [vmem:[#allocation103_spill] sm:$0xff] %v10940_v8 }
 0x1f3   :  { %v734_v42 = vpop.f32.mrf.mxu3 }
 0x1f4   :  { %v10942_v5 = vadd.f32 %v734_v42, %v506_v43  ;;  %v860_v33 = vpop.f32.mrf.mxu2 }
 0x1f5   :  { %v10944_v52 = vadd.f32 %v860_v33, %v509_v51  ;;  %v825_v46 = vpop.f32.mrf.mxu1 }
 0x1f6   :  { %12664 = vst [vmem:[#allocation104_spill] sm:$0xff] %v10942_v5  ;;  %v10947_v31 = vadd.f32 %v825_v46, %v10887_v54 }
 0x1f7   :  { %12665 = vst [vmem:[#allocation105_spill] sm:$0xff] %v10944_v52 }
 0x1f8   :  { %12666 = vst [vmem:[#allocation106_spill] sm:$0xff] %v10947_v31 }
 0x1fb   :  { %v737_v37 = vpop.f32.mrf.mxu3 }
 0x1fc   :  { %v10949_v24 = vadd.f32 %v737_v37, %v506_v43  ;;  %v863_v47 = vpop.f32.mrf.mxu2 }
 0x1fd   :  { %v10951_v57 = vadd.f32 %v863_v47, %v509_v51  ;;  %v828_v53 = vpop.f32.mrf.mxu1 }
 0x1fe   :  { %12667 = vst [vmem:[#allocation107_spill] sm:$0xff] %v10949_v24  ;;  %v10954_v44 = vadd.f32 %v828_v53, %v10887_v54 }
 0x1ff   :  { %12668 = vst [vmem:[#allocation108_spill] sm:$0xff] %v10951_v57 }
 0x200   :  { %12669 = vst [vmem:[#allocation109_spill] sm:$0xff] %v10954_v44 }
 0x203   :  { %v740_v8 = vpop.f32.mrf.mxu3 }
 0x204   :  { %v10956_v42 = vadd.f32 %v740_v8, %v506_v43  ;;  %v866_v5 = vpop.f32.mrf.mxu2  ;;  %v512_v8 = vperm.slane %v10743_v63, 2 }
 0x205   :  { %v10958_v33 = vadd.f32 %v866_v5, %v509_v51  ;;  %v831_v52 = vpop.f32.mrf.mxu1 }
 0x206   :  { %12670 = vst [vmem:[#allocation110_spill] sm:$0xff] %v10956_v42  ;;  %v10961_v46 = vadd.f32 %v831_v52, %v10887_v54 }
 0x207   :  { %12671 = vst [vmem:[#allocation111_spill] sm:$0xff] %v10958_v33 }
 0x208   :  { %12672 = vst [vmem:[#allocation112_spill] sm:$0xff] %v10961_v46 }
 0x20b   :  { %v743_v31 = vpop.f32.mrf.mxu3 }
 0x20c   :  { %v10963_v37 = vadd.f32 %v743_v31, %v506_v43  ;;  %v869_v24 = vpop.f32.mrf.mxu2 }
 0x20d   :  { %v10965_v47 = vadd.f32 %v869_v24, %v509_v51  ;;  %v834_v57 = vpop.f32.mrf.mxu1 }
 0x20e   :  { %12673 = vst [vmem:[#allocation113_spill] sm:$0xff] %v10963_v37  ;;  %v10968_v53 = vadd.f32 %v834_v57, %v10887_v54  ;;  %v513_v57 = vperm.slane %v10743_v63, 3 }
 0x20f   :  { %12674 = vst [vmem:[#allocation114_spill] sm:$0xff] %v10965_v47 }
 0x210   :  { %12675 = vst [vmem:[#allocation115_spill] sm:$0xff] %v10968_v53 }
 0x213   :  { %v746_v44 = vpop.f32.mrf.mxu3 }
 0x214   :  { %v10971_v42 = vadd.f32 %v746_v44, %v506_v43  ;;  %v872_v5 = vpop.f32.mrf.mxu2 }
 0x215   :  { %v10973_v33 = vadd.f32 %v872_v5, %v509_v51  ;;  %v977_v52 = vpop.f32.mrf.mxu1 }
 0x216   :  { %12676 = vst [vmem:[#allocation116_spill] sm:$0xff] %v10971_v42  ;;  %v10975_v46 = vadd.f32 %v977_v52, %v512_v8 }
 0x217   :  { %12677 = vst [vmem:[#allocation117_spill] sm:$0xff] %v10973_v33 }
 0x218   :  { %12678 = vst [vmem:[#allocation118_spill] sm:$0xff] %v10975_v46 }
 0x21b   :  { %v749_v31 = vpop.f32.mrf.mxu3 }
 0x21c   :  { %v10977_v37 = vadd.f32 %v749_v31, %v506_v43  ;;  %v875_v24 = vpop.f32.mrf.mxu2  ;;  %v510_v31 = vperm.slane %v10743_v63, 0 }
 0x21d   :  { %v10979_v47 = vadd.f32 %v875_v24, %v509_v51  ;;  %v980_v35 = vpop.f32.mrf.mxu1 }
 0x21e   :  { %12679 = vst [vmem:[#allocation119_spill] sm:$0xff] %v10977_v37  ;;  %v10981_v54 = vadd.f32 %v980_v35, %v512_v8 }
 0x21f   :  { %12680 = vst [vmem:[#allocation120_spill] sm:$0xff] %v10979_v47 }
 0x220   :  { %12681 = vst [vmem:[#allocation121_spill] sm:$0xff] %v10981_v54 }
 0x223   :  { %v752_v53 = vpop.f32.mrf.mxu3 }
 0x224   :  { %v10984_v44 = vadd.f32 %v752_v53, %v506_v43  ;;  %v1018_v42 = vpop.f32.mrf.mxu2 }
 0x225   :  { %v10986_v5 = vadd.f32 %v1018_v42, %v513_v57  ;;  %v983_v33 = vpop.f32.mrf.mxu1 }
 0x226   :  { %12682 = vst [vmem:[#allocation122_spill] sm:$0xff] %v10984_v44  ;;  %v10988_v52 = vadd.f32 %v983_v33, %v512_v8 }
 0x227   :  { %12683 = vst [vmem:[#allocation123_spill] sm:$0xff] %v10986_v5 }
 0x228   :  { %12684 = vst [vmem:[#allocation124_spill] sm:$0xff] %v10988_v52 }
 0x22b   :  { %v895_v46 = vpop.f32.mrf.mxu3 }
 0x22c   :  { %v10991_v37 = vadd.f32 %v895_v46, %v510_v31  ;;  %v1021_v51 = vpop.f32.mrf.mxu2 }
 0x22d   :  { %v10993_v24 = vadd.f32 %v1021_v51, %v513_v57  ;;  %v986_v35 = vpop.f32.mrf.mxu1 }
 0x22e   :  { %12685 = vst [vmem:[#allocation125_spill] sm:$0xff] %v10991_v37  ;;  %v10995_v54 = vadd.f32 %v986_v35, %v512_v8 }
 0x22f   :  { %12686 = vst [vmem:[#allocation126_spill] sm:$0xff] %v10993_v24 }
 0x230   :  { %12687 = vst [vmem:[#allocation127_spill] sm:$0xff] %v10995_v54 }
 0x233   :  { %v898_v47 = vpop.f32.mrf.mxu3 }
 0x234   :  { %v10997_v43 = vadd.f32 %v898_v47, %v510_v31  ;;  %v1024_v53 = vpop.f32.mrf.mxu2 }
 0x235   :  { %v10999_v42 = vadd.f32 %v1024_v53, %v513_v57  ;;  %v989_v5 = vpop.f32.mrf.mxu1 }
 0x236   :  { %12688 = vst [vmem:[#allocation128_spill] sm:$0xff] %v10997_v43  ;;  %v11001_v33 = vadd.f32 %v989_v5, %v512_v8 }
 0x237   :  { %12689 = vst [vmem:[#allocation129_spill] sm:$0xff] %v10999_v42 }
 0x238   :  { %12690 = vst [vmem:[#allocation130_spill] sm:$0xff] %v11001_v33 }
 0x23b   :  { %v901_v52 = vpop.f32.mrf.mxu3 }
 0x23c   :  { %v11003_v63 = vadd.f32 %v901_v52, %v510_v31  ;;  %v1027_v46 = vpop.f32.mrf.mxu2 }
 0x23d   :  { %v11005_v37 = vadd.f32 %v1027_v46, %v513_v57  ;;  %v992_v51 = vpop.f32.mrf.mxu1 }
 0x23e   :  { %12691 = vst [vmem:[#allocation131_spill] sm:$0xff] %v11003_v63  ;;  %v11007_v24 = vadd.f32 %v992_v51, %v512_v8 }
 0x23f   :  { %12692 = vst [vmem:[#allocation132_spill] sm:$0xff] %v11005_v37 }
 0x240   :  { %12693 = vst [vmem:[#allocation133_spill] sm:$0xff] %v11007_v24 }
 0x243   :  { %v904_v35 = vpop.f32.mrf.mxu3 }
 0x244   :  { %v11009_v54 = vadd.f32 %v904_v35, %v510_v31  ;;  %v1030_v47 = vpop.f32.mrf.mxu2 }
 0x245   :  { %v11011_v43 = vadd.f32 %v1030_v47, %v513_v57  ;;  %v995_v53 = vpop.f32.mrf.mxu1 }
 0x246   :  { %12694 = vst [vmem:[#allocation134_spill] sm:$0xff] %v11009_v54  ;;  %v11013_v42 = vadd.f32 %v995_v53, %v512_v8 }
 0x247   :  { %12695 = vst [vmem:[#allocation135_spill] sm:$0xff] %v11011_v43 }
 0x248   :  { %12696 = vst [vmem:[#allocation136_spill] sm:$0xff] %v11013_v42 }
 0x24b   :  { %v907_v5 = vpop.f32.mrf.mxu3 }
 0x24c   :  { %v11015_v33 = vadd.f32 %v907_v5, %v510_v31  ;;  %v1033_v52 = vpop.f32.mrf.mxu2 }
 0x24d   :  { %v11017_v63 = vadd.f32 %v1033_v52, %v513_v57  ;;  %v998_v46 = vpop.f32.mrf.mxu1 }
 0x24e   :  { %12697 = vst [vmem:[#allocation137_spill] sm:$0xff] %v11015_v33  ;;  %v11019_v37 = vadd.f32 %v998_v46, %v512_v8 }
 0x24f   :  { %12698 = vst [vmem:[#allocation138_spill] sm:$0xff] %v11017_v63 }
 0x250   :  { %12699 = vst [vmem:[#allocation139_spill] sm:$0xff] %v11019_v37 }
 0x253   :  { %v910_v51 = vpop.f32.mrf.mxu3 }
 0x254   :  { %v11021_v24 = vadd.f32 %v910_v51, %v510_v31  ;;  %v1036_v35 = vpop.f32.mrf.mxu2 }
 0x255   :  { %v11023_v54 = vadd.f32 %v1036_v35, %v513_v57 }
 0x256   :  { %12700 = vst [vmem:[#allocation140_spill] sm:$0xff] %v11021_v24 }
 0x257   :  { %12701 = vst [vmem:[#allocation141_spill] sm:$0xff] %v11023_v54 }
 0x25b   :  { %v913_v47 = vpop.f32.mrf.mxu3 }
 0x25c   :  { %v11025_v43 = vadd.f32 %v913_v47, %v510_v31  ;;  %v1039_v53 = vpop.f32.mrf.mxu2 }
 0x25d   :  { %v11027_v42 = vadd.f32 %v1039_v53, %v513_v57 }
 0x25e   :  { %12702 = vst [vmem:[#allocation142_spill] sm:$0xff] %v11025_v43 }
 0x25f   :  { %12703 = vst [vmem:[#allocation143_spill] sm:$0xff] %v11027_v42 }
 0x263   :  { %v916_v5 = vpop.f32.mrf.mxu3 }
 0x264   :  { %v11029_v33 = vadd.f32 %v916_v5, %v510_v31 }
 0x266   :  { %12704 = vst [vmem:[#allocation144_spill] sm:$0xff] %v11029_v33 }
 0x267   :  { %10119 = dma.done.wait [#allocation5], 32768 }
 0x268   :  { %10120 = vsyncadd [#allocation5], 4294934528  ;;  %v7461_v52 = vld [vmem:[#allocation2 + $0x1c0] sm:$0xf] }
 0x269   :  { %v9221_v8 = vld [vmem:[#allocation2 + $0x1dc] sm:$0xf0] }
 0x26a   :  { %v7717_v46 = vld [vmem:[#allocation2 + $0x3c0] sm:$0xf]  ;;  %v7462_v63 = vor.u32 %v9221_v8, %v7461_v52 }
 0x26b   :  { %v9285_v51 = vld [vmem:[#allocation2 + $0x3dc] sm:$0xf0] }
 0x26c   :  { %v7973_v37 = vld [vmem:[#allocation2 + $0x5c0] sm:$0xf]  ;;  %v7718_v35 = vor.u32 %v9285_v51, %v7717_v46  ;;  %2598 = vmatpush.bf16.msra.mxu3 %v7462_v63 }
 0x26d   :  { %v9349_v24 = vld [vmem:[#allocation2 + $0x5dc] sm:$0xf0] }
 0x26e   :  { %v7974_v54 = vor.u32 %v9349_v24, %v7973_v37  ;;  %v8229_v44 = vld [vmem:[#allocation2 + $0x7c0] sm:$0xf]  ;;  %2627 = vmatpush.bf16.msrb.mxu0 %v7718_v35 }
 0x26f   :  { %v9413_v47 = vld [vmem:[#allocation2 + $0x7dc] sm:$0xf0] }
 0x270   :  { %v7429_v43 = vld [vmem:[#allocation2 + $0x180] sm:$0xf]  ;;  %v8230_v57 = vor.u32 %v9413_v47, %v8229_v44  ;;  %2656 = vmatpush.bf16.msrb.mxu1 %v7974_v54 }
 0x271   :  { %v9213_v53 = vld [vmem:[#allocation2 + $0x19c] sm:$0xf0] }
 0x272   :  { %v7685_v42 = vld [vmem:[#allocation2 + $0x380] sm:$0xf]  ;;  %v7430_v5 = vor.u32 %v9213_v53, %v7429_v43  ;;  %2685 = vmatpush.bf16.msrb.mxu2 %v8230_v57 }
 0x273   :  { %v9277_v31 = vld [vmem:[#allocation2 + $0x39c] sm:$0xf0] }
 0x274   :  { %v7686_v33 = vor.u32 %v9277_v31, %v7685_v42  ;;  %v7941_v10 = vld [vmem:[#allocation2 + $0x580] sm:$0xf]  ;;  %2599 = vmatpush.bf16.msra.mxu3 %v7430_v5 }
 0x275   :  { %v9341_v40 = vld [vmem:[#allocation2 + $0x59c] sm:$0xf0] }
 0x276   :  { %v8197_v52 = vld [vmem:[#allocation2 + $0x780] sm:$0xf]  ;;  %v7942_v8 = vor.u32 %v9341_v40, %v7941_v10  ;;  %2628 = vmatpush.bf16.msrb.mxu0 %v7686_v33 }
 0x277   :  { %v9405_v6 = vld [vmem:[#allocation2 + $0x79c] sm:$0xf0] }
 0x278   :  { %v7397_v46 = vld [vmem:[#allocation2 + $0x140] sm:$0xf]  ;;  %v8198_v24 = vor.u32 %v9405_v6, %v8197_v52  ;;  %2657 = vmatpush.bf16.msrb.mxu1 %v7942_v8 }
 0x279   :  { %v9205_v37 = vld [vmem:[#allocation2 + $0x15c] sm:$0xf0] }
 0x27a   :  { %v7653_v51 = vld [vmem:[#allocation2 + $0x340] sm:$0xf]  ;;  %v7398_v44 = vor.u32 %v9205_v37, %v7397_v46  ;;  %2686 = vmatpush.bf16.msrb.mxu2 %v8198_v24 }
 0x27b   :  { %v9269_v22 = vld [vmem:[#allocation2 + $0x35c] sm:$0xf0] }
 0x27c   :  { %v7909_v63 = vld [vmem:[#allocation2 + $0x540] sm:$0xf]  ;;  %v7654_v54 = vor.u32 %v9269_v22, %v7653_v51  ;;  %2600 = vmatpush.bf16.msra.mxu3 %v7398_v44 }
 0x27d   :  { %v9333_v47 = vld [vmem:[#allocation2 + $0x55c] sm:$0xf0] }
 0x27e   :  { %v8165_v25 = vld [vmem:[#allocation2 + $0x740] sm:$0xf]  ;;  %v7910_v43 = vor.u32 %v9333_v47, %v7909_v63  ;;  %2629 = vmatpush.bf16.msrb.mxu0 %v7654_v54 }
 0x27f   :  { %v9397_v35 = vld [vmem:[#allocation2 + $0x75c] sm:$0xf0] }
 0x280   :  { %v7365_v42 = vld [vmem:[#allocation2 + $0x100] sm:$0xf]  ;;  %v8166_v40 = vor.u32 %v9397_v35, %v8165_v25  ;;  %2658 = vmatpush.bf16.msrb.mxu1 %v7910_v43 }
 0x281   :  { %v9197_v53 = vld [vmem:[#allocation2 + $0x11c] sm:$0xf0] }
 0x282   :  { %v7621_v57 = vld [vmem:[#allocation2 + $0x300] sm:$0xf]  ;;  %v7366_v5 = vor.u32 %v9197_v53, %v7365_v42  ;;  %2687 = vmatpush.bf16.msrb.mxu2 %v8166_v40 }
 0x283   :  { %v9261_v10 = vld [vmem:[#allocation2 + $0x31c] sm:$0xf0] }
 0x284   :  { %v7877_v31 = vld [vmem:[#allocation2 + $0x500] sm:$0xf]  ;;  %v7622_v46 = vor.u32 %v9261_v10, %v7621_v57  ;;  %2601 = vmatpush.bf16.msra.mxu3 %v7366_v5 }
 0x285   :  { %v9325_v6 = vld [vmem:[#allocation2 + $0x51c] sm:$0xf0] }
 0x286   :  { %v8133_v52 = vld [vmem:[#allocation2 + $0x700] sm:$0xf]  ;;  %v7878_v37 = vor.u32 %v9325_v6, %v7877_v31  ;;  %2630 = vmatpush.bf16.msrb.mxu0 %v7622_v46 }
 0x287   :  { %v9389_v2 = vld [vmem:[#allocation2 + $0x71c] sm:$0xf0] }
 0x288   :  { %v7333_v33 = vld [vmem:[#allocation2 + $0xc0] sm:$0xf]  ;;  %v8134_v51 = vor.u32 %v9389_v2, %v8133_v52  ;;  %2659 = vmatpush.bf16.msrb.mxu1 %v7878_v37 }
 0x289   :  { %v9189_v8 = vld [vmem:[#allocation2 + $0xdc] sm:$0xf0] }
 0x28a   :  { %v7589_v22 = vld [vmem:[#allocation2 + $0x2c0] sm:$0xf]  ;;  %v7334_v39 = vor.u32 %v9189_v8, %v7333_v33  ;;  %2688 = vmatpush.bf16.msrb.mxu2 %v8134_v51 }
 0x28b   :  { %v9253_v63 = vld [vmem:[#allocation2 + $0x2dc] sm:$0xf0] }
 0x28c   :  { %v7845_v47 = vld [vmem:[#allocation2 + $0x4c0] sm:$0xf]  ;;  %v7590_v44 = vor.u32 %v9253_v63, %v7589_v22  ;;  %2602 = vmatpush.bf16.msra.mxu3 %v7334_v39 }
 0x28d   :  { %v9317_v24 = vld [vmem:[#allocation2 + $0x4dc] sm:$0xf0] }
 0x28e   :  { %v8101_v25 = vld [vmem:[#allocation2 + $0x6c0] sm:$0xf]  ;;  %v7846_v42 = vor.u32 %v9317_v24, %v7845_v47  ;;  %2631 = vmatpush.bf16.msrb.mxu0 %v7590_v44 }
 0x28f   :  { %v9381_v35 = vld [vmem:[#allocation2 + $0x6dc] sm:$0xf0] }
 0x290   :  { %v7301_v54 = vld [vmem:[#allocation2 + $0x80] sm:$0xf]  ;;  %v8102_v57 = vor.u32 %v9381_v35, %v8101_v25  ;;  %2660 = vmatpush.bf16.msrb.mxu1 %v7846_v42 }
 0x291   :  { %v9181_v43 = vld [vmem:[#allocation2 + $0x9c] sm:$0xf0] }
 0x292   :  { %v7557_v53 = vld [vmem:[#allocation2 + $0x280] sm:$0xf]  ;;  %v7302_v52 = vor.u32 %v9181_v43, %v7301_v54  ;;  %2689 = vmatpush.bf16.msrb.mxu2 %v8102_v57 }
 0x293   :  { %v9245_v10 = vld [vmem:[#allocation2 + $0x29c] sm:$0xf0] }
 0x294   :  { %v7813_v31 = vld [vmem:[#allocation2 + $0x480] sm:$0xf]  ;;  %v7558_v5 = vor.u32 %v9245_v10, %v7557_v53  ;;  %2603 = vmatpush.bf16.msra.mxu3 %v7302_v52  ;;  %v9409_v52 = vld [vmem:[#allocation2 + $0x7c4] sm:$0xf] }
 0x295   :  { %v9309_v40 = vld [vmem:[#allocation2 + $0x49c] sm:$0xf0] }
 0x296   :  { %v8069_v2 = vld [vmem:[#allocation2 + $0x680] sm:$0xf]  ;;  %v7814_v33 = vor.u32 %v9309_v40, %v7813_v31  ;;  %2632 = vmatpush.bf16.msrb.mxu0 %v7558_v5 }
 0x297   :  { %v9373_v6 = vld [vmem:[#allocation2 + $0x69c] sm:$0xf0] }
 0x298   :  { %v7269_v46 = vld [vmem:[#allocation2 + $0x40] sm:$0xf]  ;;  %v8070_v22 = vor.u32 %v9373_v6, %v8069_v2  ;;  %2661 = vmatpush.bf16.msrb.mxu1 %v7814_v33  ;;  %v9217_v2 = vld [vmem:[#allocation2 + $0x1c4] sm:$0xf] }
 0x299   :  { %v9173_v37 = vld [vmem:[#allocation2 + $0x5c] sm:$0xf0]  ;;  %v7463_v6 = vld [vmem:[#allocation2 + $0x1e0] sm:$0xf0] }
 0x29a   :  { %v7525_v8 = vld [vmem:[#allocation2 + $0x240] sm:$0xf]  ;;  %v7270_v35 = vor.u32 %v9173_v37, %v7269_v46  ;;  %2690 = vmatpush.bf16.msrb.mxu2 %v8070_v22  ;;  %v8231_v46 = vld [vmem:[#allocation2 + $0x7e0] sm:$0xf0] }
 0x29b   :  { %v9237_v63 = vld [vmem:[#allocation2 + $0x25c] sm:$0xf0]  ;;  %v7719_v22 = vld [vmem:[#allocation2 + $0x3e0] sm:$0xf0] }
 0x29c   :  { %v7781_v47 = vld [vmem:[#allocation2 + $0x440] sm:$0xf]  ;;  %v7526_v39 = vor.u32 %v9237_v63, %v7525_v8  ;;  %2604 = vmatpush.bf16.msra.mxu3 %v7270_v35  ;;  %v7466_v8 = vor.u32 %v9217_v2, %v7463_v6  ;;  %v9281_v63 = vld [vmem:[#allocation2 + $0x3c4] sm:$0xf] }
 0x29d   :  { %v9301_v51 = vld [vmem:[#allocation2 + $0x45c] sm:$0xf0]  ;;  %v9345_v35 = vld [vmem:[#allocation2 + $0x5c4] sm:$0xf] }
 0x29e   :  { %v8037_v24 = vld [vmem:[#allocation2 + $0x640] sm:$0xf]  ;;  %v7782_v44 = vor.u32 %v9301_v51, %v7781_v47  ;;  %2633 = vmatpush.bf16.msrb.mxu0 %v7526_v39  ;;  %v9209_v47 = vld [vmem:[#allocation2 + $0x184] sm:$0xf]  ;;  %v11033_v51 = vpack.c.bf16 %v10436_v61, %v10419_v55  ;;  %v11037_v39 = vpack.c.bf16 %v10452_v1, %v10434_v59 }
 0x29f   :  { %v9365_v25 = vld [vmem:[#allocation2 + $0x65c] sm:$0xf0]  ;;  %v7399_v6 = vld [vmem:[#allocation2 + $0x160] sm:$0xf0] }
 0x2a0   :  { %v7237_v28 = vld [vmem:[#allocation2] sm:$0xf]  ;;  %v8038_v53 = vor.u32 %v9365_v25, %v8037_v24  ;;  %2662 = vmatpush.bf16.msrb.mxu1 %v7782_v44  ;;  %v8234_v24 = vor.u32 %v9409_v52, %v8231_v46  ;;  %v7431_v25 = vld [vmem:[#allocation2 + $0x1a0] sm:$0xf0]  ;;  %v11041_v44 = vpack.c.bf16 %v10640_v26, %v10618_v12 }
 0x2a1   :  { %v9165_v42 = vld [vmem:[#allocation2 + $0x1c] sm:$0xf0]  ;;  %v9337_v52 = vld [vmem:[#allocation2 + $0x584] sm:$0xf] }
 0x2a2   :  { %v7493_v54 = vld [vmem:[#allocation2 + $0x200] sm:$0xf]  ;;  %v7238_v41 = vor.u32 %v9165_v42, %v7237_v28  ;;  %2691 = vmatpush.bf16.msrb.mxu2 %v8038_v53  ;;  %v7975_v28 = vld [vmem:[#allocation2 + $0x5e0] sm:$0xf0]  ;;  %v7722_v53 = vor.u32 %v9281_v63, %v7719_v22 }
 0x2a3   :  { %v9229_v43 = vld [vmem:[#allocation2 + $0x21c] sm:$0xf0]  ;;  %v9401_v42 = vld [vmem:[#allocation2 + $0x784] sm:$0xf] }
 0x2a4   :  { %v7749_v10 = vld [vmem:[#allocation2 + $0x400] sm:$0xf]  ;;  %v7494_v5 = vor.u32 %v9229_v43, %v7493_v54  ;;  %2605 = vmatpush.bf16.msra.mxu3 %v7238_v41  ;;  %v8199_v54 = vld [vmem:[#allocation2 + $0x7a0] sm:$0xf0]  ;;  %v11045_v43 = vpack.c.bf16 %v10576_v50, %v10553_v36  ;;  %v7434_v41 = vor.u32 %v9209_v47, %v7431_v25 }
 0x2a5   :  { %v9293_v57 = vld [vmem:[#allocation2 + $0x41c] sm:$0xf0]  ;;  %v8202_v2 = vor.u32 %v9401_v42, %v8199_v54  ;;  %v7943_v46 = vld [vmem:[#allocation2 + $0x5a0] sm:$0xf0] }
 0x2a6   :  { %v8005_v31 = vld [vmem:[#allocation2 + $0x600] sm:$0xf]  ;;  %v7750_v33 = vor.u32 %v9293_v57, %v7749_v10  ;;  %2634 = vmatpush.bf16.msrb.mxu0 %v7494_v5  ;;  %v7978_v10 = vor.u32 %v9345_v35, %v7975_v28  ;;  %v9273_v57 = vld [vmem:[#allocation2 + $0x384] sm:$0xf]  ;;  %v7946_v63 = vor.u32 %v9337_v52, %v7943_v46 }
 0x2a7   :  { %v9357_v40 = vld [vmem:[#allocation2 + $0x61c] sm:$0xf0]  ;;  %2606 = vmatmul.bf16.vlgmr.msra.gmra.mxu3 %v11033_v51  ;;  %v9393_v5 = vld [vmem:[#allocation2 + $0x744] sm:$0xf] }
 0x2a8   :  { %v8006_v37 = vor.u32 %v9357_v40, %v8005_v31  ;;  %2663 = vmatpush.bf16.msrb.mxu1 %v7750_v33  ;;  %2714 = vmatpush.bf16.msrb.mxu3 %v7466_v8  ;;  %v7687_v31 = vld [vmem:[#allocation2 + $0x3a0] sm:$0xf0] }
 0x2a9   :  { %v9201_v40 = vld [vmem:[#allocation2 + $0x144] sm:$0xf]  ;;  %2635 = vmatmul.bf16.vlgmr.msrb.gmra.mxu0 %v11037_v39 }
 0x2aa   :  { %2692 = vmatpush.bf16.msrb.mxu2 %v8006_v37  ;;  %v8167_v33 = vld [vmem:[#allocation2 + $0x760] sm:$0xf0]  ;;  %2743 = vmatpush.bf16.msra.mxu0 %v7722_v53  ;;  %v7690_v37 = vor.u32 %v9273_v57, %v7687_v31  ;;  %v7402_v8 = vor.u32 %v9201_v40, %v7399_v6 }
 0x2ab   :  { %2664 = vmatmul.bf16.vlgmr.msrb.gmra.mxu1 %v11041_v44  ;;  %v9265_v22 = vld [vmem:[#allocation2 + $0x344] sm:$0xf]  ;;  %v8170_v25 = vor.u32 %v9393_v5, %v8167_v33 }
 0x2ac   :  { %2715 = vmatpush.bf16.msrb.mxu3 %v7434_v41  ;;  %2772 = vmatpush.bf16.msra.mxu1 %v7978_v10  ;;  %v7655_v47 = vld [vmem:[#allocation2 + $0x360] sm:$0xf0] }
 0x2ad   :  { %2693 = vmatmul.bf16.vlgmr.msrb.gmra.mxu2 %v11045_v43  ;;  %v7367_v35 = vld [vmem:[#allocation2 + $0x120] sm:$0xf0]  ;;  %v7658_v36 = vor.u32 %v9265_v22, %v7655_v47 }
 0x2ae   :  { %2801 = vmatpush.bf16.msra.mxu2 %v8234_v24  ;;  %v9193_v24 = vld [vmem:[#allocation2 + $0x104] sm:$0xf]  ;;  %2744 = vmatpush.bf16.msra.mxu0 %v7690_v37 }
 0x2af   :  { %v9329_v28 = vld [vmem:[#allocation2 + $0x544] sm:$0xf]  ;;  %v7370_v53 = vor.u32 %v9193_v24, %v7367_v35  ;;  %v11053_v24 = vpack.c.bf16 %v10472_v9, %v10454_v3 }
 0x2b0   :  { %v7911_v42 = vld [vmem:[#allocation2 + $0x560] sm:$0xf0]  ;;  %2716 = vmatpush.bf16.msrb.mxu3 %v7402_v8  ;;  %2773 = vmatpush.bf16.msra.mxu1 %v7946_v63 }
 0x2b1   :  { %v9385_v54 = vld [vmem:[#allocation2 + $0x704] sm:$0xf]  ;;  %v7914_v57 = vor.u32 %v9329_v28, %v7911_v42  ;;  %v11061_v42 = vpack.c.bf16 %v10684_v11, %v10662_v49 }
 0x2b2   :  { %2802 = vmatpush.bf16.msra.mxu2 %v8202_v2  ;;  %v8135_v50 = vld [vmem:[#allocation2 + $0x720] sm:$0xf0]  ;;  %2745 = vmatpush.bf16.msra.mxu0 %v7658_v36  ;;  %v11057_v36 = vpack.c.bf16 %v10488_v13, %v10470_v7 }
 0x2b3   :  { %v9257_v41 = vld [vmem:[#allocation2 + $0x304] sm:$0xf]  ;;  %v8138_v40 = vor.u32 %v9385_v54, %v8135_v50 }
 0x2b4   :  { %v7623_v10 = vld [vmem:[#allocation2 + $0x320] sm:$0xf0]  ;;  %2717 = vmatpush.bf16.msrb.mxu3 %v7370_v53  ;;  %2774 = vmatpush.bf16.msra.mxu1 %v7914_v57  ;;  %v11065_v57 = vpack.c.bf16 %v10623_v18, %v10601_v4 }
 0x2b5   :  { %v9185_v31 = vld [vmem:[#allocation2 + $0xc4] sm:$0xf]  ;;  %v7626_v33 = vor.u32 %v9257_v41, %v7623_v10 }
 0x2b6   :  { %2803 = vmatpush.bf16.msra.mxu2 %v8170_v25  ;;  %v7335_v6 = vld [vmem:[#allocation2 + $0xe0] sm:$0xf0] }
 0x2b7   :  { %v9321_v52 = vld [vmem:[#allocation2 + $0x504] sm:$0xf]  ;;  %v7338_v37 = vor.u32 %v9185_v31, %v7335_v6  ;;  %2746 = vmatpush.bf16.msra.mxu0 %v7626_v33  ;;  %2611 = vmatmul.bf16.gmra.mxu3 %v11053_v24 }
 0x2b8   :  { %v7879_v2 = vld [vmem:[#allocation2 + $0x520] sm:$0xf0] }
 0x2b9   :  { %v9377_v46 = vld [vmem:[#allocation2 + $0x6c4] sm:$0xf]  ;;  %v7882_v22 = vor.u32 %v9321_v52, %v7879_v2  ;;  %2718 = vmatpush.bf16.msrb.mxu3 %v7338_v37  ;;  %2640 = vmatmul.bf16.gmra.mxu0 %v11057_v36 }
 0x2ba   :  { %v8103_v5 = vld [vmem:[#allocation2 + $0x6e0] sm:$0xf0]  ;;  %2804 = vmatpush.bf16.msra.mxu2 %v8138_v40 }
 0x2bb   :  { %v9249_v8 = vld [vmem:[#allocation2 + $0x2c4] sm:$0xf]  ;;  %v8106_v50 = vor.u32 %v9377_v46, %v8103_v5  ;;  %2775 = vmatpush.bf16.msra.mxu1 %v7882_v22 }
 0x2bc   :  { %v7591_v63 = vld [vmem:[#allocation2 + $0x2e0] sm:$0xf0]  ;;  %2669 = vmatmul.bf16.gmra.mxu1 %v11061_v42 }
 0x2bd   :  { %v9177_v47 = vld [vmem:[#allocation2 + $0x84] sm:$0xf]  ;;  %v7594_v41 = vor.u32 %v9249_v8, %v7591_v63  ;;  %2698 = vmatmul.bf16.gmra.mxu2 %v11065_v57 }
 0x2be   :  { %v7303_v25 = vld [vmem:[#allocation2 + $0xa0] sm:$0xf0]  ;;  %2805 = vmatpush.bf16.msra.mxu2 %v8106_v50 }
 0x2bf   :  { %v9313_v35 = vld [vmem:[#allocation2 + $0x4c4] sm:$0xf]  ;;  %v7306_v10 = vor.u32 %v9177_v47, %v7303_v25  ;;  %2747 = vmatpush.bf16.msra.mxu0 %v7594_v41 }
 0x2c0   :  { %v7847_v28 = vld [vmem:[#allocation2 + $0x4e0] sm:$0xf0] }
 0x2c1   :  { %v9369_v54 = vld [vmem:[#allocation2 + $0x684] sm:$0xf]  ;;  %v7850_v31 = vor.u32 %v9313_v35, %v7847_v28  ;;  %2719 = vmatpush.bf16.msrb.mxu3 %v7306_v10 }
 0x2c2   :  { %v8071_v53 = vld [vmem:[#allocation2 + $0x6a0] sm:$0xf0] }
 0x2c3   :  { %v9241_v40 = vld [vmem:[#allocation2 + $0x284] sm:$0xf]  ;;  %v8074_v52 = vor.u32 %v9369_v54, %v8071_v53  ;;  %2776 = vmatpush.bf16.msra.mxu1 %v7850_v31 }
 0x2c4   :  { %v7559_v6 = vld [vmem:[#allocation2 + $0x2a0] sm:$0xf0] }
 0x2c5   :  { %v7562_v2 = vor.u32 %v9241_v40, %v7559_v6  ;;  %v9169_v46 = vld [vmem:[#allocation2 + $0x44] sm:$0xf]  ;;  %2806 = vmatpush.bf16.msra.mxu2 %v8074_v52 }
 0x2c6   :  { %v7271_v5 = vld [vmem:[#allocation2 + $0x60] sm:$0xf0] }
 0x2c7   :  { %v9305_v33 = vld [vmem:[#allocation2 + $0x484] sm:$0xf]  ;;  %v7274_v37 = vor.u32 %v9169_v46, %v7271_v5  ;;  %2748 = vmatpush.bf16.msra.mxu0 %v7562_v2  ;;  %v11073_v2 = vpack.c.bf16 %v10508_v21, %v10490_v15 }
 0x2c8   :  { %v7815_v22 = vld [vmem:[#allocation2 + $0x4a0] sm:$0xf0] }
 0x2c9   :  { %v9361_v8 = vld [vmem:[#allocation2 + $0x644] sm:$0xf]  ;;  %v7818_v47 = vor.u32 %v9305_v33, %v7815_v22  ;;  %2720 = vmatpush.bf16.msrb.mxu3 %v7274_v37  ;;  %v11077_v37 = vpack.c.bf16 %v10530_v27, %v10506_v19  ;;  %v9311_v19 = vld [vmem:[#allocation2 + $0x4ac] sm:$0xf0] }
 0x2ca   :  { %v8039_v63 = vld [vmem:[#allocation2 + $0x660] sm:$0xf0]  ;;  %2616 = vmatmul.bf16.gmra.mxu3 %v11073_v2 }
 0x2cb   :  { %v8042_v50 = vor.u32 %v9361_v8, %v8039_v63  ;;  %v9233_v25 = vld [vmem:[#allocation2 + $0x244] sm:$0xf]  ;;  %2777 = vmatpush.bf16.msra.mxu1 %v7818_v47  ;;  %v11085_v47 = vpack.c.bf16 %v10667_v60, %v10645_v32  ;;  %2645 = vmatmul.bf16.gmra.mxu0 %v11077_v37  ;;  %v7693_v60 = vld [vmem:[#allocation2 + $0x388] sm:$0xf] }
 0x2cc   :  { %v7527_v35 = vld [vmem:[#allocation2 + $0x260] sm:$0xf0]  ;;  %v9278_v32 = vld [vmem:[#allocation2 + $0x3a4] sm:$0xf0] }
 0x2cd   :  { %v9161_v28 = vld [vmem:[#allocation2 + $0x4] sm:$0xf]  ;;  %v7530_v41 = vor.u32 %v9233_v25, %v7527_v35  ;;  %2807 = vmatpush.bf16.msra.mxu2 %v8042_v50  ;;  %v7469_v50 = vld [vmem:[#allocation2 + $0x1c8] sm:$0xf] }
 0x2ce   :  { %v7239_v54 = vld [vmem:[#allocation2 + $0x20] sm:$0xf0]  ;;  %2703 = vmatmul.bf16.gmra.mxu2 %v11085_v47  ;;  %v9222_v25 = vld [vmem:[#allocation2 + $0x1e4] sm:$0xf0] }
 0x2cf   :  { %v9297_v53 = vld [vmem:[#allocation2 + $0x444] sm:$0xf]  ;;  %v7242_v10 = vor.u32 %v9161_v28, %v7239_v54  ;;  %2749 = vmatpush.bf16.msra.mxu0 %v7530_v41  ;;  %v8237_v35 = vld [vmem:[#allocation2 + $0x7c8] sm:$0xf]  ;;  %v7470_v28 = vor.u32 %v9222_v25, %v7469_v50  ;;  %v7694_v50 = vor.u32 %v9278_v32, %v7693_v60  ;;  %v11093_v25 = vpack.c.bf16 %v10574_v48, %v10532_v29 }
 0x2d0   :  { %v7783_v18 = vld [vmem:[#allocation2 + $0x460] sm:$0xf0]  ;;  %v9414_v54 = vld [vmem:[#allocation2 + $0x7e4] sm:$0xf0] }
 0x2d1   :  { %v9353_v40 = vld [vmem:[#allocation2 + $0x604] sm:$0xf]  ;;  %v7786_v31 = vor.u32 %v9297_v53, %v7783_v18  ;;  %2721 = vmatpush.bf16.msrb.mxu3 %v7242_v10  ;;  %v11081_v18 = vpack.c.bf16 %v10728_v20, %v10706_v38  ;;  %v7725_v53 = vld [vmem:[#allocation2 + $0x3c8] sm:$0xf] }
 0x2d2   :  { %v8007_v6 = vld [vmem:[#allocation2 + $0x620] sm:$0xf0]  ;;  %v9286_v41 = vld [vmem:[#allocation2 + $0x3e4] sm:$0xf0] }
 0x2d3   :  { %v9225_v46 = vld [vmem:[#allocation2 + $0x204] sm:$0xf]  ;;  %v8010_v52 = vor.u32 %v9353_v40, %v8007_v6  ;;  %2778 = vmatpush.bf16.msra.mxu1 %v7786_v31  ;;  %v8238_v40 = vor.u32 %v9414_v54, %v8237_v35  ;;  %v7726_v6 = vor.u32 %v9286_v41, %v7725_v53  ;;  %v7437_v10 = vld [vmem:[#allocation2 + $0x188] sm:$0xf]  ;;  %v11097_v35 = vpack.c.bf16 %v10596_v62, %v10551_v34 }
 0x2d4   :  { %v7495_v5 = vld [vmem:[#allocation2 + $0x220] sm:$0xf0]  ;;  %2674 = vmatmul.bf16.gmra.mxu1 %v11081_v18  ;;  %v9214_v31 = vld [vmem:[#allocation2 + $0x1a4] sm:$0xf0]  ;;  %v11105_v54 = vpack.c.bf16 %v10711_v58, %v10689_v23 }
 0x2d5   :  { %v9289_v33 = vld [vmem:[#allocation2 + $0x404] sm:$0xf]  ;;  %v7498_v8 = vor.u32 %v9225_v46, %v7495_v5  ;;  %2808 = vmatpush.bf16.msra.mxu2 %v8010_v52  ;;  %v7981_v46 = vld [vmem:[#allocation2 + $0x5c8] sm:$0xf]  ;;  %2830 = vmatpush.bf16.msra.mxu3 %v7470_v28  ;;  %v7438_v5 = vor.u32 %v9214_v31, %v7437_v10  ;;  %v11101_v28 = vpack.c.bf16 %v10776_v14, %v10753_v45 }
 0x2d6   :  { %v7751_v22 = vld [vmem:[#allocation2 + $0x420] sm:$0xf0]  ;;  %v9350_v52 = vld [vmem:[#allocation2 + $0x5e4] sm:$0xf0] }
 0x2d7   :  { %v7754_v63 = vor.u32 %v9289_v33, %v7751_v22  ;;  %2750 = vmatpush.bf16.msra.mxu0 %v7498_v8  ;;  %v8205_v33 = vld [vmem:[#allocation2 + $0x788] sm:$0xf]  ;;  %v7982_v8 = vor.u32 %v9350_v52, %v7981_v46 }
 0x2d8   :  { %v9406_v22 = vld [vmem:[#allocation2 + $0x7a4] sm:$0xf0] }
 0x2d9   :  { %2779 = vmatpush.bf16.msra.mxu1 %v7754_v63  ;;  %2917 = vmatpush.bf16.msrb.mxu2 %v8238_v40  ;;  %v8206_v63 = vor.u32 %v9406_v22, %v8205_v33  ;;  %v7405_v32 = vld [vmem:[#allocation2 + $0x148] sm:$0xf] }
 0x2da   :  { %2831 = vmatpush.bf16.msra.mxu3 %v7438_v5  ;;  %v9206_v60 = vld [vmem:[#allocation2 + $0x164] sm:$0xf0] }
 0x2db   :  { %2859 = vmatpush.bf16.msrb.mxu0 %v7726_v6  ;;  %2621 = vmatmul.bf16.gmra.mxu3 %v11093_v25  ;;  %v7949_v53 = vld [vmem:[#allocation2 + $0x588] sm:$0xf]  ;;  %v7406_v41 = vor.u32 %v9206_v60, %v7405_v32 }
 0x2dc   :  { %2650 = vmatmul.bf16.gmra.mxu0 %v11097_v35  ;;  %v9342_v40 = vld [vmem:[#allocation2 + $0x5a4] sm:$0xf0] }
 0x2dd   :  { %2888 = vmatpush.bf16.msrb.mxu1 %v7982_v8  ;;  %2918 = vmatpush.bf16.msrb.mxu2 %v8206_v63  ;;  %v8173_v6 = vld [vmem:[#allocation2 + $0x748] sm:$0xf]  ;;  %v7950_v31 = vor.u32 %v9342_v40, %v7949_v53 }
 0x2de   :  { %2708 = vmatmul.bf16.gmra.mxu2 %v11105_v54  ;;  %v9398_v10 = vld [vmem:[#allocation2 + $0x764] sm:$0xf0]  ;;  %2832 = vmatpush.bf16.msra.mxu3 %v7406_v41 }
 0x2df   :  { %2860 = vmatpush.bf16.msrb.mxu0 %v7694_v50  ;;  %v8174_v46 = vor.u32 %v9398_v10, %v8173_v6  ;;  %v7661_v5 = vld [vmem:[#allocation2 + $0x348] sm:$0xf] }
 0x2e0   :  { %v9270_v52 = vld [vmem:[#allocation2 + $0x364] sm:$0xf0] }
 0x2e1   :  { %v7373_v33 = vld [vmem:[#allocation2 + $0x108] sm:$0xf]  ;;  %v7662_v22 = vor.u32 %v9270_v52, %v7661_v5  ;;  %2889 = vmatpush.bf16.msrb.mxu1 %v7950_v31  ;;  %2919 = vmatpush.bf16.msrb.mxu2 %v8174_v46 }
 0x2e2   :  { %v9198_v8 = vld [vmem:[#allocation2 + $0x124] sm:$0xf0] }
 0x2e3   :  { %v7917_v63 = vld [vmem:[#allocation2 + $0x548] sm:$0xf]  ;;  %v7374_v58 = vor.u32 %v9198_v8, %v7373_v33  ;;  %2861 = vmatpush.bf16.msrb.mxu0 %v7662_v22 }
 0x2e4   :  { %2679 = vmatmul.bf16.gmra.mxu1 %v11101_v28  ;;  %v9334_v50 = vld [vmem:[#allocation2 + $0x564] sm:$0xf0] }
 0x2e5   :  { %v7918_v23 = vor.u32 %v9334_v50, %v7917_v63  ;;  %v8141_v14 = vld [vmem:[#allocation2 + $0x708] sm:$0xf]  ;;  %2833 = vmatpush.bf16.msra.mxu3 %v7374_v58 }
 0x2e6   :  { %v9390_v45 = vld [vmem:[#allocation2 + $0x724] sm:$0xf0] }
 0x2e7   :  { %v7629_v32 = vld [vmem:[#allocation2 + $0x308] sm:$0xf]  ;;  %v8142_v60 = vor.u32 %v9390_v45, %v8141_v14  ;;  %2890 = vmatpush.bf16.msrb.mxu1 %v7918_v23 }
 0x2e8   :  { %v9262_v62 = vld [vmem:[#allocation2 + $0x324] sm:$0xf0] }
 0x2e9   :  { %v7630_v53 = vor.u32 %v9262_v62, %v7629_v32  ;;  %2920 = vmatpush.bf16.msrb.mxu2 %v8142_v60  ;;  %v7341_v41 = vld [vmem:[#allocation2 + $0xc8] sm:$0xf] }
 0x2ea   :  { %v9190_v40 = vld [vmem:[#allocation2 + $0xe4] sm:$0xf0] }
 0x2eb   :  { %2862 = vmatpush.bf16.msrb.mxu0 %v7630_v53  ;;  %2722 = vmatmul.bf16.vlgmr.msrb.gmra.mxu3 %v11033_v51  ;;  %v7885_v6 = vld [vmem:[#allocation2 + $0x508] sm:$0xf]  ;;  %v7342_v10 = vor.u32 %v9190_v40, %v7341_v41 }
 0x2ec   :  { %2751 = vmatmul.bf16.vlgmr.msra.gmra.mxu0 %v11037_v39  ;;  %v9326_v31 = vld [vmem:[#allocation2 + $0x524] sm:$0xf0] }
 0x2ed   :  { %v8109_v45 = vld [vmem:[#allocation2 + $0x6c8] sm:$0xf]  ;;  %v7886_v62 = vor.u32 %v9326_v31, %v7885_v6  ;;  %2834 = vmatpush.bf16.msra.mxu3 %v7342_v10 }
 0x2ee   :  { %2809 = vmatmul.bf16.vlgmr.msra.gmra.mxu2 %v11045_v43  ;;  %v9382_v14 = vld [vmem:[#allocation2 + $0x6e4] sm:$0xf0] }
 0x2ef   :  { %v8110_v58 = vor.u32 %v9382_v14, %v8109_v45  ;;  %v7597_v23 = vld [vmem:[#allocation2 + $0x2c8] sm:$0xf]  ;;  %2891 = vmatpush.bf16.msrb.mxu1 %v7886_v62 }
 0x2f0   :  { %v9254_v46 = vld [vmem:[#allocation2 + $0x2e4] sm:$0xf0] }
 0x2f1   :  { %v7309_v5 = vld [vmem:[#allocation2 + $0x88] sm:$0xf]  ;;  %v7598_v52 = vor.u32 %v9254_v46, %v7597_v23  ;;  %2921 = vmatpush.bf16.msrb.mxu2 %v8110_v58 }
 0x2f2   :  { %v9182_v33 = vld [vmem:[#allocation2 + $0xa4] sm:$0xf0] }
 0x2f3   :  { %v7853_v22 = vld [vmem:[#allocation2 + $0x4c8] sm:$0xf]  ;;  %v7310_v63 = vor.u32 %v9182_v33, %v7309_v5  ;;  %2863 = vmatpush.bf16.msrb.mxu0 %v7598_v52 }
 0x2f4   :  { %2780 = vmatmul.bf16.vlgmr.msra.gmra.mxu1 %v11041_v44  ;;  %v9318_v8 = vld [vmem:[#allocation2 + $0x4e4] sm:$0xf0] }
 0x2f5   :  { %v7854_v50 = vor.u32 %v9318_v8, %v7853_v22  ;;  %v8077_v32 = vld [vmem:[#allocation2 + $0x688] sm:$0xf]  ;;  %2835 = vmatpush.bf16.msra.mxu3 %v7310_v63 }
 0x2f6   :  { %v9374_v60 = vld [vmem:[#allocation2 + $0x6a4] sm:$0xf0] }
 0x2f7   :  { %v7565_v53 = vld [vmem:[#allocation2 + $0x288] sm:$0xf]  ;;  %v8078_v41 = vor.u32 %v9374_v60, %v8077_v32  ;;  %2892 = vmatpush.bf16.msrb.mxu1 %v7854_v50 }
 0x2f8   :  { %v9246_v40 = vld [vmem:[#allocation2 + $0x2a4] sm:$0xf0] }
 0x2f9   :  { %v7566_v6 = vor.u32 %v9246_v40, %v7565_v53  ;;  %2922 = vmatpush.bf16.msrb.mxu2 %v8078_v41  ;;  %v7277_v10 = vld [vmem:[#allocation2 + $0x48] sm:$0xf] }
 0x2fa   :  { %v9174_v31 = vld [vmem:[#allocation2 + $0x64] sm:$0xf0] }
 0x2fb   :  { %2864 = vmatpush.bf16.msrb.mxu0 %v7566_v6  ;;  %2727 = vmatmul.bf16.gmra.mxu3 %v11053_v24  ;;  %v7821_v45 = vld [vmem:[#allocation2 + $0x488] sm:$0xf]  ;;  %v7278_v14 = vor.u32 %v9174_v31, %v7277_v10 }
 0x2fc   :  { %2756 = vmatmul.bf16.gmra.mxu0 %v11057_v36  ;;  %v9310_v62 = vld [vmem:[#allocation2 + $0x4a4] sm:$0xf0] }
 0x2fd   :  { %v8045_v58 = vld [vmem:[#allocation2 + $0x648] sm:$0xf]  ;;  %v7822_v46 = vor.u32 %v9310_v62, %v7821_v45  ;;  %2836 = vmatpush.bf16.msra.mxu3 %v7278_v14 }
 0x2fe   :  { %2814 = vmatmul.bf16.gmra.mxu2 %v11065_v57  ;;  %v9366_v23 = vld [vmem:[#allocation2 + $0x664] sm:$0xf0] }
 0x2ff   :  { %v8046_v5 = vor.u32 %v9366_v23, %v8045_v58  ;;  %v7533_v52 = vld [vmem:[#allocation2 + $0x248] sm:$0xf]  ;;  %2893 = vmatpush.bf16.msrb.mxu1 %v7822_v46  ;;  %v9218_v23 = vld [vmem:[#allocation2 + $0x1cc] sm:$0xf] }
 0x300   :  { %v9238_v33 = vld [vmem:[#allocation2 + $0x264] sm:$0xf0]  ;;  %v7471_v46 = vld [vmem:[#allocation2 + $0x1e8] sm:$0xf0] }
 0x301   :  { %v7245_v22 = vld [vmem:[#allocation2 + $0x8] sm:$0xf]  ;;  %v7534_v8 = vor.u32 %v9238_v33, %v7533_v52  ;;  %2923 = vmatpush.bf16.msrb.mxu2 %v8046_v5  ;;  %v7474_v5 = vor.u32 %v9218_v23, %v7471_v46  ;;  %v8207_v23 = vld [vmem:[#allocation2 + $0x7a8] sm:$0xf0] }
 0x302   :  { %v9166_v63 = vld [vmem:[#allocation2 + $0x24] sm:$0xf0]  ;;  %v9274_v46 = vld [vmem:[#allocation2 + $0x38c] sm:$0xf] }
 0x303   :  { %v7789_v50 = vld [vmem:[#allocation2 + $0x448] sm:$0xf]  ;;  %v7246_v60 = vor.u32 %v9166_v63, %v7245_v22  ;;  %2865 = vmatpush.bf16.msrb.mxu0 %v7534_v8  ;;  %v9410_v22 = vld [vmem:[#allocation2 + $0x7cc] sm:$0xf] }
 0x304   :  { %2785 = vmatmul.bf16.gmra.mxu1 %v11061_v42  ;;  %v9302_v32 = vld [vmem:[#allocation2 + $0x464] sm:$0xf0]  ;;  %v8239_v8 = vld [vmem:[#allocation2 + $0x7e8] sm:$0xf0] }
 0x305   :  { %v7790_v53 = vor.u32 %v9302_v32, %v7789_v50  ;;  %v8013_v41 = vld [vmem:[#allocation2 + $0x608] sm:$0xf]  ;;  %2837 = vmatpush.bf16.msra.mxu3 %v7246_v60  ;;  %v9282_v63 = vld [vmem:[#allocation2 + $0x3cc] sm:$0xf]  ;;  %v8242_v50 = vor.u32 %v9410_v22, %v8239_v8 }
 0x306   :  { %v9358_v40 = vld [vmem:[#allocation2 + $0x624] sm:$0xf0]  ;;  %v7727_v32 = vld [vmem:[#allocation2 + $0x3e8] sm:$0xf0] }
 0x307   :  { %v8014_v6 = vor.u32 %v9358_v40, %v8013_v41  ;;  %2894 = vmatpush.bf16.msrb.mxu1 %v7790_v53  ;;  %v7501_v10 = vld [vmem:[#allocation2 + $0x208] sm:$0xf]  ;;  %v9346_v60 = vld [vmem:[#allocation2 + $0x5cc] sm:$0xf]  ;;  %v7730_v41 = vor.u32 %v9282_v63, %v7727_v32 }
 0x308   :  { %v9230_v31 = vld [vmem:[#allocation2 + $0x224] sm:$0xf0]  ;;  %v7983_v53 = vld [vmem:[#allocation2 + $0x5e8] sm:$0xf0] }
 0x309   :  { %2924 = vmatpush.bf16.msrb.mxu2 %v8014_v6  ;;  %v7757_v45 = vld [vmem:[#allocation2 + $0x408] sm:$0xf]  ;;  %v7502_v62 = vor.u32 %v9230_v31, %v7501_v10  ;;  %2946 = vmatpush.bf16.msrb.mxu3 %v7474_v5  ;;  %v7986_v40 = vor.u32 %v9346_v60, %v7983_v53  ;;  %v9210_v31 = vld [vmem:[#allocation2 + $0x18c] sm:$0xf] }
 0x30a   :  { %v9294_v14 = vld [vmem:[#allocation2 + $0x424] sm:$0xf0]  ;;  %v7695_v5 = vld [vmem:[#allocation2 + $0x3a8] sm:$0xf0] }
 0x30b   :  { %v7758_v58 = vor.u32 %v9294_v14, %v7757_v45  ;;  %2866 = vmatpush.bf16.msrb.mxu0 %v7502_v62  ;;  %2732 = vmatmul.bf16.gmra.mxu3 %v11073_v2  ;;  %v7439_v45 = vld [vmem:[#allocation2 + $0x1a8] sm:$0xf0]  ;;  %v7698_v29 = vor.u32 %v9274_v46, %v7695_v5 }
 0x30c   :  { %2761 = vmatmul.bf16.gmra.mxu0 %v11077_v37  ;;  %v9402_v62 = vld [vmem:[#allocation2 + $0x78c] sm:$0xf] }
 0x30d   :  { %2895 = vmatpush.bf16.msrb.mxu1 %v7758_v58  ;;  %3033 = vmatpush.bf16.msra.mxu2 %v8242_v50  ;;  %v7442_v58 = vor.u32 %v9210_v31, %v7439_v45  ;;  %v8210_v48 = vor.u32 %v9402_v62, %v8207_v23  ;;  %v9338_v63 = vld [vmem:[#allocation2 + $0x58c] sm:$0xf] }
 0x30e   :  { %2819 = vmatmul.bf16.gmra.mxu2 %v11085_v47  ;;  %v7951_v32 = vld [vmem:[#allocation2 + $0x5a8] sm:$0xf0] }
 0x30f   :  { %2975 = vmatpush.bf16.msra.mxu0 %v7730_v41  ;;  %2947 = vmatpush.bf16.msrb.mxu3 %v7442_v58  ;;  %v7954_v50 = vor.u32 %v9338_v63, %v7951_v32  ;;  %v9202_v60 = vld [vmem:[#allocation2 + $0x14c] sm:$0xf] }
 0x310   :  { %v7407_v53 = vld [vmem:[#allocation2 + $0x168] sm:$0xf0] }
 0x311   :  { %3004 = vmatpush.bf16.msra.mxu1 %v7986_v40  ;;  %3034 = vmatpush.bf16.msra.mxu2 %v8210_v48  ;;  %v9394_v41 = vld [vmem:[#allocation2 + $0x74c] sm:$0xf]  ;;  %v7410_v40 = vor.u32 %v9202_v60, %v7407_v53 }
 0x312   :  { %v9266_v31 = vld [vmem:[#allocation2 + $0x34c] sm:$0xf] }
 0x313   :  { %2976 = vmatpush.bf16.msra.mxu0 %v7698_v29  ;;  %v7663_v45 = vld [vmem:[#allocation2 + $0x368] sm:$0xf0]  ;;  %2948 = vmatpush.bf16.msrb.mxu3 %v7410_v40 }
 0x314   :  { %2790 = vmatmul.bf16.gmra.mxu1 %v11081_v18  ;;  %v7666_v62 = vor.u32 %v9266_v31, %v7663_v45  ;;  %v9330_v23 = vld [vmem:[#allocation2 + $0x54c] sm:$0xf] }
 0x315   :  { %3005 = vmatpush.bf16.msra.mxu1 %v7954_v50  ;;  %v7919_v46 = vld [vmem:[#allocation2 + $0x568] sm:$0xf0] }
 0x316   :  { %v7922_v58 = vor.u32 %v9330_v23, %v7919_v46  ;;  %v9194_v29 = vld [vmem:[#allocation2 + $0x10c] sm:$0xf] }
 0x317   :  { %2977 = vmatpush.bf16.msra.mxu0 %v7666_v62  ;;  %v9386_v50 = vld [vmem:[#allocation2 + $0x70c] sm:$0xf] }
 0x318   :  { %v8143_v60 = vld [vmem:[#allocation2 + $0x728] sm:$0xf0] }
 0x319   :  { %3006 = vmatpush.bf16.msra.mxu1 %v7922_v58  ;;  %v9258_v53 = vld [vmem:[#allocation2 + $0x30c] sm:$0xf] }
 0x31a   :  { %v7631_v31 = vld [vmem:[#allocation2 + $0x328] sm:$0xf0] }
 0x31b   :  { %2737 = vmatmul.bf16.gmra.mxu3 %v11093_v25  ;;  %v9322_v40 = vld [vmem:[#allocation2 + $0x50c] sm:$0xf] }
 0x31c   :  { %2766 = vmatmul.bf16.gmra.mxu0 %v11097_v35  ;;  %v7887_v45 = vld [vmem:[#allocation2 + $0x528] sm:$0xf0] }
 0x31d   :  { %v9186_v62 = vld [vmem:[#allocation2 + $0xcc] sm:$0xf] }
 0x31e   :  { %2824 = vmatmul.bf16.gmra.mxu2 %v11105_v54  ;;  %v7343_v23 = vld [vmem:[#allocation2 + $0xe8] sm:$0xf0] }
 0x31f   :  { %v9378_v46 = vld [vmem:[#allocation2 + $0x6cc] sm:$0xf] }
 0x320   :  { %v9250_v58 = vld [vmem:[#allocation2 + $0x2cc] sm:$0xf] }
 0x324   :  { %2795 = vmatmul.bf16.gmra.mxu1 %v11101_v28 }
 0x326   :  { %v2636_v52 = vpop.f32.mrf.mxu0 }
 0x328   :  { %v2665_v33 = vpop.f32.mrf.mxu1 }
 0x32a   :  { %v2607_v6 = vpop.f32.mrf.mxu3 }
 0x32b   :  { %2838 = vmatmul.bf16.vlgmr.msra.gmra.mxu3 %v11033_v51  ;;  %v2637_v10 = vadd.f32 %v2636_v52, %v2607_v6  ;;  %v8175_v6 = vld [vmem:[#allocation2 + $0x768] sm:$0xf0] }
 0x32c   :  { %2867 = vmatmul.bf16.vlgmr.msrb.gmra.mxu0 %v11037_v39 }
 0x32d   :  { %v2666_v22 = vadd.f32 %v2665_v33, %v2637_v10  ;;  %v8178_v10 = vor.u32 %v9394_v41, %v8175_v6  ;;  %v8146_v6 = vor.u32 %v9386_v50, %v8143_v60 }
 0x32e   :  { %2925 = vmatmul.bf16.vlgmr.msrb.gmra.mxu2 %v11045_v43  ;;  %v2638_v8 = vpop.f32.mrf.mxu0 }
 0x32f   :  { %3035 = vmatpush.bf16.msra.mxu2 %v8178_v10 }
 0x330   :  { %v2694_v14 = vpop.f32.mrf.mxu2  ;;  %v2667_v34 = vpop.f32.mrf.mxu1 }
 0x331   :  { %v2695_v52 = vadd.f32 %v2694_v14, %v2666_v22  ;;  %v7375_v22 = vld [vmem:[#allocation2 + $0x128] sm:$0xf0] }
 0x332   :  { %v2609_v5 = vpop.f32.mrf.mxu3  ;;  %v7378_v32 = vor.u32 %v9194_v29, %v7375_v22 }
 0x333   :  { %v3526_v33 = vadd.f32 %v2695_v52, %v10599_v0  ;;  %v2639_v48 = vadd.f32 %v2638_v8, %v2609_v5  ;;  %v7634_v8 = vor.u32 %v9258_v53, %v7631_v31  ;;  %3036 = vmatpush.bf16.msra.mxu2 %v8146_v6  ;;  %v8111_v5 = vld [vmem:[#allocation2 + $0x6e8] sm:$0xf0] }
 0x334   :  { %2896 = vmatmul.bf16.vlgmr.msrb.gmra.mxu1 %v11041_v44  ;;  %2949 = vmatpush.bf16.msrb.mxu3 %v7378_v32  ;;  %v8114_v29 = vor.u32 %v9378_v46, %v8111_v5  ;;  %v7855_v32 = vld [vmem:[#allocation2 + $0x4e8] sm:$0xf0] }
 0x335   :  { %v8259_v14 = vmul.f32 -1.442695, %v3526_v33  ;;  %v2668_v0 = vadd.f32 %v2667_v34, %v2639_v48  ;;  %v7890_v33 = vor.u32 %v9322_v40, %v7887_v45  ;;  %v7346_v34 = vor.u32 %v9186_v62, %v7343_v23  ;;  %2978 = vmatpush.bf16.msra.mxu0 %v7634_v8  ;;  %v9178_v31 = vld [vmem:[#allocation2 + $0x8c] sm:$0xf] }
 0x336   :  { %v2641_v52 = vpop.f32.mrf.mxu0  ;;  %v7311_v40 = vld [vmem:[#allocation2 + $0xa8] sm:$0xf0] }
 0x337   :  { %9636 = vpow2.f32 %v8259_v14  ;;  %v7599_v14 = vld [vmem:[#allocation2 + $0x2e8] sm:$0xf0]  ;;  %3007 = vmatpush.bf16.msra.mxu1 %v7890_v33  ;;  %3037 = vmatpush.bf16.msra.mxu2 %v8114_v29 }
 0x338   :  { %v2696_v63 = vpop.f32.mrf.mxu2  ;;  %v7602_v22 = vor.u32 %v9250_v58, %v7599_v14  ;;  %2950 = vmatpush.bf16.msrb.mxu3 %v7346_v34  ;;  %v9370_v62 = vld [vmem:[#allocation2 + $0x68c] sm:$0xf] }
 0x339   :  { %v2670_v41 = vpop.f32.mrf.mxu1  ;;  %v2697_v10 = vadd.f32 %v2696_v63, %v2668_v0  ;;  %v9314_v63 = vld [vmem:[#allocation2 + $0x4cc] sm:$0xf] }
 0x33a   :  { %v2612_v50 = vpop.f32.mrf.mxu3  ;;  %v7858_v60 = vor.u32 %v9314_v63, %v7855_v32  ;;  %v8079_v8 = vld [vmem:[#allocation2 + $0x6a8] sm:$0xf0]  ;;  %2979 = vmatpush.bf16.msra.mxu0 %v7602_v22 }
 0x33b   :  { %2843 = vmatmul.bf16.gmra.mxu3 %v11053_v24  ;;  %v3534_v48 = vadd.f32 %v2697_v10, %v10621_v16  ;;  %v2642_v6 = vadd.f32 %v2641_v52, %v2612_v50  ;;  %v7314_v10 = vor.u32 %v9178_v31, %v7311_v40  ;;  %v8082_v34 = vor.u32 %v9370_v62, %v8079_v8  ;;  %v9242_v33 = vld [vmem:[#allocation2 + $0x28c] sm:$0xf] }
 0x33c   :  { %2872 = vmatmul.bf16.gmra.mxu0 %v11057_v36  ;;  %v7567_v58 = vld [vmem:[#allocation2 + $0x2a8] sm:$0xf0]  ;;  %3008 = vmatpush.bf16.msra.mxu1 %v7858_v60 }
 0x33d   :  { %v9637_v53 = vpop.eup %9636  ;;  %v8263_v0 = vmul.f32 -1.442695, %v3534_v48  ;;  %v2671_v23 = vadd.f32 %v2670_v41, %v2642_v6  ;;  %v9306_v14 = vld [vmem:[#allocation2 + $0x48c] sm:$0xf]  ;;  %2951 = vmatpush.bf16.msrb.mxu3 %v7314_v10  ;;  %3038 = vmatpush.bf16.msra.mxu2 %v8082_v34  ;;  %v7570_v29 = vor.u32 %v9242_v33, %v7567_v58 }
 0x33e   :  { %2930 = vmatmul.bf16.gmra.mxu2 %v11065_v57  ;;  %v11137_v45 = vadd.f32 1.0, %v9637_v53  ;;  %v2643_v46 = vpop.f32.mrf.mxu0  ;;  %v7823_v52 = vld [vmem:[#allocation2 + $0x4a8] sm:$0xf0] }
 0x33f   :  { %9638 = vpow2.f32 %v8263_v0  ;;  %v9170_v63 = vld [vmem:[#allocation2 + $0x4c] sm:$0xf]  ;;  %v7826_v50 = vor.u32 %v9306_v14, %v7823_v52  ;;  %2980 = vmatpush.bf16.msra.mxu0 %v7570_v29 }
 0x340   :  { %v2699_v16 = vpop.f32.mrf.mxu2  ;;  %9640 = vrcp.f32 %v11137_v45  ;;  %v7279_v32 = vld [vmem:[#allocation2 + $0x68] sm:$0xf0]  ;;  %vm3723_vm3 = vweird.f32 %v11137_v45 }
 0x341   :  { %v2672_v5 = vpop.f32.mrf.mxu1  ;;  %v2700_v48 = vadd.f32 %v2699_v16, %v2671_v23  ;;  %v7282_v53 = vor.u32 %v9170_v63, %v7279_v32  ;;  %v9362_v41 = vld [vmem:[#allocation2 + $0x64c] sm:$0xf]  ;;  %3009 = vmatpush.bf16.msra.mxu1 %v7826_v50 }
 0x342   :  { %v8047_v0 = vld [vmem:[#allocation2 + $0x668] sm:$0xf0]  ;;  %v2614_v8 = vpop.f32.mrf.mxu3 }
 0x343   :  { %v3542_v22 = vadd.f32 %v2700_v48, %v10643_v30  ;;  %v8050_v6 = vor.u32 %v9362_v41, %v8047_v0  ;;  %v9234_v31 = vld [vmem:[#allocation2 + $0x24c] sm:$0xf]  ;;  %2952 = vmatpush.bf16.msrb.mxu3 %v7282_v53  ;;  %v2644_v34 = vadd.f32 %v2643_v46, %v2614_v8 }
 0x344   :  { %2901 = vmatmul.bf16.gmra.mxu1 %v11061_v42  ;;  %v7535_v40 = vld [vmem:[#allocation2 + $0x268] sm:$0xf0] }
 0x345   :  { %v9298_v62 = vld [vmem:[#allocation2 + $0x44c] sm:$0xf]  ;;  %v7538_v60 = vor.u32 %v9234_v31, %v7535_v40  ;;  %v9639_v10 = vpop.eup %9638  ;;  %v8267_v23 = vmul.f32 -1.442695, %v3542_v22  ;;  %3039 = vmatpush.bf16.msra.mxu2 %v8050_v6  ;;  %v2673_v63 = vadd.f32 %v2672_v5, %v2644_v34  ;;  %v3729_v5 = vand.u32 2147483648, %v11137_v45 }
 0x346   :  { %v7791_v16 = vld [vmem:[#allocation2 + $0x468] sm:$0xf0]  ;;  %v9641_v58 = vpop.eup %9640  ;;  %v11141_v14 = vadd.f32 1.0, %v9639_v10 }
 0x347   :  { %v7794_v33 = vor.u32 %v9298_v62, %v7791_v16  ;;  %v9162_v30 = vld [vmem:[#allocation2 + $0xc] sm:$0xf]  ;;  %v3719_v29 = vmul.f32 %v9641_v58, %v11137_v45  ;;  %9642 = vpow2.f32 %v8267_v23  ;;  %2981 = vmatpush.bf16.msra.mxu0 %v7538_v60  ;;  %vm3724_vm2 = vweird.f32 %v9641_v58 }
 0x348   :  { %v2701_v52 = vpop.f32.mrf.mxu2  ;;  %v7247_v48 = vld [vmem:[#allocation2 + $0x28] sm:$0xf0]  ;;  %v2646_v32 = vpop.f32.mrf.mxu0  ;;  %9644 = vrcp.f32 %v11141_v14  ;;  %v3727_v23 = vand.u32 2147483647, %v11137_v45  ;;  %vm3725_vm4 = vmor %vm3723_vm3, %vm3724_vm2  ;;  %vm3783_vm7 = vweird.f32 %v11141_v14 }
 0x349   :  { %v9354_v50 = vld [vmem:[#allocation2 + $0x60c] sm:$0xf]  ;;  %3010 = vmatpush.bf16.msra.mxu1 %v7794_v33  ;;  %v3720_v22 = vsub.f32 1.0, %v3719_v29  ;;  %v2702_v6 = vadd.f32 %v2701_v52, %v2673_v63  ;;  %v7250_v31 = vor.u32 %v9162_v30, %v7247_v48 }
 0x34a   :  { %v8015_v41 = vld [vmem:[#allocation2 + $0x628] sm:$0xf0]  ;;  %vm3728_vm5 = vcmp.eq.f32.partialorder %v3727_v23, 8.507059e+37 }
 0x34b   :  { %v9226_v0 = vld [vmem:[#allocation2 + $0x20c] sm:$0xf]  ;;  %2848 = vmatmul.bf16.gmra.mxu3 %v11073_v2  ;;  %v8018_v40 = vor.u32 %v9354_v50, %v8015_v41  ;;  %v3721_v10 = vmul.f32 %v9641_v58, %v3720_v22  ;;  %v3550_v34 = vadd.f32 %v2702_v6, %v10665_v56  ;;  %v3730_v50 = vor.u32 1.1754944e-38, %v3729_v5 }
 0x34c   :  { %v7503_v46 = vld [vmem:[#allocation2 + $0x228] sm:$0xf0]  ;;  %2877 = vmatmul.bf16.gmra.mxu0 %v11077_v37  ;;  %2953 = vmatpush.bf16.msrb.mxu3 %v7250_v31 }
 0x34d   :  { %v9290_v62 = vld [vmem:[#allocation2 + $0x40c] sm:$0xf]  ;;  %v7506_v60 = vor.u32 %v9226_v0, %v7503_v46  ;;  %v2617_v33 = vpop.f32.mrf.mxu3  ;;  %3040 = vmatpush.bf16.msra.mxu2 %v8018_v40  ;;  %v9643_v52 = vpop.eup %9642  ;;  %v3722_v30 = vadd.f32 %v9641_v58, %v3721_v10  ;;  %v8271_v48 = vmul.f32 -1.442695, %v3550_v34 }
 0x34e   :  { %v7759_v8 = vld [vmem:[#allocation2 + $0x428] sm:$0xf0]  ;;  %2935 = vmatmul.bf16.gmra.mxu2 %v11085_v47  ;;  %v2647_v29 = vadd.f32 %v2646_v32, %v2617_v33  ;;  %v9645_v63 = vpop.eup %9644  ;;  %v3694_v41 = vadd.f32 1.0, %v9643_v52  ;;  %v3789_v32 = vand.u32 2147483648, %v11141_v14 }
 0x34f   :  { %v7762_v16 = vor.u32 %v9290_v62, %v7759_v8  ;;  %2982 = vmatpush.bf16.msra.mxu0 %v7506_v60  ;;  %v3726_v56 = vsel %vm3725_vm4, %v9641_v58, %v3722_v30  ;;  %v3779_v46 = vmul.f32 %v9645_v63, %v11141_v14  ;;  %9646 = vpow2.f32 %v8271_v48 }
 0x350   :  { %v2648_v22 = vpop.f32.mrf.mxu0  ;;  %v11155_v31 = vsel %vm3728_vm5, %v3730_v50, %v3726_v56  ;;  %9648 = vrcp.f32 %v3694_v41  ;;  %vm3784_vm6 = vweird.f32 %v9645_v63  ;;  %v3787_v8 = vand.u32 2147483647, %v11141_v14 }
 0x351   :  { %v2675_v53 = vpop.f32.mrf.mxu1  ;;  %3011 = vmatpush.bf16.msra.mxu1 %v7762_v16  ;;  %v2704_v0 = vpop.f32.mrf.mxu2  ;;  %12705 = vst [vmem:[#allocation145_spill] sm:$0xff] %v11155_v31  ;;  %v3780_v45 = vsub.f32 1.0, %v3779_v46  ;;  %vm3785_vm8 = vmor %vm3783_vm7, %vm3784_vm6  ;;  %v3790_v33 = vor.u32 1.1754944e-38, %v3789_v32  ;;  %vm3843_vm11 = vweird.f32 %v3694_v41  ;;  %v8213_v31 = vld [vmem:[#allocation2 + $0x790] sm:$0xf] }
 0x352   :  { %v2676_v40 = vadd.f32 %v2675_v53, %v2647_v29  ;;  %vm3788_vm9 = vcmp.eq.f32.partialorder %v3787_v8, 8.507059e+37 }
 0x353   :  { %v3781_v62 = vmul.f32 %v9645_v63, %v3780_v45 }
 0x354   :  { %2906 = vmatmul.bf16.gmra.mxu1 %v11081_v18  ;;  %v2705_v5 = vadd.f32 %v2704_v0, %v2676_v40 }
 0x355   :  { %v2619_v60 = vpop.f32.mrf.mxu3  ;;  %v9647_v58 = vpop.eup %9646  ;;  %v3782_v16 = vadd.f32 %v9645_v63, %v3781_v62  ;;  %v12707_v62 = vld [vmem:[#allocation56_spill] sm:$0xff] }
 0x356   :  { %v3558_v10 = vadd.f32 %v2705_v5, %v10687_v17  ;;  %v2649_v23 = vadd.f32 %v2648_v22, %v2619_v60  ;;  %v9649_v34 = vpop.eup %9648  ;;  %v3698_v52 = vadd.f32 1.0, %v9647_v58  ;;  %v3849_v17 = vand.u32 2147483648, %v3694_v41 }
 0x357   :  { %v3786_v30 = vsel %vm3785_vm8, %v9645_v63, %v3782_v16  ;;  %v3839_v48 = vmul.f32 %v9649_v34, %v3694_v41  ;;  %vm3844_vm10 = vweird.f32 %v9649_v34  ;;  %v3847_v63 = vand.u32 2147483647, %v3694_v41 }
 0x358   :  { %v8275_v29 = vmul.f32 -1.442695, %v3558_v10  ;;  %v11161_v0 = vsel %vm3788_vm9, %v3790_v33, %v3786_v30  ;;  %9650 = vrcp.f32 %v3698_v52  ;;  %vm3845_vm12 = vmor %vm3843_vm11, %vm3844_vm10  ;;  %v3850_v60 = vor.u32 1.1754944e-38, %v3849_v17 }
 0x359   :  { %v2677_v6 = vpop.f32.mrf.mxu1  ;;  %v2706_v53 = vpop.f32.mrf.mxu2  ;;  %12706 = vst [vmem:[#allocation146_spill] sm:$0xff] %v11161_v0  ;;  %v3840_v46 = vsub.f32 1.0, %v3839_v48  ;;  %vm3848_vm13 = vcmp.eq.f32.partialorder %v3847_v63, 8.507059e+37  ;;  %v3907_v17 = vand.u32 2147483647, %v3698_v52  ;;  %vm3903_vm15 = vweird.f32 %v3698_v52 }
 0x35a   :  { %v2651_v50 = vpop.f32.mrf.mxu0  ;;  %9652 = vpow2.f32 %v8275_v29  ;;  %v2678_v14 = vadd.f32 %v2677_v6, %v2649_v23 }
 0x35b   :  { %2853 = vmatmul.bf16.gmra.mxu3 %v11093_v25  ;;  %v3841_v22 = vmul.f32 %v9649_v34, %v3840_v46  ;;  %vm3908_vm2 = vcmp.eq.f32.partialorder %v3907_v17, 8.507059e+37 }
 0x35c   :  { %2882 = vmatmul.bf16.gmra.mxu0 %v11097_v35  ;;  %v2707_v45 = vadd.f32 %v2706_v53, %v2678_v14  ;;  %v3909_v14 = vand.u32 2147483648, %v3698_v52 }
 0x35d   :  { %v3842_v32 = vadd.f32 %v9649_v34, %v3841_v22 }
 0x35e   :  { %2940 = vmatmul.bf16.gmra.mxu2 %v11105_v54  ;;  %v2622_v40 = vpop.f32.mrf.mxu3  ;;  %v3566_v8 = vadd.f32 %v2707_v45, %v12707_v62  ;;  %v9651_v6 = vpop.eup %9650  ;;  %v12709_v45 = vld [vmem:[#allocation60_spill] sm:$0xff]  ;;  %v3910_v62 = vor.u32 1.1754944e-38, %v3909_v14 }
 0x35f   :  { %v2652_v5 = vadd.f32 %v2651_v50, %v2622_v40  ;;  %v3846_v10 = vsel %vm3845_vm12, %v9649_v34, %v3842_v32  ;;  %v3899_v23 = vmul.f32 %v9651_v6, %v3698_v52  ;;  %vm3904_vm14 = vweird.f32 %v9651_v6 }
 0x360   :  { %v9653_v16 = vpop.eup %9652  ;;  %v8279_v33 = vmul.f32 -1.442695, %v3566_v8  ;;  %v11168_v53 = vsel %vm3848_vm13, %v3850_v60, %v3846_v10  ;;  %vm3905_vm0 = vmor %vm3903_vm15, %vm3904_vm14 }
 0x361   :  { %v2680_v56 = vpop.f32.mrf.mxu1  ;;  %v2709_v58 = vpop.f32.mrf.mxu2  ;;  %12708 = vst [vmem:[#allocation56_spill] sm:$0xff] %v11168_v53  ;;  %v11170_v29 = vadd.f32 1.0, %v9653_v16  ;;  %v3900_v41 = vsub.f32 1.0, %v3899_v23 }
 0x362   :  { %v2653_v30 = vpop.f32.mrf.mxu0  ;;  %v2681_v46 = vadd.f32 %v2680_v56, %v2652_v5  ;;  %9654 = vpow2.f32 %v8279_v33 }
 0x363   :  { %9656 = vrcp.f32 %v11170_v29  ;;  %v3901_v50 = vmul.f32 %v9651_v6, %v3900_v41  ;;  %vm3963_vm4 = vweird.f32 %v11170_v29 }
 0x364   :  { %2911 = vmatmul.bf16.gmra.mxu1 %v11101_v28  ;;  %v2710_v22 = vadd.f32 %v2709_v58, %v2681_v46  ;;  %v3969_v58 = vand.u32 2147483648, %v11170_v29  ;;  %v7477_v46 = vld [vmem:[#allocation2 + $0x1d0] sm:$0xf] }
 0x365   :  { %v3902_v63 = vadd.f32 %v9651_v6, %v3901_v50  ;;  %v8245_v50 = vld [vmem:[#allocation2 + $0x7d0] sm:$0xf] }
 0x366   :  { %v2624_v34 = vpop.f32.mrf.mxu3  ;;  %v3574_v40 = vadd.f32 %v2710_v22, %v12709_v45  ;;  %v12711_v22 = vld [vmem:[#allocation64_spill] sm:$0xff]  ;;  %v9415_v45 = vld [vmem:[#allocation2 + $0x7ec] sm:$0xf0] }
 0x367   :  { %v2654_v32 = vadd.f32 %v2653_v30, %v2624_v34  ;;  %v3906_v56 = vsel %vm3905_vm0, %v9651_v6, %v3902_v63  ;;  %v9223_v30 = vld [vmem:[#allocation2 + $0x1ec] sm:$0xf0] }
 0x368   :  { %v9655_v60 = vpop.eup %9654  ;;  %v8283_v5 = vmul.f32 -1.442695, %v3574_v40  ;;  %v11176_v41 = vsel %vm3908_vm2, %v3910_v62, %v3906_v56  ;;  %v7478_v63 = vor.u32 %v9223_v30, %v7477_v46  ;;  %v7733_v40 = vld [vmem:[#allocation2 + $0x3d0] sm:$0xf] }
 0x369   :  { %v2682_v48 = vpop.f32.mrf.mxu1  ;;  %v2711_v8 = vpop.f32.mrf.mxu2  ;;  %12710 = vst [vmem:[#allocation60_spill] sm:$0xff] %v11176_v41  ;;  %v11179_v52 = vadd.f32 1.0, %v9655_v60  ;;  %v9287_v60 = vld [vmem:[#allocation2 + $0x3ec] sm:$0xf0] }
 0x36a   :  { %v2683_v16 = vadd.f32 %v2682_v48, %v2654_v32  ;;  %v2752_v10 = vpop.f32.mrf.mxu0  ;;  %v11174_v33 = vpop.eup %9656  ;;  %9658 = vpow2.f32 %v8283_v5  ;;  %v3967_v48 = vand.u32 2147483647, %v11170_v29  ;;  %v3970_v32 = vor.u32 1.1754944e-38, %v3969_v58  ;;  %v7989_v56 = vld [vmem:[#allocation2 + $0x5d0] sm:$0xf]  ;;  %3062 = vmatpush.bf16.msra.mxu3 %v7478_v63 }
 0x36b   :  { %v3959_v14 = vmul.f32 %v11174_v33, %v11170_v29  ;;  %2954 = vmatmul.bf16.vlgmr.msrb.gmra.mxu3 %v11033_v51  ;;  %9660 = vrcp.f32 %v11179_v52  ;;  %vm3964_vm3 = vweird.f32 %v11174_v33  ;;  %v9351_v41 = vld [vmem:[#allocation2 + $0x5ec] sm:$0xf0]  ;;  %v4029_v29 = vand.u32 2147483648, %v11179_v52 }
 0x36c   :  { %v2712_v6 = vadd.f32 %v2711_v8, %v2683_v16  ;;  %2983 = vmatmul.bf16.vlgmr.msra.gmra.mxu0 %v11037_v39  ;;  %v8246_v8 = vor.u32 %v9415_v45, %v8245_v50  ;;  %v7445_v46 = vld [vmem:[#allocation2 + $0x190] sm:$0xf]  ;;  %vm3965_vm5 = vmor %vm3963_vm4, %vm3964_vm3  ;;  %vm3968_vm6 = vcmp.eq.f32.partialorder %v3967_v48, 8.507059e+37  ;;  %vm4023_vm9 = vweird.f32 %v11179_v52 }
 0x36d   :  { %v3960_v17 = vsub.f32 1.0, %v3959_v14  ;;  %v7734_v14 = vor.u32 %v9287_v60, %v7733_v40  ;;  %v9215_v30 = vld [vmem:[#allocation2 + $0x1ac] sm:$0xf0] }
 0x36e   :  { %v3582_v34 = vadd.f32 %v2712_v6, %v12711_v22  ;;  %3041 = vmatmul.bf16.vlgmr.msra.gmra.mxu2 %v11045_v43  ;;  %v2723_v62 = vpop.f32.mrf.mxu3  ;;  %v7990_v22 = vor.u32 %v9351_v41, %v7989_v56  ;;  %v7701_v63 = vld [vmem:[#allocation2 + $0x390] sm:$0xf]  ;;  %v4027_v41 = vand.u32 2147483647, %v11179_v52 }
 0x36f   :  { %v3961_v5 = vmul.f32 %v11174_v33, %v3960_v17  ;;  %v2753_v0 = vadd.f32 %v2752_v10, %v2723_v62  ;;  %3149 = vmatpush.bf16.msrb.mxu2 %v8246_v8  ;;  %3091 = vmatpush.bf16.msrb.mxu0 %v7734_v14  ;;  %v9407_v10 = vld [vmem:[#allocation2 + $0x7ac] sm:$0xf0] }
 0x370   :  { %v8287_v16 = vmul.f32 -1.442695, %v3582_v34  ;;  %v9659_v58 = vpop.eup %9658  ;;  %v7446_v34 = vor.u32 %v9215_v30, %v7445_v46  ;;  %v9279_v40 = vld [vmem:[#allocation2 + $0x3ac] sm:$0xf0]  ;;  %3120 = vmatpush.bf16.msrb.mxu1 %v7990_v22  ;;  %vm11212_vm8 = vcmp.eq.f32.partialorder %v4027_v41, 8.507059e+37 }
 0x371   :  { %v2781_v23 = vpop.f32.mrf.mxu1  ;;  %v2810_v6 = vpop.f32.mrf.mxu2  ;;  %v3962_v50 = vadd.f32 %v11174_v33, %v3961_v5  ;;  %v11201_v8 = vadd.f32 1.0, %v9659_v58  ;;  %v9343_v14 = vld [vmem:[#allocation2 + $0x5ac] sm:$0xf0]  ;;  %v12713_v58 = vld [vmem:[#allocation71_spill] sm:$0xff] }
 0x372   :  { %9662 = vpow2.f32 %v8287_v16  ;;  %v2782_v45 = vadd.f32 %v2781_v23, %v2753_v0  ;;  %v2754_v53 = vpop.f32.mrf.mxu0  ;;  %v11194_v62 = vpop.eup %9660  ;;  %v8214_v0 = vor.u32 %v9407_v10, %v8213_v31  ;;  %v7702_v23 = vor.u32 %v9279_v40, %v7701_v63  ;;  %3063 = vmatpush.bf16.msra.mxu3 %v7446_v34  ;;  %v7957_v16 = vld [vmem:[#allocation2 + $0x590] sm:$0xf] }
 0x373   :  { %v3966_v60 = vsel %vm3965_vm5, %v11174_v33, %v3962_v50  ;;  %v4019_v56 = vmul.f32 %v11194_v62, %v11179_v52  ;;  %9664 = vrcp.f32 %v11201_v8  ;;  %v7413_v30 = vld [vmem:[#allocation2 + $0x150] sm:$0xf]  ;;  %vm4024_vm7 = vweird.f32 %v11194_v62 }
 0x374   :  { %3012 = vmatmul.bf16.vlgmr.msra.gmra.mxu1 %v11041_v44  ;;  %v2811_v5 = vadd.f32 %v2810_v6, %v2782_v45  ;;  %v11206_v46 = vsel %vm3968_vm6, %v3970_v32, %v3966_v60  ;;  %3150 = vmatpush.bf16.msrb.mxu2 %v8214_v0  ;;  %v9207_v31 = vld [vmem:[#allocation2 + $0x16c] sm:$0xf0]  ;;  %v7958_v45 = vor.u32 %v9343_v14, %v7957_v16  ;;  %vm11224_vm10 = vmor %vm4023_vm9, %vm4024_vm7  ;;  %vm4083_vm12 = vweird.f32 %v11201_v8 }
 0x375   :  { %12712 = vst [vmem:[#allocation64_spill] sm:$0xff] %v11206_v46  ;;  %v4020_v22 = vsub.f32 1.0, %v4019_v56  ;;  %3092 = vmatpush.bf16.msrb.mxu0 %v7702_v23  ;;  %v7414_v48 = vor.u32 %v9207_v31, %v7413_v30  ;;  %v8181_v50 = vld [vmem:[#allocation2 + $0x750] sm:$0xf]  ;;  %v4030_v30 = vor.u32 1.1754944e-38, %v4029_v29 }
 0x376   :  { %v3527_v33 = vadd.f32 %v2811_v5, %v12713_v58  ;;  %v9399_v10 = vld [vmem:[#allocation2 + $0x76c] sm:$0xf0]  ;;  %v2725_v32 = vpop.f32.mrf.mxu3  ;;  %3121 = vmatpush.bf16.msrb.mxu1 %v7958_v45 }
 0x377   :  { %v8182_v34 = vor.u32 %v9399_v10, %v8181_v50  ;;  %v7669_v63 = vld [vmem:[#allocation2 + $0x350] sm:$0xf]  ;;  %v4021_v60 = vmul.f32 %v11194_v62, %v4020_v22  ;;  %v2755_v5 = vadd.f32 %v2754_v53, %v2725_v32  ;;  %3064 = vmatpush.bf16.msra.mxu3 %v7414_v48 }
 0x378   :  { %v9271_v40 = vld [vmem:[#allocation2 + $0x36c] sm:$0xf0]  ;;  %v9663_v0 = vpop.eup %9662  ;;  %v8260_v23 = vmul.f32 -1.442695, %v3527_v33 }
 0x379   :  { %v2783_v17 = vpop.f32.mrf.mxu1  ;;  %v11219_v41 = vadd.f32 1.0, %v9663_v0  ;;  %v2812_v31 = vpop.f32.mrf.mxu2  ;;  %3151 = vmatpush.bf16.msrb.mxu2 %v8182_v34  ;;  %v7670_v16 = vor.u32 %v9271_v40, %v7669_v63  ;;  %v7381_v14 = vld [vmem:[#allocation2 + $0x110] sm:$0xf]  ;;  %v4022_v50 = vadd.f32 %v11194_v62, %v4021_v60 }
 0x37a   :  { %v9199_v58 = vld [vmem:[#allocation2 + $0x12c] sm:$0xf0]  ;;  %9666 = vpow2.f32 %v8260_v23  ;;  %v2784_v53 = vadd.f32 %v2783_v17, %v2755_v5  ;;  %v2757_v52 = vpop.f32.mrf.mxu0  ;;  %v11230_v32 = vpop.eup %9664 }
 0x37b   :  { %v7382_v33 = vor.u32 %v9199_v58, %v7381_v14  ;;  %v7925_v48 = vld [vmem:[#allocation2 + $0x550] sm:$0xf]  ;;  %9668 = vrcp.f32 %v11219_v41  ;;  %3093 = vmatpush.bf16.msrb.mxu0 %v7670_v16  ;;  %v4026_v40 = vsel %vm11224_vm10, %v11194_v62, %v4022_v50  ;;  %v4079_v17 = vmul.f32 %v11230_v32, %v11201_v8  ;;  %2959 = vmatmul.bf16.gmra.mxu3 %v11053_v24 }
 0x37c   :  { %v9335_v10 = vld [vmem:[#allocation2 + $0x56c] sm:$0xf0]  ;;  %v2813_v0 = vadd.f32 %v2812_v31, %v2784_v53  ;;  %v11241_v14 = vsel %vm11212_vm8, %v4030_v30, %v4026_v40  ;;  %v4089_v16 = vand.u32 2147483648, %v11201_v8  ;;  %2988 = vmatmul.bf16.gmra.mxu0 %v11057_v36  ;;  %v12719_v31 = vld [vmem:[#allocation75_spill] sm:$0xff]  ;;  %vm4084_vm11 = vweird.f32 %v11230_v32 }
 0x37d   :  { %v8149_v45 = vld [vmem:[#allocation2 + $0x710] sm:$0xf]  ;;  %12718 = vst [vmem:[#allocation71_spill] sm:$0xff] %v11241_v14  ;;  %v7926_v62 = vor.u32 %v9335_v10, %v7925_v48  ;;  %v4080_v22 = vsub.f32 1.0, %v4079_v17  ;;  %3065 = vmatpush.bf16.msra.mxu3 %v7382_v33  ;;  %vm11270_vm14 = vmor %vm4083_vm12, %vm4084_vm11  ;;  %vm4143_vm0 = vweird.f32 %v11219_v41 }
 0x37e   :  { %v9391_v34 = vld [vmem:[#allocation2 + $0x72c] sm:$0xf0]  ;;  %v3535_v53 = vadd.f32 %v2813_v0, %v12719_v31  ;;  %3046 = vmatmul.bf16.gmra.mxu2 %v11065_v57  ;;  %v2728_v40 = vpop.f32.mrf.mxu3 }
 0x37f   :  { %v7637_v63 = vld [vmem:[#allocation2 + $0x310] sm:$0xf]  ;;  %v8150_v56 = vor.u32 %v9391_v34, %v8149_v45  ;;  %3122 = vmatpush.bf16.msrb.mxu1 %v7926_v62  ;;  %v4081_v17 = vmul.f32 %v11230_v32, %v4080_v22  ;;  %v2758_v31 = vadd.f32 %v2757_v52, %v2728_v40 }
 0x380   :  { %v9263_v60 = vld [vmem:[#allocation2 + $0x32c] sm:$0xf0]  ;;  %v9667_v27 = vpop.eup %9666  ;;  %v8264_v0 = vmul.f32 -1.442695, %v3535_v53 }
 0x381   :  { %v11228_v29 = vpop.f32.mrf.mxu1  ;;  %v7893_v23 = vld [vmem:[#allocation2 + $0x510] sm:$0xf]  ;;  %v7638_v46 = vor.u32 %v9263_v60, %v7637_v63  ;;  %3152 = vmatpush.bf16.msrb.mxu2 %v8150_v56  ;;  %v11250_v63 = vpop.eup %9668  ;;  %v12720_v60 = vand.u32 2147483647, %v11201_v8  ;;  %v4090_v56 = vor.u32 1.1754944e-38, %v4089_v16 }
 0x382   :  { %v9327_v5 = vld [vmem:[#allocation2 + $0x52c] sm:$0xf0]  ;;  %v2815_v62 = vpop.f32.mrf.mxu2  ;;  %9670 = vpow2.f32 %v8264_v0  ;;  %v2759_v22 = vpop.f32.mrf.mxu0  ;;  %v4147_v16 = vand.u32 2147483647, %v11219_v41  ;;  %v2787_v0 = vadd.f32 %v11228_v29, %v2758_v31  ;;  %vm4144_vm15 = vweird.f32 %v11250_v63 }
 0x383   :  { %v7349_v58 = vld [vmem:[#allocation2 + $0xd0] sm:$0xf]  ;;  %v7894_v20 = vor.u32 %v9327_v5, %v7893_v23  ;;  %3094 = vmatpush.bf16.msrb.mxu0 %v7638_v46  ;;  %vm11255_vm13 = vcmp.eq.f32.partialorder %v12720_v60, 8.507059e+37  ;;  %v11259_v5 = vadd.f32 1.0, %v9667_v27  ;;  %v4082_v46 = vadd.f32 %v11230_v32, %v4081_v17  ;;  %vm11300_vm3 = vmor %vm4143_vm0, %vm4144_vm15 }
 0x384   :  { %3017 = vmatmul.bf16.gmra.mxu1 %v11061_v42  ;;  %v9191_v50 = vld [vmem:[#allocation2 + $0xec] sm:$0xf0]  ;;  %vm11289_vm2 = vcmp.eq.f32.partialorder %v4147_v16, 8.507059e+37 }
 0x385   :  { %v8117_v6 = vld [vmem:[#allocation2 + $0x6d0] sm:$0xf]  ;;  %v7350_v14 = vor.u32 %v9191_v50, %v7349_v58  ;;  %v4139_v50 = vmul.f32 %v11250_v63, %v11219_v41  ;;  %9672 = vrcp.f32 %v11259_v5  ;;  %3123 = vmatpush.bf16.msrb.mxu1 %v7894_v20  ;;  %v4149_v20 = vand.u32 2147483648, %v11219_v41 }
 0x386   :  { %v9383_v30 = vld [vmem:[#allocation2 + $0x6ec] sm:$0xf0]  ;;  %v2730_v23 = vpop.f32.mrf.mxu3  ;;  %vm3738_vm5 = vweird.f32 %v11259_v5 }
 0x387   :  { %v8118_v38 = vor.u32 %v9383_v30, %v8117_v6  ;;  %v7605_v48 = vld [vmem:[#allocation2 + $0x2d0] sm:$0xf]  ;;  %3066 = vmatpush.bf16.msra.mxu3 %v7350_v14  ;;  %v4086_v14 = vsel %vm11270_vm14, %v11230_v32, %v4082_v46  ;;  %v4140_v17 = vsub.f32 1.0, %v4139_v50  ;;  %v2816_v46 = vadd.f32 %v2815_v62, %v2787_v0  ;;  %v12728_v62 = vld [vmem:[#allocation79_spill] sm:$0xff] }
 0x388   :  { %v9255_v10 = vld [vmem:[#allocation2 + $0x2ec] sm:$0xf0]  ;;  %v11282_v21 = vsel %vm11255_vm13, %v4090_v56, %v4086_v14  ;;  %v9671_v14 = vpop.eup %9670  ;;  %v4150_v16 = vor.u32 1.1754944e-38, %v4149_v20 }
 0x389   :  { %v7606_v33 = vor.u32 %v9255_v10, %v7605_v48  ;;  %v7861_v45 = vld [vmem:[#allocation2 + $0x4d0] sm:$0xf]  ;;  %v11264_v53 = vpop.f32.mrf.mxu1  ;;  %3153 = vmatpush.bf16.msrb.mxu2 %v8118_v38  ;;  %12725 = vst [vmem:[#allocation75_spill] sm:$0xff] %v11282_v21  ;;  %v4141_v32 = vmul.f32 %v11250_v63, %v4140_v17 }
 0x38a   :  { %v9319_v34 = vld [vmem:[#allocation2 + $0x4ec] sm:$0xf0] }
 0x38b   :  { %v7317_v58 = vld [vmem:[#allocation2 + $0x90] sm:$0xf]  ;;  %v7862_v40 = vor.u32 %v9319_v34, %v7861_v45  ;;  %3095 = vmatpush.bf16.msrb.mxu0 %v7606_v33  ;;  %2964 = vmatmul.bf16.gmra.mxu3 %v11073_v2 }
 0x38c   :  { %v9183_v52 = vld [vmem:[#allocation2 + $0xac] sm:$0xf0]  ;;  %2993 = vmatmul.bf16.gmra.mxu0 %v11077_v37 }
 0x38d   :  { %v8085_v6 = vld [vmem:[#allocation2 + $0x690] sm:$0xf]  ;;  %v7318_v8 = vor.u32 %v9183_v52, %v7317_v58  ;;  %3124 = vmatpush.bf16.msrb.mxu1 %v7862_v40  ;;  %v11304_v40 = vadd.f32 1.0, %v9671_v14 }
 0x38e   :  { %v9375_v30 = vld [vmem:[#allocation2 + $0x6ac] sm:$0xf0]  ;;  %3051 = vmatmul.bf16.gmra.mxu2 %v11085_v47 }
 0x38f   :  { %v7573_v48 = vld [vmem:[#allocation2 + $0x290] sm:$0xf]  ;;  %v8086_v45 = vor.u32 %v9375_v30, %v8085_v6  ;;  %3067 = vmatpush.bf16.msra.mxu3 %v7318_v8  ;;  %v4142_v6 = vadd.f32 %v11250_v63, %v4141_v32  ;;  %v11294_v8 = vpop.eup %9672  ;;  %9674 = vrcp.f32 %v11304_v40  ;;  %v3744_v30 = vand.u32 2147483648, %v11259_v5 }
 0x390   :  { %v9247_v10 = vld [vmem:[#allocation2 + $0x2ac] sm:$0xf0]  ;;  %vm3739_vm4 = vweird.f32 %v11294_v8  ;;  %vm3798_vm9 = vweird.f32 %v11304_v40 }
 0x391   :  { %v7829_v60 = vld [vmem:[#allocation2 + $0x490] sm:$0xf]  ;;  %v7574_v38 = vor.u32 %v9247_v10, %v7573_v48  ;;  %v3543_v48 = vadd.f32 %v2816_v46, %v12728_v62  ;;  %v2760_v10 = vadd.f32 %v2759_v22, %v2730_v23  ;;  %3154 = vmatpush.bf16.msrb.mxu2 %v8086_v45  ;;  %v4146_v45 = vsel %vm11300_vm3, %v11250_v63, %v4142_v6  ;;  %v2762_v46 = vpop.f32.mrf.mxu0  ;;  %v2791_v41 = vpop.f32.mrf.mxu1  ;;  %vm3740_vm6 = vmor %vm3738_vm5, %vm3739_vm4 }
 0x392   :  { %v7285_v34 = vld [vmem:[#allocation2 + $0x50] sm:$0xf]  ;;  %v7830_v58 = vor.u32 %v9311_v19, %v7829_v60  ;;  %v2817_v60 = vpop.f32.mrf.mxu2  ;;  %v11313_v20 = vsel %vm11289_vm2, %v4150_v16, %v4146_v45  ;;  %v12732_v16 = vld [vmem:[#allocation83_spill] sm:$0xff] }
 0x393   :  { %v9175_v27 = vld [vmem:[#allocation2 + $0x6c] sm:$0xf0]  ;;  %3096 = vmatpush.bf16.msrb.mxu0 %v7574_v38  ;;  %v8268_v32 = vmul.f32 -1.442695, %v3543_v48  ;;  %12731 = vst [vmem:[#allocation79_spill] sm:$0xff] %v11313_v20  ;;  %v2789_v62 = vadd.f32 %v11264_v53, %v2760_v10  ;;  %v2733_v10 = vpop.f32.mrf.mxu3 }
 0x394   :  { %v7286_v29 = vor.u32 %v9175_v27, %v7285_v34  ;;  %v8053_v31 = vld [vmem:[#allocation2 + $0x650] sm:$0xf]  ;;  %v3734_v27 = vmul.f32 %v11294_v8, %v11259_v5  ;;  %3125 = vmatpush.bf16.msrb.mxu1 %v7830_v58 }
 0x395   :  { %v9367_v33 = vld [vmem:[#allocation2 + $0x66c] sm:$0xf0]  ;;  %9676 = vpow2.f32 %v8268_v32  ;;  %3022 = vmatmul.bf16.gmra.mxu1 %v11081_v18  ;;  %v2818_v53 = vadd.f32 %v2817_v60, %v2789_v62  ;;  %v9675_v45 = vpop.eup %9674  ;;  %v3745_v60 = vor.u32 1.1754944e-38, %v3744_v30  ;;  %v3804_v62 = vand.u32 2147483648, %v11304_v40 }
 0x396   :  { %v8054_v52 = vor.u32 %v9367_v33, %v8053_v31  ;;  %v7541_v56 = vld [vmem:[#allocation2 + $0x250] sm:$0xf]  ;;  %3068 = vmatpush.bf16.msra.mxu3 %v7286_v29  ;;  %v3735_v6 = vsub.f32 1.0, %v3734_v27  ;;  %vm3799_vm8 = vweird.f32 %v9675_v45 }
 0x397   :  { %v9239_v50 = vld [vmem:[#allocation2 + $0x26c] sm:$0xf0]  ;;  %vm3800_vm10 = vmor %vm3798_vm9, %vm3799_vm8 }
 0x398   :  { %v7797_v17 = vld [vmem:[#allocation2 + $0x450] sm:$0xf]  ;;  %v7542_v38 = vor.u32 %v9239_v50, %v7541_v56  ;;  %3155 = vmatpush.bf16.msrb.mxu2 %v8054_v52  ;;  %v3742_v50 = vand.u32 2147483647, %v11259_v5 }
 0x399   :  { %v9303_v0 = vld [vmem:[#allocation2 + $0x46c] sm:$0xf0] }
 0x39a   :  { %v7253_v34 = vld [vmem:[#allocation2 + $0x10] sm:$0xf]  ;;  %v7798_v23 = vor.u32 %v9303_v0, %v7797_v17  ;;  %v3736_v17 = vmul.f32 %v11294_v8, %v3735_v6  ;;  %3097 = vmatpush.bf16.msrb.mxu0 %v7542_v38  ;;  %v2820_v27 = vpop.f32.mrf.mxu2  ;;  %vm3743_vm7 = vcmp.eq.f32.partialorder %v3742_v50, 8.507059e+37 }
 0x39b   :  { %v9167_v22 = vld [vmem:[#allocation2 + $0x2c] sm:$0xf0]  ;;  %v9677_v32 = vpop.eup %9676  ;;  %v2735_v50 = vpop.f32.mrf.mxu3  ;;  %2969 = vmatmul.bf16.gmra.mxu3 %v11093_v25 }
 0x39c   :  { %v8021_v31 = vld [vmem:[#allocation2 + $0x610] sm:$0xf]  ;;  %v7254_v58 = vor.u32 %v9167_v22, %v7253_v34  ;;  %3126 = vmatpush.bf16.msrb.mxu1 %v7798_v23  ;;  %v3737_v19 = vadd.f32 %v11294_v8, %v3736_v17  ;;  %v3551_v34 = vadd.f32 %v2818_v53, %v12732_v16  ;;  %v2763_v22 = vadd.f32 %v2762_v46, %v2733_v10  ;;  %v2764_v23 = vpop.f32.mrf.mxu0 }
 0x39d   :  { %v9359_v33 = vld [vmem:[#allocation2 + $0x62c] sm:$0xf0]  ;;  %v3695_v46 = vadd.f32 1.0, %v9677_v32  ;;  %v2765_v17 = vadd.f32 %v2764_v23, %v2735_v50  ;;  %2998 = vmatmul.bf16.gmra.mxu0 %v11097_v35 }
 0x39e   :  { %v7509_v14 = vld [vmem:[#allocation2 + $0x210] sm:$0xf]  ;;  %v8022_v48 = vor.u32 %v9359_v33, %v8021_v31  ;;  %3069 = vmatpush.bf16.msra.mxu3 %v7254_v58  ;;  %v3741_v38 = vsel %vm3740_vm6, %v11294_v8, %v3737_v19  ;;  %v3794_v31 = vmul.f32 %v9675_v45, %v11304_v40  ;;  %v8272_v33 = vmul.f32 -1.442695, %v3551_v34  ;;  %v12734_v58 = vld [vmem:[#allocation87_spill] sm:$0xff]  ;;  %3056 = vmatmul.bf16.gmra.mxu2 %v11105_v54 }
 0x39f   :  { %v9231_v63 = vld [vmem:[#allocation2 + $0x22c] sm:$0xf0]  ;;  %v11332_v5 = vsel %vm3743_vm7, %v3745_v60, %v3741_v38  ;;  %v3802_v8 = vand.u32 2147483647, %v11304_v40  ;;  %v12736_v38 = vld [vmem:[#allocation91_spill] sm:$0xff]  ;;  %v3864_v23 = vand.u32 2147483648, %v3695_v46  ;;  %vm3858_vm13 = vweird.f32 %v3695_v46 }
 0x3a0   :  { %v7765_v29 = vld [vmem:[#allocation2 + $0x410] sm:$0xf]  ;;  %v7510_v52 = vor.u32 %v9231_v63, %v7509_v14  ;;  %3156 = vmatpush.bf16.msrb.mxu2 %v8022_v48  ;;  %v2793_v14 = vpop.f32.mrf.mxu1  ;;  %12733 = vst [vmem:[#allocation83_spill] sm:$0xff] %v11332_v5  ;;  %v2792_v63 = vadd.f32 %v2791_v41, %v2763_v22  ;;  %v3795_v6 = vsub.f32 1.0, %v3794_v31  ;;  %9678 = vpow2.f32 %v8272_v33  ;;  %v9203_v5 = vld [vmem:[#allocation2 + $0x154] sm:$0xf] }
 0x3a1   :  { %v9295_v56 = vld [vmem:[#allocation2 + $0x42c] sm:$0xf0]  ;;  %9680 = vrcp.f32 %v3695_v46  ;;  %v3805_v41 = vor.u32 1.1754944e-38, %v3804_v62  ;;  %vm3803_vm11 = vcmp.eq.f32.partialorder %v3802_v8, 8.507059e+37  ;;  %v2794_v19 = vadd.f32 %v2793_v14, %v2765_v17 }
 0x3a2   :  { %v7766_v0 = vor.u32 %v9295_v56, %v7765_v29  ;;  %3098 = vmatpush.bf16.msrb.mxu0 %v7510_v52  ;;  %v3796_v29 = vmul.f32 %v9675_v45, %v3795_v6  ;;  %v2821_v56 = vadd.f32 %v2820_v27, %v2792_v63  ;;  %v2822_v53 = vpop.f32.mrf.mxu2  ;;  %v3862_v33 = vand.u32 2147483647, %v3695_v46 }
 0x3a3   :  { %v2823_v40 = vadd.f32 %v2822_v53, %v2794_v19  ;;  %v2738_v14 = vpop.f32.mrf.mxu3  ;;  %v3865_v17 = vor.u32 1.1754944e-38, %v3864_v23 }
 0x3a4   :  { %3127 = vmatpush.bf16.msrb.mxu1 %v7766_v0  ;;  %v3797_v30 = vadd.f32 %v9675_v45, %v3796_v29  ;;  %v3559_v48 = vadd.f32 %v2821_v56, %v12734_v58  ;;  %v2767_v16 = vpop.f32.mrf.mxu0  ;;  %vm3863_vm15 = vcmp.eq.f32.partialorder %v3862_v33, 8.507059e+37 }
 0x3a5   :  { %3027 = vmatmul.bf16.gmra.mxu1 %v11101_v28  ;;  %v3567_v31 = vadd.f32 %v2823_v40, %v12736_v38  ;;  %v2768_v62 = vadd.f32 %v2767_v16, %v2738_v14  ;;  %v12738_v16 = vld [vmem:[#allocation95_spill] sm:$0xff] }
 0x3a6   :  { %v9679_v52 = vpop.eup %9678  ;;  %v3801_v10 = vsel %vm3800_vm10, %v9675_v45, %v3797_v30  ;;  %v8276_v0 = vmul.f32 -1.442695, %v3559_v48 }
 0x3a7   :  { %v9681_v22 = vpop.eup %9680  ;;  %v11338_v60 = vsel %vm3803_vm11, %v3805_v41, %v3801_v10  ;;  %v3699_v27 = vadd.f32 1.0, %v9679_v52  ;;  %v8280_v6 = vmul.f32 -1.442695, %v3567_v31 }
 0x3a8   :  { %v2796_v34 = vpop.f32.mrf.mxu1  ;;  %12735 = vst [vmem:[#allocation87_spill] sm:$0xff] %v11338_v60  ;;  %v3854_v32 = vmul.f32 %v9681_v22, %v3695_v46  ;;  %9682 = vpow2.f32 %v8276_v0  ;;  %vm3859_vm12 = vweird.f32 %v9681_v22  ;;  %v9339_v60 = vld [vmem:[#allocation2 + $0x594] sm:$0xf] }
 0x3a9   :  { %9684 = vrcp.f32 %v3699_v27  ;;  %v2797_v50 = vadd.f32 %v2796_v34, %v2768_v62  ;;  %vm3860_vm14 = vmor %vm3858_vm13, %vm3859_vm12  ;;  %v3924_v34 = vand.u32 2147483648, %v3699_v27  ;;  %vm3918_vm2 = vweird.f32 %v3699_v27 }
 0x3aa   :  { %v3855_v45 = vsub.f32 1.0, %v3854_v32  ;;  %v2825_v29 = vpop.f32.mrf.mxu2  ;;  %9686 = vpow2.f32 %v8280_v6  ;;  %v3922_v32 = vand.u32 2147483647, %v3699_v27 }
 0x3ab   :  { %v2826_v10 = vadd.f32 %v2825_v29, %v2797_v50  ;;  %v2740_v40 = vpop.f32.mrf.mxu3  ;;  %3070 = vmatmul.bf16.vlgmr.msra.gmra.mxu3 %v11033_v51 }
 0x3ac   :  { %v3856_v63 = vmul.f32 %v9681_v22, %v3855_v45  ;;  %v2769_v30 = vpop.f32.mrf.mxu0  ;;  %vm3923_vm4 = vcmp.eq.f32.partialorder %v3922_v32, 8.507059e+37  ;;  %v12740_v32 = vld [vmem:[#allocation98_spill] sm:$0xff] }
 0x3ad   :  { %v3575_v46 = vadd.f32 %v2826_v10, %v12738_v16  ;;  %v2770_v23 = vadd.f32 %v2769_v30, %v2740_v40  ;;  %3099 = vmatmul.bf16.vlgmr.msrb.gmra.mxu0 %v11037_v39 }
 0x3ae   :  { %v9683_v8 = vpop.eup %9682  ;;  %v3857_v56 = vadd.f32 %v9681_v22, %v3856_v63  ;;  %3157 = vmatmul.bf16.vlgmr.msrb.gmra.mxu2 %v11045_v43 }
 0x3af   :  { %v9685_v48 = vpop.eup %9684  ;;  %v11345_v41 = vadd.f32 1.0, %v9683_v8  ;;  %v8284_v31 = vmul.f32 -1.442695, %v3575_v46  ;;  %v3925_v8 = vor.u32 1.1754944e-38, %v3924_v34 }
 0x3b0   :  { %v2798_v58 = vpop.f32.mrf.mxu1  ;;  %v3861_v53 = vsel %vm3860_vm14, %v9681_v22, %v3857_v56  ;;  %v3914_v52 = vmul.f32 %v9685_v48, %v3699_v27  ;;  %v9687_v45 = vpop.eup %9686  ;;  %vm3919_vm0 = vweird.f32 %v9685_v48  ;;  %v9219_v56 = vld [vmem:[#allocation2 + $0x1d4] sm:$0xf] }
 0x3b1   :  { %v11347_v0 = vsel %vm3863_vm15, %v3865_v17, %v3861_v53  ;;  %9688 = vrcp.f32 %v11345_v41  ;;  %v11351_v14 = vadd.f32 1.0, %v9687_v45  ;;  %v2799_v63 = vadd.f32 %v2798_v58, %v2770_v23  ;;  %vm3920_vm3 = vmor %vm3918_vm2, %vm3919_vm0  ;;  %v7479_v58 = vld [vmem:[#allocation2 + $0x1f0] sm:$0xf0] }
 0x3b2   :  { %12737 = vst [vmem:[#allocation91_spill] sm:$0xff] %v11347_v0  ;;  %v3915_v19 = vsub.f32 1.0, %v3914_v52  ;;  %v2827_v22 = vpop.f32.mrf.mxu2  ;;  %9690 = vpow2.f32 %v8284_v31  ;;  %v3982_v17 = vand.u32 2147483647, %v11345_v41  ;;  %v7482_v10 = vor.u32 %v9219_v56, %v7479_v58  ;;  %v9283_v45 = vld [vmem:[#allocation2 + $0x3d4] sm:$0xf] }
 0x3b3   :  { %9692 = vrcp.f32 %v11351_v14  ;;  %v2828_v27 = vadd.f32 %v2827_v22, %v2799_v63  ;;  %v4042_v52 = vand.u32 2147483647, %v11351_v14  ;;  %v3984_v46 = vand.u32 2147483648, %v11345_v41  ;;  %v2839_v23 = vpop.f32.mrf.mxu3  ;;  %v7991_v63 = vld [vmem:[#allocation2 + $0x5f0] sm:$0xf0] }
 0x3b4   :  { %v3916_v38 = vmul.f32 %v9685_v48, %v3915_v19  ;;  %v2868_v6 = vpop.f32.mrf.mxu0  ;;  %v9411_v19 = vld [vmem:[#allocation2 + $0x7d4] sm:$0xf]  ;;  %v4044_v31 = vand.u32 2147483648, %v11351_v14  ;;  %3178 = vmatpush.bf16.msrb.mxu3 %v7482_v10  ;;  %vm3978_vm6 = vweird.f32 %v11345_v41  ;;  %vm11376_vm7 = vcmp.eq.f32.partialorder %v3982_v17, 8.507059e+37 }
 0x3b5   :  { %3128 = vmatmul.bf16.vlgmr.msrb.gmra.mxu1 %v11041_v44  ;;  %v3583_v34 = vadd.f32 %v2828_v27, %v12740_v32  ;;  %v9211_v32 = vld [vmem:[#allocation2 + $0x194] sm:$0xf]  ;;  %vm11391_vm9 = vcmp.eq.f32.partialorder %v4042_v52, 8.507059e+37  ;;  %vm4038_vm11 = vweird.f32 %v11351_v14 }
 0x3b6   :  { %v3917_v33 = vadd.f32 %v9685_v48, %v3916_v38  ;;  %v7735_v38 = vld [vmem:[#allocation2 + $0x3f0] sm:$0xf0] }
 0x3b7   :  { %v11355_v29 = vpop.eup %9688  ;;  %v7738_v22 = vor.u32 %v9283_v45, %v7735_v38  ;;  %v7447_v45 = vld [vmem:[#allocation2 + $0x1b0] sm:$0xf0] }
 0x3b8   :  { %v11353_v62 = vpop.f32.mrf.mxu1  ;;  %v3921_v50 = vsel %vm3920_vm3, %v9685_v48, %v3917_v33  ;;  %v3974_v30 = vmul.f32 %v11355_v29, %v11345_v41  ;;  %v8247_v48 = vld [vmem:[#allocation2 + $0x7f0] sm:$0xf0]  ;;  %vm3979_vm5 = vweird.f32 %v11355_v29 }
 0x3b9   :  { %v11362_v53 = vsel %vm3923_vm4, %v3925_v8, %v3921_v50  ;;  %v8250_v40 = vor.u32 %v9411_v19, %v8247_v48  ;;  %v9347_v33 = vld [vmem:[#allocation2 + $0x5d4] sm:$0xf]  ;;  %v9691_v8 = vpop.eup %9690  ;;  %v8288_v50 = vmul.f32 -1.442695, %v3583_v34  ;;  %3207 = vmatpush.bf16.msra.mxu0 %v7738_v22  ;;  %v3985_v34 = vor.u32 1.1754944e-38, %v3984_v46  ;;  %vm3980_vm8 = vmor %vm3978_vm6, %vm3979_vm5 }
 0x3ba   :  { %12739 = vst [vmem:[#allocation95_spill] sm:$0xff] %v11362_v53  ;;  %v3975_v16 = vsub.f32 1.0, %v3974_v30  ;;  %v2869_v30 = vadd.f32 %v2868_v6, %v2839_v23  ;;  %v7994_v27 = vor.u32 %v9347_v33, %v7991_v63  ;;  %v11373_v58 = vpop.eup %9692  ;;  %v11380_v10 = vadd.f32 1.0, %v9691_v8  ;;  %v2926_v48 = vpop.f32.mrf.mxu2  ;;  %v9403_v17 = vld [vmem:[#allocation2 + $0x794] sm:$0xf] }
 0x3bb   :  { %3265 = vmatpush.bf16.msra.mxu2 %v8250_v40  ;;  %v4034_v6 = vmul.f32 %v11373_v58, %v11351_v14  ;;  %9694 = vpow2.f32 %v8288_v50  ;;  %v8215_v23 = vld [vmem:[#allocation2 + $0x7b0] sm:$0xf0]  ;;  %v4045_v46 = vor.u32 1.1754944e-38, %v4044_v31  ;;  %vm4039_vm10 = vweird.f32 %v11373_v58  ;;  %v2841_v19 = vpop.f32.mrf.mxu3  ;;  %3075 = vmatmul.bf16.gmra.mxu3 %v11053_v24 }
 0x3bc   :  { %v3976_v56 = vmul.f32 %v11355_v29, %v3975_v16  ;;  %v2870_v40 = vpop.f32.mrf.mxu0  ;;  %3236 = vmatpush.bf16.msra.mxu1 %v7994_v27  ;;  %9696 = vrcp.f32 %v11380_v10  ;;  %v9275_v33 = vld [vmem:[#allocation2 + $0x394] sm:$0xf]  ;;  %v2898_v50 = vadd.f32 %v11353_v62, %v2869_v30  ;;  %v7450_v27 = vor.u32 %v9211_v32, %v7447_v45  ;;  %vm11414_vm12 = vmor %vm4038_vm11, %vm4039_vm10 }
 0x3bd   :  { %v7703_v63 = vld [vmem:[#allocation2 + $0x3b0] sm:$0xf0]  ;;  %v4102_v52 = vand.u32 2147483647, %v11380_v10  ;;  %v8218_v31 = vor.u32 %v9403_v17, %v8215_v23  ;;  %3104 = vmatmul.bf16.gmra.mxu0 %v11057_v36  ;;  %vm4098_vm15 = vweird.f32 %v11380_v10 }
 0x3be   :  { %v3977_v16 = vadd.f32 %v11355_v29, %v3976_v56  ;;  %v4035_v56 = vsub.f32 1.0, %v4034_v6  ;;  %v7959_v53 = vld [vmem:[#allocation2 + $0x5b0] sm:$0xf0]  ;;  %3179 = vmatpush.bf16.msrb.mxu3 %v7450_v27  ;;  %3162 = vmatmul.bf16.gmra.mxu2 %v11065_v57 }
 0x3bf   :  { %v7415_v0 = vld [vmem:[#allocation2 + $0x170] sm:$0xf0]  ;;  %3266 = vmatpush.bf16.msra.mxu2 %v8218_v31  ;;  %vm11432_vm13 = vcmp.eq.f32.partialorder %v4102_v52, 8.507059e+37 }
 0x3c0   :  { %v11385_v38 = vpop.f32.mrf.mxu1  ;;  %v3981_v8 = vsel %vm3980_vm8, %v11355_v29, %v3977_v16  ;;  %v4036_v20 = vmul.f32 %v11373_v58, %v4035_v56  ;;  %v2927_v29 = vadd.f32 %v2926_v48, %v2898_v50  ;;  %v7706_v16 = vor.u32 %v9275_v33, %v7703_v63  ;;  %v9395_v30 = vld [vmem:[#allocation2 + $0x754] sm:$0xf]  ;;  %v12746_v56 = vld [vmem:[#allocation61_spill] sm:$0xff] }
 0x3c1   :  { %v11400_v41 = vsel %vm11376_vm7, %v3985_v34, %v3981_v8  ;;  %v7418_v62 = vor.u32 %v9203_v5, %v7415_v0  ;;  %v8183_v32 = vld [vmem:[#allocation2 + $0x770] sm:$0xf0]  ;;  %v7962_v34 = vor.u32 %v9339_v60, %v7959_v53  ;;  %v9695_v23 = vpop.eup %9694  ;;  %v2871_v50 = vadd.f32 %v2870_v40, %v2841_v19 }
 0x3c2   :  { %12745 = vst [vmem:[#allocation98_spill] sm:$0xff] %v11400_v41  ;;  %v9267_v45 = vld [vmem:[#allocation2 + $0x354] sm:$0xf]  ;;  %v8186_v6 = vor.u32 %v9395_v30, %v8183_v32  ;;  %v4037_v21 = vadd.f32 %v11373_v58, %v4036_v20  ;;  %v3528_v48 = vadd.f32 %v2927_v29, %v12746_v56  ;;  %3208 = vmatpush.bf16.msra.mxu0 %v7706_v16  ;;  %v11408_v0 = vpop.eup %9696  ;;  %v4104_v53 = vand.u32 2147483648, %v11380_v10  ;;  %v2928_v20 = vpop.f32.mrf.mxu2 }
 0x3c3   :  { %v7671_v8 = vld [vmem:[#allocation2 + $0x370] sm:$0xf0]  ;;  %v11419_v33 = vadd.f32 1.0, %v9695_v23  ;;  %3237 = vmatpush.bf16.msra.mxu1 %v7962_v34  ;;  %v4094_v31 = vmul.f32 %v11408_v0, %v11380_v10  ;;  %3180 = vmatpush.bf16.msrb.mxu3 %v7418_v62  ;;  %vm4099_vm14 = vweird.f32 %v11408_v0 }
 0x3c4   :  { %v9331_v41 = vld [vmem:[#allocation2 + $0x554] sm:$0xf]  ;;  %v7674_v5 = vor.u32 %v9267_v45, %v7671_v8  ;;  %v4041_v27 = vsel %vm11414_vm12, %v11373_v58, %v4037_v21  ;;  %v8261_v14 = vmul.f32 -1.442695, %v3528_v48  ;;  %v2873_v29 = vpop.f32.mrf.mxu0  ;;  %3267 = vmatpush.bf16.msra.mxu2 %v8186_v6  ;;  %v4105_v60 = vor.u32 1.1754944e-38, %v4104_v53  ;;  %vm11450_vm0 = vmor %vm4098_vm15, %vm4099_vm14 }
 0x3c5   :  { %v7927_v17 = vld [vmem:[#allocation2 + $0x570] sm:$0xf0]  ;;  %v11430_v19 = vsel %vm11391_vm9, %v4045_v46, %v4041_v27  ;;  %9698 = vrcp.f32 %v11419_v33  ;;  %v4095_v8 = vsub.f32 1.0, %v4094_v31  ;;  %v4162_v52 = vand.u32 2147483647, %v11419_v33  ;;  %3133 = vmatmul.bf16.gmra.mxu1 %v11061_v42  ;;  %v2844_v31 = vpop.f32.mrf.mxu3 }
 0x3c6   :  { %v9195_v63 = vld [vmem:[#allocation2 + $0x114] sm:$0xf]  ;;  %v7930_v30 = vor.u32 %v9331_v41, %v7927_v17  ;;  %12749 = vst [vmem:[#allocation61_spill] sm:$0xff] %v11430_v19  ;;  %9700 = vpow2.f32 %v8261_v14  ;;  %v2900_v41 = vadd.f32 %v11385_v38, %v2871_v50  ;;  %3209 = vmatpush.bf16.msra.mxu0 %v7674_v5  ;;  %v2874_v10 = vadd.f32 %v2873_v29, %v2844_v31 }
 0x3c7   :  { %v7383_v40 = vld [vmem:[#allocation2 + $0x130] sm:$0xf0]  ;;  %v4096_v48 = vmul.f32 %v11408_v0, %v4095_v8  ;;  %vm4158_vm3 = vweird.f32 %v11419_v33  ;;  %vm11475_vm4 = vcmp.eq.f32.partialorder %v4162_v52, 8.507059e+37 }
 0x3c8   :  { %v11426_v16 = vpop.f32.mrf.mxu1  ;;  %v9387_v32 = vld [vmem:[#allocation2 + $0x714] sm:$0xf]  ;;  %v7386_v62 = vor.u32 %v9195_v63, %v7383_v40  ;;  %v2929_v50 = vadd.f32 %v2928_v20, %v2900_v41  ;;  %3238 = vmatpush.bf16.msra.mxu1 %v7930_v30  ;;  %v12754_v30 = vld [vmem:[#allocation65_spill] sm:$0xff] }
 0x3c9   :  { %v8151_v45 = vld [vmem:[#allocation2 + $0x730] sm:$0xf0]  ;;  %v4097_v53 = vadd.f32 %v11408_v0, %v4096_v48  ;;  %v2903_v38 = vadd.f32 %v11426_v16, %v2874_v10 }
 0x3ca   :  { %v9259_v21 = vld [vmem:[#allocation2 + $0x314] sm:$0xf]  ;;  %v8154_v6 = vor.u32 %v9387_v32, %v8151_v45  ;;  %3181 = vmatpush.bf16.msrb.mxu3 %v7386_v62 }
 0x3cb   :  { %v7639_v58 = vld [vmem:[#allocation2 + $0x330] sm:$0xf0]  ;;  %v11455_v62 = vpop.eup %9698  ;;  %v4101_v48 = vsel %vm11450_vm0, %v11408_v0, %v4097_v53  ;;  %3080 = vmatmul.bf16.gmra.mxu3 %v11073_v2 }
 0x3cc   :  { %v9323_v22 = vld [vmem:[#allocation2 + $0x514] sm:$0xf]  ;;  %v7642_v17 = vor.u32 %v9259_v21, %v7639_v58  ;;  %3268 = vmatpush.bf16.msra.mxu2 %v8154_v6  ;;  %v3536_v58 = vadd.f32 %v2929_v50, %v12754_v30  ;;  %v2875_v50 = vpop.f32.mrf.mxu0  ;;  %vm4159_vm2 = vweird.f32 %v11455_v62 }
 0x3cd   :  { %v7895_v46 = vld [vmem:[#allocation2 + $0x530] sm:$0xf0]  ;;  %vm11486_vm5 = vmor %vm4158_vm3, %vm4159_vm2  ;;  %3109 = vmatmul.bf16.gmra.mxu0 %v11077_v37 }
 0x3ce   :  { %v9187_v23 = vld [vmem:[#allocation2 + $0xd4] sm:$0xf]  ;;  %v7898_v40 = vor.u32 %v9323_v22, %v7895_v46  ;;  %3210 = vmatpush.bf16.msra.mxu0 %v7642_v17  ;;  %v2931_v22 = vpop.f32.mrf.mxu2  ;;  %3167 = vmatmul.bf16.gmra.mxu2 %v11085_v47 }
 0x3cf   :  { %v7351_v56 = vld [vmem:[#allocation2 + $0xf0] sm:$0xf0]  ;;  %v2932_v16 = vadd.f32 %v2931_v22, %v2903_v38 }
 0x3d0   :  { %v9379_v5 = vld [vmem:[#allocation2 + $0x6d4] sm:$0xf]  ;;  %v7354_v63 = vor.u32 %v9187_v23, %v7351_v56  ;;  %v9701_v56 = vpop.eup %9700  ;;  %v2904_v29 = vpop.f32.mrf.mxu1  ;;  %3239 = vmatpush.bf16.msra.mxu1 %v7898_v40 }
 0x3d1   :  { %v8119_v27 = vld [vmem:[#allocation2 + $0x6f0] sm:$0xf0]  ;;  %v11466_v30 = vadd.f32 1.0, %v9701_v56  ;;  %v2846_v56 = vpop.f32.mrf.mxu3 }
 0x3d2   :  { %v8122_v14 = vor.u32 %v9379_v5, %v8119_v27  ;;  %v9251_v32 = vld [vmem:[#allocation2 + $0x2d4] sm:$0xf]  ;;  %v4154_v5 = vmul.f32 %v11455_v62, %v11419_v33  ;;  %v8265_v27 = vmul.f32 -1.442695, %v3536_v58  ;;  %3182 = vmatpush.bf16.msrb.mxu3 %v7354_v63 }
 0x3d3   :  { %v7607_v45 = vld [vmem:[#allocation2 + $0x2f0] sm:$0xf0]  ;;  %vm3753_vm7 = vweird.f32 %v11466_v30 }
 0x3d4   :  { %v9315_v21 = vld [vmem:[#allocation2 + $0x4d4] sm:$0xf]  ;;  %v7610_v8 = vor.u32 %v9251_v32, %v7607_v45  ;;  %v11464_v45 = vsel %vm11432_vm13, %v4105_v60, %v4101_v48  ;;  %3269 = vmatpush.bf16.msra.mxu2 %v8122_v14  ;;  %v4155_v58 = vsub.f32 1.0, %v4154_v5  ;;  %9702 = vpow2.f32 %v8265_v27 }
 0x3d5   :  { %v7863_v41 = vld [vmem:[#allocation2 + $0x4f0] sm:$0xf0]  ;;  %12755 = vst [vmem:[#allocation65_spill] sm:$0xff] %v11464_v45  ;;  %9704 = vrcp.f32 %v11466_v30  ;;  %3138 = vmatmul.bf16.gmra.mxu1 %v11081_v18  ;;  %v7839_v45 = vld [vmem:[#allocation2 + $0x4b8] sm:$0xf0] }
 0x3d6   :  { %v9179_v46 = vld [vmem:[#allocation2 + $0x94] sm:$0xf]  ;;  %v7866_v17 = vor.u32 %v9315_v21, %v7863_v41  ;;  %3211 = vmatpush.bf16.msra.mxu0 %v7610_v8  ;;  %v4156_v60 = vmul.f32 %v11455_v62, %v4155_v58  ;;  %v2933_v58 = vpop.f32.mrf.mxu2 }
 0x3d7   :  { %v7319_v6 = vld [vmem:[#allocation2 + $0xb0] sm:$0xf0] }
 0x3d8   :  { %v9371_v23 = vld [vmem:[#allocation2 + $0x694] sm:$0xf]  ;;  %v7322_v0 = vor.u32 %v9179_v46, %v7319_v6  ;;  %3240 = vmatpush.bf16.msra.mxu1 %v7866_v17  ;;  %v12758_v6 = vand.u32 2147483648, %v11419_v33  ;;  %v4157_v27 = vadd.f32 %v11455_v62, %v4156_v60  ;;  %v12761_v17 = vld [vmem:[#allocation69_spill] sm:$0xff] }
 0x3d9   :  { %v8087_v31 = vld [vmem:[#allocation2 + $0x6b0] sm:$0xf0] }
 0x3da   :  { %v9243_v32 = vld [vmem:[#allocation2 + $0x294] sm:$0xf]  ;;  %v8090_v40 = vor.u32 %v9371_v23, %v8087_v31  ;;  %v4165_v23 = vor.u32 1.1754944e-38, %v12758_v6  ;;  %3183 = vmatpush.bf16.msrb.mxu3 %v7322_v0  ;;  %v3544_v31 = vadd.f32 %v2932_v16, %v12761_v17  ;;  %v9703_v60 = vpop.eup %9702  ;;  %v4161_v33 = vsel %vm11486_vm5, %v11455_v62, %v4157_v27  ;;  %v2907_v6 = vpop.f32.mrf.mxu1 }
 0x3db   :  { %v7575_v53 = vld [vmem:[#allocation2 + $0x2b0] sm:$0xf0]  ;;  %3085 = vmatmul.bf16.gmra.mxu3 %v11093_v25 }
 0x3dc   :  { %v9307_v20 = vld [vmem:[#allocation2 + $0x494] sm:$0xf]  ;;  %v7578_v21 = vor.u32 %v9243_v32, %v7575_v53  ;;  %3270 = vmatpush.bf16.msra.mxu2 %v8090_v40  ;;  %v2876_v32 = vadd.f32 %v2875_v50, %v2846_v56  ;;  %v9705_v56 = vpop.eup %9704 }
 0x3dd   :  { %v7831_v41 = vld [vmem:[#allocation2 + $0x4b0] sm:$0xf0]  ;;  %vm3754_vm6 = vweird.f32 %v9705_v56  ;;  %3114 = vmatmul.bf16.gmra.mxu0 %v11097_v35 }
 0x3de   :  { %v9171_v34 = vld [vmem:[#allocation2 + $0x54] sm:$0xf]  ;;  %v7834_v14 = vor.u32 %v9307_v20, %v7831_v41  ;;  %3212 = vmatpush.bf16.msra.mxu0 %v7578_v21  ;;  %vm3755_vm8 = vmor %vm3753_vm7, %vm3754_vm6  ;;  %3172 = vmatmul.bf16.gmra.mxu2 %v11105_v54 }
 0x3df   :  { %v7287_v63 = vld [vmem:[#allocation2 + $0x70] sm:$0xf0] }
 0x3e0   :  { %v9363_v10 = vld [vmem:[#allocation2 + $0x654] sm:$0xf]  ;;  %v7290_v48 = vor.u32 %v9171_v34, %v7287_v63  ;;  %v8269_v63 = vmul.f32 -1.442695, %v3544_v31  ;;  %3241 = vmatpush.bf16.msra.mxu1 %v7834_v14 }
 0x3e1   :  { %v8055_v46 = vld [vmem:[#allocation2 + $0x670] sm:$0xf0] }
 0x3e2   :  { %v8058_v5 = vor.u32 %v9363_v10, %v8055_v46  ;;  %v9235_v38 = vld [vmem:[#allocation2 + $0x254] sm:$0xf]  ;;  %v2905_v10 = vadd.f32 %v2904_v29, %v2876_v32  ;;  %v2878_v46 = vpop.f32.mrf.mxu0  ;;  %3184 = vmatpush.bf16.msrb.mxu3 %v7290_v48  ;;  %v3749_v29 = vmul.f32 %v9705_v56, %v11466_v30  ;;  %9706 = vpow2.f32 %v8269_v63 }
 0x3e3   :  { %v7543_v22 = vld [vmem:[#allocation2 + $0x270] sm:$0xf0] }
 0x3e4   :  { %v7546_v0 = vor.u32 %v9235_v38, %v7543_v22  ;;  %v9299_v53 = vld [vmem:[#allocation2 + $0x454] sm:$0xf]  ;;  %v11496_v38 = vsel %vm11475_vm4, %v4165_v23, %v4161_v33  ;;  %v11498_v22 = vadd.f32 1.0, %v9703_v60  ;;  %3271 = vmatpush.bf16.msra.mxu2 %v8058_v5  ;;  %v2934_v14 = vadd.f32 %v2933_v58, %v2905_v10  ;;  %v12763_v23 = vld [vmem:[#allocation73_spill] sm:$0xff] }
 0x3e5   :  { %v7799_v20 = vld [vmem:[#allocation2 + $0x470] sm:$0xf0]  ;;  %12762 = vst [vmem:[#allocation69_spill] sm:$0xff] %v11496_v38  ;;  %v3750_v8 = vsub.f32 1.0, %v3749_v29  ;;  %3143 = vmatmul.bf16.gmra.mxu1 %v11101_v28  ;;  %v9344_v38 = vld [vmem:[#allocation2 + $0x5b4] sm:$0xf0] }
 0x3e6   :  { %v9163_v40 = vld [vmem:[#allocation2 + $0x14] sm:$0xf]  ;;  %v7802_v16 = vor.u32 %v9299_v53, %v7799_v20  ;;  %3213 = vmatpush.bf16.msra.mxu0 %v7546_v0  ;;  %9708 = vrcp.f32 %v11498_v22  ;;  %v3552_v48 = vadd.f32 %v2934_v14, %v12763_v23  ;;  %v3757_v53 = vand.u32 2147483647, %v11466_v30  ;;  %v2849_v0 = vpop.f32.mrf.mxu3  ;;  %v12765_v14 = vld [vmem:[#allocation77_spill] sm:$0xff] }
 0x3e7   :  { %v7255_v41 = vld [vmem:[#allocation2 + $0x30] sm:$0xf0]  ;;  %v3759_v20 = vand.u32 2147483648, %v11466_v30  ;;  %v3751_v58 = vmul.f32 %v9705_v56, %v3750_v8  ;;  %vm3813_vm11 = vweird.f32 %v11498_v22 }
 0x3e8   :  { %v9355_v34 = vld [vmem:[#allocation2 + $0x614] sm:$0xf]  ;;  %v7258_v17 = vor.u32 %v9163_v40, %v7255_v41  ;;  %3242 = vmatpush.bf16.msra.mxu1 %v7802_v16  ;;  %v8273_v40 = vmul.f32 -1.442695, %v3552_v48  ;;  %v2879_v41 = vadd.f32 %v2878_v46, %v2849_v0  ;;  %v9707_v60 = vpop.eup %9706  ;;  %v2909_v16 = vpop.f32.mrf.mxu1  ;;  %vm3758_vm9 = vcmp.eq.f32.partialorder %v3757_v53, 8.507059e+37 }
 0x3e9   :  { %v8023_v50 = vld [vmem:[#allocation2 + $0x630] sm:$0xf0]  ;;  %v3752_v33 = vadd.f32 %v9705_v56, %v3751_v58 }
 0x3ea   :  { %v9227_v21 = vld [vmem:[#allocation2 + $0x214] sm:$0xf]  ;;  %v8026_v52 = vor.u32 %v9355_v34, %v8023_v50  ;;  %3185 = vmatpush.bf16.msrb.mxu3 %v7258_v17  ;;  %v2936_v34 = vpop.f32.mrf.mxu2  ;;  %9710 = vpow2.f32 %v8273_v40  ;;  %v2908_v63 = vadd.f32 %v2907_v6, %v2879_v41  ;;  %v2880_v10 = vpop.f32.mrf.mxu0  ;;  %v3696_v17 = vadd.f32 1.0, %v9707_v60 }
 0x3eb   :  { %v7511_v62 = vld [vmem:[#allocation2 + $0x230] sm:$0xf0]  ;;  %v3817_v6 = vand.u32 2147483647, %v11498_v22 }
 0x3ec   :  { %v9291_v27 = vld [vmem:[#allocation2 + $0x414] sm:$0xf]  ;;  %v7514_v5 = vor.u32 %v9227_v21, %v7511_v62  ;;  %3272 = vmatpush.bf16.msra.mxu2 %v8026_v52  ;;  %v9709_v50 = vpop.eup %9708  ;;  %v3760_v21 = vor.u32 1.1754944e-38, %v3759_v20  ;;  %v3756_v52 = vsel %vm3755_vm8, %v9705_v56, %v3752_v33  ;;  %v2937_v46 = vadd.f32 %v2936_v34, %v2908_v63 }
 0x3ed   :  { %v7767_v31 = vld [vmem:[#allocation2 + $0x430] sm:$0xf0]  ;;  %v3809_v62 = vmul.f32 %v9709_v50, %v11498_v22  ;;  %9712 = vrcp.f32 %v3696_v17  ;;  %vm3814_vm10 = vweird.f32 %v9709_v50  ;;  %vm3818_vm13 = vcmp.eq.f32.partialorder %v3817_v6, 8.507059e+37  ;;  %3186 = vmatmul.bf16.vlgmr.msrb.gmra.mxu3 %v11033_v51 }
 0x3ee   :  { %v7770_v32 = vor.u32 %v9291_v27, %v7767_v31  ;;  %3214 = vmatpush.bf16.msra.mxu0 %v7514_v5  ;;  %v11511_v27 = vsel %vm3758_vm9, %v3760_v21, %v3756_v52  ;;  %v3560_v30 = vadd.f32 %v2937_v46, %v12765_v14  ;;  %v3819_v31 = vand.u32 2147483648, %v11498_v22  ;;  %v2851_v8 = vpop.f32.mrf.mxu3  ;;  %vm3815_vm12 = vmor %vm3813_vm11, %vm3814_vm10 }
 0x3ef   :  { %12764 = vst [vmem:[#allocation73_spill] sm:$0xff] %v11511_v27  ;;  %v3810_v29 = vsub.f32 1.0, %v3809_v62  ;;  %v2881_v56 = vadd.f32 %v2880_v10, %v2851_v8  ;;  %v3877_v52 = vand.u32 2147483647, %v3696_v17  ;;  %v3879_v62 = vand.u32 2147483648, %v3696_v17  ;;  %3273 = vmatmul.bf16.vlgmr.msra.gmra.mxu2 %v11045_v43 }
 0x3f0   :  { %3243 = vmatpush.bf16.msra.mxu1 %v7770_v32  ;;  %v9711_v23 = vpop.eup %9710  ;;  %v8277_v5 = vmul.f32 -1.442695, %v3560_v30  ;;  %v2912_v40 = vpop.f32.mrf.mxu1  ;;  %v3820_v34 = vor.u32 1.1754944e-38, %v3819_v31  ;;  %vm3873_vm15 = vweird.f32 %v3696_v17 }
 0x3f1   :  { %v3811_v48 = vmul.f32 %v9709_v50, %v3810_v29  ;;  %v11516_v32 = vadd.f32 1.0, %v9711_v23  ;;  %v2910_v0 = vadd.f32 %v2909_v16, %v2881_v56  ;;  %v12767_v16 = vld [vmem:[#allocation81_spill] sm:$0xff]  ;;  %vm3878_vm2 = vcmp.eq.f32.partialorder %v3877_v52, 8.507059e+37  ;;  %3215 = vmatmul.bf16.vlgmr.msra.gmra.mxu0 %v11037_v39 }
 0x3f2   :  { %v2938_v53 = vpop.f32.mrf.mxu2  ;;  %9714 = vpow2.f32 %v8277_v5  ;;  %v2883_v58 = vpop.f32.mrf.mxu0  ;;  %v12769_v52 = vld [vmem:[#allocation85_spill] sm:$0xff] }
 0x3f3   :  { %v3812_v20 = vadd.f32 %v9709_v50, %v3811_v48  ;;  %v9713_v41 = vpop.eup %9712  ;;  %9716 = vrcp.f32 %v11516_v32  ;;  %v2939_v63 = vadd.f32 %v2938_v53, %v2910_v0  ;;  %v3880_v53 = vor.u32 1.1754944e-38, %v3879_v62 }
 0x3f4   :  { %v3869_v33 = vmul.f32 %v9713_v41, %v3696_v17  ;;  %vm3874_vm14 = vweird.f32 %v9713_v41  ;;  %v3937_v17 = vand.u32 2147483647, %v11516_v32  ;;  %vm3933_vm4 = vweird.f32 %v11516_v32 }
 0x3f5   :  { %v3816_v60 = vsel %vm3815_vm12, %v9709_v50, %v3812_v20  ;;  %v3568_v21 = vadd.f32 %v2939_v63, %v12767_v16  ;;  %vm3875_vm0 = vmor %vm3873_vm15, %vm3874_vm14  ;;  %3244 = vmatmul.bf16.vlgmr.msra.gmra.mxu1 %v11041_v44 }
 0x3f6   :  { %v11521_v10 = vsel %vm3818_vm13, %v3820_v34, %v3816_v60  ;;  %v3870_v22 = vsub.f32 1.0, %v3869_v33  ;;  %v2854_v46 = vpop.f32.mrf.mxu3  ;;  %v3939_v60 = vand.u32 2147483648, %v11516_v32  ;;  %vm3938_vm6 = vcmp.eq.f32.partialorder %v3937_v17, 8.507059e+37  ;;  %v9224_v17 = vld [vmem:[#allocation2 + $0x1f4] sm:$0xf0] }
 0x3f7   :  { %12766 = vst [vmem:[#allocation77_spill] sm:$0xff] %v11521_v10  ;;  %v8281_v14 = vmul.f32 -1.442695, %v3568_v21  ;;  %v2884_v30 = vadd.f32 %v2883_v58, %v2854_v46 }
 0x3f8   :  { %v9715_v50 = vpop.eup %9714  ;;  %v3871_v29 = vmul.f32 %v9713_v41, %v3870_v22  ;;  %v2914_v56 = vpop.f32.mrf.mxu1 }
 0x3f9   :  { %v9717_v6 = vpop.eup %9716  ;;  %v11527_v31 = vadd.f32 1.0, %v9715_v50  ;;  %9718 = vpow2.f32 %v8281_v14  ;;  %v2913_v34 = vadd.f32 %v2912_v40, %v2884_v30 }
 0x3fa   :  { %v2941_v8 = vpop.f32.mrf.mxu2  ;;  %v3872_v23 = vadd.f32 %v9713_v41, %v3871_v29  ;;  %v3929_v48 = vmul.f32 %v9717_v6, %v11516_v32  ;;  %v2885_v5 = vpop.f32.mrf.mxu0  ;;  %vm3934_vm3 = vweird.f32 %v9717_v6  ;;  %v3940_v29 = vor.u32 1.1754944e-38, %v3939_v60 }
 0x3fb   :  { %9720 = vrcp.f32 %v11527_v31  ;;  %v2942_v63 = vadd.f32 %v2941_v8, %v2913_v34  ;;  %v3997_v22 = vand.u32 2147483647, %v11527_v31  ;;  %vm3935_vm5 = vmor %vm3933_vm4, %vm3934_vm3  ;;  %vm3993_vm9 = vweird.f32 %v11527_v31 }
 0x3fc   :  { %v3876_v20 = vsel %vm3875_vm0, %v9713_v41, %v3872_v23  ;;  %v3930_v0 = vsub.f32 1.0, %v3929_v48  ;;  %v3999_v41 = vand.u32 2147483648, %v11527_v31 }
 0x3fd   :  { %v11531_v58 = vsel %vm3878_vm2, %v3880_v53, %v3876_v20  ;;  %v3576_v40 = vadd.f32 %v2942_v63, %v12769_v52  ;;  %vm11547_vm7 = vcmp.eq.f32.partialorder %v3997_v22, 8.507059e+37  ;;  %3191 = vmatmul.bf16.gmra.mxu3 %v11053_v24 }
 0x3fe   :  { %12768 = vst [vmem:[#allocation81_spill] sm:$0xff] %v11531_v58  ;;  %v3931_v33 = vmul.f32 %v9717_v6, %v3930_v0  ;;  %v2856_v16 = vpop.f32.mrf.mxu3  ;;  %v4000_v34 = vor.u32 1.1754944e-38, %v3999_v41  ;;  %v9208_v0 = vld [vmem:[#allocation2 + $0x174] sm:$0xf0] }
 0x3ff   :  { %v9719_v21 = vpop.eup %9718  ;;  %v2886_v46 = vadd.f32 %v2885_v5, %v2856_v16  ;;  %v8285_v23 = vmul.f32 -1.442695, %v3576_v40  ;;  %v7741_v40 = vld [vmem:[#allocation2 + $0x3d8] sm:$0xf]  ;;  %3278 = vmatmul.bf16.gmra.mxu2 %v11065_v57 }
 0x400   :  { %v3932_v62 = vadd.f32 %v9717_v6, %v3931_v33  ;;  %v11541_v14 = vadd.f32 1.0, %v9719_v21  ;;  %v3013_v53 = vpop.f32.mrf.mxu1  ;;  %v7485_v33 = vld [vmem:[#allocation2 + $0x1d8] sm:$0xf] }
 0x401   :  { %v11539_v50 = vpop.eup %9720  ;;  %v2915_v60 = vadd.f32 %v2914_v56, %v2886_v46  ;;  %v7486_v56 = vor.u32 %v9224_v17, %v7485_v33  ;;  %v8253_v21 = vld [vmem:[#allocation2 + $0x7d8] sm:$0xf]  ;;  %3220 = vmatmul.bf16.gmra.mxu0 %v11057_v36 }
 0x402   :  { %v2943_v30 = vpop.f32.mrf.mxu2  ;;  %v3936_v8 = vsel %vm3935_vm5, %v9717_v6, %v3932_v62  ;;  %v3989_v32 = vmul.f32 %v11539_v50, %v11527_v31  ;;  %v2984_v48 = vpop.f32.mrf.mxu0  ;;  %9722 = vrcp.f32 %v11541_v14  ;;  %vm3994_vm8 = vweird.f32 %v11539_v50  ;;  %v9416_v62 = vld [vmem:[#allocation2 + $0x7f4] sm:$0xf0] }
 0x403   :  { %v11545_v20 = vsel %vm3938_vm6, %v3940_v29, %v3936_v8  ;;  %9724 = vpow2.f32 %v8285_v23  ;;  %v4057_v6 = vand.u32 2147483647, %v11541_v14  ;;  %v4059_v22 = vand.u32 2147483648, %v11541_v14  ;;  %v9288_v46 = vld [vmem:[#allocation2 + $0x3f4] sm:$0xf0]  ;;  %vm11564_vm10 = vmor %vm3993_vm9, %vm3994_vm8  ;;  %3294 = vmatpush.bf16.msra.mxu3 %v7486_v56 }
 0x404   :  { %12770 = vst [vmem:[#allocation85_spill] sm:$0xff] %v11545_v20  ;;  %v3990_v5 = vsub.f32 1.0, %v3989_v32  ;;  %v2944_v16 = vadd.f32 %v2943_v30, %v2915_v60  ;;  %v8254_v52 = vor.u32 %v9416_v62, %v8253_v21  ;;  %v7997_v29 = vld [vmem:[#allocation2 + $0x5d8] sm:$0xf]  ;;  %v12775_v30 = vld [vmem:[#allocation89_spill] sm:$0xff]  ;;  %v7742_v60 = vor.u32 %v9288_v46, %v7741_v40 }
 0x405   :  { %v9352_v33 = vld [vmem:[#allocation2 + $0x5f4] sm:$0xf0]  ;;  %vm11583_vm12 = vcmp.eq.f32.partialorder %v4057_v6, 8.507059e+37  ;;  %vm4053_vm13 = vweird.f32 %v11541_v14  ;;  %3249 = vmatmul.bf16.gmra.mxu1 %v11061_v42 }
 0x406   :  { %v3991_v63 = vmul.f32 %v11539_v50, %v3990_v5  ;;  %v2955_v41 = vpop.f32.mrf.mxu3  ;;  %v3584_v23 = vadd.f32 %v2944_v16, %v12775_v30  ;;  %3381 = vmatpush.bf16.msrb.mxu2 %v8254_v52  ;;  %v7453_v21 = vld [vmem:[#allocation2 + $0x198] sm:$0xf]  ;;  %v7998_v10 = vor.u32 %v9352_v33, %v7997_v29  ;;  %3323 = vmatpush.bf16.msrb.mxu0 %v7742_v60 }
 0x407   :  { %v2985_v5 = vadd.f32 %v2984_v48, %v2955_v41  ;;  %v9216_v62 = vld [vmem:[#allocation2 + $0x1b4] sm:$0xf0] }
 0x408   :  { %v3992_v8 = vadd.f32 %v11539_v50, %v3991_v63  ;;  %v11569_v31 = vpop.eup %9722  ;;  %v8221_v63 = vld [vmem:[#allocation2 + $0x798] sm:$0xf]  ;;  %v8289_v56 = vmul.f32 -1.442695, %v3584_v23  ;;  %v3015_v41 = vpop.f32.mrf.mxu1  ;;  %v7454_v33 = vor.u32 %v9216_v62, %v7453_v21  ;;  %3352 = vmatpush.bf16.msrb.mxu1 %v7998_v10 }
 0x409   :  { %v9725_v20 = vpop.eup %9724  ;;  %v4049_v16 = vmul.f32 %v11569_v31, %v11541_v14  ;;  %v9408_v40 = vld [vmem:[#allocation2 + $0x7b4] sm:$0xf0]  ;;  %v3014_v30 = vadd.f32 %v3013_v53, %v2985_v5  ;;  %vm4054_vm11 = vweird.f32 %v11569_v31 }
 0x40a   :  { %v3042_v17 = vpop.f32.mrf.mxu2  ;;  %v3996_v27 = vsel %vm11564_vm10, %v11539_v50, %v3992_v8  ;;  %v2986_v48 = vpop.f32.mrf.mxu0  ;;  %v7709_v46 = vld [vmem:[#allocation2 + $0x398] sm:$0xf]  ;;  %v11580_v29 = vadd.f32 1.0, %v9725_v20  ;;  %9726 = vpow2.f32 %v8289_v56  ;;  %v8222_v58 = vor.u32 %v9408_v40, %v8221_v63  ;;  %3295 = vmatpush.bf16.msra.mxu3 %v7454_v33  ;;  %vm11594_vm14 = vmor %vm4053_vm13, %vm4054_vm11 }
 0x40b   :  { %v11578_v52 = vsel %vm11547_vm7, %v4000_v34, %v3996_v27  ;;  %v9280_v32 = vld [vmem:[#allocation2 + $0x3b4] sm:$0xf0]  ;;  %v4050_v8 = vsub.f32 1.0, %v4049_v16  ;;  %v4060_v27 = vor.u32 1.1754944e-38, %v4059_v22  ;;  %v3043_v20 = vadd.f32 %v3042_v17, %v3014_v30 }
 0x40c   :  { %12776 = vst [vmem:[#allocation89_spill] sm:$0xff] %v11578_v52  ;;  %v7965_v50 = vld [vmem:[#allocation2 + $0x598] sm:$0xf]  ;;  %v7710_v23 = vor.u32 %v9280_v32, %v7709_v46  ;;  %9728 = vrcp.f32 %v11580_v29  ;;  %3382 = vmatpush.bf16.msrb.mxu2 %v8222_v58  ;;  %v4117_v6 = vand.u32 2147483647, %v11580_v29  ;;  %vm4113_vm2 = vweird.f32 %v11580_v29 }
 0x40d   :  { %v7421_v53 = vld [vmem:[#allocation2 + $0x158] sm:$0xf]  ;;  %v4051_v10 = vmul.f32 %v11569_v31, %v4050_v8  ;;  %v7966_v34 = vor.u32 %v9344_v38, %v7965_v50  ;;  %v12781_v38 = vld [vmem:[#allocation68_spill] sm:$0xff]  ;;  %3196 = vmatmul.bf16.gmra.mxu3 %v11073_v2 }
 0x40e   :  { %3324 = vmatpush.bf16.msrb.mxu0 %v7710_v23  ;;  %v8189_v5 = vld [vmem:[#allocation2 + $0x758] sm:$0xf]  ;;  %v2957_v62 = vpop.f32.mrf.mxu3  ;;  %v7422_v63 = vor.u32 %v9208_v0, %v7421_v53  ;;  %v3529_v17 = vadd.f32 %v3043_v20, %v12781_v38  ;;  %vm11619_vm0 = vcmp.eq.f32.partialorder %v4117_v6, 8.507059e+37 }
 0x40f   :  { %v9400_v21 = vld [vmem:[#allocation2 + $0x774] sm:$0xf0]  ;;  %v4052_v40 = vadd.f32 %v11569_v31, %v4051_v10  ;;  %v2987_v46 = vadd.f32 %v2986_v48, %v2957_v62  ;;  %3353 = vmatpush.bf16.msrb.mxu1 %v7966_v34  ;;  %3283 = vmatmul.bf16.gmra.mxu2 %v11085_v47 }
 0x410   :  { %v8190_v22 = vor.u32 %v9400_v21, %v8189_v5  ;;  %v7677_v16 = vld [vmem:[#allocation2 + $0x358] sm:$0xf]  ;;  %3296 = vmatpush.bf16.msra.mxu3 %v7422_v63  ;;  %v9727_v10 = vpop.eup %9726  ;;  %v8262_v5 = vmul.f32 -1.442695, %v3529_v17  ;;  %v3018_v20 = vpop.f32.mrf.mxu1  ;;  %v12783_v17 = vld [vmem:[#allocation72_spill] sm:$0xff] }
 0x411   :  { %v9272_v56 = vld [vmem:[#allocation2 + $0x374] sm:$0xf0]  ;;  %v4056_v0 = vsel %vm11594_vm14, %v11569_v31, %v4052_v40  ;;  %v3016_v21 = vadd.f32 %v3015_v41, %v2987_v46  ;;  %3225 = vmatmul.bf16.gmra.mxu0 %v11077_v37 }
 0x412   :  { %v7678_v14 = vor.u32 %v9272_v56, %v7677_v16  ;;  %v7933_v30 = vld [vmem:[#allocation2 + $0x558] sm:$0xf]  ;;  %v3044_v32 = vpop.f32.mrf.mxu2  ;;  %v2989_v52 = vpop.f32.mrf.mxu0  ;;  %3383 = vmatpush.bf16.msrb.mxu2 %v8190_v22  ;;  %v11606_v63 = vsel %vm11583_vm12, %v4060_v27, %v4056_v0  ;;  %v11608_v56 = vadd.f32 1.0, %v9727_v10  ;;  %9730 = vpow2.f32 %v8262_v5 }
 0x413   :  { %v9336_v33 = vld [vmem:[#allocation2 + $0x574] sm:$0xf0]  ;;  %v11602_v16 = vpop.eup %9728  ;;  %12782 = vst [vmem:[#allocation68_spill] sm:$0xff] %v11606_v63  ;;  %v3045_v22 = vadd.f32 %v3044_v32, %v3016_v21 }
 0x414   :  { %v7389_v50 = vld [vmem:[#allocation2 + $0x118] sm:$0xf]  ;;  %v7934_v23 = vor.u32 %v9336_v33, %v7933_v30  ;;  %3325 = vmatpush.bf16.msrb.mxu0 %v7678_v14  ;;  %v4109_v41 = vmul.f32 %v11602_v16, %v11580_v29  ;;  %9732 = vrcp.f32 %v11608_v56  ;;  %vm4114_vm15 = vweird.f32 %v11602_v16 }
 0x415   :  { %v9200_v8 = vld [vmem:[#allocation2 + $0x134] sm:$0xf0]  ;;  %v3537_v46 = vadd.f32 %v3045_v22, %v12783_v17  ;;  %vm11633_vm3 = vmor %vm4113_vm2, %vm4114_vm15  ;;  %vm4173_vm6 = vweird.f32 %v11608_v56  ;;  %3254 = vmatmul.bf16.gmra.mxu1 %v11081_v18 }
 0x416   :  { %v8157_v53 = vld [vmem:[#allocation2 + $0x718] sm:$0xf]  ;;  %v7390_v48 = vor.u32 %v9200_v8, %v7389_v50  ;;  %3354 = vmatpush.bf16.msrb.mxu1 %v7934_v23  ;;  %v4110_v27 = vsub.f32 1.0, %v4109_v41  ;;  %v4119_v8 = vand.u32 2147483648, %v11580_v29  ;;  %v2960_v23 = vpop.f32.mrf.mxu3  ;;  %v4177_v29 = vand.u32 2147483647, %v11608_v56 }
 0x417   :  { %v9392_v34 = vld [vmem:[#allocation2 + $0x734] sm:$0xf0]  ;;  %v8266_v21 = vmul.f32 -1.442695, %v3537_v46 }
 0x418   :  { %v7645_v62 = vld [vmem:[#allocation2 + $0x318] sm:$0xf]  ;;  %v8158_v38 = vor.u32 %v9392_v34, %v8157_v53  ;;  %3297 = vmatpush.bf16.msra.mxu3 %v7390_v48  ;;  %v4111_v5 = vmul.f32 %v11602_v16, %v4110_v27  ;;  %v2990_v48 = vadd.f32 %v2989_v52, %v2960_v23  ;;  %v3020_v46 = vpop.f32.mrf.mxu1  ;;  %v4120_v23 = vor.u32 1.1754944e-38, %v4119_v8 }
 0x419   :  { %v9264_v58 = vld [vmem:[#allocation2 + $0x334] sm:$0xf0]  ;;  %9734 = vpow2.f32 %v8266_v21  ;;  %vm11654_vm5 = vcmp.eq.f32.partialorder %v4177_v29, 8.507059e+37 }
 0x41a   :  { %v7901_v31 = vld [vmem:[#allocation2 + $0x518] sm:$0xf]  ;;  %v7646_v14 = vor.u32 %v9264_v58, %v7645_v62  ;;  %3384 = vmatpush.bf16.msrb.mxu2 %v8158_v38  ;;  %v3047_v6 = vpop.f32.mrf.mxu2  ;;  %v9731_v38 = vpop.eup %9730  ;;  %v3019_v17 = vadd.f32 %v3018_v20, %v2990_v48 }
 0x41b   :  { %v9328_v40 = vld [vmem:[#allocation2 + $0x534] sm:$0xf0]  ;;  %v2991_v27 = vpop.f32.mrf.mxu0 }
 0x41c   :  { %v7357_v60 = vld [vmem:[#allocation2 + $0xd8] sm:$0xf]  ;;  %v7902_v33 = vor.u32 %v9328_v40, %v7901_v31  ;;  %3326 = vmatpush.bf16.msrb.mxu0 %v7646_v14 }
 0x41d   :  { %v9192_v30 = vld [vmem:[#allocation2 + $0xf4] sm:$0xf0]  ;;  %3201 = vmatmul.bf16.gmra.mxu3 %v11093_v25 }
 0x41e   :  { %v8125_v32 = vld [vmem:[#allocation2 + $0x6d8] sm:$0xf]  ;;  %v7358_v53 = vor.u32 %v9192_v30, %v7357_v60  ;;  %3355 = vmatpush.bf16.msrb.mxu1 %v7902_v33  ;;  %v4112_v60 = vadd.f32 %v11602_v16, %v4111_v5  ;;  %v11627_v33 = vpop.eup %9732 }
 0x41f   :  { %v9384_v10 = vld [vmem:[#allocation2 + $0x6f4] sm:$0xf0]  ;;  %v4169_v48 = vmul.f32 %v11627_v33, %v11608_v56  ;;  %vm4174_vm4 = vweird.f32 %v11627_v33  ;;  %3288 = vmatmul.bf16.gmra.mxu2 %v11105_v54 }
 0x420   :  { %v7613_v0 = vld [vmem:[#allocation2 + $0x2d8] sm:$0xf]  ;;  %v8126_v34 = vor.u32 %v9384_v10, %v8125_v32  ;;  %3298 = vmatpush.bf16.msra.mxu3 %v7358_v53  ;;  %v11637_v10 = vadd.f32 1.0, %v9731_v38  ;;  %v4116_v21 = vsel %vm11633_vm3, %v11602_v16, %v4112_v60  ;;  %v12789_v38 = vld [vmem:[#allocation76_spill] sm:$0xff]  ;;  %vm11664_vm7 = vmor %vm4173_vm6, %vm4174_vm4 }
 0x421   :  { %v9256_v62 = vld [vmem:[#allocation2 + $0x2f4] sm:$0xf0]  ;;  %3230 = vmatmul.bf16.gmra.mxu0 %v11097_v35 }
 0x422   :  { %v7869_v58 = vld [vmem:[#allocation2 + $0x4d8] sm:$0xf]  ;;  %v7614_v31 = vor.u32 %v9256_v62, %v7613_v0  ;;  %3385 = vmatpush.bf16.msrb.mxu2 %v8126_v34  ;;  %v3048_v62 = vadd.f32 %v3047_v6, %v3019_v17  ;;  %v11647_v34 = vsel %vm11619_vm0, %v4120_v23, %v4116_v21  ;;  %9736 = vrcp.f32 %v11637_v10  ;;  %v2962_v17 = vpop.f32.mrf.mxu3 }
 0x423   :  { %v7325_v41 = vld [vmem:[#allocation2 + $0x98] sm:$0xf]  ;;  %12788 = vst [vmem:[#allocation72_spill] sm:$0xff] %v11647_v34  ;;  %v9735_v34 = vpop.eup %9734  ;;  %vm3768_vm9 = vweird.f32 %v11637_v10 }
 0x424   :  { %v9184_v22 = vld [vmem:[#allocation2 + $0xb4] sm:$0xf0]  ;;  %3327 = vmatpush.bf16.msrb.mxu0 %v7614_v31  ;;  %v3545_v60 = vadd.f32 %v3048_v62, %v12789_v38  ;;  %v11659_v62 = vadd.f32 1.0, %v9735_v34 }
 0x425   :  { %v9320_v40 = vld [vmem:[#allocation2 + $0x4f4] sm:$0xf0]  ;;  %v7326_v52 = vor.u32 %v9184_v22, %v7325_v41  ;;  %3259 = vmatmul.bf16.gmra.mxu1 %v11101_v28 }
 0x426   :  { %v8093_v14 = vld [vmem:[#allocation2 + $0x698] sm:$0xf]  ;;  %v7870_v20 = vor.u32 %v9320_v40, %v7869_v58  ;;  %v4179_v58 = vand.u32 2147483648, %v11608_v56  ;;  %v4170_v40 = vsub.f32 1.0, %v4169_v48  ;;  %v3023_v56 = vpop.f32.mrf.mxu1  ;;  %vm3828_vm13 = vweird.f32 %v11659_v62 }
 0x427   :  { %v9376_v30 = vld [vmem:[#allocation2 + $0x6b4] sm:$0xf0]  ;;  %3299 = vmatpush.bf16.msra.mxu3 %v7326_v52  ;;  %v8270_v52 = vmul.f32 -1.442695, %v3545_v60 }
 0x428   :  { %v8094_v0 = vor.u32 %v9376_v30, %v8093_v14  ;;  %v7581_v53 = vld [vmem:[#allocation2 + $0x298] sm:$0xf]  ;;  %3356 = vmatpush.bf16.msrb.mxu1 %v7870_v20  ;;  %v4171_v20 = vmul.f32 %v11627_v33, %v4170_v40  ;;  %v2994_v40 = vpop.f32.mrf.mxu0  ;;  %v9737_v60 = vpop.eup %9736 }
 0x429   :  { %v9248_v5 = vld [vmem:[#allocation2 + $0x2b4] sm:$0xf0]  ;;  %9738 = vpow2.f32 %v8270_v52  ;;  %vm3769_vm8 = vweird.f32 %v9737_v60 }
 0x42a   :  { %v7837_v41 = vld [vmem:[#allocation2 + $0x498] sm:$0xf]  ;;  %v7582_v14 = vor.u32 %v9248_v5, %v7581_v53  ;;  %3386 = vmatpush.bf16.msrb.mxu2 %v8094_v0  ;;  %v2992_v53 = vadd.f32 %v2991_v27, %v2962_v17  ;;  %v4180_v5 = vor.u32 1.1754944e-38, %v4179_v58  ;;  %v3049_v0 = vpop.f32.mrf.mxu2  ;;  %9740 = vrcp.f32 %v11659_v62  ;;  %v2965_v48 = vpop.f32.mrf.mxu3  ;;  %vm3770_vm10 = vmor %vm3768_vm9, %vm3769_vm8 }
 0x42b   :  { %v9312_v8 = vld [vmem:[#allocation2 + $0x4b4] sm:$0xf0] }
 0x42c   :  { %v7293_v22 = vld [vmem:[#allocation2 + $0x58] sm:$0xf]  ;;  %v7838_v30 = vor.u32 %v9312_v8, %v7837_v41  ;;  %3328 = vmatpush.bf16.msrb.mxu0 %v7582_v14  ;;  %v3021_v27 = vadd.f32 %v3020_v46, %v2992_v53 }
 0x42d   :  { %v9176_v16 = vld [vmem:[#allocation2 + $0x74] sm:$0xf0] }
 0x42e   :  { %v8061_v6 = vld [vmem:[#allocation2 + $0x658] sm:$0xf]  ;;  %v7294_v50 = vor.u32 %v9176_v16, %v7293_v22  ;;  %3357 = vmatpush.bf16.msrb.mxu1 %v7838_v30  ;;  %v4172_v16 = vadd.f32 %v11627_v33, %v4171_v20  ;;  %v3764_v30 = vmul.f32 %v9737_v60, %v11637_v10  ;;  %v3050_v46 = vadd.f32 %v3049_v0, %v3021_v27 }
 0x42f   :  { %v9368_v31 = vld [vmem:[#allocation2 + $0x674] sm:$0xf0] }
 0x430   :  { %v8062_v32 = vor.u32 %v9368_v31, %v8061_v6  ;;  %v7549_v23 = vld [vmem:[#allocation2 + $0x258] sm:$0xf]  ;;  %3300 = vmatpush.bf16.msra.mxu3 %v7294_v50  ;;  %v4176_v17 = vsel %vm11664_vm7, %v11627_v33, %v4172_v16  ;;  %v3765_v52 = vsub.f32 1.0, %v3764_v30  ;;  %v12795_v33 = vld [vmem:[#allocation80_spill] sm:$0xff]  ;;  %v9739_v16 = vpop.eup %9738  ;;  %v3025_v30 = vpop.f32.mrf.mxu1 }
 0x431   :  { %v9240_v21 = vld [vmem:[#allocation2 + $0x274] sm:$0xf0]  ;;  %v11676_v20 = vsel %vm11654_vm5, %v4180_v5, %v4176_v17  ;;  %v3553_v53 = vadd.f32 %v3050_v46, %v12795_v33  ;;  %v11684_v17 = vadd.f32 1.0, %v9739_v16 }
 0x432   :  { %v7550_v41 = vor.u32 %v9240_v21, %v7549_v23  ;;  %v7261_v8 = vld [vmem:[#allocation2 + $0x18] sm:$0xf]  ;;  %3387 = vmatpush.bf16.msrb.mxu2 %v8062_v32  ;;  %12794 = vst [vmem:[#allocation76_spill] sm:$0xff] %v11676_v20  ;;  %v3766_v29 = vmul.f32 %v9737_v60, %v3765_v52 }
 0x433   :  { %v9168_v22 = vld [vmem:[#allocation2 + $0x34] sm:$0xf0]  ;;  %v8274_v27 = vmul.f32 -1.442695, %v3553_v53  ;;  %v2967_v53 = vpop.f32.mrf.mxu3  ;;  %vm3888_vm2 = vweird.f32 %v11684_v17 }
 0x434   :  { %v7262_v34 = vor.u32 %v9168_v22, %v7261_v8  ;;  %v7805_v58 = vld [vmem:[#allocation2 + $0x458] sm:$0xf]  ;;  %3329 = vmatpush.bf16.msrb.mxu0 %v7550_v41  ;;  %v3772_v8 = vand.u32 2147483647, %v11637_v10  ;;  %v3774_v22 = vand.u32 2147483648, %v11637_v10 }
 0x435   :  { %v9304_v38 = vld [vmem:[#allocation2 + $0x474] sm:$0xf0]  ;;  %9742 = vpow2.f32 %v8274_v27  ;;  %v3832_v10 = vand.u32 2147483647, %v11659_v62 }
 0x436   :  { %v8029_v14 = vld [vmem:[#allocation2 + $0x618] sm:$0xf]  ;;  %v7806_v32 = vor.u32 %v9304_v38, %v7805_v58  ;;  %3301 = vmatpush.bf16.msra.mxu3 %v7262_v34  ;;  %v2995_v58 = vadd.f32 %v2994_v40, %v2965_v48  ;;  %v9741_v38 = vpop.eup %9740  ;;  %v3052_v34 = vpop.f32.mrf.mxu2  ;;  %v3775_v46 = vor.u32 1.1754944e-38, %v3774_v22  ;;  %9744 = vrcp.f32 %v11684_v17  ;;  %v12797_v22 = vld [vmem:[#allocation84_spill] sm:$0xff] }
 0x437   :  { %v9360_v6 = vld [vmem:[#allocation2 + $0x634] sm:$0xf0]  ;;  %vm3773_vm11 = vcmp.eq.f32.partialorder %v3772_v8, 8.507059e+37  ;;  %vm3829_vm12 = vweird.f32 %v9741_v38  ;;  %vm3833_vm15 = vcmp.eq.f32.partialorder %v3832_v10, 8.507059e+37 }
 0x438   :  { %v7517_v31 = vld [vmem:[#allocation2 + $0x218] sm:$0xf]  ;;  %v8030_v0 = vor.u32 %v9360_v6, %v8029_v14  ;;  %3358 = vmatpush.bf16.msrb.mxu1 %v7806_v32  ;;  %v3767_v14 = vadd.f32 %v9737_v60, %v3766_v29  ;;  %v3824_v6 = vmul.f32 %v9741_v38, %v11659_v62  ;;  %v3834_v32 = vand.u32 2147483648, %v11659_v62  ;;  %vm3830_vm14 = vmor %vm3828_vm13, %vm3829_vm12 }
 0x439   :  { %v9232_v50 = vld [vmem:[#allocation2 + $0x234] sm:$0xf0]  ;;  %3302 = vmatmul.bf16.vlgmr.msra.gmra.mxu3 %v11033_v51 }
 0x43a   :  { %v7773_v23 = vld [vmem:[#allocation2 + $0x418] sm:$0xf]  ;;  %v7518_v41 = vor.u32 %v9232_v50, %v7517_v31  ;;  %3388 = vmatpush.bf16.msrb.mxu2 %v8030_v0  ;;  %v2996_v31 = vpop.f32.mrf.mxu0  ;;  %v3771_v40 = vsel %vm3770_vm10, %v9737_v60, %v3767_v14  ;;  %v3825_v50 = vsub.f32 1.0, %v3824_v6 }
 0x43b   :  { %v9296_v21 = vld [vmem:[#allocation2 + $0x434] sm:$0xf0]  ;;  %v9743_v0 = vpop.eup %9742  ;;  %v2997_v60 = vadd.f32 %v2996_v31, %v2967_v53  ;;  %v3894_v31 = vand.u32 2147483648, %v11684_v17 }
 0x43c   :  { %v7774_v5 = vor.u32 %v9296_v21, %v7773_v23  ;;  %3330 = vmatpush.bf16.msrb.mxu0 %v7518_v41  ;;  %v3024_v23 = vadd.f32 %v3023_v56, %v2995_v58  ;;  %v11689_v21 = vsel %vm3773_vm11, %v3775_v46, %v3771_v40  ;;  %v3826_v52 = vmul.f32 %v9741_v38, %v3825_v50  ;;  %v9745_v8 = vpop.eup %9744 }
 0x43d   :  { %12796 = vst [vmem:[#allocation80_spill] sm:$0xff] %v11689_v21  ;;  %v3835_v56 = vor.u32 1.1754944e-38, %v3834_v32  ;;  %v3884_v27 = vmul.f32 %v9745_v8, %v11684_v17  ;;  %v3026_v62 = vadd.f32 %v3025_v30, %v2997_v60  ;;  %vm3889_vm0 = vweird.f32 %v9745_v8  ;;  %v12799_v30 = vld [vmem:[#allocation88_spill] sm:$0xff]  ;;  %3389 = vmatmul.bf16.vlgmr.msrb.gmra.mxu2 %v11045_v43 }
 0x43e   :  { %3359 = vmatpush.bf16.msrb.mxu1 %v7774_v5  ;;  %v3053_v33 = vadd.f32 %v3052_v34, %v3024_v23  ;;  %v3827_v41 = vadd.f32 %v9741_v38, %v3826_v52  ;;  %v3701_v5 = vadd.f32 1.0, %v9743_v0  ;;  %v3054_v16 = vpop.f32.mrf.mxu2  ;;  %v3028_v34 = vpop.f32.mrf.mxu1  ;;  %v3892_v40 = vand.u32 2147483647, %v11684_v17  ;;  %vm3890_vm3 = vmor %vm3888_vm2, %vm3889_vm0 }
 0x43f   :  { %v3885_v46 = vsub.f32 1.0, %v3884_v27  ;;  %v3055_v50 = vadd.f32 %v3054_v16, %v3026_v62  ;;  %v2970_v23 = vpop.f32.mrf.mxu3  ;;  %v3895_v53 = vor.u32 1.1754944e-38, %v3894_v31  ;;  %3331 = vmatmul.bf16.vlgmr.msrb.gmra.mxu0 %v11037_v39 }
 0x440   :  { %v3561_v48 = vadd.f32 %v3053_v33, %v12797_v22  ;;  %v3831_v29 = vsel %vm3830_vm14, %v9741_v38, %v3827_v41  ;;  %9746 = vrcp.f32 %v3701_v5  ;;  %vm3893_vm4 = vcmp.eq.f32.partialorder %v3892_v40, 8.507059e+37  ;;  %v12801_v40 = vld [vmem:[#allocation92_spill] sm:$0xff] }
 0x441   :  { %v11696_v6 = vsel %vm3833_vm15, %v3835_v56, %v3831_v29  ;;  %v3886_v38 = vmul.f32 %v9745_v8, %v3885_v46  ;;  %v3569_v52 = vadd.f32 %v3055_v50, %v12799_v30  ;;  %v3954_v46 = vand.u32 2147483648, %v3701_v5  ;;  %3360 = vmatmul.bf16.vlgmr.msrb.gmra.mxu1 %v11041_v44 }
 0x442   :  { %v8278_v58 = vmul.f32 -1.442695, %v3561_v48  ;;  %v2999_v14 = vpop.f32.mrf.mxu0  ;;  %12798 = vst [vmem:[#allocation84_spill] sm:$0xff] %v11696_v6  ;;  %v3952_v62 = vand.u32 2147483647, %v3701_v5  ;;  %vm3948_vm6 = vweird.f32 %v3701_v5 }
 0x443   :  { %v3887_v32 = vadd.f32 %v9745_v8, %v3886_v38  ;;  %v3000_v10 = vadd.f32 %v2999_v14, %v2970_v23  ;;  %v8282_v60 = vmul.f32 -1.442695, %v3569_v52  ;;  %v7999_v6 = vld [vmem:[#allocation2 + $0x5f8] sm:$0xf0] }
 0x444   :  { %9748 = vpow2.f32 %v8278_v58  ;;  %vm3953_vm8 = vcmp.eq.f32.partialorder %v3952_v62, 8.507059e+37  ;;  %v12803_v62 = vld [vmem:[#allocation96_spill] sm:$0xff] }
 0x445   :  { %v3891_v22 = vsel %vm3890_vm3, %v9745_v8, %v3887_v32  ;;  %v3029_v58 = vadd.f32 %v3028_v34, %v3000_v10  ;;  %9750 = vpow2.f32 %v8282_v60  ;;  %v3955_v32 = vor.u32 1.1754944e-38, %v3954_v46  ;;  %v9412_v46 = vld [vmem:[#allocation2 + $0x7dc] sm:$0xf] }
 0x446   :  { %v9747_v33 = vpop.eup %9746  ;;  %v3057_v0 = vpop.f32.mrf.mxu2  ;;  %v11706_v29 = vsel %vm3893_vm4, %v3895_v53, %v3891_v22 }
 0x447   :  { %v3944_v48 = vmul.f32 %v9747_v33, %v3701_v5  ;;  %v3030_v16 = vpop.f32.mrf.mxu1  ;;  %12800 = vst [vmem:[#allocation88_spill] sm:$0xff] %v11706_v29  ;;  %vm3949_vm5 = vweird.f32 %v9747_v33  ;;  %v3058_v31 = vadd.f32 %v3057_v0, %v3029_v58  ;;  %v2972_v8 = vpop.f32.mrf.mxu3  ;;  %v9220_v58 = vld [vmem:[#allocation2 + $0x1dc] sm:$0xf] }
 0x448   :  { %vm3950_vm7 = vmor %vm3948_vm6, %vm3949_vm5 }
 0x449   :  { %v3945_v17 = vsub.f32 1.0, %v3944_v48  ;;  %v3577_v50 = vadd.f32 %v3058_v31, %v12801_v40  ;;  %v9284_v40 = vld [vmem:[#allocation2 + $0x3dc] sm:$0xf]  ;;  %3307 = vmatmul.bf16.gmra.mxu3 %v11053_v24 }
 0x44a   :  { %v9749_v41 = vpop.eup %9748  ;;  %v3001_v56 = vpop.f32.mrf.mxu0 }
 0x44b   :  { %v11708_v27 = vadd.f32 1.0, %v9749_v41  ;;  %v3946_v14 = vmul.f32 %v9747_v33, %v3945_v17  ;;  %v3002_v23 = vadd.f32 %v3001_v56, %v2972_v8  ;;  %v9751_v52 = vpop.eup %9750  ;;  %v8286_v10 = vmul.f32 -1.442695, %v3577_v50  ;;  %v7487_v56 = vld [vmem:[#allocation2 + $0x1f8] sm:$0xf0] }
 0x44c   :  { %v11717_v5 = vadd.f32 1.0, %v9751_v52  ;;  %v7490_v8 = vor.u32 %v9220_v58, %v7487_v56  ;;  %v9348_v52 = vld [vmem:[#allocation2 + $0x5dc] sm:$0xf] }
 0x44d   :  { %9752 = vrcp.f32 %v11708_v27  ;;  %v3947_v38 = vadd.f32 %v9747_v33, %v3946_v14  ;;  %v3031_v53 = vadd.f32 %v3030_v16, %v3002_v23  ;;  %v4014_v0 = vand.u32 2147483648, %v11708_v27  ;;  %v9212_v58 = vld [vmem:[#allocation2 + $0x19c] sm:$0xf]  ;;  %3394 = vmatmul.bf16.gmra.mxu2 %v11065_v57 }
 0x44e   :  { %v3059_v30 = vpop.f32.mrf.mxu2  ;;  %9754 = vpow2.f32 %v8286_v10  ;;  %v4012_v16 = vand.u32 2147483647, %v11708_v27  ;;  %3410 = vmatpush.bf16.msrb.mxu3 %v7490_v8  ;;  %vm4008_vm10 = vweird.f32 %v11708_v27  ;;  %v7455_v56 = vld [vmem:[#allocation2 + $0x1b8] sm:$0xf0]  ;;  %vm4068_vm15 = vweird.f32 %v11717_v5 }
 0x44f   :  { %v3951_v34 = vsel %vm3950_vm7, %v9747_v33, %v3947_v38  ;;  %v3129_v22 = vpop.f32.mrf.mxu1  ;;  %v3060_v33 = vadd.f32 %v3059_v30, %v3031_v53  ;;  %9756 = vrcp.f32 %v11717_v5  ;;  %v8255_v38 = vld [vmem:[#allocation2 + $0x7f8] sm:$0xf0]  ;;  %v4015_v50 = vor.u32 1.1754944e-38, %v4014_v0  ;;  %v3071_v23 = vpop.f32.mrf.mxu3  ;;  %3336 = vmatmul.bf16.gmra.mxu0 %v11057_v36 }
 0x450   :  { %v11714_v60 = vsel %vm3953_vm8, %v3955_v32, %v3951_v34  ;;  %v8258_v32 = vor.u32 %v9412_v46, %v8255_v38  ;;  %v7743_v30 = vld [vmem:[#allocation2 + $0x3f8] sm:$0xf0]  ;;  %vm4013_vm12 = vcmp.eq.f32.partialorder %v4012_v16, 8.507059e+37 }
 0x451   :  { %12802 = vst [vmem:[#allocation92_spill] sm:$0xff] %v11714_v60  ;;  %v3585_v31 = vadd.f32 %v3060_v33, %v12803_v62  ;;  %v8002_v62 = vor.u32 %v9348_v52, %v7999_v6  ;;  %v9404_v60 = vld [vmem:[#allocation2 + $0x79c] sm:$0xf]  ;;  %v4072_v6 = vand.u32 2147483647, %v11717_v5  ;;  %3365 = vmatmul.bf16.gmra.mxu1 %v11061_v42 }
 0x452   :  { %v3100_v41 = vpop.f32.mrf.mxu0  ;;  %3497 = vmatpush.bf16.msra.mxu2 %v8258_v32  ;;  %v9276_v8 = vld [vmem:[#allocation2 + $0x39c] sm:$0xf] }
 0x453   :  { %v11712_v48 = vpop.eup %9752  ;;  %v8290_v10 = vmul.f32 -1.442695, %v3585_v31  ;;  %v3101_v53 = vadd.f32 %v3100_v41, %v3071_v23  ;;  %v7458_v31 = vor.u32 %v9212_v58, %v7455_v56  ;;  %v8223_v41 = vld [vmem:[#allocation2 + $0x7b8] sm:$0xf0]  ;;  %3468 = vmatpush.bf16.msra.mxu1 %v8002_v62  ;;  %vm11750_vm14 = vcmp.eq.f32.partialorder %v4072_v6, 8.507059e+37 }
 0x454   :  { %v4004_v17 = vmul.f32 %v11712_v48, %v11708_v27  ;;  %vm4009_vm9 = vweird.f32 %v11712_v48  ;;  %v9755_v0 = vpop.eup %9754  ;;  %v4074_v27 = vand.u32 2147483648, %v11717_v5  ;;  %v9204_v56 = vld [vmem:[#allocation2 + $0x15c] sm:$0xf] }
 0x455   :  { %9758 = vpow2.f32 %v8290_v10  ;;  %v3130_v38 = vadd.f32 %v3129_v22, %v3101_v53  ;;  %v11732_v23 = vpop.eup %9756  ;;  %vm4010_vm11 = vmor %vm4008_vm10, %vm4009_vm9  ;;  %v11739_v32 = vadd.f32 1.0, %v9755_v0  ;;  %v8226_v22 = vor.u32 %v9404_v60, %v8223_v41  ;;  %3411 = vmatpush.bf16.msrb.mxu3 %v7458_v31  ;;  %v9340_v53 = vld [vmem:[#allocation2 + $0x59c] sm:$0xf]  ;;  %v12805_v0 = vld [vmem:[#allocation101_spill] sm:$0xff] }
 0x456   :  { %v4005_v14 = vsub.f32 1.0, %v4004_v17  ;;  %v7746_v17 = vor.u32 %v9284_v40, %v7743_v30  ;;  %v3158_v33 = vpop.f32.mrf.mxu2  ;;  %v7711_v40 = vld [vmem:[#allocation2 + $0x3b8] sm:$0xf0]  ;;  %vm4069_vm13 = vweird.f32 %v11732_v23 }
 0x457   :  { %v7714_v30 = vor.u32 %v9276_v8, %v7711_v40  ;;  %v3159_v10 = vadd.f32 %v3158_v33, %v3130_v38  ;;  %9760 = vrcp.f32 %v11739_v32  ;;  %3498 = vmatpush.bf16.msra.mxu2 %v8226_v22  ;;  %v7423_v60 = vld [vmem:[#allocation2 + $0x178] sm:$0xf0]  ;;  %vm11762_vm0 = vmor %vm4068_vm15, %vm4069_vm13  ;;  %vm4128_vm3 = vweird.f32 %v11739_v32 }
 0x458   :  { %v4006_v34 = vmul.f32 %v11712_v48, %v4005_v14  ;;  %v3131_v14 = vpop.f32.mrf.mxu1  ;;  %3439 = vmatpush.bf16.msra.mxu0 %v7746_v17  ;;  %v7967_v17 = vld [vmem:[#allocation2 + $0x5b8] sm:$0xf0]  ;;  %v7426_v16 = vor.u32 %v9204_v56, %v7423_v60  ;;  %v4075_v56 = vor.u32 1.1754944e-38, %v4074_v27 }
 0x459   :  { %v8191_v41 = vld [vmem:[#allocation2 + $0x778] sm:$0xf0]  ;;  %v7970_v38 = vor.u32 %v9340_v53, %v7967_v17  ;;  %3312 = vmatmul.bf16.gmra.mxu3 %v11073_v2 }
 0x45a   :  { %v4007_v46 = vadd.f32 %v11712_v48, %v4006_v34  ;;  %v3102_v21 = vpop.f32.mrf.mxu0  ;;  %v4064_v34 = vmul.f32 %v11732_v23, %v11717_v5  ;;  %v9268_v8 = vld [vmem:[#allocation2 + $0x35c] sm:$0xf]  ;;  %3412 = vmatpush.bf16.msrb.mxu3 %v7426_v16 }
 0x45b   :  { %v7679_v40 = vld [vmem:[#allocation2 + $0x378] sm:$0xf0]  ;;  %v9759_v22 = vpop.eup %9758  ;;  %3469 = vmatpush.bf16.msra.mxu1 %v7970_v38 }
 0x45c   :  { %v4011_v52 = vsel %vm4010_vm11, %v11712_v48, %v4007_v46  ;;  %v4065_v62 = vsub.f32 1.0, %v4064_v34  ;;  %v3530_v48 = vadd.f32 %v3159_v10, %v12805_v0  ;;  %3440 = vmatpush.bf16.msra.mxu0 %v7714_v30  ;;  %v9396_v46 = vld [vmem:[#allocation2 + $0x75c] sm:$0xf]  ;;  %v11757_v6 = vadd.f32 1.0, %v9759_v22 }
 0x45d   :  { %v11744_v58 = vsel %vm4013_vm12, %v4015_v50, %v4011_v52  ;;  %v3073_v50 = vpop.f32.mrf.mxu3  ;;  %v8194_v31 = vor.u32 %v9396_v46, %v8191_v41  ;;  %v7682_v53 = vor.u32 %v9268_v8, %v7679_v40  ;;  %v9196_v17 = vld [vmem:[#allocation2 + $0x11c] sm:$0xf]  ;;  %3399 = vmatmul.bf16.gmra.mxu2 %v11085_v47 }
 0x45e   :  { %12804 = vst [vmem:[#allocation96_spill] sm:$0xff] %v11744_v58  ;;  %v4066_v52 = vmul.f32 %v11732_v23, %v4065_v62  ;;  %v8291_v30 = vmul.f32 -1.442695, %v3530_v48  ;;  %v3103_v10 = vadd.f32 %v3102_v21, %v3073_v50  ;;  %v3160_v60 = vpop.f32.mrf.mxu2  ;;  %v7391_v0 = vld [vmem:[#allocation2 + $0x138] sm:$0xf0]  ;;  %v11768_v50 = vpop.eup %9760  ;;  %vm4188_vm7 = vweird.f32 %v11757_v6 }
 0x45f   :  { %3499 = vmatpush.bf16.msra.mxu2 %v8194_v31  ;;  %v7394_v48 = vor.u32 %v9196_v17, %v7391_v0  ;;  %v9332_v16 = vld [vmem:[#allocation2 + $0x55c] sm:$0xf]  ;;  %vm4129_vm2 = vweird.f32 %v11768_v50  ;;  %3341 = vmatmul.bf16.gmra.mxu0 %v11077_v37 }
 0x460   :  { %v4067_v46 = vadd.f32 %v11732_v23, %v4066_v52  ;;  %9762 = vpow2.f32 %v8291_v30  ;;  %v3132_v21 = vadd.f32 %v3131_v14, %v3103_v10  ;;  %v11766_v27 = vpop.f32.mrf.mxu1  ;;  %v7935_v41 = vld [vmem:[#allocation2 + $0x578] sm:$0xf0]  ;;  %3441 = vmatpush.bf16.msra.mxu0 %v7682_v53  ;;  %v4124_v14 = vmul.f32 %v11768_v50, %v11739_v32  ;;  %vm11808_vm5 = vmor %vm4128_vm3, %vm4129_vm2 }
 0x461   :  { %9764 = vrcp.f32 %v11757_v6  ;;  %v9388_v38 = vld [vmem:[#allocation2 + $0x71c] sm:$0xf]  ;;  %v4134_v53 = vand.u32 2147483648, %v11739_v32  ;;  %3413 = vmatpush.bf16.msrb.mxu3 %v7394_v48  ;;  %3370 = vmatmul.bf16.gmra.mxu1 %v11081_v18 }
 0x462   :  { %v3105_v5 = vpop.f32.mrf.mxu0  ;;  %v8159_v31 = vld [vmem:[#allocation2 + $0x738] sm:$0xf0]  ;;  %v4071_v40 = vsel %vm11762_vm0, %v11732_v23, %v4067_v46  ;;  %v3161_v22 = vadd.f32 %v3160_v60, %v3132_v21  ;;  %v7938_v23 = vor.u32 %v9332_v16, %v7935_v41  ;;  %v4125_v62 = vsub.f32 1.0, %v4124_v14  ;;  %v12811_v60 = vld [vmem:[#allocation104_spill] sm:$0xff] }
 0x463   :  { %v9260_v8 = vld [vmem:[#allocation2 + $0x31c] sm:$0xf]  ;;  %v11779_v17 = vsel %vm11750_vm14, %v4075_v56, %v4071_v40  ;;  %v8162_v34 = vor.u32 %v9388_v38, %v8159_v31 }
 0x464   :  { %v7647_v52 = vld [vmem:[#allocation2 + $0x338] sm:$0xf0]  ;;  %12810 = vst [vmem:[#allocation101_spill] sm:$0xff] %v11779_v17  ;;  %v3538_v21 = vadd.f32 %v3161_v22, %v12811_v60  ;;  %3470 = vmatpush.bf16.msra.mxu1 %v7938_v23  ;;  %v4126_v14 = vmul.f32 %v11768_v50, %v4125_v62 }
 0x465   :  { %v9324_v30 = vld [vmem:[#allocation2 + $0x51c] sm:$0xf]  ;;  %v7650_v58 = vor.u32 %v9260_v8, %v7647_v52  ;;  %v3076_v40 = vpop.f32.mrf.mxu3  ;;  %3500 = vmatpush.bf16.msra.mxu2 %v8162_v34  ;;  %v12812_v52 = vand.u32 2147483647, %v11739_v32  ;;  %v4135_v34 = vor.u32 1.1754944e-38, %v4134_v53 }
 0x466   :  { %v7903_v10 = vld [vmem:[#allocation2 + $0x538] sm:$0xf0]  ;;  %v9763_v63 = vpop.eup %9762  ;;  %v8295_v22 = vmul.f32 -1.442695, %v3538_v21  ;;  %v3106_v60 = vadd.f32 %v3105_v5, %v3076_v40  ;;  %v3163_v23 = vpop.f32.mrf.mxu2  ;;  %v4192_v53 = vand.u32 2147483647, %v11757_v6 }
 0x467   :  { %v9188_v0 = vld [vmem:[#allocation2 + $0xdc] sm:$0xf]  ;;  %v7906_v29 = vor.u32 %v9324_v30, %v7903_v10  ;;  %3442 = vmatpush.bf16.msra.mxu0 %v7650_v58  ;;  %v11788_v8 = vpop.eup %9764  ;;  %vm11793_vm4 = vcmp.eq.f32.partialorder %v12812_v52, 8.507059e+37  ;;  %v11797_v10 = vadd.f32 1.0, %v9763_v63  ;;  %v4127_v58 = vadd.f32 %v11768_v50, %v4126_v14 }
 0x468   :  { %v7359_v46 = vld [vmem:[#allocation2 + $0xf8] sm:$0xf0]  ;;  %9766 = vpow2.f32 %v8295_v22  ;;  %v11802_v21 = vpop.f32.mrf.mxu1  ;;  %v3135_v22 = vadd.f32 %v11766_v27, %v3106_v60  ;;  %vm4189_vm6 = vweird.f32 %v11788_v8  ;;  %vm11827_vm8 = vcmp.eq.f32.partialorder %v4192_v53, 8.507059e+37 }
 0x469   :  { %v9380_v33 = vld [vmem:[#allocation2 + $0x6dc] sm:$0xf]  ;;  %v7362_v17 = vor.u32 %v9188_v0, %v7359_v46  ;;  %v4184_v46 = vmul.f32 %v11788_v8, %v11757_v6  ;;  %9768 = vrcp.f32 %v11797_v10  ;;  %3471 = vmatpush.bf16.msra.mxu1 %v7906_v29  ;;  %v4194_v29 = vand.u32 2147483648, %v11757_v6  ;;  %vm11838_vm9 = vmor %vm4188_vm7, %vm4189_vm6  ;;  %3317 = vmatmul.bf16.gmra.mxu3 %v11093_v25 }
 0x46a   :  { %v8127_v56 = vld [vmem:[#allocation2 + $0x6f8] sm:$0xf0]  ;;  %v3107_v62 = vpop.f32.mrf.mxu0  ;;  %vm4331_vm11 = vweird.f32 %v11797_v10 }
 0x46b   :  { %v8130_v20 = vor.u32 %v9380_v33, %v8127_v56  ;;  %v9252_v16 = vld [vmem:[#allocation2 + $0x2dc] sm:$0xf]  ;;  %3414 = vmatpush.bf16.msrb.mxu3 %v7362_v17  ;;  %v4131_v17 = vsel %vm11808_vm5, %v11768_v50, %v4127_v58  ;;  %v4185_v14 = vsub.f32 1.0, %v4184_v46  ;;  %v3164_v58 = vadd.f32 %v3163_v23, %v3135_v22 }
 0x46c   :  { %v7615_v41 = vld [vmem:[#allocation2 + $0x2f8] sm:$0xf0]  ;;  %v11820_v19 = vsel %vm11793_vm4, %v4135_v34, %v4131_v17  ;;  %v4195_v53 = vor.u32 1.1754944e-38, %v4194_v29 }
 0x46d   :  { %v7618_v48 = vor.u32 %v9252_v16, %v7615_v41  ;;  %v9316_v38 = vld [vmem:[#allocation2 + $0x4dc] sm:$0xf]  ;;  %3501 = vmatpush.bf16.msra.mxu2 %v8130_v20  ;;  %12817 = vst [vmem:[#allocation104_spill] sm:$0xff] %v11820_v19  ;;  %v4186_v50 = vmul.f32 %v11788_v8, %v4185_v14  ;;  %v3078_v30 = vpop.f32.mrf.mxu3 }
 0x46e   :  { %v7871_v31 = vld [vmem:[#allocation2 + $0x4f8] sm:$0xf0]  ;;  %v9767_v17 = vpop.eup %9766  ;;  %3404 = vmatmul.bf16.gmra.mxu2 %v11105_v54 }
 0x46f   :  { %v9180_v0 = vld [vmem:[#allocation2 + $0x9c] sm:$0xf]  ;;  %v7874_v40 = vor.u32 %v9316_v38, %v7871_v31  ;;  %3443 = vmatpush.bf16.msra.mxu0 %v7618_v48 }
 0x470   :  { %v7327_v5 = vld [vmem:[#allocation2 + $0xb8] sm:$0xf0]  ;;  %v3139_v6 = vpop.f32.mrf.mxu1  ;;  %3346 = vmatmul.bf16.gmra.mxu0 %v11097_v35 }
 0x471   :  { %v9372_v33 = vld [vmem:[#allocation2 + $0x69c] sm:$0xf]  ;;  %v7330_v32 = vor.u32 %v9180_v0, %v7327_v5  ;;  %3472 = vmatpush.bf16.msra.mxu1 %v7874_v40  ;;  %v11842_v40 = vadd.f32 1.0, %v9767_v17 }
 0x472   :  { %v8095_v56 = vld [vmem:[#allocation2 + $0x6b8] sm:$0xf0]  ;;  %3375 = vmatmul.bf16.gmra.mxu1 %v11101_v28 }
 0x473   :  { %v9244_v16 = vld [vmem:[#allocation2 + $0x29c] sm:$0xf]  ;;  %v8098_v38 = vor.u32 %v9372_v33, %v8095_v56  ;;  %3415 = vmatpush.bf16.msrb.mxu3 %v7330_v32  ;;  %v4187_v33 = vadd.f32 %v11788_v8, %v4186_v50  ;;  %v11832_v32 = vpop.eup %9768  ;;  %9770 = vrcp.f32 %v11842_v40  ;;  %v4337_v56 = vand.u32 2147483648, %v11797_v10 }
 0x474   :  { %v7583_v41 = vld [vmem:[#allocation2 + $0x2b8] sm:$0xf0]  ;;  %vm4332_vm10 = vweird.f32 %v11832_v32  ;;  %vm4391_vm15 = vweird.f32 %v11842_v40 }
 0x475   :  { %v9308_v52 = vld [vmem:[#allocation2 + $0x49c] sm:$0xf]  ;;  %v7586_v20 = vor.u32 %v9244_v16, %v7583_v41  ;;  %v3108_v41 = vadd.f32 %v3107_v62, %v3078_v30  ;;  %3502 = vmatpush.bf16.msra.mxu2 %v8098_v38  ;;  %v4191_v38 = vsel %vm11838_vm9, %v11788_v8, %v4187_v33  ;;  %vm4333_vm12 = vmor %vm4331_vm11, %vm4332_vm10 }
 0x476   :  { %v9172_v31 = vld [vmem:[#allocation2 + $0x5c] sm:$0xf]  ;;  %v7842_v0 = vor.u32 %v9308_v52, %v7839_v45  ;;  %v3165_v52 = vpop.f32.mrf.mxu2  ;;  %v11851_v29 = vsel %vm11827_vm8, %v4195_v53, %v4191_v38  ;;  %v12824_v53 = vld [vmem:[#allocation110_spill] sm:$0xff] }
 0x477   :  { %v7295_v63 = vld [vmem:[#allocation2 + $0x78] sm:$0xf0]  ;;  %3444 = vmatpush.bf16.msra.mxu0 %v7586_v20 }
 0x478   :  { %v7298_v27 = vor.u32 %v9172_v31, %v7295_v63  ;;  %v9364_v60 = vld [vmem:[#allocation2 + $0x65c] sm:$0xf]  ;;  %v4327_v63 = vmul.f32 %v11832_v32, %v11797_v10  ;;  %3473 = vmatpush.bf16.msra.mxu1 %v7842_v0 }
 0x479   :  { %v8063_v48 = vld [vmem:[#allocation2 + $0x678] sm:$0xf0]  ;;  %v9771_v38 = vpop.eup %9770 }
 0x47a   :  { %v8066_v5 = vor.u32 %v9364_v60, %v8063_v48  ;;  %v9236_v34 = vld [vmem:[#allocation2 + $0x25c] sm:$0xf]  ;;  %3416 = vmatpush.bf16.msrb.mxu3 %v7298_v27  ;;  %v4328_v33 = vsub.f32 1.0, %v4327_v63  ;;  %vm4392_vm14 = vweird.f32 %v9771_v38 }
 0x47b   :  { %v7551_v46 = vld [vmem:[#allocation2 + $0x278] sm:$0xf0]  ;;  %vm4393_vm0 = vmor %vm4391_vm15, %vm4392_vm14 }
 0x47c   :  { %v12820_v23 = vld [vmem:[#allocation107_spill] sm:$0xff]  ;;  %v7554_v20 = vor.u32 %v9236_v34, %v7551_v46  ;;  %3503 = vmatpush.bf16.msra.mxu2 %v8066_v5  ;;  %v4335_v46 = vand.u32 2147483647, %v11797_v10 }
 0x47d   :  { %v3546_v16 = vadd.f32 %v3164_v58, %v12820_v23  ;;  %v9300_v14 = vld [vmem:[#allocation2 + $0x45c] sm:$0xf]  ;;  %v3110_v58 = vpop.f32.mrf.mxu0  ;;  %12823 = vst [vmem:[#allocation107_spill] sm:$0xff] %v11851_v29  ;;  %v3137_v23 = vadd.f32 %v11802_v21, %v3108_v41  ;;  %v3081_v41 = vpop.f32.mrf.mxu3 }
 0x47e   :  { %v7807_v22 = vld [vmem:[#allocation2 + $0x478] sm:$0xf0]  ;;  %3445 = vmatpush.bf16.msra.mxu0 %v7554_v20  ;;  %v3168_v63 = vpop.f32.mrf.mxu2  ;;  %vm4336_vm13 = vcmp.eq.f32.partialorder %v4335_v46, 8.507059e+37 }
 0x47f   :  { %v9164_v31 = vld [vmem:[#allocation2 + $0x1c] sm:$0xf]  ;;  %v8299_v50 = vmul.f32 -1.442695, %v3546_v16  ;;  %v7810_v30 = vor.u32 %v9300_v14, %v7807_v22  ;;  %v4329_v14 = vmul.f32 %v11832_v32, %v4328_v33  ;;  %v3166_v21 = vadd.f32 %v3165_v52, %v3137_v23 }
 0x480   :  { %v7263_v62 = vld [vmem:[#allocation2 + $0x38] sm:$0xf0]  ;;  %v4338_v52 = vor.u32 1.1754944e-38, %v4337_v56  ;;  %v4397_v23 = vand.u32 2147483648, %v11842_v40 }
 0x481   :  { %v9356_v60 = vld [vmem:[#allocation2 + $0x61c] sm:$0xf]  ;;  %9772 = vpow2.f32 %v8299_v50  ;;  %v7266_v0 = vor.u32 %v9164_v31, %v7263_v62  ;;  %3474 = vmatpush.bf16.msra.mxu1 %v7810_v30  ;;  %v4330_v45 = vadd.f32 %v11832_v32, %v4329_v14  ;;  %v3554_v31 = vadd.f32 %v3166_v21, %v12824_v53 }
 0x482   :  { %v8031_v48 = vld [vmem:[#allocation2 + $0x638] sm:$0xf0]  ;;  %v3111_v62 = vadd.f32 %v3110_v58, %v3081_v41 }
 0x483   :  { %v9228_v17 = vld [vmem:[#allocation2 + $0x21c] sm:$0xf]  ;;  %v8034_v16 = vor.u32 %v9356_v60, %v8031_v48  ;;  %3417 = vmatpush.bf16.msrb.mxu3 %v7266_v0  ;;  %v4334_v20 = vsel %vm4333_vm12, %v11832_v32, %v4330_v45  ;;  %v4387_v60 = vmul.f32 %v9771_v38, %v11842_v40  ;;  %v8303_v48 = vmul.f32 -1.442695, %v3554_v31  ;;  %v12825_v0 = vld [vmem:[#allocation113_spill] sm:$0xff] }
 0x484   :  { %v7519_v8 = vld [vmem:[#allocation2 + $0x238] sm:$0xf0]  ;;  %v11870_v10 = vsel %vm4336_vm13, %v4338_v52, %v4334_v20  ;;  %v4395_v32 = vand.u32 2147483647, %v11842_v40  ;;  %v12826_v20 = vld [vmem:[#allocation116_spill] sm:$0xff] }
 0x485   :  { %v9292_v27 = vld [vmem:[#allocation2 + $0x41c] sm:$0xf]  ;;  %v7522_v5 = vor.u32 %v9228_v17, %v7519_v8  ;;  %3504 = vmatpush.bf16.msra.mxu2 %v8034_v16  ;;  %v3112_v30 = vpop.f32.mrf.mxu0  ;;  %v3141_v17 = vpop.f32.mrf.mxu1  ;;  %v3140_v8 = vadd.f32 %v3139_v6, %v3111_v62  ;;  %v4388_v33 = vsub.f32 1.0, %v4387_v60  ;;  %9774 = vpow2.f32 %v8303_v48 }
 0x486   :  { %v7775_v34 = vld [vmem:[#allocation2 + $0x438] sm:$0xf0]  ;;  %v3083_v46 = vpop.f32.mrf.mxu3  ;;  %v4398_v6 = vor.u32 1.1754944e-38, %v4397_v23  ;;  %v3170_v21 = vpop.f32.mrf.mxu2  ;;  %vm4396_vm2 = vcmp.eq.f32.partialorder %v4395_v32, 8.507059e+37  ;;  %3418 = vmatmul.bf16.vlgmr.msrb.gmra.mxu3 %v11033_v51 }
 0x487   :  { %v7778_v22 = vor.u32 %v9292_v27, %v7775_v34  ;;  %v9773_v50 = vpop.eup %9772  ;;  %3446 = vmatpush.bf16.msra.mxu0 %v7522_v5  ;;  %v4389_v27 = vmul.f32 %v9771_v38, %v4388_v33  ;;  %v3169_v34 = vadd.f32 %v3168_v63, %v3140_v8  ;;  %v3113_v14 = vadd.f32 %v3112_v30, %v3083_v46 }
 0x488   :  { %v4302_v58 = vadd.f32 1.0, %v9773_v50  ;;  %3505 = vmatmul.bf16.vlgmr.msra.gmra.mxu2 %v11045_v43 }
 0x489   :  { %3475 = vmatpush.bf16.msra.mxu1 %v7778_v22  ;;  %v4390_v56 = vadd.f32 %v9771_v38, %v4389_v27  ;;  %v3562_v16 = vadd.f32 %v3169_v34, %v12825_v0  ;;  %v3142_v45 = vadd.f32 %v3141_v17, %v3113_v14 }
 0x48a   :  { %9776 = vrcp.f32 %v4302_v58  ;;  %v4455_v48 = vand.u32 2147483647, %v4302_v58  ;;  %v4457_v30 = vand.u32 2147483648, %v4302_v58  ;;  %vm4451_vm4 = vweird.f32 %v4302_v58  ;;  %3447 = vmatmul.bf16.vlgmr.msra.gmra.mxu0 %v11037_v39 }
 0x48b   :  { %v9775_v5 = vpop.eup %9774  ;;  %v4394_v41 = vsel %vm4393_vm0, %v9771_v38, %v4390_v56  ;;  %v8307_v22 = vmul.f32 -1.442695, %v3562_v16  ;;  %v3171_v40 = vadd.f32 %v3170_v21, %v3142_v45 }
 0x48c   :  { %v11876_v52 = vsel %vm4396_vm2, %v4398_v6, %v4394_v41  ;;  %v4306_v63 = vadd.f32 1.0, %v9775_v5  ;;  %v4458_v14 = vor.u32 1.1754944e-38, %v4457_v30  ;;  %vm4456_vm6 = vcmp.eq.f32.partialorder %v4455_v48, 8.507059e+37  ;;  %3476 = vmatmul.bf16.vlgmr.msra.gmra.mxu1 %v11041_v44 }
 0x48d   :  { %v3115_v53 = vpop.f32.mrf.mxu0  ;;  %v3144_v31 = vpop.f32.mrf.mxu1  ;;  %9778 = vpow2.f32 %v8307_v22  ;;  %v3570_v60 = vadd.f32 %v3171_v40, %v12826_v20 }
 0x48e   :  { %9780 = vrcp.f32 %v4306_v63  ;;  %v3086_v17 = vpop.f32.mrf.mxu3  ;;  %v3173_v27 = vpop.f32.mrf.mxu2  ;;  %v4515_v40 = vand.u32 2147483647, %v4306_v63  ;;  %vm4511_vm8 = vweird.f32 %v4306_v63 }
 0x48f   :  { %v8311_v33 = vmul.f32 -1.442695, %v3570_v60  ;;  %v3116_v23 = vadd.f32 %v3115_v53, %v3086_v17  ;;  %v12827_v53 = vld [vmem:[#allocation119_spill] sm:$0xff] }
 0x490   :  { %v9777_v62 = vpop.eup %9776  ;;  %vm4516_vm10 = vcmp.eq.f32.partialorder %v4515_v40, 8.507059e+37 }
 0x491   :  { %v4447_v50 = vmul.f32 %v9777_v62, %v4302_v58  ;;  %vm4452_vm3 = vweird.f32 %v9777_v62  ;;  %9782 = vpow2.f32 %v8311_v33  ;;  %v3145_v46 = vadd.f32 %v3144_v31, %v3116_v23 }
 0x492   :  { %vm4453_vm5 = vmor %vm4451_vm4, %vm4452_vm3  ;;  %v4517_v58 = vand.u32 2147483648, %v4306_v63 }
 0x493   :  { %v4448_v38 = vsub.f32 1.0, %v4447_v50  ;;  %v9779_v32 = vpop.eup %9778  ;;  %v3174_v41 = vadd.f32 %v3173_v27, %v3145_v46 }
 0x494   :  { %v9781_v16 = vpop.eup %9780  ;;  %v4310_v6 = vadd.f32 1.0, %v9779_v32  ;;  %v4518_v32 = vor.u32 1.1754944e-38, %v4517_v58 }
 0x495   :  { %v4449_v8 = vmul.f32 %v9777_v62, %v4448_v38  ;;  %v3117_v56 = vpop.f32.mrf.mxu0  ;;  %v3146_v0 = vpop.f32.mrf.mxu1  ;;  %v4507_v5 = vmul.f32 %v9781_v16, %v4306_v63  ;;  %v3578_v50 = vadd.f32 %v3174_v41, %v12827_v53  ;;  %vm4512_vm7 = vweird.f32 %v9781_v16 }
 0x496   :  { %9784 = vrcp.f32 %v4310_v6  ;;  %v3088_v38 = vpop.f32.mrf.mxu3  ;;  %vm4513_vm9 = vmor %vm4511_vm8, %vm4512_vm7  ;;  %v4577_v41 = vand.u32 2147483648, %v4310_v6  ;;  %vm4571_vm12 = vweird.f32 %v4310_v6  ;;  %3423 = vmatmul.bf16.gmra.mxu3 %v11053_v24 }
 0x497   :  { %v4450_v34 = vadd.f32 %v9777_v62, %v4449_v8  ;;  %v4508_v45 = vsub.f32 1.0, %v4507_v5  ;;  %v9783_v31 = vpop.eup %9782  ;;  %v8315_v60 = vmul.f32 -1.442695, %v3578_v50  ;;  %v3118_v17 = vadd.f32 %v3117_v56, %v3088_v38 }
 0x498   :  { %v11886_v30 = vadd.f32 1.0, %v9783_v31  ;;  %v4575_v5 = vand.u32 2147483647, %v4310_v6  ;;  %v4578_v43 = vor.u32 1.1754944e-38, %v4577_v41  ;;  %3510 = vmatmul.bf16.gmra.mxu2 %v11065_v57 }
 0x499   :  { %v4454_v21 = vsel %vm4453_vm5, %v9777_v62, %v4450_v34  ;;  %v4509_v20 = vmul.f32 %v9781_v16, %v4508_v45  ;;  %v3175_v62 = vpop.f32.mrf.mxu2  ;;  %9786 = vpow2.f32 %v8315_v60  ;;  %v3147_v8 = vadd.f32 %v3146_v0, %v3118_v17  ;;  %v12828_v0 = vld [vmem:[#allocation122_spill] sm:$0xff] }
 0x49a   :  { %v11883_v22 = vsel %vm4456_vm6, %v4458_v14, %v4454_v21  ;;  %9788 = vrcp.f32 %v11886_v30  ;;  %vm4576_vm14 = vcmp.eq.f32.partialorder %v4575_v5, 8.507059e+37  ;;  %vm4631_vm0 = vweird.f32 %v11886_v30  ;;  %3452 = vmatmul.bf16.gmra.mxu0 %v11057_v36 }
 0x49b   :  { %v4510_v48 = vadd.f32 %v9781_v16, %v4509_v20  ;;  %v3176_v14 = vadd.f32 %v3175_v62, %v3147_v8  ;;  %v4637_v8 = vand.u32 2147483648, %v11886_v30 }
 0x49c   :  { %v9785_v27 = vpop.eup %9784  ;;  %3481 = vmatmul.bf16.gmra.mxu1 %v11061_v42 }
 0x49d   :  { %v3216_v33 = vpop.f32.mrf.mxu0  ;;  %v3245_v23 = vpop.f32.mrf.mxu1  ;;  %v4514_v34 = vsel %vm4513_vm9, %v9781_v16, %v4510_v48  ;;  %v4567_v46 = vmul.f32 %v9785_v27, %v4310_v6  ;;  %v3586_v21 = vadd.f32 %v3176_v14, %v12828_v0  ;;  %vm4572_vm11 = vweird.f32 %v9785_v27 }
 0x49e   :  { %v11890_v56 = vsel %vm4516_vm10, %v4518_v32, %v4514_v34  ;;  %v3187_v45 = vpop.f32.mrf.mxu3  ;;  %vm4573_vm13 = vmor %vm4571_vm12, %vm4572_vm11  ;;  %v4635_v6 = vand.u32 2147483647, %v11886_v30 }
 0x49f   :  { %v4568_v63 = vsub.f32 1.0, %v4567_v46  ;;  %v9787_v16 = vpop.eup %9786  ;;  %v8319_v50 = vmul.f32 -1.442695, %v3586_v21  ;;  %v3217_v40 = vadd.f32 %v3216_v33, %v3187_v45 }
 0x4a0   :  { %v9789_v51 = vpop.eup %9788  ;;  %v11896_v58 = vadd.f32 1.0, %v9787_v16  ;;  %vm4636_vm3 = vcmp.eq.f32.partialorder %v4635_v6, 8.507059e+37 }
 0x4a1   :  { %v4569_v53 = vmul.f32 %v9785_v27, %v4568_v63  ;;  %v3274_v38 = vpop.f32.mrf.mxu2  ;;  %v4627_v44 = vmul.f32 %v9789_v51, %v11886_v30  ;;  %9790 = vpow2.f32 %v8319_v50  ;;  %v3246_v62 = vadd.f32 %v3245_v23, %v3217_v40  ;;  %v12829_v63 = vld [vmem:[#allocation39_spill] sm:$0xff] }
 0x4a2   :  { %9792 = vrcp.f32 %v11896_v58  ;;  %vm4632_vm15 = vweird.f32 %v9789_v51  ;;  %v4638_v23 = vor.u32 1.1754944e-38, %v4637_v8  ;;  %vm4691_vm5 = vweird.f32 %v11896_v58 }
 0x4a3   :  { %v4570_v39 = vadd.f32 %v9785_v27, %v4569_v53  ;;  %v4628_v17 = vsub.f32 1.0, %v4627_v44  ;;  %v3275_v32 = vadd.f32 %v3274_v38, %v3246_v62  ;;  %vm4633_vm2 = vmor %vm4631_vm0, %vm4632_vm15  ;;  %v4697_v44 = vand.u32 2147483648, %v11896_v58 }
 0x4a5   :  { %v3218_v31 = vpop.f32.mrf.mxu0  ;;  %v3247_v20 = vpop.f32.mrf.mxu1  ;;  %v4574_v60 = vsel %vm4573_vm13, %v9785_v27, %v4570_v39  ;;  %v4629_v33 = vmul.f32 %v9789_v51, %v4628_v17  ;;  %v3531_v0 = vadd.f32 %v3275_v32, %v12829_v63 }
 0x4a6   :  { %v11900_v48 = vsel %vm4576_vm14, %v4578_v43, %v4574_v60  ;;  %v3189_v34 = vpop.f32.mrf.mxu3  ;;  %3428 = vmatmul.bf16.gmra.mxu3 %v11073_v2 }
 0x4a7   :  { %v9791_v46 = vpop.eup %9790  ;;  %v4630_v14 = vadd.f32 %v9789_v51, %v4629_v33  ;;  %v3219_v27 = vadd.f32 %v3218_v31, %v3189_v34  ;;  %v8292_v53 = vmul.f32 -1.442695, %v3531_v0  ;;  %v4695_v31 = vand.u32 2147483647, %v11896_v58 }
 0x4a8   :  { %v9793_v21 = vpop.eup %9792  ;;  %v4322_v5 = vadd.f32 1.0, %v9791_v46  ;;  %v4698_v33 = vor.u32 1.1754944e-38, %v4697_v44  ;;  %3515 = vmatmul.bf16.gmra.mxu2 %v11085_v47 }
 0x4a9   :  { %v3276_v41 = vpop.f32.mrf.mxu2  ;;  %v4634_v45 = vsel %vm4633_vm2, %v9789_v51, %v4630_v14  ;;  %v4687_v16 = vmul.f32 %v9793_v21, %v11896_v58  ;;  %v3248_v30 = vadd.f32 %v3247_v20, %v3219_v27  ;;  %vm4692_vm4 = vweird.f32 %v9793_v21  ;;  %v12830_v20 = vld [vmem:[#allocation42_spill] sm:$0xff] }
 0x4aa   :  { %v11907_v38 = vsel %vm4636_vm3, %v4638_v23, %v4634_v45  ;;  %9794 = vrcp.f32 %v4322_v5  ;;  %vm4693_vm6 = vmor %vm4691_vm5, %vm4692_vm4  ;;  %vm4696_vm7 = vcmp.eq.f32.partialorder %v4695_v31, 8.507059e+37  ;;  %v4757_v58 = vand.u32 2147483648, %v4322_v5  ;;  %3457 = vmatmul.bf16.gmra.mxu0 %v11077_v37 }
 0x4ab   :  { %v4688_v39 = vsub.f32 1.0, %v4687_v16  ;;  %9796 = vpow2.f32 %v8292_v53  ;;  %v3277_v43 = vadd.f32 %v3276_v41, %v3248_v30  ;;  %v4755_v41 = vand.u32 2147483647, %v4322_v5 }
 0x4ac   :  { %vm4751_vm9 = vweird.f32 %v4322_v5  ;;  %v4758_v30 = vor.u32 1.1754944e-38, %v4757_v58  ;;  %3486 = vmatmul.bf16.gmra.mxu1 %v11081_v18 }
 0x4ad   :  { %v3221_v50 = vpop.f32.mrf.mxu0  ;;  %v3250_v40 = vpop.f32.mrf.mxu1  ;;  %v4689_v51 = vmul.f32 %v9793_v21, %v4688_v39  ;;  %v3539_v62 = vadd.f32 %v3277_v43, %v12830_v20  ;;  %vm4756_vm11 = vcmp.eq.f32.partialorder %v4755_v41, 8.507059e+37 }
 0x4ae   :  { %v3192_v60 = vpop.f32.mrf.mxu3 }
 0x4af   :  { %v4690_v17 = vadd.f32 %v9793_v21, %v4689_v51  ;;  %v3222_v24 = vadd.f32 %v3221_v50, %v3192_v60  ;;  %v8296_v34 = vmul.f32 -1.442695, %v3539_v62 }
 0x4b0   :  { %v9795_v8 = vpop.eup %9794 }
 0x4b1   :  { %v3279_v36 = vpop.f32.mrf.mxu2  ;;  %v9797_v6 = vpop.eup %9796  ;;  %v4694_v42 = vsel %vm4693_vm6, %v9793_v21, %v4690_v17  ;;  %v4747_v32 = vmul.f32 %v9795_v8, %v4322_v5  ;;  %v3251_v0 = vadd.f32 %v3250_v40, %v3222_v24  ;;  %9798 = vpow2.f32 %v8296_v34  ;;  %v12832_v21 = vld [vmem:[#allocation45_spill] sm:$0xff] }
 0x4b2   :  { %v11917_v63 = vsel %vm4696_vm7, %v4698_v33, %v4694_v42  ;;  %v4295_v57 = vadd.f32 1.0, %v9797_v6  ;;  %vm4752_vm8 = vweird.f32 %v9795_v8 }
 0x4b3   :  { %12831 = vst [vmem:[#allocation110_spill] sm:$0xff] %v11917_v63  ;;  %v4748_v27 = vsub.f32 1.0, %v4747_v32  ;;  %v3280_v45 = vadd.f32 %v3279_v36, %v3251_v0  ;;  %vm4753_vm10 = vmor %vm4751_vm9, %vm4752_vm8  ;;  %v12834_v36 = vld [vmem:[#allocation48_spill] sm:$0xff] }
 0x4b4   :  { %9800 = vrcp.f32 %v4295_v57  ;;  %v4350_v42 = vand.u32 2147483647, %v4295_v57  ;;  %v4352_v32 = vand.u32 2147483648, %v4295_v57  ;;  %vm4346_vm13 = vweird.f32 %v4295_v57 }
 0x4b5   :  { %v3223_v46 = vpop.f32.mrf.mxu0  ;;  %v3252_v14 = vpop.f32.mrf.mxu1  ;;  %v4749_v23 = vmul.f32 %v9795_v8, %v4748_v27  ;;  %v3547_v50 = vadd.f32 %v3280_v45, %v12832_v21 }
 0x4b6   :  { %v3194_v16 = vpop.f32.mrf.mxu3  ;;  %v4353_v45 = vor.u32 1.1754944e-38, %v4352_v32  ;;  %vm4351_vm15 = vcmp.eq.f32.partialorder %v4350_v42, 8.507059e+37  ;;  %3433 = vmatmul.bf16.gmra.mxu3 %v11093_v25 }
 0x4b7   :  { %v4750_v53 = vadd.f32 %v9795_v8, %v4749_v23  ;;  %v3224_v39 = vadd.f32 %v3223_v46, %v3194_v16  ;;  %v9799_v51 = vpop.eup %9798  ;;  %v8300_v40 = vmul.f32 -1.442695, %v3547_v50 }
 0x4b8   :  { %v4299_v24 = vadd.f32 1.0, %v9799_v51  ;;  %3520 = vmatmul.bf16.gmra.mxu2 %v11105_v54 }
 0x4b9   :  { %v3281_v44 = vpop.f32.mrf.mxu2  ;;  %v4754_v31 = vsel %vm4753_vm10, %v9795_v8, %v4750_v53  ;;  %v3253_v43 = vadd.f32 %v3252_v14, %v3224_v39  ;;  %9802 = vpow2.f32 %v8300_v40 }
 0x4ba   :  { %v9801_v20 = vpop.eup %9800  ;;  %v11920_v62 = vsel %vm4756_vm11, %v4758_v30, %v4754_v31  ;;  %9804 = vrcp.f32 %v4299_v24  ;;  %v12835_v30 = vld [vmem:[#allocation51_spill] sm:$0xff]  ;;  %v4410_v51 = vand.u32 2147483647, %v4299_v24  ;;  %vm4406_vm2 = vweird.f32 %v4299_v24  ;;  %3462 = vmatmul.bf16.gmra.mxu0 %v11097_v35 }
 0x4bb   :  { %12833 = vst [vmem:[#allocation113_spill] sm:$0xff] %v11920_v62  ;;  %v4342_v33 = vmul.f32 %v9801_v20, %v4295_v57  ;;  %v3282_v5 = vadd.f32 %v3281_v44, %v3253_v43  ;;  %vm4347_vm12 = vweird.f32 %v9801_v20  ;;  %v4412_v57 = vand.u32 2147483648, %v4299_v24 }
 0x4bc   :  { %vm4348_vm14 = vmor %vm4346_vm13, %vm4347_vm12  ;;  %vm4411_vm4 = vcmp.eq.f32.partialorder %v4410_v51, 8.507059e+37  ;;  %3491 = vmatmul.bf16.gmra.mxu1 %v11101_v28 }
 0x4bd   :  { %v3226_v60 = vpop.f32.mrf.mxu0  ;;  %v3255_v17 = vpop.f32.mrf.mxu1  ;;  %v4343_v8 = vsub.f32 1.0, %v4342_v33  ;;  %v3555_v6 = vadd.f32 %v3282_v5, %v12834_v36  ;;  %v4413_v32 = vor.u32 1.1754944e-38, %v4412_v57 }
 0x4be   :  { %v3197_v34 = vpop.f32.mrf.mxu3 }
 0x4bf   :  { %v4344_v46 = vmul.f32 %v9801_v20, %v4343_v8  ;;  %v8304_v14 = vmul.f32 -1.442695, %v3555_v6  ;;  %v3227_v0 = vadd.f32 %v3226_v60, %v3197_v34  ;;  %v9803_v58 = vpop.eup %9802 }
 0x4c0   :  { %v9805_v41 = vpop.eup %9804  ;;  %v4303_v16 = vadd.f32 1.0, %v9803_v58 }
 0x4c1   :  { %v3284_v27 = vpop.f32.mrf.mxu2  ;;  %v4345_v2 = vadd.f32 %v9801_v20, %v4344_v46  ;;  %9806 = vpow2.f32 %v8304_v14  ;;  %v3256_v37 = vadd.f32 %v3255_v17, %v3227_v0  ;;  %v4402_v53 = vmul.f32 %v9805_v41, %v4299_v24 }
 0x4c2   :  { %9808 = vrcp.f32 %v4303_v16  ;;  %vm4407_vm0 = vweird.f32 %v9805_v41  ;;  %vm4466_vm6 = vweird.f32 %v4303_v16 }
 0x4c3   :  { %v4349_v47 = vsel %vm4348_vm14, %v9801_v20, %v4345_v2  ;;  %v3285_v21 = vadd.f32 %v3284_v27, %v3256_v37  ;;  %v4403_v39 = vsub.f32 1.0, %v4402_v53  ;;  %vm4408_vm3 = vmor %vm4406_vm2, %vm4407_vm0  ;;  %v12836_v27 = vld [vmem:[#allocation54_spill] sm:$0xff]  ;;  %v4470_v2 = vand.u32 2147483647, %v4303_v16 }
 0x4c4   :  { %v11927_v50 = vsel %vm4351_vm15, %v4353_v45, %v4349_v47  ;;  %v4472_v37 = vand.u32 2147483648, %v4303_v16 }
 0x4c5   :  { %v3228_v23 = vpop.f32.mrf.mxu0  ;;  %v3257_v18 = vpop.f32.mrf.mxu1  ;;  %v3563_v44 = vadd.f32 %v3285_v21, %v12835_v30  ;;  %v4404_v43 = vmul.f32 %v9805_v41, %v4403_v39  ;;  %vm4471_vm8 = vcmp.eq.f32.partialorder %v4470_v2, 8.507059e+37 }
 0x4c6   :  { %v3199_v31 = vpop.f32.mrf.mxu3  ;;  %v4473_v54 = vor.u32 1.1754944e-38, %v4472_v37 }
 0x4c7   :  { %v9807_v40 = vpop.eup %9806  ;;  %v8308_v60 = vmul.f32 -1.442695, %v3563_v44  ;;  %v3229_v17 = vadd.f32 %v3228_v23, %v3199_v31  ;;  %v4405_v5 = vadd.f32 %v9805_v41, %v4404_v43 }
 0x4c8   :  { %v11930_v33 = vadd.f32 1.0, %v9807_v40  ;;  %v9809_v42 = vpop.eup %9808 }
 0x4c9   :  { %v3286_v20 = vpop.f32.mrf.mxu2  ;;  %9810 = vpow2.f32 %v8308_v60  ;;  %v3258_v8 = vadd.f32 %v3257_v18, %v3229_v17  ;;  %v4409_v34 = vsel %vm4408_vm3, %v9805_v41, %v4405_v5  ;;  %v4462_v46 = vmul.f32 %v9809_v42, %v4303_v16 }
 0x4ca   :  { %9812 = vrcp.f32 %v11930_v33  ;;  %v11934_v0 = vsel %vm4411_vm4, %v4413_v32, %v4409_v34  ;;  %vm4467_vm5 = vweird.f32 %v9809_v42  ;;  %v4532_v40 = vand.u32 2147483648, %v11930_v33 }
 0x4cb   :  { %v3287_v14 = vadd.f32 %v3286_v20, %v3258_v8  ;;  %v4463_v24 = vsub.f32 1.0, %v4462_v46  ;;  %vm4468_vm7 = vmor %vm4466_vm6, %vm4467_vm5  ;;  %v4530_v16 = vand.u32 2147483647, %v11930_v33  ;;  %vm4526_vm10 = vweird.f32 %v11930_v33  ;;  %v12837_v8 = vld [vmem:[#allocation58_spill] sm:$0xff] }
 0x4cd   :  { %v3231_v36 = vpop.f32.mrf.mxu0  ;;  %v3260_v6 = vpop.f32.mrf.mxu1  ;;  %v3571_v58 = vadd.f32 %v3287_v14, %v12836_v27  ;;  %v4464_v41 = vmul.f32 %v9809_v42, %v4463_v24  ;;  %vm4531_vm12 = vcmp.eq.f32.partialorder %v4530_v16, 8.507059e+37 }
 0x4ce   :  { %v3202_v23 = vpop.f32.mrf.mxu3 }
 0x4cf   :  { %v9811_v18 = vpop.eup %9810  ;;  %v8312_v45 = vmul.f32 -1.442695, %v3571_v58  ;;  %v3232_v47 = vadd.f32 %v3231_v36, %v3202_v23  ;;  %v4465_v39 = vadd.f32 %v9809_v42, %v4464_v41 }
 0x4d0   :  { %v9813_v25 = vpop.eup %9812  ;;  %v4311_v53 = vadd.f32 1.0, %v9811_v18 }
 0x4d1   :  { %v3289_v21 = vpop.f32.mrf.mxu2  ;;  %v4522_v35 = vmul.f32 %v9813_v25, %v11930_v33  ;;  %9814 = vpow2.f32 %v8312_v45  ;;  %v4469_v44 = vsel %vm4468_vm7, %v9809_v42, %v4465_v39  ;;  %v3261_v57 = vadd.f32 %v3260_v6, %v3232_v47 }
 0x4d2   :  { %9816 = vrcp.f32 %v4311_v53  ;;  %v11941_v31 = vsel %vm4471_vm8, %v4473_v54, %v4469_v44  ;;  %vm4527_vm9 = vweird.f32 %v9813_v25  ;;  %v4533_v6 = vor.u32 1.1754944e-38, %v4532_v40 }
 0x4d3   :  { %v4523_v51 = vsub.f32 1.0, %v4522_v35  ;;  %v3290_v60 = vadd.f32 %v3289_v21, %v3261_v57  ;;  %vm4528_vm11 = vmor %vm4526_vm10, %vm4527_vm9  ;;  %v4592_v18 = vand.u32 2147483648, %v4311_v53  ;;  %v4590_v45 = vand.u32 2147483647, %v4311_v53 }
 0x4d4   :  { %vm4586_vm14 = vweird.f32 %v4311_v53 }
 0x4d5   :  { %v3233_v28 = vpop.f32.mrf.mxu0  ;;  %v3262_v30 = vpop.f32.mrf.mxu1  ;;  %v4524_v43 = vmul.f32 %v9813_v25, %v4523_v51  ;;  %v3579_v36 = vadd.f32 %v3290_v60, %v12837_v8  ;;  %v4593_v44 = vor.u32 1.1754944e-38, %v4592_v18  ;;  %vm4591_vm0 = vcmp.eq.f32.partialorder %v4590_v45, 8.507059e+37 }
 0x4d6   :  { %v3204_v17 = vpop.f32.mrf.mxu3 }
 0x4d7   :  { %v9815_v20 = vpop.eup %9814  ;;  %v4525_v5 = vadd.f32 %v9813_v25, %v4524_v43  ;;  %v3234_v42 = vadd.f32 %v3233_v28, %v3204_v17  ;;  %v8316_v27 = vmul.f32 -1.442695, %v3579_v36 }
 0x4d8   :  { %v9817_v32 = vpop.eup %9816  ;;  %v4315_v34 = vadd.f32 1.0, %v9815_v20 }
 0x4d9   :  { %v3291_v46 = vpop.f32.mrf.mxu2  ;;  %v4529_v14 = vsel %vm4528_vm11, %v9813_v25, %v4525_v5  ;;  %v4582_v24 = vmul.f32 %v9817_v32, %v4311_v53  ;;  %v3263_v33 = vadd.f32 %v3262_v30, %v3234_v42  ;;  %vm4587_vm13 = vweird.f32 %v9817_v32  ;;  %v12838_v25 = vld [vmem:[#allocation62_spill] sm:$0xff] }
 0x4da   :  { %v11947_v37 = vsel %vm4531_vm12, %v4533_v6, %v4529_v14  ;;  %9818 = vrcp.f32 %v4315_v34  ;;  %vm4588_vm15 = vmor %vm4586_vm14, %vm4587_vm13  ;;  %v4652_v53 = vand.u32 2147483648, %v4315_v34  ;;  %v4650_v42 = vand.u32 2147483647, %v4315_v34 }
 0x4db   :  { %v4583_v23 = vsub.f32 1.0, %v4582_v24  ;;  %9820 = vpow2.f32 %v8316_v27  ;;  %v3292_v47 = vadd.f32 %v3291_v46, %v3263_v33  ;;  %vm4646_vm3 = vweird.f32 %v4315_v34 }
 0x4dc   :  { %vm4651_vm5 = vcmp.eq.f32.partialorder %v4650_v42, 8.507059e+37 }
 0x4dd   :  { %v3332_v58 = vpop.f32.mrf.mxu0  ;;  %v3361_v2 = vpop.f32.mrf.mxu1  ;;  %v4584_v41 = vmul.f32 %v9817_v32, %v4583_v23  ;;  %v3587_v35 = vadd.f32 %v3292_v47, %v12838_v25 }
 0x4de   :  { %v3303_v21 = vpop.f32.mrf.mxu3 }
 0x4df   :  { %v4585_v39 = vadd.f32 %v9817_v32, %v4584_v41  ;;  %v3333_v28 = vadd.f32 %v3332_v58, %v3303_v21  ;;  %v8320_v30 = vmul.f32 -1.442695, %v3587_v35  ;;  %v4653_v58 = vor.u32 1.1754944e-38, %v4652_v53 }
 0x4e0   :  { %v9819_v54 = vpop.eup %9818 }
 0x4e1   :  { %v3390_v51 = vpop.f32.mrf.mxu2  ;;  %v9821_v57 = vpop.eup %9820  ;;  %v4589_v40 = vsel %vm4588_vm15, %v9817_v32, %v4585_v39  ;;  %v4642_v43 = vmul.f32 %v9819_v54, %v4315_v34  ;;  %v3362_v5 = vadd.f32 %v3361_v2, %v3333_v28  ;;  %9822 = vpow2.f32 %v8320_v30  ;;  %v12839_v32 = vld [vmem:[#allocation93_spill] sm:$0xff] }
 0x4e2   :  { %v11950_v17 = vsel %vm4591_vm0, %v4593_v44, %v4589_v40  ;;  %v4319_v20 = vadd.f32 1.0, %v9821_v57  ;;  %vm4647_vm2 = vweird.f32 %v9819_v54  ;;  %v12840_v44 = vld [vmem:[#allocation97_spill] sm:$0xff] }
 0x4e3   :  { %v4643_v8 = vsub.f32 1.0, %v4642_v43  ;;  %v3391_v6 = vadd.f32 %v3390_v51, %v3362_v5  ;;  %vm4648_vm4 = vmor %vm4646_vm3, %vm4647_vm2 }
 0x4e4   :  { %9824 = vrcp.f32 %v4319_v20  ;;  %v4710_v57 = vand.u32 2147483647, %v4319_v20  ;;  %v4712_v40 = vand.u32 2147483648, %v4319_v20  ;;  %vm4706_vm7 = vweird.f32 %v4319_v20 }
 0x4e5   :  { %v3334_v16 = vpop.f32.mrf.mxu0  ;;  %v3363_v60 = vpop.f32.mrf.mxu1  ;;  %v4644_v36 = vmul.f32 %v9819_v54, %v4643_v8  ;;  %v3532_v24 = vadd.f32 %v3391_v6, %v12839_v32 }
 0x4e6   :  { %v3305_v46 = vpop.f32.mrf.mxu3  ;;  %vm4711_vm9 = vcmp.eq.f32.partialorder %v4710_v57, 8.507059e+37 }
 0x4e7   :  { %v4645_v14 = vadd.f32 %v9819_v54, %v4644_v36  ;;  %v3335_v27 = vadd.f32 %v3334_v16, %v3305_v46  ;;  %v9823_v33 = vpop.eup %9822  ;;  %v8293_v2 = vmul.f32 -1.442695, %v3532_v24  ;;  %v4713_v46 = vor.u32 1.1754944e-38, %v4712_v40 }
 0x4e8   :  { %v4323_v25 = vadd.f32 1.0, %v9823_v33  ;;  %v12842_v33 = vld [vmem:[#allocation100_spill] sm:$0xff] }
 0x4e9   :  { %v3392_v23 = vpop.f32.mrf.mxu2  ;;  %v4649_v18 = vsel %vm4648_vm4, %v9819_v54, %v4645_v14  ;;  %v3364_v41 = vadd.f32 %v3363_v60, %v3335_v27  ;;  %9826 = vpow2.f32 %v8293_v2 }
 0x4ea   :  { %v9825_v21 = vpop.eup %9824  ;;  %v11953_v39 = vsel %vm4651_vm5, %v4653_v58, %v4649_v18  ;;  %9828 = vrcp.f32 %v4323_v25  ;;  %v4770_v2 = vand.u32 2147483647, %v4323_v25  ;;  %vm4766_vm11 = vweird.f32 %v4323_v25 }
 0x4eb   :  { %v4702_v35 = vmul.f32 %v9825_v21, %v4319_v20  ;;  %v3393_v34 = vadd.f32 %v3392_v23, %v3364_v41  ;;  %vm4707_vm6 = vweird.f32 %v9825_v21  ;;  %v4772_v20 = vand.u32 2147483648, %v4323_v25 }
 0x4ec   :  { %vm4708_vm8 = vmor %vm4706_vm7, %vm4707_vm6  ;;  %vm4771_vm13 = vcmp.eq.f32.partialorder %v4770_v2, 8.507059e+37 }
 0x4ed   :  { %v3337_v45 = vpop.f32.mrf.mxu0  ;;  %v3366_v47 = vpop.f32.mrf.mxu1  ;;  %v4703_v28 = vsub.f32 1.0, %v4702_v35  ;;  %v3540_v51 = vadd.f32 %v3393_v34, %v12840_v44 }
 0x4ee   :  { %v3308_v43 = vpop.f32.mrf.mxu3 }
 0x4ef   :  { %v4704_v54 = vmul.f32 %v9825_v21, %v4703_v28  ;;  %v8297_v30 = vmul.f32 -1.442695, %v3540_v51  ;;  %v3338_v16 = vadd.f32 %v3337_v45, %v3308_v43  ;;  %v9827_v5 = vpop.eup %9826 }
 0x4f0   :  { %v9829_v6 = vpop.eup %9828  ;;  %v4296_v14 = vadd.f32 1.0, %v9827_v5 }
 0x4f1   :  { %v3395_v60 = vpop.f32.mrf.mxu2  ;;  %v4705_v8 = vadd.f32 %v9825_v21, %v4704_v54  ;;  %9830 = vpow2.f32 %v8297_v30  ;;  %v3367_v53 = vadd.f32 %v3366_v47, %v3338_v16  ;;  %v4762_v24 = vmul.f32 %v9829_v6, %v4323_v25 }
 0x4f2   :  { %9832 = vrcp.f32 %v4296_v14  ;;  %vm4767_vm10 = vweird.f32 %v9829_v6  ;;  %v4773_v54 = vor.u32 1.1754944e-38, %v4772_v20  ;;  %vm4361_vm15 = vweird.f32 %v4296_v14 }
 0x4f3   :  { %v4709_v32 = vsel %vm4708_vm8, %v9825_v21, %v4705_v8  ;;  %v3396_v27 = vadd.f32 %v3395_v60, %v3367_v53  ;;  %v4763_v23 = vsub.f32 1.0, %v4762_v24  ;;  %vm4768_vm12 = vmor %vm4766_vm11, %vm4767_vm10  ;;  %v12844_v53 = vld [vmem:[#allocation103_spill] sm:$0xff] }
 0x4f4   :  { %v11956_v58 = vsel %vm4711_vm9, %v4713_v46, %v4709_v32  ;;  %v4365_v46 = vand.u32 2147483647, %v4296_v14  ;;  %v4367_v32 = vand.u32 2147483648, %v4296_v14 }
 0x4f5   :  { %v3339_v36 = vpop.f32.mrf.mxu0  ;;  %v3368_v42 = vpop.f32.mrf.mxu1  ;;  %12841 = vst [vmem:[#allocation116_spill] sm:$0xff] %v11956_v58  ;;  %v3548_v18 = vadd.f32 %v3396_v27, %v12842_v33  ;;  %v4764_v47 = vmul.f32 %v9829_v6, %v4763_v23 }
 0x4f6   :  { %v3310_v41 = vpop.f32.mrf.mxu3  ;;  %vm4366_vm2 = vcmp.eq.f32.partialorder %v4365_v46, 8.507059e+37 }
 0x4f7   :  { %v9831_v45 = vpop.eup %9830  ;;  %v8301_v35 = vmul.f32 -1.442695, %v3548_v18  ;;  %v3340_v34 = vadd.f32 %v3339_v36, %v3310_v41  ;;  %v4765_v21 = vadd.f32 %v9829_v6, %v4764_v47  ;;  %v4368_v47 = vor.u32 1.1754944e-38, %v4367_v32 }
 0x4f8   :  { %v4300_v28 = vadd.f32 1.0, %v9831_v45  ;;  %v9833_v43 = vpop.eup %9832 }
 0x4f9   :  { %v3397_v44 = vpop.f32.mrf.mxu2  ;;  %9834 = vpow2.f32 %v8301_v35  ;;  %v3369_v51 = vadd.f32 %v3368_v42, %v3340_v34  ;;  %v4769_v30 = vsel %vm4768_vm12, %v9829_v6, %v4765_v21  ;;  %v4357_v16 = vmul.f32 %v9833_v43, %v4296_v14 }
 0x4fa   :  { %9836 = vrcp.f32 %v4300_v28  ;;  %v11959_v5 = vsel %vm4771_vm13, %v4773_v54, %v4769_v30  ;;  %vm4362_vm14 = vweird.f32 %v9833_v43  ;;  %v4425_v54 = vand.u32 2147483647, %v4300_v28 }
 0x4fb   :  { %v3398_v60 = vadd.f32 %v3397_v44, %v3369_v51  ;;  %12843 = vst [vmem:[#allocation119_spill] sm:$0xff] %v11959_v5  ;;  %v4358_v8 = vsub.f32 1.0, %v4357_v16  ;;  %vm4363_vm0 = vmor %vm4361_vm15, %vm4362_vm14  ;;  %v4427_v51 = vand.u32 2147483648, %v4300_v28  ;;  %vm4421_vm4 = vweird.f32 %v4300_v28 }
 0x4fc   :  { %vm4426_vm6 = vcmp.eq.f32.partialorder %v4425_v54, 8.507059e+37 }
 0x4fd   :  { %v3342_v57 = vpop.f32.mrf.mxu0  ;;  %v3371_v40 = vpop.f32.mrf.mxu1  ;;  %v3556_v36 = vadd.f32 %v3398_v60, %v12844_v53  ;;  %v4359_v42 = vmul.f32 %v9833_v43, %v4358_v8  ;;  %v12845_v8 = vld [vmem:[#allocation106_spill] sm:$0xff] }
 0x4fe   :  { %v3313_v25 = vpop.f32.mrf.mxu3 }
 0x4ff   :  { %v9835_v24 = vpop.eup %9834  ;;  %v8305_v27 = vmul.f32 -1.442695, %v3556_v36  ;;  %v3343_v23 = vadd.f32 %v3342_v57, %v3313_v25  ;;  %v4360_v6 = vadd.f32 %v9833_v43, %v4359_v42 }
 0x500   :  { %v9837_v33 = vpop.eup %9836  ;;  %v4304_v18 = vadd.f32 1.0, %v9835_v24 }
 0x501   :  { %v3400_v20 = vpop.f32.mrf.mxu2  ;;  %v4417_v2 = vmul.f32 %v9837_v33, %v4300_v28  ;;  %9838 = vpow2.f32 %v8305_v27  ;;  %v4364_v35 = vsel %vm4363_vm0, %v9833_v43, %v4360_v6  ;;  %v3372_v44 = vadd.f32 %v3371_v40, %v3343_v23 }
 0x502   :  { %9840 = vrcp.f32 %v4304_v18  ;;  %v11962_v21 = vsel %vm4366_vm2, %v4368_v47, %v4364_v35  ;;  %vm4422_vm3 = vweird.f32 %v9837_v33  ;;  %v4428_v43 = vor.u32 1.1754944e-38, %v4427_v51 }
 0x503   :  { %v4418_v34 = vsub.f32 1.0, %v4417_v2  ;;  %v3401_v30 = vadd.f32 %v3400_v20, %v3372_v44  ;;  %vm4423_vm5 = vmor %vm4421_vm4, %vm4422_vm3  ;;  %v4487_v2 = vand.u32 2147483648, %v4304_v18  ;;  %vm4481_vm8 = vweird.f32 %v4304_v18 }
 0x505   :  { %v3344_v41 = vpop.f32.mrf.mxu0  ;;  %v3373_v45 = vpop.f32.mrf.mxu1  ;;  %v4419_v57 = vmul.f32 %v9837_v33, %v4418_v34  ;;  %v3564_v53 = vadd.f32 %v3401_v30, %v12845_v8  ;;  %v4488_v30 = vor.u32 1.1754944e-38, %v4487_v2 }
 0x506   :  { %v3315_v16 = vpop.f32.mrf.mxu3 }
 0x507   :  { %v9839_v14 = vpop.eup %9838  ;;  %v4420_v60 = vadd.f32 %v9837_v33, %v4419_v57  ;;  %v3345_v36 = vadd.f32 %v3344_v41, %v3315_v16  ;;  %v8309_v42 = vmul.f32 -1.442695, %v3564_v53  ;;  %v4485_v41 = vand.u32 2147483647, %v4304_v18 }
 0x508   :  { %v9841_v32 = vpop.eup %9840  ;;  %v4308_v46 = vadd.f32 1.0, %v9839_v14 }
 0x509   :  { %v3402_v25 = vpop.f32.mrf.mxu2  ;;  %v4424_v40 = vsel %vm4423_vm5, %v9837_v33, %v4420_v60  ;;  %v4477_v24 = vmul.f32 %v9841_v32, %v4304_v18  ;;  %v3374_v28 = vadd.f32 %v3373_v45, %v3345_v36  ;;  %vm4482_vm7 = vweird.f32 %v9841_v32  ;;  %v12846_v33 = vld [vmem:[#allocation109_spill] sm:$0xff] }
 0x50a   :  { %v11965_v6 = vsel %vm4426_vm6, %v4428_v43, %v4424_v40  ;;  %9842 = vrcp.f32 %v4308_v46  ;;  %vm4483_vm9 = vmor %vm4481_vm8, %vm4482_vm7  ;;  %vm4486_vm10 = vcmp.eq.f32.partialorder %v4485_v41, 8.507059e+37  ;;  %v4547_v18 = vand.u32 2147483648, %v4308_v46 }
 0x50b   :  { %v4478_v20 = vsub.f32 1.0, %v4477_v24  ;;  %9844 = vpow2.f32 %v8309_v42  ;;  %v3403_v35 = vadd.f32 %v3402_v25, %v3374_v28  ;;  %vm4541_vm12 = vweird.f32 %v4308_v46 }
 0x50d   :  { %v3347_v27 = vpop.f32.mrf.mxu0  ;;  %v3376_v23 = vpop.f32.mrf.mxu1  ;;  %v4479_v47 = vmul.f32 %v9841_v32, %v4478_v20  ;;  %v3572_v51 = vadd.f32 %v3403_v35, %v12846_v33  ;;  %v4548_v35 = vor.u32 1.1754944e-38, %v4547_v18 }
 0x50e   :  { %v3318_v34 = vpop.f32.mrf.mxu3 }
 0x50f   :  { %v4480_v44 = vadd.f32 %v9841_v32, %v4479_v47  ;;  %v3348_v57 = vadd.f32 %v3347_v27, %v3318_v34  ;;  %v8313_v45 = vmul.f32 -1.442695, %v3572_v51  ;;  %v4545_v27 = vand.u32 2147483647, %v4308_v46 }
 0x510   :  { %v9843_v54 = vpop.eup %9842 }
 0x511   :  { %v3405_v16 = vpop.f32.mrf.mxu2  ;;  %v9845_v14 = vpop.eup %9844  ;;  %v4484_v60 = vsel %vm4483_vm9, %v9841_v32, %v4480_v44  ;;  %v4537_v8 = vmul.f32 %v9843_v54, %v4308_v46  ;;  %v3377_v40 = vadd.f32 %v3376_v23, %v3348_v57  ;;  %9846 = vpow2.f32 %v8313_v45  ;;  %v12847_v32 = vld [vmem:[#allocation112_spill] sm:$0xff] }
 0x512   :  { %v11968_v43 = vsel %vm4486_vm10, %v4488_v30, %v4484_v60  ;;  %v4312_v25 = vadd.f32 1.0, %v9845_v14  ;;  %vm4542_vm11 = vweird.f32 %v9843_v54  ;;  %vm4546_vm14 = vcmp.eq.f32.partialorder %v4545_v27, 8.507059e+37 }
 0x513   :  { %v4538_v24 = vsub.f32 1.0, %v4537_v8  ;;  %v3406_v20 = vadd.f32 %v3405_v16, %v3377_v40  ;;  %vm4543_vm13 = vmor %vm4541_vm12, %vm4542_vm11 }
 0x514   :  { %9848 = vrcp.f32 %v4312_v25  ;;  %v4607_v18 = vand.u32 2147483648, %v4312_v25  ;;  %vm4601_vm0 = vweird.f32 %v4312_v25 }
 0x515   :  { %v3349_v53 = vpop.f32.mrf.mxu0  ;;  %v3378_v36 = vpop.f32.mrf.mxu1  ;;  %v4539_v42 = vmul.f32 %v9843_v54, %v4538_v24  ;;  %v3580_v47 = vadd.f32 %v3406_v20, %v12847_v32  ;;  %v4605_v24 = vand.u32 2147483647, %v4312_v25 }
 0x516   :  { %v3320_v28 = vpop.f32.mrf.mxu3 }
 0x517   :  { %v4540_v2 = vadd.f32 %v9843_v54, %v4539_v42  ;;  %v3350_v41 = vadd.f32 %v3349_v53, %v3320_v28  ;;  %v9847_v44 = vpop.eup %9846  ;;  %v8317_v23 = vmul.f32 -1.442695, %v3580_v47  ;;  %v12848_v53 = vld [vmem:[#allocation115_spill] sm:$0xff]  ;;  %vm4606_vm3 = vcmp.eq.f32.partialorder %v4605_v24, 8.507059e+37 }
 0x518   :  { %v4316_v16 = vadd.f32 1.0, %v9847_v44 }
 0x519   :  { %v3407_v34 = vpop.f32.mrf.mxu2  ;;  %v4544_v33 = vsel %vm4543_vm13, %v9843_v54, %v4540_v2  ;;  %v3379_v51 = vadd.f32 %v3378_v36, %v3350_v41  ;;  %9850 = vpow2.f32 %v8317_v23 }
 0x51a   :  { %v9849_v14 = vpop.eup %9848  ;;  %v11971_v60 = vsel %vm4546_vm14, %v4548_v35, %v4544_v33  ;;  %9852 = vrcp.f32 %v4316_v16  ;;  %vm4661_vm5 = vweird.f32 %v4316_v16 }
 0x51b   :  { %v4597_v8 = vmul.f32 %v9849_v14, %v4312_v25  ;;  %v3408_v46 = vadd.f32 %v3407_v34, %v3379_v51  ;;  %vm4602_vm15 = vweird.f32 %v9849_v14  ;;  %v4608_v34 = vor.u32 1.1754944e-38, %v4607_v18 }
 0x51c   :  { %vm4603_vm2 = vmor %vm4601_vm0, %vm4602_vm15  ;;  %v4667_v25 = vand.u32 2147483648, %v4316_v16 }
 0x51d   :  { %v3448_v57 = vpop.f32.mrf.mxu0  ;;  %v3477_v30 = vpop.f32.mrf.mxu1  ;;  %v4598_v45 = vsub.f32 1.0, %v4597_v8  ;;  %v3588_v40 = vadd.f32 %v3408_v46, %v12848_v53  ;;  %v12849_v46 = vld [vmem:[#allocation99_spill] sm:$0xff]  ;;  %v4665_v53 = vand.u32 2147483647, %v4316_v16 }
 0x51e   :  { %v3419_v42 = vpop.f32.mrf.mxu3 }
 0x51f   :  { %v4599_v54 = vmul.f32 %v9849_v14, %v4598_v45  ;;  %v8321_v27 = vmul.f32 -1.442695, %v3588_v40  ;;  %v3449_v36 = vadd.f32 %v3448_v57, %v3419_v42  ;;  %v9851_v28 = vpop.eup %9850  ;;  %vm4666_vm7 = vcmp.eq.f32.partialorder %v4665_v53, 8.507059e+37 }
 0x520   :  { %v9853_v35 = vpop.eup %9852  ;;  %v4320_v44 = vadd.f32 1.0, %v9851_v28 }
 0x521   :  { %v3506_v20 = vpop.f32.mrf.mxu2  ;;  %v4600_v2 = vadd.f32 %v9849_v14, %v4599_v54  ;;  %9854 = vpow2.f32 %v8321_v27  ;;  %v3478_v32 = vadd.f32 %v3477_v30, %v3449_v36  ;;  %v4657_v23 = vmul.f32 %v9853_v35, %v4316_v16 }
 0x522   :  { %9856 = vrcp.f32 %v4320_v44  ;;  %vm4662_vm4 = vweird.f32 %v9853_v35  ;;  %vm4721_vm9 = vweird.f32 %v4320_v44 }
 0x523   :  { %v4604_v33 = vsel %vm4603_vm2, %v9849_v14, %v4600_v2  ;;  %v3507_v51 = vadd.f32 %v3506_v20, %v3478_v32  ;;  %v4658_v57 = vsub.f32 1.0, %v4657_v23  ;;  %vm4663_vm6 = vmor %vm4661_vm5, %vm4662_vm4  ;;  %v4668_v32 = vor.u32 1.1754944e-38, %v4667_v25 }
 0x524   :  { %v11974_v8 = vsel %vm4606_vm3, %v4608_v34, %v4604_v33 }
 0x525   :  { %v3450_v47 = vpop.f32.mrf.mxu0  ;;  %v3479_v41 = vpop.f32.mrf.mxu1  ;;  %v3533_v45 = vadd.f32 %v3507_v51, %v12849_v46  ;;  %v4659_v42 = vmul.f32 %v9853_v35, %v4658_v57 }
 0x526   :  { %v3421_v40 = vpop.f32.mrf.mxu3 }
 0x527   :  { %v9855_v30 = vpop.eup %9854  ;;  %v8294_v54 = vmul.f32 -1.442695, %v3533_v45  ;;  %v3451_v27 = vadd.f32 %v3450_v47, %v3421_v40  ;;  %v4660_v14 = vadd.f32 %v9853_v35, %v4659_v42  ;;  %v12850_v47 = vld [vmem:[#allocation102_spill] sm:$0xff]  ;;  %v4725_v45 = vand.u32 2147483647, %v4320_v44 }
 0x528   :  { %v4324_v18 = vadd.f32 1.0, %v9855_v30  ;;  %v9857_v2 = vpop.eup %9856  ;;  %v4727_v40 = vand.u32 2147483648, %v4320_v44 }
 0x529   :  { %v3508_v36 = vpop.f32.mrf.mxu2  ;;  %9858 = vpow2.f32 %v8294_v54  ;;  %v3480_v24 = vadd.f32 %v3479_v41, %v3451_v27  ;;  %v4664_v34 = vsel %vm4663_vm6, %v9853_v35, %v4660_v14  ;;  %v4717_v33 = vmul.f32 %v9857_v2, %v4320_v44 }
 0x52a   :  { %9860 = vrcp.f32 %v4324_v18  ;;  %v11977_v51 = vsel %vm4666_vm7, %v4668_v32, %v4664_v34  ;;  %vm4722_vm8 = vweird.f32 %v9857_v2  ;;  %vm4726_vm11 = vcmp.eq.f32.partialorder %v4725_v45, 8.507059e+37 }
 0x52b   :  { %v3509_v23 = vadd.f32 %v3508_v36, %v3480_v24  ;;  %v4718_v57 = vsub.f32 1.0, %v4717_v33  ;;  %vm4723_vm10 = vmor %vm4721_vm9, %vm4722_vm8  ;;  %v4728_v24 = vor.u32 1.1754944e-38, %v4727_v40  ;;  %vm4781_vm13 = vweird.f32 %v4324_v18 }
 0x52d   :  { %v3453_v20 = vpop.f32.mrf.mxu0  ;;  %v3482_v28 = vpop.f32.mrf.mxu1  ;;  %v3541_v46 = vadd.f32 %v3509_v23, %v12850_v47  ;;  %v4719_v41 = vmul.f32 %v9857_v2, %v4718_v57  ;;  %v4787_v57 = vand.u32 2147483648, %v4324_v18  ;;  %v4785_v47 = vand.u32 2147483647, %v4324_v18 }
 0x52e   :  { %v3424_v16 = vpop.f32.mrf.mxu3 }
 0x52f   :  { %v9859_v30 = vpop.eup %9858  ;;  %v8298_v42 = vmul.f32 -1.442695, %v3541_v46  ;;  %v3454_v54 = vadd.f32 %v3453_v20, %v3424_v16  ;;  %v4720_v35 = vadd.f32 %v9857_v2, %v4719_v41  ;;  %v12852_v41 = vld [vmem:[#allocation105_spill] sm:$0xff]  ;;  %vm4786_vm15 = vcmp.eq.f32.partialorder %v4785_v47, 8.507059e+37 }
 0x530   :  { %v9861_v27 = vpop.eup %9860  ;;  %v4297_v25 = vadd.f32 1.0, %v9859_v30 }
 0x531   :  { %v3511_v29 = vpop.f32.mrf.mxu2  ;;  %v4777_v53 = vmul.f32 %v9861_v27, %v4324_v18  ;;  %9862 = vpow2.f32 %v8298_v42  ;;  %v4724_v32 = vsel %vm4723_vm10, %v9857_v2, %v4720_v35  ;;  %v3483_v33 = vadd.f32 %v3482_v28, %v3454_v54 }
 0x532   :  { %9864 = vrcp.f32 %v4297_v25  ;;  %v11980_v23 = vsel %vm4726_vm11, %v4728_v24, %v4724_v32  ;;  %vm4782_vm12 = vweird.f32 %v9861_v27  ;;  %v4788_v2 = vor.u32 1.1754944e-38, %v4787_v57 }
 0x533   :  { %v4778_v34 = vsub.f32 1.0, %v4777_v53  ;;  %12851 = vst [vmem:[#allocation122_spill] sm:$0xff] %v11980_v23  ;;  %v3512_v46 = vadd.f32 %v3511_v29, %v3483_v33  ;;  %vm4783_vm14 = vmor %vm4781_vm13, %vm4782_vm12  ;;  %v4382_v33 = vand.u32 2147483648, %v4297_v25  ;;  %vm4376_vm2 = vweird.f32 %v4297_v25 }
 0x535   :  { %v3455_v36 = vpop.f32.mrf.mxu0  ;;  %v3484_v14 = vpop.f32.mrf.mxu1  ;;  %v4779_v20 = vmul.f32 %v9861_v27, %v4778_v34  ;;  %v3549_v42 = vadd.f32 %v3512_v46, %v12852_v41  ;;  %v4383_v41 = vor.u32 1.1754944e-38, %v4382_v33 }
 0x536   :  { %v3426_v16 = vpop.f32.mrf.mxu3 }
 0x537   :  { %v9863_v44 = vpop.eup %9862  ;;  %v4780_v30 = vadd.f32 %v9861_v27, %v4779_v20  ;;  %v3456_v19 = vadd.f32 %v3455_v36, %v3426_v16  ;;  %v8302_v53 = vmul.f32 -1.442695, %v3549_v42  ;;  %v4380_v36 = vand.u32 2147483647, %v4297_v25 }
 0x538   :  { %v9865_v40 = vpop.eup %9864  ;;  %v4301_v45 = vadd.f32 1.0, %v9863_v44 }
 0x539   :  { %v3513_v35 = vpop.f32.mrf.mxu2  ;;  %v4784_v28 = vsel %vm4783_vm14, %v9861_v27, %v4780_v30  ;;  %v4372_v54 = vmul.f32 %v9865_v40, %v4297_v25  ;;  %v3485_v18 = vadd.f32 %v3484_v14, %v3456_v19  ;;  %vm4377_vm0 = vweird.f32 %v9865_v40  ;;  %v12854_v27 = vld [vmem:[#allocation108_spill] sm:$0xff] }
 0x53a   :  { %v11983_v32 = vsel %vm4786_vm15, %v4788_v2, %v4784_v28  ;;  %9866 = vrcp.f32 %v4301_v45  ;;  %vm4378_vm3 = vmor %vm4376_vm2, %vm4377_vm0  ;;  %vm4381_vm4 = vcmp.eq.f32.partialorder %v4380_v36, 8.507059e+37  ;;  %v4442_v25 = vand.u32 2147483648, %v4301_v45 }
 0x53b   :  { %12853 = vst [vmem:[#allocation39_spill] sm:$0xff] %v11983_v32  ;;  %v4373_v34 = vsub.f32 1.0, %v4372_v54  ;;  %9868 = vpow2.f32 %v8302_v53  ;;  %v3514_v46 = vadd.f32 %v3513_v35, %v3485_v18  ;;  %vm4436_vm6 = vweird.f32 %v4301_v45 }
 0x53d   :  { %v3458_v24 = vpop.f32.mrf.mxu0  ;;  %v3487_v29 = vpop.f32.mrf.mxu1  ;;  %v4374_v20 = vmul.f32 %v9865_v40, %v4373_v34  ;;  %v3557_v47 = vadd.f32 %v3514_v46, %v12854_v27  ;;  %v4440_v46 = vand.u32 2147483647, %v4301_v45 }
 0x53e   :  { %v3429_v57 = vpop.f32.mrf.mxu3 }
 0x53f   :  { %v4375_v16 = vadd.f32 %v9865_v40, %v4374_v20  ;;  %v3459_v44 = vadd.f32 %v3458_v24, %v3429_v57  ;;  %v8306_v19 = vmul.f32 -1.442695, %v3557_v47  ;;  %v4443_v47 = vor.u32 1.1754944e-38, %v4442_v25 }
 0x540   :  { %v9867_v30 = vpop.eup %9866  ;;  %vm4441_vm8 = vcmp.eq.f32.partialorder %v4440_v46, 8.507059e+37 }
 0x541   :  { %v3516_v42 = vpop.f32.mrf.mxu2  ;;  %v9869_v2 = vpop.eup %9868  ;;  %v4379_v28 = vsel %vm4378_vm3, %v9865_v40, %v4375_v16  ;;  %v4432_v54 = vmul.f32 %v9867_v30, %v4301_v45  ;;  %v3488_v34 = vadd.f32 %v3487_v29, %v3459_v44  ;;  %9870 = vpow2.f32 %v8306_v19  ;;  %v12855_v40 = vld [vmem:[#allocation111_spill] sm:$0xff] }
 0x542   :  { %v11986_v14 = vsel %vm4381_vm4, %v4383_v41, %v4379_v28  ;;  %v4305_v53 = vadd.f32 1.0, %v9869_v2  ;;  %vm4437_vm5 = vweird.f32 %v9867_v30 }
 0x543   :  { %v4433_v18 = vsub.f32 1.0, %v4432_v54  ;;  %v3517_v33 = vadd.f32 %v3516_v42, %v3488_v34  ;;  %vm4438_vm7 = vmor %vm4436_vm6, %vm4437_vm5 }
 0x544   :  { %9872 = vrcp.f32 %v4305_v53  ;;  %v4502_v25 = vand.u32 2147483648, %v4305_v53  ;;  %vm4496_vm10 = vweird.f32 %v4305_v53 }
 0x545   :  { %v3460_v35 = vpop.f32.mrf.mxu0  ;;  %v3489_v20 = vpop.f32.mrf.mxu1  ;;  %v4434_v24 = vmul.f32 %v9867_v30, %v4433_v18  ;;  %v3565_v36 = vadd.f32 %v3517_v33, %v12855_v40  ;;  %v4500_v33 = vand.u32 2147483647, %v4305_v53 }
 0x546   :  { %v3431_v57 = vpop.f32.mrf.mxu3 }
 0x547   :  { %v4435_v27 = vadd.f32 %v9867_v30, %v4434_v24  ;;  %v3461_v16 = vadd.f32 %v3460_v35, %v3431_v57  ;;  %v9871_v29 = vpop.eup %9870  ;;  %v8310_v2 = vmul.f32 -1.442695, %v3565_v36  ;;  %v12856_v24 = vld [vmem:[#allocation114_spill] sm:$0xff]  ;;  %vm4501_vm12 = vcmp.eq.f32.partialorder %v4500_v33, 8.507059e+37 }
 0x548   :  { %v4309_v18 = vadd.f32 1.0, %v9871_v29  ;;  %v4503_v29 = vor.u32 1.1754944e-38, %v4502_v25 }
 0x549   :  { %v3518_v41 = vpop.f32.mrf.mxu2  ;;  %v4439_v44 = vsel %vm4438_vm7, %v9867_v30, %v4435_v27  ;;  %v3490_v28 = vadd.f32 %v3489_v20, %v3461_v16  ;;  %9874 = vpow2.f32 %v8310_v2 }
 0x54a   :  { %v9873_v54 = vpop.eup %9872  ;;  %v11989_v19 = vsel %vm4441_vm8, %v4443_v47, %v4439_v44  ;;  %9876 = vrcp.f32 %v4309_v18  ;;  %vm4556_vm14 = vweird.f32 %v4309_v18 }
 0x54b   :  { %v4492_v32 = vmul.f32 %v9873_v54, %v4305_v53  ;;  %v3519_v42 = vadd.f32 %v3518_v41, %v3490_v28  ;;  %vm4497_vm9 = vweird.f32 %v9873_v54 }
 0x54c   :  { %vm4498_vm11 = vmor %vm4496_vm10, %vm4497_vm9 }
 0x54d   :  { %v3463_v45 = vpop.f32.mrf.mxu0  ;;  %v4493_v34 = vsub.f32 1.0, %v4492_v32  ;;  %v3573_v35 = vadd.f32 %v3519_v42, %v12856_v24  ;;  %v3492_v57 = vpop.f32.mrf.mxu1  ;;  %v12857_v24 = vld [vmem:[#allocation117_spill] sm:$0xff] }
 0x54e   :  { %v3434_v40 = vpop.f32.mrf.mxu3 }
 0x54f   :  { %v4494_v30 = vmul.f32 %v9873_v54, %v4493_v34  ;;  %v8314_v46 = vmul.f32 -1.442695, %v3573_v35  ;;  %v3464_v20 = vadd.f32 %v3463_v45, %v3434_v40  ;;  %v9875_v36 = vpop.eup %9874  ;;  %v4560_v35 = vand.u32 2147483647, %v4309_v18 }
 0x550   :  { %v9877_v41 = vpop.eup %9876  ;;  %v4313_v32 = vadd.f32 1.0, %v9875_v36  ;;  %v4562_v40 = vand.u32 2147483648, %v4309_v18 }
 0x551   :  { %v3521_v27 = vpop.f32.mrf.mxu2  ;;  %v4495_v16 = vadd.f32 %v9873_v54, %v4494_v30  ;;  %9878 = vpow2.f32 %v8314_v46  ;;  %v3493_v47 = vadd.f32 %v3492_v57, %v3464_v20  ;;  %v4552_v2 = vmul.f32 %v9877_v41, %v4309_v18 }
 0x552   :  { %9880 = vrcp.f32 %v4313_v32  ;;  %vm4557_vm13 = vweird.f32 %v9877_v41  ;;  %vm4561_vm0 = vcmp.eq.f32.partialorder %v4560_v35, 8.507059e+37  ;;  %v4620_v18 = vand.u32 2147483647, %v4313_v32 }
 0x553   :  { %v4499_v44 = vsel %vm4498_vm11, %v9873_v54, %v4495_v16  ;;  %v3522_v28 = vadd.f32 %v3521_v27, %v3493_v47  ;;  %v4553_v34 = vsub.f32 1.0, %v4552_v2  ;;  %vm4558_vm15 = vmor %vm4556_vm14, %vm4557_vm13  ;;  %v4563_v47 = vor.u32 1.1754944e-38, %v4562_v40 }
 0x554   :  { %v11992_v42 = vsel %vm4501_vm12, %v4503_v29, %v4499_v44  ;;  %vm4616_vm3 = vweird.f32 %v4313_v32  ;;  %vm4621_vm5 = vcmp.eq.f32.partialorder %v4620_v18, 8.507059e+37 }
 0x555   :  { %v3581_v45 = vadd.f32 %v3522_v28, %v12857_v24  ;;  %v3465_v30 = vpop.f32.mrf.mxu0  ;;  %v4554_v57 = vmul.f32 %v9877_v41, %v4553_v34  ;;  %v3494_v54 = vpop.f32.mrf.mxu1 }
 0x556   :  { %v3436_v53 = vpop.f32.mrf.mxu3 }
 0x557   :  { %v9879_v46 = vpop.eup %9878  ;;  %v8318_v20 = vmul.f32 -1.442695, %v3581_v45  ;;  %v3466_v25 = vadd.f32 %v3465_v30, %v3436_v53  ;;  %v4555_v33 = vadd.f32 %v9877_v41, %v4554_v57  ;;  %v12858_v45 = vld [vmem:[#allocation120_spill] sm:$0xff]  ;;  %v4622_v53 = vand.u32 2147483648, %v4313_v32 }
 0x558   :  { %v4317_v36 = vadd.f32 1.0, %v9879_v46  ;;  %v9881_v16 = vpop.eup %9880 }
 0x559   :  { %9882 = vpow2.f32 %v8318_v20  ;;  %v3495_v27 = vadd.f32 %v3494_v54, %v3466_v25  ;;  %v3523_v29 = vpop.f32.mrf.mxu2  ;;  %v4559_v44 = vsel %vm4558_vm15, %v9877_v41, %v4555_v33  ;;  %v4612_v2 = vmul.f32 %v9881_v16, %v4313_v32 }
 0x55a   :  { %9884 = vrcp.f32 %v4317_v36  ;;  %v11995_v24 = vsel %vm4561_vm0, %v4563_v47, %v4559_v44  ;;  %vm4617_vm2 = vweird.f32 %v9881_v16  ;;  %v4623_v41 = vor.u32 1.1754944e-38, %v4622_v53 }
 0x55b   :  { %v3524_v28 = vadd.f32 %v3523_v29, %v3495_v27  ;;  %v4613_v34 = vsub.f32 1.0, %v4612_v2  ;;  %vm4618_vm4 = vmor %vm4616_vm3, %vm4617_vm2  ;;  %v4682_v47 = vand.u32 2147483648, %v4317_v36  ;;  %v4680_v44 = vand.u32 2147483647, %v4317_v36 }
 0x55c   :  { %vm4676_vm7 = vweird.f32 %v4317_v36 }
 0x55d   :  { %v3589_v30 = vadd.f32 %v3524_v28, %v12858_v45  ;;  %v4614_v57 = vmul.f32 %v9881_v16, %v4613_v34  ;;  %v4683_v32 = vor.u32 1.1754944e-38, %v4682_v47  ;;  %vm4681_vm9 = vcmp.eq.f32.partialorder %v4680_v44, 8.507059e+37 }
 0x55f   :  { %v9883_v46 = vpop.eup %9882  ;;  %v8322_v20 = vmul.f32 -1.442695, %v3589_v30  ;;  %v4615_v40 = vadd.f32 %v9881_v16, %v4614_v57 }
 0x560   :  { %v9885_v25 = vpop.eup %9884  ;;  %v4321_v54 = vadd.f32 1.0, %v9883_v46 }
 0x561   :  { %v4672_v23 = vmul.f32 %v9885_v25, %v4317_v36  ;;  %9886 = vpow2.f32 %v8322_v20  ;;  %v4619_v35 = vsel %vm4618_vm4, %v9881_v16, %v4615_v40  ;;  %vm4677_vm6 = vweird.f32 %v9885_v25 }
 0x562   :  { %9888 = vrcp.f32 %v4321_v54  ;;  %v11998_v27 = vsel %vm4621_vm5, %v4623_v41, %v4619_v35  ;;  %vm4678_vm8 = vmor %vm4676_vm7, %vm4677_vm6  ;;  %v4742_v16 = vand.u32 2147483648, %v4321_v54  ;;  %v4740_v18 = vand.u32 2147483647, %v4321_v54 }
 0x563   :  { %v4673_v33 = vsub.f32 1.0, %v4672_v23  ;;  %vm4736_vm11 = vweird.f32 %v4321_v54 }
 0x564   :  { %v4743_v36 = vor.u32 1.1754944e-38, %v4742_v16  ;;  %vm4741_vm13 = vcmp.eq.f32.partialorder %v4740_v18, 8.507059e+37 }
 0x565   :  { %v4674_v29 = vmul.f32 %v9885_v25, %v4673_v33 }
 0x567   :  { %v9887_v2 = vpop.eup %9886  ;;  %v4675_v28 = vadd.f32 %v9885_v25, %v4674_v29 }
 0x568   :  { %v9889_v34 = vpop.eup %9888  ;;  %v4325_v45 = vadd.f32 1.0, %v9887_v2 }
 0x569   :  { %v4679_v30 = vsel %vm4678_vm8, %v9885_v25, %v4675_v28  ;;  %v4732_v53 = vmul.f32 %v9889_v34, %v4321_v54  ;;  %vm4737_vm10 = vweird.f32 %v9889_v34 }
 0x56a   :  { %v12000_v46 = vsel %vm4681_vm9, %v4683_v32, %v4679_v30  ;;  %9890 = vrcp.f32 %v4325_v45  ;;  %vm4738_vm12 = vmor %vm4736_vm11, %vm4737_vm10  ;;  %v4802_v47 = vand.u32 2147483648, %v4325_v45  ;;  %v4800_v44 = vand.u32 2147483647, %v4325_v45 }
 0x56b   :  { %v4733_v23 = vsub.f32 1.0, %v4732_v53  ;;  %vm4796_vm15 = vweird.f32 %v4325_v45 }
 0x56c   :  { %v4803_v28 = vor.u32 1.1754944e-38, %v4802_v47  ;;  %vm4801_vm2 = vcmp.eq.f32.partialorder %v4800_v44, 8.507059e+37 }
 0x56d   :  { %v4734_v57 = vmul.f32 %v9889_v34, %v4733_v23 }
 0x56f   :  { %v4735_v20 = vadd.f32 %v9889_v34, %v4734_v57 }
 0x570   :  { %v9891_v40 = vpop.eup %9890 }
 0x571   :  { %v4739_v41 = vsel %vm4738_vm12, %v9889_v34, %v4735_v20  ;;  %v4792_v35 = vmul.f32 %v9891_v40, %v4325_v45  ;;  %vm4797_vm14 = vweird.f32 %v9891_v40 }
 0x572   :  { %v12002_v33 = vsel %vm4741_vm13, %v4743_v36, %v4739_v41  ;;  %vm4798_vm0 = vmor %vm4796_vm15, %vm4797_vm14 }
 0x573   :  { %12859 = vst [vmem:[#allocation42_spill] sm:$0xff] %v12002_v33  ;;  %v4793_v25 = vsub.f32 1.0, %v4792_v35 }
 0x575   :  { %v4794_v29 = vmul.f32 %v9891_v40, %v4793_v25 }
 0x577   :  { %v4795_v2 = vadd.f32 %v9891_v40, %v4794_v29 }
 0x579   :  { %v4799_v32 = vsel %vm4798_vm0, %v9891_v40, %v4795_v2 }
 0x57a   :  { %v12004_v54 = vsel %vm4801_vm2, %v4803_v28, %v4799_v32 }
 0x57b   :  { %12860 = vst [vmem:[#allocation45_spill] sm:$0xff] %v12004_v54 }
 0x57c   :  { %10121 = dma.done.wait [#allocation5 + $0x1], 16384 }
 0x57d   :  { %10122 = vsyncadd [#allocation5 + $0x1], 4294950912  ;;  %v8437_v34 = vld [vmem:[#allocation3 + $0xe0] sm:$0xf]  ;;  %v9447_v30 = vld [vmem:[#allocation3 + $0xec] sm:$0xf0] }
 0x57e   :  { %v8565_v53 = vld [vmem:[#allocation3 + $0x1e0] sm:$0xf]  ;;  %v8438_v23 = vor.u32 %v9447_v30, %v8437_v34  ;;  %v9479_v16 = vld [vmem:[#allocation3 + $0x1ec] sm:$0xf0]  ;;  %s12196_s9 = sld [smem:[#allocation6 + $0x1]] }
 0x57f   :  { %v8693_v57 = vld [vmem:[#allocation3 + $0x2e0] sm:$0xf]  ;;  %v9511_v18 = vld [vmem:[#allocation3 + $0x2ec] sm:$0xf0]  ;;  %v8566_v20 = vor.u32 %v9479_v16, %v8565_v53  ;;  %s6281_s3 = sld [smem:[#allocation6]] }
 0x580   :  { %v8694_v36 = vor.u32 %v9511_v18, %v8693_v57  ;;  %v8821_v41 = vld [vmem:[#allocation3 + $0x3e0] sm:$0xf]  ;;  %v9543_v35 = vld [vmem:[#allocation3 + $0x3ec] sm:$0xf0]  ;;  %5625 = vmatpush.bf16.msra.mxu3 %v8438_v23  ;;  %s12200_s27 = sld [smem:[#allocation6 + $0x2]] }
 0x581   :  { %v8421_v45 = vld [vmem:[#allocation3 + $0xc0] sm:$0xf]  ;;  %v8822_v25 = vor.u32 %v9543_v35, %v8821_v41  ;;  %v9443_v40 = vld [vmem:[#allocation3 + $0xcc] sm:$0xf0]  ;;  %5654 = vmatpush.bf16.msrb.mxu0 %v8566_v20  ;;  %s12209_s1 = sld [smem:[#allocation6 + $0x3]] }
 0x582   :  { %v8549_v47 = vld [vmem:[#allocation3 + $0x1c0] sm:$0xf]  ;;  %v9475_v29 = vld [vmem:[#allocation3 + $0x1cc] sm:$0xf0]  ;;  %5683 = vmatpush.bf16.msrb.mxu1 %v8694_v36  ;;  %v8422_v44 = vor.u32 %v9443_v40, %v8421_v45 }
 0x583   :  { %v8550_v2 = vor.u32 %v9475_v29, %v8549_v47  ;;  %v8677_v28 = vld [vmem:[#allocation3 + $0x2c0] sm:$0xf]  ;;  %v9507_v32 = vld [vmem:[#allocation3 + $0x2cc] sm:$0xf0]  ;;  %5712 = vmatpush.bf16.msrb.mxu2 %v8822_v25 }
 0x584   :  { %v8805_v34 = vld [vmem:[#allocation3 + $0x3c0] sm:$0xf]  ;;  %v8678_v30 = vor.u32 %v9507_v32, %v8677_v28  ;;  %v9539_v54 = vld [vmem:[#allocation3 + $0x3cc] sm:$0xf0]  ;;  %5626 = vmatpush.bf16.msra.mxu3 %v8422_v44 }
 0x585   :  { %v8405_v53 = vld [vmem:[#allocation3 + $0xa0] sm:$0xf]  ;;  %v9439_v16 = vld [vmem:[#allocation3 + $0xac] sm:$0xf0]  ;;  %v8806_v57 = vor.u32 %v9539_v54, %v8805_v34  ;;  %5655 = vmatpush.bf16.msrb.mxu0 %v8550_v2 }
 0x586   :  { %v8533_v18 = vld [vmem:[#allocation3 + $0x1a0] sm:$0xf]  ;;  %v9471_v33 = vld [vmem:[#allocation3 + $0x1ac] sm:$0xf0]  ;;  %v8406_v41 = vor.u32 %v9439_v16, %v8405_v53  ;;  %5684 = vmatpush.bf16.msrb.mxu1 %v8678_v30 }
 0x587   :  { %v8661_v23 = vld [vmem:[#allocation3 + $0x2a0] sm:$0xf]  ;;  %v9503_v35 = vld [vmem:[#allocation3 + $0x2ac] sm:$0xf0]  ;;  %v8534_v36 = vor.u32 %v9471_v33, %v8533_v18  ;;  %5713 = vmatpush.bf16.msrb.mxu2 %v8806_v57 }
 0x588   :  { %v8789_v5 = vld [vmem:[#allocation3 + $0x3a0] sm:$0xf]  ;;  %v9535_v20 = vld [vmem:[#allocation3 + $0x3ac] sm:$0xf0]  ;;  %v8662_v45 = vor.u32 %v9503_v35, %v8661_v23  ;;  %5627 = vmatpush.bf16.msra.mxu3 %v8406_v41 }
 0x589   :  { %v8389_v40 = vld [vmem:[#allocation3 + $0x80] sm:$0xf]  ;;  %v9435_v47 = vld [vmem:[#allocation3 + $0x8c] sm:$0xf0]  ;;  %v8790_v29 = vor.u32 %v9535_v20, %v8789_v5  ;;  %5656 = vmatpush.bf16.msrb.mxu0 %v8534_v36 }
 0x58a   :  { %v8517_v25 = vld [vmem:[#allocation3 + $0x180] sm:$0xf]  ;;  %v9467_v28 = vld [vmem:[#allocation3 + $0x18c] sm:$0xf0]  ;;  %v8390_v44 = vor.u32 %v9435_v47, %v8389_v40  ;;  %5685 = vmatpush.bf16.msrb.mxu1 %v8662_v45 }
 0x58b   :  { %v8645_v32 = vld [vmem:[#allocation3 + $0x280] sm:$0xf]  ;;  %v9499_v54 = vld [vmem:[#allocation3 + $0x28c] sm:$0xf0]  ;;  %v8518_v53 = vor.u32 %v9467_v28, %v8517_v25  ;;  %5714 = vmatpush.bf16.msrb.mxu2 %v8790_v29 }
 0x58c   :  { %v8773_v34 = vld [vmem:[#allocation3 + $0x380] sm:$0xf]  ;;  %v9531_v58 = vld [vmem:[#allocation3 + $0x38c] sm:$0xf0]  ;;  %v8646_v16 = vor.u32 %v9499_v54, %v8645_v32  ;;  %5628 = vmatpush.bf16.msra.mxu3 %v8390_v44 }
 0x58d   :  { %v8373_v2 = vld [vmem:[#allocation3 + $0x60] sm:$0xf]  ;;  %v9431_v30 = vld [vmem:[#allocation3 + $0x6c] sm:$0xf0]  ;;  %v8774_v18 = vor.u32 %v9531_v58, %v8773_v34  ;;  %5657 = vmatpush.bf16.msrb.mxu0 %v8518_v53 }
 0x58e   :  { %v8501_v33 = vld [vmem:[#allocation3 + $0x160] sm:$0xf]  ;;  %v9463_v23 = vld [vmem:[#allocation3 + $0x16c] sm:$0xf0]  ;;  %v8374_v62 = vor.u32 %v9431_v30, %v8373_v2  ;;  %5686 = vmatpush.bf16.msrb.mxu1 %v8646_v16 }
 0x58f   :  { %v8629_v35 = vld [vmem:[#allocation3 + $0x260] sm:$0xf]  ;;  %v9495_v57 = vld [vmem:[#allocation3 + $0x26c] sm:$0xf0]  ;;  %v8502_v41 = vor.u32 %v9463_v23, %v8501_v33  ;;  %5715 = vmatpush.bf16.msrb.mxu2 %v8774_v18 }
 0x590   :  { %v8757_v5 = vld [vmem:[#allocation3 + $0x360] sm:$0xf]  ;;  %v9527_v20 = vld [vmem:[#allocation3 + $0x36c] sm:$0xf0]  ;;  %v8630_v40 = vor.u32 %v9495_v57, %v8629_v35  ;;  %5629 = vmatpush.bf16.msra.mxu3 %v8374_v62 }
 0x591   :  { %v8357_v36 = vld [vmem:[#allocation3 + $0x40] sm:$0xf]  ;;  %v9427_v45 = vld [vmem:[#allocation3 + $0x4c] sm:$0xf0]  ;;  %v8758_v25 = vor.u32 %v9527_v20, %v8757_v5  ;;  %5658 = vmatpush.bf16.msrb.mxu0 %v8502_v41 }
 0x592   :  { %v8485_v47 = vld [vmem:[#allocation3 + $0x140] sm:$0xf]  ;;  %v9459_v28 = vld [vmem:[#allocation3 + $0x14c] sm:$0xf0]  ;;  %v8358_v34 = vor.u32 %v9427_v45, %v8357_v36  ;;  %5687 = vmatpush.bf16.msrb.mxu1 %v8630_v40 }
 0x593   :  { %v8613_v32 = vld [vmem:[#allocation3 + $0x240] sm:$0xf]  ;;  %v9491_v29 = vld [vmem:[#allocation3 + $0x24c] sm:$0xf0]  ;;  %v8486_v44 = vor.u32 %v9459_v28, %v8485_v47  ;;  %5716 = vmatpush.bf16.msrb.mxu2 %v8758_v25 }
 0x594   :  { %v8741_v58 = vld [vmem:[#allocation3 + $0x340] sm:$0xf]  ;;  %v9523_v54 = vld [vmem:[#allocation3 + $0x34c] sm:$0xf0]  ;;  %v8614_v2 = vor.u32 %v9491_v29, %v8613_v32  ;;  %5630 = vmatpush.bf16.msra.mxu3 %v8358_v34  ;;  %v4810_v34 = vmul.f32 %v11927_v50, %v10434_v59 }
 0x595   :  { %v8341_v53 = vld [vmem:[#allocation3 + $0x20] sm:$0xf]  ;;  %v9423_v16 = vld [vmem:[#allocation3 + $0x2c] sm:$0xf0]  ;;  %v8742_v33 = vor.u32 %v9523_v54, %v8741_v58  ;;  %5659 = vmatpush.bf16.msrb.mxu0 %v8486_v44  ;;  %v4809_v58 = vmul.f32 %v11870_v10, %v10419_v55  ;;  %v4813_v54 = vmul.f32 %v11876_v52, %v10436_v61  ;;  %v4814_v44 = vmul.f32 %v11934_v0, %v10452_v1  ;;  %v12861_v10 = vld [vmem:[#allocation36_spill] sm:$0xff] }
 0x596   :  { %v8469_v30 = vld [vmem:[#allocation3 + $0x120] sm:$0xf]  ;;  %v9455_v23 = vld [vmem:[#allocation3 + $0x12c] sm:$0xf0]  ;;  %v8342_v20 = vor.u32 %v9423_v16, %v8341_v53  ;;  %5688 = vmatpush.bf16.msrb.mxu1 %v8614_v2  ;;  %v9445_v2 = vld [vmem:[#allocation3 + $0xe4] sm:$0xf] }
 0x597   :  { %v8597_v35 = vld [vmem:[#allocation3 + $0x220] sm:$0xf]  ;;  %v9487_v18 = vld [vmem:[#allocation3 + $0x22c] sm:$0xf0]  ;;  %v8470_v62 = vor.u32 %v9455_v23, %v8469_v30  ;;  %5717 = vmatpush.bf16.msrb.mxu2 %v8742_v33  ;;  %v8439_v53 = vld [vmem:[#allocation3 + $0xf0] sm:$0xf0]  ;;  %v4811_v30 = vmul.f32 %v11962_v21, %v10618_v12  ;;  %v4815_v33 = vmul.f32 %v11965_v6, %v10640_v26  ;;  %v4812_v23 = vmul.f32 %v11986_v14, %v12861_v10 }
 0x598   :  { %v8725_v57 = vld [vmem:[#allocation3 + $0x320] sm:$0xf]  ;;  %v9519_v5 = vld [vmem:[#allocation3 + $0x32c] sm:$0xf0]  ;;  %v8598_v41 = vor.u32 %v9487_v18, %v8597_v35  ;;  %5631 = vmatpush.bf16.msra.mxu3 %v8342_v20  ;;  %v9541_v52 = vld [vmem:[#allocation3 + $0x3e4] sm:$0xf]  ;;  %v12022_v12 = vpack.c.bf16 %v4813_v54, %v4809_v58 }
 0x599   :  { %v8325_v63 = vld [vmem:[#allocation3] sm:$0xf]  ;;  %v9419_v40 = vld [vmem:[#allocation3 + $0xc] sm:$0xf0]  ;;  %v8726_v47 = vor.u32 %v9519_v5, %v8725_v57  ;;  %v8823_v35 = vld [vmem:[#allocation3 + $0x3f0] sm:$0xf0]  ;;  %5660 = vmatpush.bf16.msrb.mxu0 %v8470_v62  ;;  %v8442_v5 = vor.u32 %v9445_v2, %v8439_v53  ;;  %v12024_v62 = vpack.c.bf16 %v4814_v44, %v4810_v34 }
 0x59a   :  { %v8453_v36 = vld [vmem:[#allocation3 + $0x100] sm:$0xf]  ;;  %v9451_v45 = vld [vmem:[#allocation3 + $0x10c] sm:$0xf0]  ;;  %v8326_v16 = vor.u32 %v9419_v40, %v8325_v63  ;;  %5689 = vmatpush.bf16.msrb.mxu1 %v8598_v41  ;;  %v12862_v0 = vld [vmem:[#allocation38_spill] sm:$0xff]  ;;  %v8826_v6 = vor.u32 %v9541_v52, %v8823_v35  ;;  %v12026_v41 = vpack.c.bf16 %v4815_v33, %v4811_v30 }
 0x59b   :  { %v8581_v28 = vld [vmem:[#allocation3 + $0x200] sm:$0xf]  ;;  %v9483_v25 = vld [vmem:[#allocation3 + $0x20c] sm:$0xf0]  ;;  %v8454_v50 = vor.u32 %v9451_v45, %v8453_v36  ;;  %v4816_v57 = vmul.f32 %v11989_v19, %v12862_v0  ;;  %5718 = vmatpush.bf16.msrb.mxu2 %v8726_v47  ;;  %v9477_v20 = vld [vmem:[#allocation3 + $0x1e4] sm:$0xf] }
 0x59c   :  { %v8709_v32 = vld [vmem:[#allocation3 + $0x300] sm:$0xf]  ;;  %v9515_v29 = vld [vmem:[#allocation3 + $0x30c] sm:$0xf0]  ;;  %v8582_v18 = vor.u32 %v9483_v25, %v8581_v28  ;;  %v8567_v21 = vld [vmem:[#allocation3 + $0x1f0] sm:$0xf0]  ;;  %5632 = vmatpush.bf16.msra.mxu3 %v8326_v16 }
 0x59d   :  { %v8710_v63 = vor.u32 %v9515_v29, %v8709_v32  ;;  %v9441_v40 = vld [vmem:[#allocation3 + $0xc4] sm:$0xf]  ;;  %v8423_v26 = vld [vmem:[#allocation3 + $0xd0] sm:$0xf0]  ;;  %5661 = vmatpush.bf16.msrb.mxu0 %v8454_v50  ;;  %v12028_v19 = vpack.c.bf16 %v4816_v57, %v4812_v23  ;;  %v8570_v47 = vor.u32 %v9477_v20, %v8567_v21  ;;  %v9466_v0 = vld [vmem:[#allocation3 + $0x18c] sm:$0xf] }
 0x59e   :  { %v9509_v14 = vld [vmem:[#allocation3 + $0x2e4] sm:$0xf]  ;;  %v8695_v10 = vld [vmem:[#allocation3 + $0x2f0] sm:$0xf0]  ;;  %5690 = vmatpush.bf16.msrb.mxu1 %v8582_v18  ;;  %v8426_v28 = vor.u32 %v9441_v40, %v8423_v26  ;;  %v8607_v1 = vld [vmem:[#allocation3 + $0x238] sm:$0xf0] }
 0x59f   :  { %v9537_v36 = vld [vmem:[#allocation3 + $0x3c4] sm:$0xf]  ;;  %v8807_v45 = vld [vmem:[#allocation3 + $0x3d0] sm:$0xf0]  ;;  %5719 = vmatpush.bf16.msrb.mxu2 %v8710_v63  ;;  %v8698_v25 = vor.u32 %v9509_v14, %v8695_v10  ;;  %5633 = vmatmul.bf16.vlgmr.msra.gmra.mxu3 %v12022_v12 }
 0x5a0   :  { %5741 = vmatpush.bf16.msrb.mxu3 %v8442_v5  ;;  %v9473_v32 = vld [vmem:[#allocation3 + $0x1c4] sm:$0xf]  ;;  %v8551_v29 = vld [vmem:[#allocation3 + $0x1d0] sm:$0xf0]  ;;  %v8810_v54 = vor.u32 %v9537_v36, %v8807_v45  ;;  %5662 = vmatmul.bf16.vlgmr.msrb.gmra.mxu0 %v12024_v62  ;;  %v4817_v45 = vmul.f32 %v11883_v22, %v10454_v3  ;;  %v4823_v22 = vmul.f32 %v11971_v60, %v10684_v11  ;;  %v8495_v11 = vld [vmem:[#allocation3 + $0x158] sm:$0xf0] }
 0x5a1   :  { %v9437_v58 = vld [vmem:[#allocation3 + $0xa4] sm:$0xf]  ;;  %v8407_v34 = vld [vmem:[#allocation3 + $0xb0] sm:$0xf0]  ;;  %5691 = vmatmul.bf16.vlgmr.msrb.gmra.mxu1 %v12026_v41  ;;  %5770 = vmatpush.bf16.msra.mxu0 %v8570_v47  ;;  %v8554_v26 = vor.u32 %v9473_v32, %v8551_v29  ;;  %v4821_v47 = vmul.f32 %v11890_v56, %v10472_v9  ;;  %v4820_v56 = vmul.f32 %v11992_v42, %v10601_v4  ;;  %v8367_v4 = vld [vmem:[#allocation3 + $0x58] sm:$0xf0] }
 0x5a2   :  { %v9505_v44 = vld [vmem:[#allocation3 + $0x2c4] sm:$0xf]  ;;  %v8679_v2 = vld [vmem:[#allocation3 + $0x2d0] sm:$0xf0]  ;;  %5720 = vmatmul.bf16.vlgmr.msrb.gmra.mxu2 %v12028_v19  ;;  %5799 = vmatpush.bf16.msra.mxu1 %v8698_v25  ;;  %v8410_v30 = vor.u32 %v9437_v58, %v8407_v34  ;;  %v4818_v58 = vmul.f32 %v11941_v31, %v10470_v7  ;;  %v4819_v34 = vmul.f32 %v11968_v43, %v10662_v49 }
 0x5a3   :  { %5828 = vmatpush.bf16.msra.mxu2 %v8826_v6  ;;  %v9533_v53 = vld [vmem:[#allocation3 + $0x3a4] sm:$0xf]  ;;  %v8791_v16 = vld [vmem:[#allocation3 + $0x3b0] sm:$0xf0]  ;;  %v8682_v33 = vor.u32 %v9505_v44, %v8679_v2 }
 0x5a4   :  { %5742 = vmatpush.bf16.msrb.mxu3 %v8426_v28  ;;  %v9469_v10 = vld [vmem:[#allocation3 + $0x1a4] sm:$0xf]  ;;  %v8535_v23 = vld [vmem:[#allocation3 + $0x1b0] sm:$0xf0]  ;;  %v8794_v35 = vor.u32 %v9533_v53, %v8791_v16 }
 0x5a5   :  { %v9433_v52 = vld [vmem:[#allocation3 + $0x84] sm:$0xf]  ;;  %v8391_v50 = vld [vmem:[#allocation3 + $0x90] sm:$0xf0]  ;;  %5771 = vmatpush.bf16.msra.mxu0 %v8554_v26  ;;  %v8538_v20 = vor.u32 %v9469_v10, %v8535_v23  ;;  %v12050_v10 = vpack.c.bf16 %v4821_v47, %v4817_v45 }
 0x5a6   :  { %v9501_v18 = vld [vmem:[#allocation3 + $0x2a4] sm:$0xf]  ;;  %v8663_v57 = vld [vmem:[#allocation3 + $0x2b0] sm:$0xf0]  ;;  %5800 = vmatpush.bf16.msra.mxu1 %v8682_v33  ;;  %v8394_v21 = vor.u32 %v9433_v52, %v8391_v50  ;;  %v12054_v50 = vpack.c.bf16 %v4823_v22, %v4819_v34 }
 0x5a7   :  { %5829 = vmatpush.bf16.msra.mxu2 %v8810_v54  ;;  %v9529_v63 = vld [vmem:[#allocation3 + $0x384] sm:$0xf]  ;;  %v8775_v5 = vld [vmem:[#allocation3 + $0x390] sm:$0xf0]  ;;  %v8666_v40 = vor.u32 %v9501_v18, %v8663_v57  ;;  %v4822_v54 = vmul.f32 %v11947_v37, %v10488_v13  ;;  %v8591_v13 = vld [vmem:[#allocation3 + $0x218] sm:$0xf0] }
 0x5a8   :  { %5743 = vmatpush.bf16.msrb.mxu3 %v8410_v30  ;;  %v9465_v6 = vld [vmem:[#allocation3 + $0x184] sm:$0xf]  ;;  %v8519_v14 = vld [vmem:[#allocation3 + $0x190] sm:$0xf0]  ;;  %v8778_v28 = vor.u32 %v9529_v63, %v8775_v5 }
 0x5a9   :  { %v9429_v36 = vld [vmem:[#allocation3 + $0x64] sm:$0xf]  ;;  %v8375_v25 = vld [vmem:[#allocation3 + $0x70] sm:$0xf0]  ;;  %5772 = vmatpush.bf16.msra.mxu0 %v8538_v20  ;;  %v8522_v26 = vor.u32 %v9465_v6, %v8519_v14  ;;  %v12052_v42 = vpack.c.bf16 %v4822_v54, %v4818_v58 }
 0x5aa   :  { %v9497_v32 = vld [vmem:[#allocation3 + $0x284] sm:$0xf]  ;;  %v8647_v29 = vld [vmem:[#allocation3 + $0x290] sm:$0xf0]  ;;  %5801 = vmatpush.bf16.msra.mxu1 %v8666_v40  ;;  %v8378_v31 = vor.u32 %v9429_v36, %v8375_v25 }
 0x5ab   :  { %5830 = vmatpush.bf16.msra.mxu2 %v8794_v35  ;;  %v9525_v44 = vld [vmem:[#allocation3 + $0x364] sm:$0xf]  ;;  %v8759_v2 = vld [vmem:[#allocation3 + $0x370] sm:$0xf0]  ;;  %v8650_v37 = vor.u32 %v9497_v32, %v8647_v29 }
 0x5ac   :  { %v12863_v53 = vld [vmem:[#allocation44_spill] sm:$0xff]  ;;  %5744 = vmatpush.bf16.msrb.mxu3 %v8394_v21  ;;  %v8503_v33 = vld [vmem:[#allocation3 + $0x170] sm:$0xf0]  ;;  %v8762_v60 = vor.u32 %v9525_v44, %v8759_v2 }
 0x5ad   :  { %v4824_v16 = vmul.f32 %v11995_v24, %v12863_v53  ;;  %v9461_v30 = vld [vmem:[#allocation3 + $0x164] sm:$0xf]  ;;  %v8359_v23 = vld [vmem:[#allocation3 + $0x50] sm:$0xf0]  ;;  %5773 = vmatpush.bf16.msra.mxu0 %v8522_v26  ;;  %v9498_v53 = vld [vmem:[#allocation3 + $0x28c] sm:$0xf] }
 0x5ae   :  { %v9425_v43 = vld [vmem:[#allocation3 + $0x44] sm:$0xf]  ;;  %v8631_v35 = vld [vmem:[#allocation3 + $0x270] sm:$0xf0]  ;;  %v8506_v63 = vor.u32 %v9461_v30, %v8503_v33  ;;  %5802 = vmatpush.bf16.msra.mxu1 %v8650_v37 }
 0x5af   :  { %5831 = vmatpush.bf16.msra.mxu2 %v8778_v28  ;;  %v9493_v52 = vld [vmem:[#allocation3 + $0x264] sm:$0xf]  ;;  %v8743_v18 = vld [vmem:[#allocation3 + $0x350] sm:$0xf0]  ;;  %v12056_v57 = vpack.c.bf16 %v4824_v16, %v4820_v56  ;;  %v8362_v5 = vor.u32 %v9425_v43, %v8359_v23  ;;  %5638 = vmatmul.bf16.gmra.mxu3 %v12050_v10  ;;  %v4825_v23 = vmul.f32 %v11900_v48, %v10490_v15  ;;  %v12869_v48 = vld [vmem:[#allocation47_spill] sm:$0xff] }
 0x5b0   :  { %v9521_v24 = vld [vmem:[#allocation3 + $0x344] sm:$0xf]  ;;  %5745 = vmatpush.bf16.msrb.mxu3 %v8378_v31  ;;  %v8634_v20 = vor.u32 %v9493_v52, %v8631_v35  ;;  %v8487_v40 = vld [vmem:[#allocation3 + $0x150] sm:$0xf0]  ;;  %5667 = vmatmul.bf16.gmra.mxu0 %v12052_v42 }
 0x5b1   :  { %v9457_v21 = vld [vmem:[#allocation3 + $0x144] sm:$0xf]  ;;  %v8746_v6 = vor.u32 %v9521_v24, %v8743_v18  ;;  %5696 = vmatmul.bf16.gmra.mxu1 %v12054_v50  ;;  %5774 = vmatpush.bf16.msra.mxu0 %v8506_v63  ;;  %v8343_v45 = vld [vmem:[#allocation3 + $0x30] sm:$0xf0] }
 0x5b2   :  { %5725 = vmatmul.bf16.gmra.mxu2 %v12056_v57  ;;  %v8490_v14 = vor.u32 %v9457_v21, %v8487_v40  ;;  %v9421_v36 = vld [vmem:[#allocation3 + $0x24] sm:$0xf]  ;;  %5803 = vmatpush.bf16.msra.mxu1 %v8634_v20  ;;  %v8615_v25 = vld [vmem:[#allocation3 + $0x250] sm:$0xf0]  ;;  %v12866_v21 = vld [vmem:[#allocation33_spill] sm:$0xff] }
 0x5b3   :  { %5832 = vmatpush.bf16.msra.mxu2 %v8762_v60  ;;  %v9489_v47 = vld [vmem:[#allocation3 + $0x244] sm:$0xf]  ;;  %v8346_v28 = vor.u32 %v9421_v36, %v8343_v45  ;;  %v8727_v29 = vld [vmem:[#allocation3 + $0x330] sm:$0xf0]  ;;  %v4830_v40 = vmul.f32 %v11953_v39, %v12866_v21  ;;  %v12868_v36 = vld [vmem:[#allocation59_spill] sm:$0xff] }
 0x5b4   :  { %5746 = vmatpush.bf16.msrb.mxu3 %v8362_v5  ;;  %v9517_v32 = vld [vmem:[#allocation3 + $0x324] sm:$0xf]  ;;  %v8618_v58 = vor.u32 %v9489_v47, %v8615_v25  ;;  %v8471_v22 = vld [vmem:[#allocation3 + $0x130] sm:$0xf0]  ;;  %v12865_v5 = vld [vmem:[#allocation31_spill] sm:$0xff]  ;;  %v4831_v45 = vmul.f32 %v11977_v51, %v12868_v36  ;;  %v4828_v47 = vmul.f32 %v11998_v27, %v12869_v48 }
 0x5b5   :  { %v8730_v54 = vor.u32 %v9517_v32, %v8727_v29  ;;  %v9453_v34 = vld [vmem:[#allocation3 + $0x124] sm:$0xf]  ;;  %v8327_v2 = vld [vmem:[#allocation3 + $0x10] sm:$0xf0]  ;;  %5775 = vmatpush.bf16.msra.mxu0 %v8490_v14  ;;  %v4826_v20 = vmul.f32 %v11950_v17, %v12865_v5  ;;  %v8445_v51 = vld [vmem:[#allocation3 + $0xe8] sm:$0xf] }
 0x5b6   :  { %v9417_v44 = vld [vmem:[#allocation3 + $0x4] sm:$0xf]  ;;  %v8599_v16 = vld [vmem:[#allocation3 + $0x230] sm:$0xf0]  ;;  %v8474_v26 = vor.u32 %v9453_v34, %v8471_v22  ;;  %5804 = vmatpush.bf16.msra.mxu1 %v8618_v58  ;;  %v9448_v27 = vld [vmem:[#allocation3 + $0xf4] sm:$0xf0] }
 0x5b7   :  { %5833 = vmatpush.bf16.msra.mxu2 %v8746_v6  ;;  %v9485_v56 = vld [vmem:[#allocation3 + $0x224] sm:$0xf]  ;;  %v8711_v37 = vld [vmem:[#allocation3 + $0x310] sm:$0xf0]  ;;  %v8330_v30 = vor.u32 %v9417_v44, %v8327_v2  ;;  %v12867_v6 = vld [vmem:[#allocation55_spill] sm:$0xff]  ;;  %v12080_v39 = vpack.c.bf16 %v4830_v40, %v4826_v20  ;;  %v8446_v58 = vor.u32 %v9448_v27, %v8445_v51 }
 0x5b8   :  { %v9513_v31 = vld [vmem:[#allocation3 + $0x304] sm:$0xf]  ;;  %5747 = vmatpush.bf16.msrb.mxu3 %v8346_v28  ;;  %v8602_v33 = vor.u32 %v9485_v56, %v8599_v16  ;;  %v8455_v60 = vld [vmem:[#allocation3 + $0x110] sm:$0xf0]  ;;  %v4827_v14 = vmul.f32 %v11974_v8, %v12867_v6  ;;  %v8573_v34 = vld [vmem:[#allocation3 + $0x1e8] sm:$0xf] }
 0x5b9   :  { %v9449_v43 = vld [vmem:[#allocation3 + $0x104] sm:$0xf]  ;;  %v8714_v24 = vor.u32 %v9513_v31, %v8711_v37  ;;  %v8583_v63 = vld [vmem:[#allocation3 + $0x210] sm:$0xf0]  ;;  %5776 = vmatpush.bf16.msra.mxu0 %v8474_v26  ;;  %v9480_v22 = vld [vmem:[#allocation3 + $0x1f4] sm:$0xf0] }
 0x5ba   :  { %v12864_v52 = vld [vmem:[#allocation32_spill] sm:$0xff]  ;;  %v8458_v25 = vor.u32 %v9449_v43, %v8455_v60  ;;  %5805 = vmatpush.bf16.msra.mxu1 %v8602_v33  ;;  %v12082_v8 = vpack.c.bf16 %v4831_v45, %v4827_v14  ;;  %v8574_v2 = vor.u32 %v9480_v22, %v8573_v34  ;;  %v9444_v16 = vld [vmem:[#allocation3 + $0xd4] sm:$0xf0]  ;;  %v12873_v40 = vld [vmem:[#allocation37_spill] sm:$0xff] }
 0x5bb   :  { %v4829_v35 = vmul.f32 %v11907_v38, %v12864_v52  ;;  %5834 = vmatpush.bf16.msra.mxu2 %v8730_v54  ;;  %v9481_v18 = vld [vmem:[#allocation3 + $0x204] sm:$0xf]  ;;  %v12870_v38 = vld [vmem:[#allocation50_spill] sm:$0xff]  ;;  %v8429_v56 = vld [vmem:[#allocation3 + $0xc8] sm:$0xf] }
 0x5bc   :  { %v4832_v28 = vmul.f32 %v12000_v46, %v12870_v38  ;;  %5748 = vmatpush.bf16.msrb.mxu3 %v8330_v30  ;;  %v8586_v17 = vor.u32 %v9481_v18, %v8583_v63  ;;  %v8829_v46 = vld [vmem:[#allocation3 + $0x3e8] sm:$0xf]  ;;  %v9544_v54 = vld [vmem:[#allocation3 + $0x3f4] sm:$0xf0]  ;;  %v8430_v31 = vor.u32 %v9444_v16, %v8429_v56  ;;  %v12874_v14 = vld [vmem:[#allocation113_spill] sm:$0xff] }
 0x5bd   :  { %v12078_v32 = vpack.c.bf16 %v4829_v35, %v4825_v23  ;;  %5777 = vmatpush.bf16.msra.mxu0 %v8458_v25  ;;  %v8830_v44 = vor.u32 %v9544_v54, %v8829_v46  ;;  %v8701_v26 = vld [vmem:[#allocation3 + $0x2e8] sm:$0xf]  ;;  %v9512_v37 = vld [vmem:[#allocation3 + $0x2f4] sm:$0xf0]  ;;  %v4837_v45 = vmul.f32 %v12874_v14, %v12873_v40  ;;  %v12878_v51 = vld [vmem:[#allocation119_spill] sm:$0xff] }
 0x5be   :  { %v12084_v29 = vpack.c.bf16 %v4832_v28, %v4828_v47  ;;  %5806 = vmatpush.bf16.msra.mxu1 %v8586_v17  ;;  %v8813_v30 = vld [vmem:[#allocation3 + $0x3c8] sm:$0xf]  ;;  %v9540_v33 = vld [vmem:[#allocation3 + $0x3d4] sm:$0xf0]  ;;  %v8702_v43 = vor.u32 %v9512_v37, %v8701_v26  ;;  %v12875_v47 = vld [vmem:[#allocation35_spill] sm:$0xff] }
 0x5bf   :  { %5835 = vmatpush.bf16.msra.mxu2 %v8714_v24  ;;  %5643 = vmatmul.bf16.gmra.mxu3 %v12078_v32  ;;  %v8814_v60 = vor.u32 %v9540_v33, %v8813_v30  ;;  %v8557_v23 = vld [vmem:[#allocation3 + $0x1c8] sm:$0xf]  ;;  %v9476_v35 = vld [vmem:[#allocation3 + $0x1d4] sm:$0xf0]  ;;  %v12879_v46 = vld [vmem:[#allocation63_spill] sm:$0xff] }
 0x5c0   :  { %5672 = vmatmul.bf16.gmra.mxu0 %v12080_v39  ;;  %5857 = vmatpush.bf16.msra.mxu3 %v8446_v58  ;;  %v8558_v24 = vor.u32 %v9476_v35, %v8557_v23  ;;  %v12871_v18 = vld [vmem:[#allocation34_spill] sm:$0xff]  ;;  %v12876_v28 = vld [vmem:[#allocation116_spill] sm:$0xff]  ;;  %v12881_v34 = vld [vmem:[#allocation67_spill] sm:$0xff] }
 0x5c1   :  { %5701 = vmatmul.bf16.gmra.mxu1 %v12082_v8  ;;  %5886 = vmatpush.bf16.msrb.mxu0 %v8574_v2  ;;  %v12872_v63 = vld [vmem:[#allocation110_spill] sm:$0xff]  ;;  %v4834_v25 = vmul.f32 %v12876_v28, %v12875_v47  ;;  %v12877_v17 = vld [vmem:[#allocation40_spill] sm:$0xff]  ;;  %v12882_v22 = vld [vmem:[#allocation39_spill] sm:$0xff] }
 0x5c2   :  { %5730 = vmatmul.bf16.gmra.mxu2 %v12084_v29  ;;  %v4833_v20 = vmul.f32 %v12872_v63, %v12871_v18  ;;  %5915 = vmatpush.bf16.msrb.mxu1 %v8702_v43  ;;  %v4838_v27 = vmul.f32 %v12878_v51, %v12877_v17  ;;  %v12880_v58 = vld [vmem:[#allocation122_spill] sm:$0xff]  ;;  %v12883_v2 = vld [vmem:[#allocation53_spill] sm:$0xff]  ;;  %v8797_v14 = vld [vmem:[#allocation3 + $0x3a8] sm:$0xf] }
 0x5c3   :  { %5944 = vmatpush.bf16.msrb.mxu2 %v8830_v44  ;;  %v4835_v54 = vmul.f32 %v12880_v58, %v12879_v46  ;;  %v4839_v44 = vmul.f32 %v12882_v22, %v12881_v34  ;;  %v12884_v56 = vld [vmem:[#allocation42_spill] sm:$0xff]  ;;  %v12885_v26 = vld [vmem:[#allocation57_spill] sm:$0xff]  ;;  %v8541_v51 = vld [vmem:[#allocation3 + $0x1a8] sm:$0xf] }
 0x5c4   :  { %5858 = vmatpush.bf16.msra.mxu3 %v8430_v31  ;;  %v4836_v16 = vmul.f32 %v12884_v56, %v12883_v2  ;;  %v12886_v37 = vld [vmem:[#allocation45_spill] sm:$0xff]  ;;  %v12106_v33 = vpack.c.bf16 %v4837_v45, %v4833_v20  ;;  %v12108_v43 = vpack.c.bf16 %v4838_v27, %v4834_v25  ;;  %v8413_v31 = vld [vmem:[#allocation3 + $0xa8] sm:$0xf]  ;;  %v9440_v63 = vld [vmem:[#allocation3 + $0xb4] sm:$0xf0] }
 0x5c5   :  { %v4840_v30 = vmul.f32 %v12886_v37, %v12885_v26  ;;  %5887 = vmatpush.bf16.msrb.mxu0 %v8558_v24  ;;  %v12110_v23 = vpack.c.bf16 %v4839_v44, %v4835_v54  ;;  %v8414_v24 = vor.u32 %v9440_v63, %v8413_v31  ;;  %v9508_v20 = vld [vmem:[#allocation3 + $0x2d4] sm:$0xf0]  ;;  %v8397_v58 = vld [vmem:[#allocation3 + $0x88] sm:$0xf]  ;;  %v8655_v48 = vld [vmem:[#allocation3 + $0x298] sm:$0xf0] }
 0x5c6   :  { %v9536_v45 = vld [vmem:[#allocation3 + $0x3b4] sm:$0xf0]  ;;  %v8669_v44 = vld [vmem:[#allocation3 + $0x2a8] sm:$0xf]  ;;  %v9522_v34 = vld [vmem:[#allocation3 + $0x34c] sm:$0xf] }
 0x5c7   :  { %5945 = vmatpush.bf16.msrb.mxu2 %v8814_v60  ;;  %v12112_v35 = vpack.c.bf16 %v4840_v30, %v4836_v16  ;;  %v8685_v60 = vld [vmem:[#allocation3 + $0x2c8] sm:$0xf]  ;;  %v8798_v25 = vor.u32 %v9536_v45, %v8797_v14  ;;  %v9472_v27 = vld [vmem:[#allocation3 + $0x1b4] sm:$0xf0]  ;;  %v9458_v46 = vld [vmem:[#allocation3 + $0x14c] sm:$0xf] }
 0x5c8   :  { %v8686_v28 = vor.u32 %v9508_v20, %v8685_v60  ;;  %5859 = vmatpush.bf16.msra.mxu3 %v8414_v24  ;;  %v8542_v54 = vor.u32 %v9472_v27, %v8541_v51  ;;  %v9436_v22 = vld [vmem:[#allocation3 + $0x94] sm:$0xf0]  ;;  %v8781_v30 = vld [vmem:[#allocation3 + $0x388] sm:$0xf]  ;;  %v9518_v6 = vld [vmem:[#allocation3 + $0x32c] sm:$0xf] }
 0x5c9   :  { %v9504_v56 = vld [vmem:[#allocation3 + $0x2b4] sm:$0xf0]  ;;  %v8398_v16 = vor.u32 %v9436_v22, %v8397_v58  ;;  %v8525_v31 = vld [vmem:[#allocation3 + $0x188] sm:$0xf]  ;;  %v8479_v17 = vld [vmem:[#allocation3 + $0x138] sm:$0xf0] }
 0x5ca   :  { %5916 = vmatpush.bf16.msrb.mxu1 %v8686_v28  ;;  %v8670_v37 = vor.u32 %v9504_v56, %v8669_v44  ;;  %v9532_v26 = vld [vmem:[#allocation3 + $0x394] sm:$0xf0]  ;;  %5888 = vmatpush.bf16.msrb.mxu0 %v8542_v54  ;;  %v8381_v24 = vld [vmem:[#allocation3 + $0x68] sm:$0xf]  ;;  %v9486_v21 = vld [vmem:[#allocation3 + $0x22c] sm:$0xf] }
 0x5cb   :  { %5946 = vmatpush.bf16.msrb.mxu2 %v8798_v25  ;;  %v8782_v63 = vor.u32 %v9532_v26, %v8781_v30  ;;  %v9468_v38 = vld [vmem:[#allocation3 + $0x194] sm:$0xf0]  ;;  %v8653_v14 = vld [vmem:[#allocation3 + $0x288] sm:$0xf]  ;;  %v9482_v47 = vld [vmem:[#allocation3 + $0x20c] sm:$0xf] }
 0x5cc   :  { %v8526_v60 = vor.u32 %v9468_v38, %v8525_v31  ;;  %5860 = vmatpush.bf16.msra.mxu3 %v8398_v16  ;;  %v9432_v20 = vld [vmem:[#allocation3 + $0x74] sm:$0xf0]  ;;  %v8765_v26 = vld [vmem:[#allocation3 + $0x368] sm:$0xf] }
 0x5cd   :  { %v8382_v45 = vor.u32 %v9432_v20, %v8381_v24  ;;  %v9500_v28 = vld [vmem:[#allocation3 + $0x294] sm:$0xf0]  ;;  %v8509_v27 = vld [vmem:[#allocation3 + $0x168] sm:$0xf] }
 0x5ce   :  { %5917 = vmatpush.bf16.msrb.mxu1 %v8670_v37  ;;  %5889 = vmatpush.bf16.msrb.mxu0 %v8526_v60  ;;  %v9528_v25 = vld [vmem:[#allocation3 + $0x374] sm:$0xf0]  ;;  %v8654_v38 = vor.u32 %v9500_v28, %v8653_v14  ;;  %v8365_v54 = vld [vmem:[#allocation3 + $0x48] sm:$0xf] }
 0x5cf   :  { %5648 = vmatmul.bf16.gmra.mxu3 %v12106_v33  ;;  %5947 = vmatpush.bf16.msrb.mxu2 %v8782_v63  ;;  %v8766_v51 = vor.u32 %v9528_v25, %v8765_v26  ;;  %v9464_v58 = vld [vmem:[#allocation3 + $0x174] sm:$0xf0]  ;;  %v8637_v56 = vld [vmem:[#allocation3 + $0x268] sm:$0xf] }
 0x5d0   :  { %5677 = vmatmul.bf16.gmra.mxu0 %v12108_v43  ;;  %5861 = vmatpush.bf16.msra.mxu3 %v8382_v45  ;;  %v8510_v22 = vor.u32 %v9464_v58, %v8509_v27  ;;  %v9428_v44 = vld [vmem:[#allocation3 + $0x54] sm:$0xf0]  ;;  %v8749_v31 = vld [vmem:[#allocation3 + $0x348] sm:$0xf] }
 0x5d1   :  { %5706 = vmatmul.bf16.gmra.mxu1 %v12110_v23  ;;  %v9496_v16 = vld [vmem:[#allocation3 + $0x274] sm:$0xf0]  ;;  %v8366_v37 = vor.u32 %v9428_v44, %v8365_v54  ;;  %v8493_v60 = vld [vmem:[#allocation3 + $0x148] sm:$0xf] }
 0x5d2   :  { %5735 = vmatmul.bf16.gmra.mxu2 %v12112_v35  ;;  %5918 = vmatpush.bf16.msrb.mxu1 %v8654_v38  ;;  %v8638_v30 = vor.u32 %v9496_v16, %v8637_v56  ;;  %v9524_v63 = vld [vmem:[#allocation3 + $0x354] sm:$0xf0]  ;;  %v8349_v45 = vld [vmem:[#allocation3 + $0x28] sm:$0xf] }
 0x5d3   :  { %5948 = vmatpush.bf16.msrb.mxu2 %v8766_v51  ;;  %5890 = vmatpush.bf16.msrb.mxu0 %v8510_v22  ;;  %v8750_v24 = vor.u32 %v9524_v63, %v8749_v31  ;;  %v9460_v20 = vld [vmem:[#allocation3 + $0x154] sm:$0xf0]  ;;  %v8621_v26 = vld [vmem:[#allocation3 + $0x248] sm:$0xf] }
 0x5d4   :  { %v8494_v14 = vor.u32 %v9460_v20, %v8493_v60  ;;  %5862 = vmatpush.bf16.msra.mxu3 %v8366_v37  ;;  %v9424_v28 = vld [vmem:[#allocation3 + $0x34] sm:$0xf0]  ;;  %v8733_v51 = vld [vmem:[#allocation3 + $0x328] sm:$0xf] }
 0x5d5   :  { %v8350_v25 = vor.u32 %v9424_v28, %v8349_v45  ;;  %v9492_v38 = vld [vmem:[#allocation3 + $0x254] sm:$0xf0]  ;;  %v8477_v22 = vld [vmem:[#allocation3 + $0x128] sm:$0xf] }
 0x5d6   :  { %5919 = vmatpush.bf16.msrb.mxu1 %v8638_v30  ;;  %v9520_v27 = vld [vmem:[#allocation3 + $0x334] sm:$0xf0]  ;;  %v8622_v58 = vor.u32 %v9492_v38, %v8621_v26  ;;  %v8333_v56 = vld [vmem:[#allocation3 + $0x8] sm:$0xf] }
 0x5d7   :  { %5949 = vmatpush.bf16.msrb.mxu2 %v8750_v24  ;;  %5891 = vmatpush.bf16.msrb.mxu0 %v8494_v14  ;;  %v8734_v54 = vor.u32 %v9520_v27, %v8733_v51  ;;  %v9456_v44 = vld [vmem:[#allocation3 + $0x134] sm:$0xf0]  ;;  %v8605_v30 = vld [vmem:[#allocation3 + $0x228] sm:$0xf]  ;;  %v9446_v27 = vld [vmem:[#allocation3 + $0xec] sm:$0xf] }
 0x5d8   :  { %5863 = vmatpush.bf16.msra.mxu3 %v8350_v25  ;;  %v8478_v16 = vor.u32 %v9456_v44, %v8477_v22  ;;  %v9420_v37 = vld [vmem:[#allocation3 + $0x14] sm:$0xf0]  ;;  %v8717_v24 = vld [vmem:[#allocation3 + $0x308] sm:$0xf]  ;;  %v9542_v22 = vld [vmem:[#allocation3 + $0x3ec] sm:$0xf] }
 0x5d9   :  { %v9488_v31 = vld [vmem:[#allocation3 + $0x234] sm:$0xf0]  ;;  %v8334_v63 = vor.u32 %v9420_v37, %v8333_v56  ;;  %v8461_v45 = vld [vmem:[#allocation3 + $0x108] sm:$0xf]  ;;  %v8831_v44 = vld [vmem:[#allocation3 + $0x3f8] sm:$0xf0] }
 0x5da   :  { %5920 = vmatpush.bf16.msrb.mxu1 %v8622_v58  ;;  %v8606_v60 = vor.u32 %v9488_v31, %v8605_v30  ;;  %v9516_v20 = vld [vmem:[#allocation3 + $0x314] sm:$0xf0]  ;;  %v8589_v26 = vld [vmem:[#allocation3 + $0x208] sm:$0xf]  ;;  %v8447_v58 = vld [vmem:[#allocation3 + $0xf8] sm:$0xf0] }
 0x5db   :  { %5950 = vmatpush.bf16.msrb.mxu2 %v8734_v54  ;;  %5892 = vmatpush.bf16.msrb.mxu0 %v8478_v16  ;;  %v8718_v14 = vor.u32 %v9516_v20, %v8717_v24  ;;  %v9452_v28 = vld [vmem:[#allocation3 + $0x114] sm:$0xf0]  ;;  %v8450_v54 = vor.u32 %v9446_v27, %v8447_v58  ;;  %v9478_v56 = vld [vmem:[#allocation3 + $0x1ec] sm:$0xf]  ;;  %v8834_v16 = vor.u32 %v9542_v22, %v8831_v44  ;;  %v8575_v37 = vld [vmem:[#allocation3 + $0x1f8] sm:$0xf0] }
 0x5dc   :  { %5864 = vmatpush.bf16.msra.mxu3 %v8334_v63  ;;  %v8462_v38 = vor.u32 %v9452_v28, %v8461_v45  ;;  %v9484_v25 = vld [vmem:[#allocation3 + $0x214] sm:$0xf0]  ;;  %v9442_v30 = vld [vmem:[#allocation3 + $0xcc] sm:$0xf]  ;;  %v8431_v31 = vld [vmem:[#allocation3 + $0xd8] sm:$0xf0]  ;;  %v8578_v63 = vor.u32 %v9478_v56, %v8575_v37 }
 0x5dd   :  { %v8590_v51 = vor.u32 %v9484_v25, %v8589_v26  ;;  %v9510_v24 = vld [vmem:[#allocation3 + $0x2ec] sm:$0xf]  ;;  %v8703_v20 = vld [vmem:[#allocation3 + $0x2f8] sm:$0xf0] }
 0x5de   :  { %5921 = vmatpush.bf16.msrb.mxu1 %v8606_v60  ;;  %v8434_v60 = vor.u32 %v9442_v30, %v8431_v31  ;;  %v9538_v26 = vld [vmem:[#allocation3 + $0x3cc] sm:$0xf]  ;;  %v8559_v27 = vld [vmem:[#allocation3 + $0x1d8] sm:$0xf0] }
 0x5df   :  { %5749 = vmatmul.bf16.vlgmr.msrb.gmra.mxu3 %v12022_v12  ;;  %5951 = vmatpush.bf16.msrb.mxu2 %v8718_v14  ;;  %v8706_v14 = vor.u32 %v9510_v24, %v8703_v20  ;;  %v9474_v25 = vld [vmem:[#allocation3 + $0x1cc] sm:$0xf]  ;;  %v8799_v20 = vld [vmem:[#allocation3 + $0x3b8] sm:$0xf0] }
 0x5e0   :  { %5778 = vmatmul.bf16.vlgmr.msra.gmra.mxu0 %v12024_v62  ;;  %5973 = vmatpush.bf16.msrb.mxu3 %v8450_v54  ;;  %v9438_v58 = vld [vmem:[#allocation3 + $0xac] sm:$0xf]  ;;  %v8415_v54 = vld [vmem:[#allocation3 + $0xb8] sm:$0xf0]  ;;  %v8562_v22 = vor.u32 %v9474_v25, %v8559_v27 }
 0x5e1   :  { %5807 = vmatmul.bf16.vlgmr.msra.gmra.mxu1 %v12026_v41  ;;  %5893 = vmatpush.bf16.msrb.mxu0 %v8462_v38  ;;  %v8815_v38 = vld [vmem:[#allocation3 + $0x3d8] sm:$0xf0]  ;;  %v8418_v44 = vor.u32 %v9438_v58, %v8415_v54  ;;  %v9506_v56 = vld [vmem:[#allocation3 + $0x2cc] sm:$0xf] }
 0x5e2   :  { %5836 = vmatmul.bf16.vlgmr.msra.gmra.mxu2 %v12028_v19  ;;  %5922 = vmatpush.bf16.msrb.mxu1 %v8590_v51  ;;  %v8818_v51 = vor.u32 %v9538_v26, %v8815_v38  ;;  %v9534_v24 = vld [vmem:[#allocation3 + $0x3ac] sm:$0xf]  ;;  %v8543_v38 = vld [vmem:[#allocation3 + $0x1b8] sm:$0xf0] }
 0x5e3   :  { %6060 = vmatpush.bf16.msra.mxu2 %v8834_v16  ;;  %v8687_v16 = vld [vmem:[#allocation3 + $0x2d8] sm:$0xf0]  ;;  %v8802_v26 = vor.u32 %v9534_v24, %v8799_v20  ;;  %v9434_v25 = vld [vmem:[#allocation3 + $0x8c] sm:$0xf] }
 0x5e4   :  { %5974 = vmatpush.bf16.msrb.mxu3 %v8434_v60  ;;  %v8690_v37 = vor.u32 %v9506_v56, %v8687_v16  ;;  %v8399_v27 = vld [vmem:[#allocation3 + $0x98] sm:$0xf0]  ;;  %v9502_v56 = vld [vmem:[#allocation3 + $0x2ac] sm:$0xf] }
 0x5e5   :  { %6002 = vmatpush.bf16.msra.mxu0 %v8578_v63  ;;  %v8402_v54 = vor.u32 %v9434_v25, %v8399_v27  ;;  %v9530_v16 = vld [vmem:[#allocation3 + $0x38c] sm:$0xf]  ;;  %v8527_v20 = vld [vmem:[#allocation3 + $0x198] sm:$0xf0]  ;;  %v8658_v27 = vor.u32 %v9498_v53, %v8655_v48 }
 0x5e6   :  { %6031 = vmatpush.bf16.msra.mxu1 %v8706_v14  ;;  %v9470_v14 = vld [vmem:[#allocation3 + $0x1ac] sm:$0xf]  ;;  %v8530_v25 = vor.u32 %v9466_v0, %v8527_v20  ;;  %v8511_v0 = vld [vmem:[#allocation3 + $0x178] sm:$0xf0] }
 0x5e7   :  { %6061 = vmatpush.bf16.msra.mxu2 %v8818_v51  ;;  %v8546_v58 = vor.u32 %v9470_v14, %v8543_v38  ;;  %v8671_v51 = vld [vmem:[#allocation3 + $0x2b8] sm:$0xf0]  ;;  %v9494_v53 = vld [vmem:[#allocation3 + $0x26c] sm:$0xf] }
 0x5e8   :  { %5975 = vmatpush.bf16.msrb.mxu3 %v8418_v44  ;;  %v8674_v44 = vor.u32 %v9502_v56, %v8671_v51  ;;  %v8767_v51 = vld [vmem:[#allocation3 + $0x378] sm:$0xf0] }
 0x5e9   :  { %6003 = vmatpush.bf16.msra.mxu0 %v8562_v22  ;;  %v8639_v48 = vld [vmem:[#allocation3 + $0x278] sm:$0xf0] }
 0x5ea   :  { %6032 = vmatpush.bf16.msra.mxu1 %v8690_v37  ;;  %v8783_v37 = vld [vmem:[#allocation3 + $0x398] sm:$0xf0]  ;;  %v8642_v20 = vor.u32 %v9494_v53, %v8639_v48  ;;  %v9422_v53 = vld [vmem:[#allocation3 + $0x2c] sm:$0xf] }
 0x5eb   :  { %6062 = vmatpush.bf16.msra.mxu2 %v8802_v26  ;;  %v8786_v24 = vor.u32 %v9530_v16, %v8783_v37  ;;  %v9430_v26 = vld [vmem:[#allocation3 + $0x6c] sm:$0xf]  ;;  %v8351_v48 = vld [vmem:[#allocation3 + $0x38] sm:$0xf0] }
 0x5ec   :  { %5976 = vmatpush.bf16.msrb.mxu3 %v8402_v54  ;;  %v9526_v54 = vld [vmem:[#allocation3 + $0x36c] sm:$0xf] }
 0x5ed   :  { %6004 = vmatpush.bf16.msra.mxu0 %v8546_v58  ;;  %v8383_v58 = vld [vmem:[#allocation3 + $0x78] sm:$0xf0]  ;;  %v8770_v16 = vor.u32 %v9526_v54, %v8767_v51 }
 0x5ee   :  { %6033 = vmatpush.bf16.msra.mxu1 %v8674_v44  ;;  %v8386_v56 = vor.u32 %v9430_v26, %v8383_v58  ;;  %v9462_v44 = vld [vmem:[#allocation3 + $0x16c] sm:$0xf]  ;;  %v8751_v58 = vld [vmem:[#allocation3 + $0x358] sm:$0xf0] }
 0x5ef   :  { %5754 = vmatmul.bf16.gmra.mxu3 %v12050_v10  ;;  %6063 = vmatpush.bf16.msra.mxu2 %v8786_v24  ;;  %v8514_v24 = vor.u32 %v9462_v44, %v8511_v0  ;;  %v8754_v51 = vor.u32 %v9522_v34, %v8751_v58  ;;  %v9490_v44 = vld [vmem:[#allocation3 + $0x24c] sm:$0xf]  ;;  %v8623_v0 = vld [vmem:[#allocation3 + $0x258] sm:$0xf0] }
 0x5f0   :  { %5783 = vmatmul.bf16.gmra.mxu0 %v12052_v42  ;;  %5977 = vmatpush.bf16.msrb.mxu3 %v8386_v56  ;;  %v8498_v56 = vor.u32 %v9458_v46, %v8495_v11  ;;  %v8610_v46 = vor.u32 %v9486_v21, %v8607_v1  ;;  %v9418_v34 = vld [vmem:[#allocation3 + $0xc] sm:$0xf] }
 0x5f1   :  { %5812 = vmatmul.bf16.gmra.mxu1 %v12054_v50  ;;  %6005 = vmatpush.bf16.msra.mxu0 %v8530_v25  ;;  %v9426_v25 = vld [vmem:[#allocation3 + $0x4c] sm:$0xf] }
 0x5f2   :  { %5841 = vmatmul.bf16.gmra.mxu2 %v12056_v57  ;;  %6034 = vmatpush.bf16.msra.mxu1 %v8658_v27  ;;  %v8370_v26 = vor.u32 %v9426_v25, %v8367_v4  ;;  %v8354_v4 = vor.u32 %v9422_v53, %v8351_v48  ;;  %v9454_v25 = vld [vmem:[#allocation3 + $0x12c] sm:$0xf]  ;;  %v8463_v53 = vld [vmem:[#allocation3 + $0x118] sm:$0xf0] }
 0x5f3   :  { %6064 = vmatpush.bf16.msra.mxu2 %v8770_v16  ;;  %v8626_v16 = vor.u32 %v9490_v44, %v8623_v0  ;;  %v8482_v11 = vor.u32 %v9454_v25, %v8479_v17  ;;  %v9514_v58 = vld [vmem:[#allocation3 + $0x30c] sm:$0xf]  ;;  %v8594_v17 = vor.u32 %v9482_v47, %v8591_v13 }
 0x5f4   :  { %5978 = vmatpush.bf16.msrb.mxu3 %v8370_v26  ;;  %v8335_v26 = vld [vmem:[#allocation3 + $0x18] sm:$0xf0]  ;;  %v9450_v0 = vld [vmem:[#allocation3 + $0x10c] sm:$0xf] }
 0x5f5   :  { %6006 = vmatpush.bf16.msra.mxu0 %v8514_v24  ;;  %v8735_v24 = vld [vmem:[#allocation3 + $0x338] sm:$0xf0]  ;;  %v8338_v44 = vor.u32 %v9418_v34, %v8335_v26 }
 0x5f6   :  { %6035 = vmatpush.bf16.msra.mxu1 %v8642_v20  ;;  %v8738_v49 = vor.u32 %v9518_v6, %v8735_v24  ;;  %v8466_v24 = vor.u32 %v9450_v0, %v8463_v53  ;;  %v12888_v0 = vld [vmem:[#allocation125_spill] sm:$0xff] }
 0x5f7   :  { %6065 = vmatpush.bf16.msra.mxu2 %v8754_v51 }
 0x5f8   :  { %5979 = vmatpush.bf16.msrb.mxu3 %v8354_v4 }
 0x5f9   :  { %6007 = vmatpush.bf16.msra.mxu0 %v8498_v56  ;;  %v8719_v56 = vld [vmem:[#allocation3 + $0x318] sm:$0xf0] }
 0x5fa   :  { %6036 = vmatpush.bf16.msra.mxu1 %v8626_v16  ;;  %v8722_v6 = vor.u32 %v9514_v58, %v8719_v56 }
 0x5fb   :  { %6066 = vmatpush.bf16.msra.mxu2 %v8738_v49 }
 0x5fc   :  { %5980 = vmatpush.bf16.msrb.mxu3 %v8338_v44  ;;  %v12887_v44 = vld [vmem:[#allocation131_spill] sm:$0xff] }
 0x5fd   :  { %6008 = vmatpush.bf16.msra.mxu0 %v8482_v11 }
 0x5fe   :  { %6037 = vmatpush.bf16.msra.mxu1 %v8610_v46 }
 0x5ff   :  { %5759 = vmatmul.bf16.gmra.mxu3 %v12078_v32  ;;  %6067 = vmatpush.bf16.msra.mxu2 %v8722_v6 }
 0x600   :  { %5788 = vmatmul.bf16.gmra.mxu0 %v12080_v39 }
 0x601   :  { %5817 = vmatmul.bf16.gmra.mxu1 %v12082_v8  ;;  %6009 = vmatpush.bf16.msra.mxu0 %v8466_v24 }
 0x602   :  { %5846 = vmatmul.bf16.gmra.mxu2 %v12084_v29  ;;  %6038 = vmatpush.bf16.msra.mxu1 %v8594_v17 }
 0x60f   :  { %5764 = vmatmul.bf16.gmra.mxu3 %v12106_v33 }
 0x610   :  { %5793 = vmatmul.bf16.gmra.mxu0 %v12108_v43 }
 0x611   :  { %5822 = vmatmul.bf16.gmra.mxu1 %v12110_v23 }
 0x612   :  { %5851 = vmatmul.bf16.gmra.mxu2 %v12112_v35 }
 0x61d   :  { %v12134_v45 = vpop.f32.mrf.mxu0 }
 0x61e   :  { %v12136_v28 = vpop.f32.mrf.mxu1 }
 0x61f   :  { %5865 = vmatmul.bf16.vlgmr.msra.gmra.mxu3 %v12022_v12 }
 0x620   :  { %5894 = vmatmul.bf16.vlgmr.msrb.gmra.mxu0 %v12024_v62 }
 0x621   :  { %5923 = vmatmul.bf16.vlgmr.msrb.gmra.mxu1 %v12026_v41 }
 0x622   :  { %5952 = vmatmul.bf16.vlgmr.msrb.gmra.mxu2 %v12028_v19  ;;  %v12142_v30 = vpop.f32.mrf.mxu3 }
 0x623   :  { %v5664_v49 = vadd.f32 %v12134_v45, %v12142_v30 }
 0x625   :  { %v12144_v31 = vpop.f32.mrf.mxu2  ;;  %v12146_v63 = vpop.f32.mrf.mxu0  ;;  %v5693_v47 = vadd.f32 %v12136_v28, %v5664_v49  ;;  %v12891_v49 = vld [vmem:[#allocation128_spill] sm:$0xff] }
 0x626   :  { %v12148_v60 = vpop.f32.mrf.mxu1 }
 0x627   :  { %v5722_v46 = vadd.f32 %v12144_v31, %v5693_v47 }
 0x629   :  { %v6089_v53 = vadd.f32 %v5722_v46, %v12888_v0 }
 0x62a   :  { %v12150_v22 = vpop.f32.mrf.mxu3 }
 0x62b   :  { %v5666_v34 = vadd.f32 %v12146_v63, %v12150_v22 }
 0x62d   :  { %v12152_v2 = vpop.f32.mrf.mxu2  ;;  %v12154_v14 = vpop.f32.mrf.mxu0 }
 0x62e   :  { %v12156_v38 = vpop.f32.mrf.mxu1 }
 0x62f   :  { %5870 = vmatmul.bf16.gmra.mxu3 %v12050_v10 }
 0x630   :  { %5899 = vmatmul.bf16.gmra.mxu0 %v12052_v42 }
 0x631   :  { %5928 = vmatmul.bf16.gmra.mxu1 %v12054_v50 }
 0x632   :  { %5957 = vmatmul.bf16.gmra.mxu2 %v12056_v57  ;;  %v5639_v37 = vpop.f32.mrf.mxu3 }
 0x633   :  { %v5669_v1 = vadd.f32 %v12154_v14, %v5639_v37 }
 0x635   :  { %v12162_v36 = vpop.f32.mrf.mxu2  ;;  %v12164_v27 = vpop.f32.mrf.mxu0  ;;  %v5698_v4 = vadd.f32 %v12156_v38, %v5669_v1 }
 0x636   :  { %v12166_v54 = vpop.f32.mrf.mxu1 }
 0x637   :  { %v5727_v45 = vadd.f32 %v12162_v36, %v5698_v4  ;;  %v12889_v36 = vld [vmem:[#allocation137_spill] sm:$0xff] }
 0x639   :  { %v6097_v38 = vadd.f32 %v5727_v45, %v12887_v44 }
 0x63a   :  { %v5641_v20 = vpop.f32.mrf.mxu3 }
 0x63b   :  { %v5671_v30 = vadd.f32 %v12164_v27, %v5641_v20  ;;  %9892 = vtanh.f32 %v6097_v38 }
 0x63c   :  { %9894 = vtanh.f32 %v6089_v53  ;;  %v12896_v53 = vld [vmem:[#allocation142_spill] sm:$0xff] }
 0x63d   :  { %v5728_v51 = vpop.f32.mrf.mxu2  ;;  %v5673_v48 = vpop.f32.mrf.mxu0  ;;  %v5700_v56 = vadd.f32 %v12166_v54, %v5671_v30  ;;  %v12890_v54 = vld [vmem:[#allocation134_spill] sm:$0xff] }
 0x63e   :  { %v5702_v16 = vpop.f32.mrf.mxu1 }
 0x63f   :  { %5875 = vmatmul.bf16.gmra.mxu3 %v12078_v32  ;;  %v5729_v24 = vadd.f32 %v5728_v51, %v5700_v56  ;;  %v12892_v51 = vld [vmem:[#allocation56_spill] sm:$0xff] }
 0x640   :  { %5904 = vmatmul.bf16.gmra.mxu0 %v12080_v39  ;;  %v6193_v4 = vsub.f32 1.0, %v12892_v51  ;;  %v6161_v38 = vmul.f32 %v12892_v51, %v10454_v3  ;;  %v12897_v3 = vld [vmem:[#allocation60_spill] sm:$0xff] }
 0x641   :  { %5933 = vmatmul.bf16.gmra.mxu1 %v12082_v8  ;;  %v6101_v17 = vadd.f32 %v5729_v24, %v12890_v54  ;;  %v9893_v47 = vpop.eup %9892  ;;  %v12214_v54 = vstv %s12196_s9 }
 0x642   :  { %5962 = vmatmul.bf16.gmra.mxu2 %v12084_v29  ;;  %v5644_v21 = vpop.f32.mrf.mxu3  ;;  %v9895_v46 = vpop.eup %9894  ;;  %v6225_v56 = vmul.f32 %v9893_v47, %v6193_v4  ;;  %v12899_v4 = vld [vmem:[#allocation71_spill] sm:$0xff] }
 0x643   :  { %v5674_v13 = vadd.f32 %v5673_v48, %v5644_v21  ;;  %v5695_v48 = vadd.f32 %v12148_v60, %v5666_v34  ;;  %v12895_v34 = vld [vmem:[#allocation64_spill] sm:$0xff]  ;;  %v12900_v47 = vld [vmem:[#allocation75_spill] sm:$0xff] }
 0x645   :  { %v5731_v14 = vpop.f32.mrf.mxu2  ;;  %v5703_v37 = vadd.f32 %v5702_v16, %v5674_v13  ;;  %v5675_v25 = vpop.f32.mrf.mxu0  ;;  %v5724_v63 = vadd.f32 %v12152_v2, %v5695_v48 }
 0x646   :  { %v5704_v11 = vpop.f32.mrf.mxu1 }
 0x647   :  { %v5732_v26 = vadd.f32 %v5731_v14, %v5703_v37  ;;  %v6093_v21 = vadd.f32 %v5724_v63, %v12891_v49  ;;  %v12893_v14 = vld [vmem:[#allocation145_spill] sm:$0xff]  ;;  %v12894_v37 = vld [vmem:[#allocation140_spill] sm:$0xff] }
 0x648   :  { %v6185_v2 = vsub.f32 1.0, %v12893_v14 }
 0x649   :  { %v6105_v6 = vadd.f32 %v5732_v26, %v12889_v36  ;;  %v6201_v26 = vsub.f32 1.0, %v12895_v34 }
 0x64a   :  { %v5646_v58 = vpop.f32.mrf.mxu3  ;;  %v6217_v0 = vmul.f32 %v9895_v46, %v6185_v2  ;;  %v6177_v46 = vmul.f32 %v12900_v47, %v12871_v18  ;;  %v6173_v18 = vmul.f32 %v12899_v4, %v12864_v52 }
 0x64b   :  { %v5676_v28 = vadd.f32 %v5675_v25, %v5646_v58  ;;  %9896 = vtanh.f32 %v6105_v6 }
 0x64c   :  { %9898 = vtanh.f32 %v6101_v17 }
 0x64d   :  { %v5733_v16 = vpop.f32.mrf.mxu2  ;;  %v5705_v27 = vadd.f32 %v5704_v11, %v5676_v28  ;;  %v5678_v20 = vpop.f32.mrf.mxu0  ;;  %9900 = vtanh.f32 %v6093_v21  ;;  %v6153_v28 = vmul.f32 %v12893_v14, %v10419_v55  ;;  %v12220_v21 = vstv %s6281_s3 }
 0x64e   :  { %v5707_v31 = vpop.f32.mrf.mxu1  ;;  %v6209_v14 = vsub.f32 1.0, %v12900_v47 }
 0x64f   :  { %5880 = vmatmul.bf16.gmra.mxu3 %v12106_v33  ;;  %v5734_v22 = vadd.f32 %v5733_v16, %v5705_v27  ;;  %v6169_v16 = vmul.f32 %v12895_v34, %v10490_v15  ;;  %v6249_v63 = vadd.f32 %v6217_v0, %v6153_v28 }
 0x650   :  { %5909 = vmatmul.bf16.gmra.mxu0 %v12108_v43 }
 0x651   :  { %5938 = vmatmul.bf16.gmra.mxu1 %v12110_v23  ;;  %v6109_v25 = vadd.f32 %v5734_v22, %v12894_v37  ;;  %v9897_v58 = vpop.eup %9896  ;;  %v12898_v22 = vld [vmem:[#allocation146_spill] sm:$0xff]  ;;  %v6165_v37 = vmul.f32 %v12897_v3, %v10472_v9 }
 0x652   :  { %5967 = vmatmul.bf16.gmra.mxu2 %v12112_v35  ;;  %v5649_v60 = vpop.f32.mrf.mxu3  ;;  %v6233_v36 = vmul.f32 %v9897_v58, %v6201_v26  ;;  %v9899_v55 = vpop.eup %9898  ;;  %v6283_v26 = vmul.f32 %v12220_v21, %v6249_v63  ;;  %v6157_v9 = vmul.f32 %v12898_v22, %v10436_v61 }
 0x653   :  { %v5679_v1 = vadd.f32 %v5678_v20, %v5649_v60  ;;  %9902 = vtanh.f32 %v6109_v25  ;;  %v6257_v20 = vadd.f32 %v6225_v56, %v6161_v38  ;;  %v6189_v60 = vsub.f32 1.0, %v12898_v22  ;;  %v9901_v49 = vpop.eup %9900 }
 0x654   :  { %v6265_v51 = vadd.f32 %v6233_v36, %v6169_v16  ;;  %v12227_v25 = vstv %s12200_s27 }
 0x655   :  { %v5736_v13 = vpop.f32.mrf.mxu2  ;;  %v5708_v11 = vadd.f32 %v5707_v31, %v5679_v1  ;;  %v5680_v45 = vpop.f32.mrf.mxu0  ;;  %v6197_v31 = vsub.f32 1.0, %v12897_v3  ;;  %v6221_v58 = vmul.f32 %v9901_v49, %v6189_v60  ;;  %v12902_v3 = vld [vmem:[#allocation79_spill] sm:$0xff] }
 0x656   :  { %v5709_v30 = vpop.f32.mrf.mxu1  ;;  %v6319_v38 = vmul.f32 %v12227_v25, %v6265_v51 }
 0x657   :  { %v5737_v44 = vadd.f32 %v5736_v13, %v5708_v11  ;;  %v6205_v13 = vsub.f32 1.0, %v12899_v4  ;;  %v6253_v16 = vadd.f32 %v6221_v58, %v6157_v9 }
 0x659   :  { %v6113_v48 = vadd.f32 %v5737_v44, %v12896_v53  ;;  %v9903_v2 = vpop.eup %9902  ;;  %v12901_v44 = vld [vmem:[#allocation144_spill] sm:$0xff]  ;;  %v6287_v22 = vmul.f32 %v12220_v21, %v6253_v16 }
 0x65a   :  { %v5651_v6 = vpop.f32.mrf.mxu3  ;;  %v6237_v56 = vmul.f32 %v9903_v2, %v6205_v13 }
 0x65b   :  { %9904 = vtanh.f32 %v6113_v48  ;;  %v5681_v27 = vadd.f32 %v5680_v45, %v5651_v6  ;;  %v6301_v45 = vmul.f32 %v12214_v54, %v6257_v20 }
 0x65d   :  { %v5738_v24 = vpop.f32.mrf.mxu2  ;;  %v5710_v17 = vadd.f32 %v5709_v30, %v5681_v27  ;;  %v12216_v1 = vpop.f32.mrf.mxu0  ;;  %v6229_v30 = vmul.f32 %v9899_v55, %v6197_v31  ;;  %v6309_v0 = vadd.f32 %v6301_v45, %v6283_v26  ;;  %v6213_v31 = vsub.f32 1.0, %v12902_v3 }
 0x65e   :  { %v12218_v15 = vpop.f32.mrf.mxu1  ;;  %v6181_v55 = vmul.f32 %v12902_v3, %v12873_v40 }
 0x65f   :  { %v5739_v11 = vadd.f32 %v5738_v24, %v5710_v17  ;;  %5981 = vmatmul.bf16.vlgmr.msrb.gmra.mxu3 %v12022_v12  ;;  %v6261_v53 = vadd.f32 %v6229_v30, %v6165_v37  ;;  %v6327_v27 = vadd.f32 %v6319_v38, %v6309_v0 }
 0x660   :  { %6010 = vmatmul.bf16.vlgmr.msra.gmra.mxu0 %v12024_v62 }
 0x661   :  { %6039 = vmatmul.bf16.vlgmr.msra.gmra.mxu1 %v12026_v41  ;;  %v9905_v34 = vpop.eup %9904  ;;  %v6117_v12 = vadd.f32 %v5739_v11, %v12901_v44  ;;  %v12244_v41 = vstv %s12209_s1  ;;  %v6305_v52 = vmul.f32 %v12214_v54, %v6261_v53 }
 0x662   :  { %6068 = vmatmul.bf16.vlgmr.msra.gmra.mxu2 %v12028_v19  ;;  %v6241_v62 = vmul.f32 %v9905_v34, %v6209_v14  ;;  %v5750_v28 = vpop.f32.mrf.mxu3  ;;  %v6269_v19 = vadd.f32 %v6237_v56, %v6173_v18 }
 0x663   :  { %9906 = vtanh.f32 %v6117_v12  ;;  %v6313_v51 = vadd.f32 %v6305_v52, %v6287_v22 }
 0x664   :  { %v6273_v48 = vadd.f32 %v6241_v62, %v6177_v46  ;;  %v6323_v60 = vmul.f32 %v12227_v25, %v6269_v19 }
 0x665   :  { %v5837_v61 = vpop.f32.mrf.mxu2  ;;  %v5781_v36 = vpop.f32.mrf.mxu0 }
 0x666   :  { %v5810_v6 = vpop.f32.mrf.mxu1  ;;  %v6337_v20 = vmul.f32 %v12244_v41, %v6273_v48  ;;  %v6331_v2 = vadd.f32 %v6323_v60, %v6313_v51  ;;  %v12906_v60 = vld [vmem:[#allocation78_spill] sm:$0xff] }
 0x667   :  { %v12907_v51 = vld [vmem:[#allocation70_spill] sm:$0xff] }
 0x668   :  { %v12249_v24 = vadd.f32 %v6337_v20, %v6327_v27 }
 0x669   :  { %v9907_v63 = vpop.eup %9906 }
 0x66a   :  { %6353 = vst [vmem:[#allocation13] sm:$0xff] %v12249_v24  ;;  %v6245_v17 = vmul.f32 %v9907_v63, %v6213_v31  ;;  %v5752_v49 = vpop.f32.mrf.mxu3  ;;  %v12905_v31 = vld [vmem:[#allocation82_spill] sm:$0xff] }
 0x66b   :  { %v5782_v48 = vadd.f32 %v5781_v36, %v5752_v49 }
 0x66c   :  { %v6277_v4 = vadd.f32 %v6245_v17, %v6181_v55 }
 0x66d   :  { %v5839_v13 = vpop.f32.mrf.mxu2  ;;  %v5784_v47 = vpop.f32.mrf.mxu0  ;;  %v5811_v20 = vadd.f32 %v5810_v6, %v5782_v48 }
 0x66e   :  { %v5813_v14 = vpop.f32.mrf.mxu1  ;;  %v6341_v37 = vmul.f32 %v12244_v41, %v6277_v4 }
 0x66f   :  { %5986 = vmatmul.bf16.gmra.mxu3 %v12050_v10  ;;  %v5780_v10 = vadd.f32 %v12216_v1, %v5750_v28 }
 0x670   :  { %v12258_v40 = vadd.f32 %v6341_v37, %v6331_v2  ;;  %6015 = vmatmul.bf16.gmra.mxu0 %v12052_v42  ;;  %v12909_v37 = vld [vmem:[#allocation83_spill] sm:$0xff] }
 0x671   :  { %6044 = vmatmul.bf16.gmra.mxu1 %v12054_v50  ;;  %v5809_v12 = vadd.f32 %v12218_v15, %v5780_v10  ;;  %v6154_v10 = vmul.f32 %v12909_v37, %v10434_v59 }
 0x672   :  { %6073 = vmatmul.bf16.gmra.mxu2 %v12056_v57  ;;  %6357 = vst [vmem:[#allocation13 + $0x20] sm:$0xff] %v12258_v40  ;;  %v5755_v11 = vpop.f32.mrf.mxu3 }
 0x673   :  { %v5785_v44 = vadd.f32 %v5784_v47, %v5755_v11  ;;  %v12908_v47 = vld [vmem:[#allocation91_spill] sm:$0xff]  ;;  %v12910_v11 = vld [vmem:[#allocation86_spill] sm:$0xff] }
 0x675   :  { %v5842_v45 = vpop.f32.mrf.mxu2  ;;  %v5786_v30 = vpop.f32.mrf.mxu0  ;;  %v5814_v50 = vadd.f32 %v5813_v14, %v5785_v44  ;;  %v6194_v14 = vsub.f32 1.0, %v12908_v47 }
 0x676   :  { %v5815_v46 = vpop.f32.mrf.mxu1 }
 0x677   :  { %v5843_v0 = vadd.f32 %v5842_v45, %v5814_v50  ;;  %v12912_v50 = vld [vmem:[#allocation90_spill] sm:$0xff] }
 0x67a   :  { %v5757_v34 = vpop.f32.mrf.mxu3 }
 0x67b   :  { %v5787_v53 = vadd.f32 %v5786_v30, %v5757_v34  ;;  %v12911_v34 = vld [vmem:[#allocation98_spill] sm:$0xff] }
 0x67d   :  { %v5844_v26 = vpop.f32.mrf.mxu2  ;;  %v5789_v9 = vpop.f32.mrf.mxu0 }
 0x67e   :  { %v5818_v58 = vpop.f32.mrf.mxu1 }
 0x67f   :  { %5991 = vmatmul.bf16.gmra.mxu3 %v12078_v32  ;;  %v5838_v32 = vadd.f32 %v5837_v61, %v5809_v12  ;;  %v5840_v61 = vadd.f32 %v5839_v13, %v5811_v20  ;;  %v6186_v13 = vsub.f32 1.0, %v12909_v37  ;;  %v6170_v12 = vmul.f32 %v12911_v34, %v12865_v5 }
 0x680   :  { %6020 = vmatmul.bf16.gmra.mxu0 %v12080_v39  ;;  %v12903_v39 = vld [vmem:[#allocation74_spill] sm:$0xff] }
 0x681   :  { %6049 = vmatmul.bf16.gmra.mxu1 %v12082_v8  ;;  %v6098_v16 = vadd.f32 %v5843_v0, %v12903_v39  ;;  %v5816_v8 = vadd.f32 %v5815_v46, %v5787_v53  ;;  %v6094_v4 = vadd.f32 %v5840_v61, %v12907_v51  ;;  %v12913_v0 = vld [vmem:[#allocation95_spill] sm:$0xff]  ;;  %v12920_v51 = vld [vmem:[#allocation94_spill] sm:$0xff] }
 0x682   :  { %6078 = vmatmul.bf16.gmra.mxu2 %v12084_v29  ;;  %v5760_v42 = vpop.f32.mrf.mxu3  ;;  %v12904_v29 = vld [vmem:[#allocation66_spill] sm:$0xff]  ;;  %v6198_v53 = vsub.f32 1.0, %v12913_v0 }
 0x683   :  { %v5790_v57 = vadd.f32 %v5789_v9, %v5760_v42  ;;  %v6090_v19 = vadd.f32 %v5838_v32, %v12904_v29  ;;  %9908 = vtanh.f32 %v6098_v16  ;;  %v5845_v22 = vadd.f32 %v5844_v26, %v5816_v8  ;;  %v12915_v29 = vld [vmem:[#allocation61_spill] sm:$0xff] }
 0x684   :  { %v6206_v5 = vsub.f32 1.0, %v12915_v29 }
 0x685   :  { %v5847_v38 = vpop.f32.mrf.mxu2  ;;  %v5819_v18 = vadd.f32 %v5818_v58, %v5790_v57  ;;  %v5791_v56 = vpop.f32.mrf.mxu0  ;;  %9910 = vtanh.f32 %v6090_v19  ;;  %v6102_v17 = vadd.f32 %v5845_v22, %v12906_v60  ;;  %v6162_v58 = vmul.f32 %v12908_v47, %v10470_v7  ;;  %v12916_v19 = vld [vmem:[#allocation65_spill] sm:$0xff]  ;;  %v12918_v22 = vld [vmem:[#allocation35_spill] sm:$0xff] }
 0x686   :  { %v5820_v62 = vpop.f32.mrf.mxu1  ;;  %v6210_v20 = vsub.f32 1.0, %v12916_v19  ;;  %v6178_v61 = vmul.f32 %v12916_v19, %v12918_v22  ;;  %v12919_v60 = vld [vmem:[#allocation29_spill] sm:$0xff] }
 0x687   :  { %v5848_v1 = vadd.f32 %v5847_v38, %v5819_v18 }
 0x689   :  { %v6106_v15 = vadd.f32 %v5848_v1, %v12905_v31  ;;  %v12914_v1 = vld [vmem:[#allocation87_spill] sm:$0xff] }
 0x68a   :  { %v5762_v28 = vpop.f32.mrf.mxu3 }
 0x68b   :  { %v5792_v27 = vadd.f32 %v5791_v56, %v5762_v28  ;;  %9912 = vtanh.f32 %v6106_v15  ;;  %v6190_v28 = vsub.f32 1.0, %v12914_v1 }
 0x68c   :  { %9914 = vtanh.f32 %v6102_v17  ;;  %v6158_v17 = vmul.f32 %v12914_v1, %v12919_v60 }
 0x68d   :  { %v5849_v3 = vpop.f32.mrf.mxu2  ;;  %v5821_v52 = vadd.f32 %v5820_v62, %v5792_v27  ;;  %v5794_v55 = vpop.f32.mrf.mxu0  ;;  %9916 = vtanh.f32 %v6094_v4 }
 0x68e   :  { %v5823_v63 = vpop.f32.mrf.mxu1 }
 0x68f   :  { %5996 = vmatmul.bf16.gmra.mxu3 %v12106_v33  ;;  %v5850_v36 = vadd.f32 %v5849_v3, %v5821_v52  ;;  %v9909_v33 = vpop.eup %9908  ;;  %v12917_v52 = vld [vmem:[#allocation30_spill] sm:$0xff] }
 0x690   :  { %6025 = vmatmul.bf16.gmra.mxu0 %v12108_v43  ;;  %v9911_v46 = vpop.eup %9910  ;;  %v6226_v44 = vmul.f32 %v9909_v33, %v6194_v14  ;;  %v12921_v14 = vld [vmem:[#allocation33_spill] sm:$0xff] }
 0x691   :  { %6054 = vmatmul.bf16.gmra.mxu1 %v12110_v23  ;;  %v6110_v43 = vadd.f32 %v5850_v36, %v12910_v11  ;;  %v9913_v26 = vpop.eup %9912  ;;  %v6218_v42 = vmul.f32 %v9911_v46, %v6186_v13 }
 0x692   :  { %6083 = vmatmul.bf16.gmra.mxu2 %v12112_v35  ;;  %v5765_v6 = vpop.f32.mrf.mxu3  ;;  %v6202_v35 = vsub.f32 1.0, %v12911_v34  ;;  %v6258_v62 = vadd.f32 %v6226_v44, %v6162_v58  ;;  %v9915_v7 = vpop.eup %9914  ;;  %v12922_v58 = vld [vmem:[#allocation69_spill] sm:$0xff] }
 0x693   :  { %v5795_v49 = vadd.f32 %v5794_v55, %v5765_v6  ;;  %9918 = vtanh.f32 %v6110_v43  ;;  %v6250_v48 = vadd.f32 %v6218_v42, %v6154_v10  ;;  %v9917_v8 = vpop.eup %9916  ;;  %v6166_v55 = vmul.f32 %v12913_v0, %v12917_v52 }
 0x694   :  { %v6234_v38 = vmul.f32 %v9913_v26, %v6202_v35  ;;  %v6302_v15 = vmul.f32 %v12214_v54, %v6258_v62  ;;  %v6214_v44 = vsub.f32 1.0, %v12922_v58 }
 0x695   :  { %v5852_v2 = vpop.f32.mrf.mxu2  ;;  %v5824_v45 = vadd.f32 %v5823_v63, %v5795_v49  ;;  %v5796_v23 = vpop.f32.mrf.mxu0  ;;  %v6230_v63 = vmul.f32 %v9915_v7, %v6198_v53  ;;  %v6284_v6 = vmul.f32 %v12220_v21, %v6250_v48  ;;  %v6222_v49 = vmul.f32 %v9917_v8, %v6190_v28 }
 0x696   :  { %v5825_v30 = vpop.f32.mrf.mxu1  ;;  %v6266_v27 = vadd.f32 %v6234_v38, %v6170_v12 }
 0x697   :  { %v5853_v9 = vadd.f32 %v5852_v2, %v5824_v45  ;;  %v6174_v2 = vmul.f32 %v12915_v29, %v12921_v14  ;;  %v6310_v11 = vadd.f32 %v6302_v15, %v6284_v6  ;;  %v6262_v43 = vadd.f32 %v6230_v63, %v6166_v55 }
 0x698   :  { %v6320_v47 = vmul.f32 %v12227_v25, %v6266_v27 }
 0x699   :  { %v6114_v57 = vadd.f32 %v5853_v9, %v12912_v50  ;;  %v9919_v3 = vpop.eup %9918  ;;  %v6306_v10 = vmul.f32 %v12214_v54, %v6262_v43  ;;  %v12923_v50 = vld [vmem:[#allocation40_spill] sm:$0xff] }
 0x69a   :  { %v5767_v18 = vpop.f32.mrf.mxu3  ;;  %v6238_v33 = vmul.f32 %v9919_v3, %v6206_v5  ;;  %v6328_v35 = vadd.f32 %v6320_v47, %v6310_v11 }
 0x69b   :  { %9920 = vtanh.f32 %v6114_v57  ;;  %v5797_v56 = vadd.f32 %v5796_v23, %v5767_v18  ;;  %v6182_v57 = vmul.f32 %v12922_v58, %v12923_v50  ;;  %v12927_v50 = vld [vmem:[#allocation127_spill] sm:$0xff] }
 0x69c   :  { %v6270_v26 = vadd.f32 %v6238_v33, %v6174_v2  ;;  %v12924_v33 = vld [vmem:[#allocation124_spill] sm:$0xff] }
 0x69d   :  { %v5854_v32 = vpop.f32.mrf.mxu2  ;;  %v5826_v59 = vadd.f32 %v5825_v30, %v5797_v56  ;;  %v5895_v39 = vpop.f32.mrf.mxu0  ;;  %v6254_v30 = vadd.f32 %v6222_v49, %v6158_v17 }
 0x69e   :  { %v12292_v16 = vpop.f32.mrf.mxu1  ;;  %v6324_v18 = vmul.f32 %v12227_v25, %v6270_v26 }
 0x69f   :  { %v5855_v31 = vadd.f32 %v5854_v32, %v5826_v59  ;;  %v6288_v38 = vmul.f32 %v12220_v21, %v6254_v30 }
 0x6a1   :  { %v9921_v36 = vpop.eup %9920  ;;  %v6118_v4 = vadd.f32 %v5855_v31, %v12920_v51  ;;  %v6314_v0 = vadd.f32 %v6306_v10, %v6288_v38  ;;  %v12928_v38 = vld [vmem:[#allocation121_spill] sm:$0xff] }
 0x6a2   :  { %v6242_v37 = vmul.f32 %v9921_v36, %v6210_v20  ;;  %v5866_v13 = vpop.f32.mrf.mxu3 }
 0x6a3   :  { %9922 = vtanh.f32 %v6118_v4  ;;  %v6332_v1 = vadd.f32 %v6324_v18, %v6314_v0  ;;  %v5896_v52 = vadd.f32 %v5895_v39, %v5866_v13  ;;  %v12925_v39 = vld [vmem:[#allocation118_spill] sm:$0xff] }
 0x6a4   :  { %v6274_v45 = vadd.f32 %v6242_v37, %v6178_v61 }
 0x6a5   :  { %v5953_v23 = vpop.f32.mrf.mxu2  ;;  %v5897_v46 = vpop.f32.mrf.mxu0  ;;  %v5925_v61 = vadd.f32 %v12292_v16, %v5896_v52  ;;  %v12934_v52 = vld [vmem:[#allocation43_spill] sm:$0xff] }
 0x6a6   :  { %v5926_v34 = vpop.f32.mrf.mxu1  ;;  %v6338_v9 = vmul.f32 %v12244_v41, %v6274_v45 }
 0x6a7   :  { %v5954_v4 = vadd.f32 %v5953_v23, %v5925_v61 }
 0x6a8   :  { %v12311_v42 = vadd.f32 %v6338_v9, %v6328_v35  ;;  %v12926_v35 = vld [vmem:[#allocation130_spill] sm:$0xff] }
 0x6a9   :  { %v9923_v12 = vpop.eup %9922  ;;  %v6091_v13 = vadd.f32 %v5954_v4, %v12925_v39  ;;  %v12937_v4 = vld [vmem:[#allocation85_spill] sm:$0xff] }
 0x6aa   :  { %6354 = vst [vmem:[#allocation13 + $0x8] sm:$0xff] %v12311_v42  ;;  %v6246_v56 = vmul.f32 %v9923_v12, %v6214_v44  ;;  %v5868_v62 = vpop.f32.mrf.mxu3 }
 0x6ab   :  { %v5898_v47 = vadd.f32 %v5897_v46, %v5868_v62 }
 0x6ac   :  { %v6278_v53 = vadd.f32 %v6246_v56, %v6182_v57  ;;  %v12929_v56 = vld [vmem:[#allocation81_spill] sm:$0xff] }
 0x6ad   :  { %v5955_v32 = vpop.f32.mrf.mxu2  ;;  %v5900_v7 = vpop.f32.mrf.mxu0  ;;  %v5927_v45 = vadd.f32 %v5926_v34, %v5898_v47  ;;  %v6195_v34 = vsub.f32 1.0, %v12929_v56  ;;  %v6199_v47 = vsub.f32 1.0, %v12937_v4 }
 0x6ae   :  { %v5929_v48 = vpop.f32.mrf.mxu1  ;;  %v6342_v28 = vmul.f32 %v12244_v41, %v6278_v53  ;;  %v12930_v53 = vld [vmem:[#allocation73_spill] sm:$0xff] }
 0x6af   :  { %v5956_v23 = vadd.f32 %v5955_v32, %v5927_v45 }
 0x6b0   :  { %v12319_v59 = vadd.f32 %v6342_v28, %v6332_v1 }
 0x6b1   :  { %v6095_v18 = vadd.f32 %v5956_v23, %v12928_v38 }
 0x6b2   :  { %6358 = vst [vmem:[#allocation13 + $0x28] sm:$0xff] %v12319_v59  ;;  %v5871_v8 = vpop.f32.mrf.mxu3 }
 0x6b3   :  { %v5901_v15 = vadd.f32 %v5900_v7, %v5871_v8  ;;  %v6187_v7 = vsub.f32 1.0, %v12930_v53 }
 0x6b5   :  { %v5958_v27 = vpop.f32.mrf.mxu2  ;;  %v5902_v29 = vpop.f32.mrf.mxu0  ;;  %v5930_v63 = vadd.f32 %v5929_v48, %v5901_v15  ;;  %v12931_v48 = vld [vmem:[#allocation133_spill] sm:$0xff] }
 0x6b6   :  { %v5931_v5 = vpop.f32.mrf.mxu1 }
 0x6b7   :  { %v5959_v49 = vadd.f32 %v5958_v27, %v5930_v63 }
 0x6b9   :  { %v6099_v37 = vadd.f32 %v5959_v49, %v12924_v33 }
 0x6ba   :  { %v5873_v19 = vpop.f32.mrf.mxu3 }
 0x6bb   :  { %v5903_v51 = vadd.f32 %v5902_v29, %v5873_v19  ;;  %9924 = vtanh.f32 %v6099_v37  ;;  %v12932_v29 = vld [vmem:[#allocation89_spill] sm:$0xff] }
 0x6bc   :  { %9926 = vtanh.f32 %v6091_v13  ;;  %v12938_v37 = vld [vmem:[#allocation77_spill] sm:$0xff] }
 0x6bd   :  { %v5960_v20 = vpop.f32.mrf.mxu2  ;;  %v5905_v3 = vpop.f32.mrf.mxu0  ;;  %v5932_v11 = vadd.f32 %v5931_v5, %v5903_v51  ;;  %v6203_v5 = vsub.f32 1.0, %v12932_v29 }
 0x6be   :  { %v5934_v31 = vpop.f32.mrf.mxu1 }
 0x6bf   :  { %v5961_v44 = vadd.f32 %v5960_v20, %v5932_v11  ;;  %v6191_v11 = vsub.f32 1.0, %v12938_v37 }
 0x6c1   :  { %v6103_v57 = vadd.f32 %v5961_v44, %v12927_v50  ;;  %v9925_v0 = vpop.eup %9924 }
 0x6c2   :  { %v5876_v55 = vpop.f32.mrf.mxu3  ;;  %v9927_v32 = vpop.eup %9926  ;;  %v6227_v15 = vmul.f32 %v9925_v0, %v6195_v34  ;;  %v12944_v0 = vld [vmem:[#allocation139_spill] sm:$0xff] }
 0x6c3   :  { %v5906_v22 = vadd.f32 %v5905_v3, %v5876_v55  ;;  %v12933_v3 = vld [vmem:[#allocation49_spill] sm:$0xff]  ;;  %v6155_v55 = vmul.f32 %v12930_v53, %v12934_v52  ;;  %v6219_v63 = vmul.f32 %v9927_v32, %v6187_v7 }
 0x6c5   :  { %v5963_v36 = vpop.f32.mrf.mxu2  ;;  %v5935_v6 = vadd.f32 %v5934_v31, %v5906_v22  ;;  %v5907_v60 = vpop.f32.mrf.mxu0  ;;  %v6163_v31 = vmul.f32 %v12929_v56, %v12933_v3  ;;  %v12935_v22 = vld [vmem:[#allocation136_spill] sm:$0xff]  ;;  %v6251_v33 = vadd.f32 %v6219_v63, %v6155_v55  ;;  %v12943_v56 = vld [vmem:[#allocation46_spill] sm:$0xff] }
 0x6c6   :  { %v5936_v17 = vpop.f32.mrf.mxu1  ;;  %v6159_v34 = vmul.f32 %v12938_v37, %v12943_v56  ;;  %v12946_v63 = vld [vmem:[#allocation76_spill] sm:$0xff] }
 0x6c7   :  { %v5964_v14 = vadd.f32 %v5963_v36, %v5935_v6  ;;  %v12936_v36 = vld [vmem:[#allocation55_spill] sm:$0xff]  ;;  %v6259_v51 = vadd.f32 %v6227_v15, %v6163_v31 }
 0x6c8   :  { %v6171_v6 = vmul.f32 %v12932_v29, %v12936_v36 }
 0x6c9   :  { %v6107_v16 = vadd.f32 %v5964_v14, %v12926_v35  ;;  %v12939_v35 = vld [vmem:[#allocation68_spill] sm:$0xff]  ;;  %v6303_v23 = vmul.f32 %v12214_v54, %v6259_v51 }
 0x6ca   :  { %v5878_v2 = vpop.f32.mrf.mxu3 }
 0x6cb   :  { %v5908_v43 = vadd.f32 %v5907_v60, %v5878_v2  ;;  %9928 = vtanh.f32 %v6107_v16  ;;  %v6207_v16 = vsub.f32 1.0, %v12939_v35 }
 0x6cc   :  { %9930 = vtanh.f32 %v6103_v57  ;;  %v12942_v57 = vld [vmem:[#allocation63_spill] sm:$0xff] }
 0x6cd   :  { %v5965_v30 = vpop.f32.mrf.mxu2  ;;  %v5937_v26 = vadd.f32 %v5936_v17, %v5908_v43  ;;  %v5910_v9 = vpop.f32.mrf.mxu0  ;;  %9932 = vtanh.f32 %v6095_v18  ;;  %v6285_v18 = vmul.f32 %v12220_v21, %v6251_v33 }
 0x6ce   :  { %v5939_v58 = vpop.f32.mrf.mxu1 }
 0x6cf   :  { %v5966_v46 = vadd.f32 %v5965_v30, %v5937_v26  ;;  %v12940_v26 = vld [vmem:[#allocation72_spill] sm:$0xff]  ;;  %v6311_v32 = vadd.f32 %v6303_v23, %v6285_v18 }
 0x6d1   :  { %v6111_v1 = vadd.f32 %v5966_v46, %v12931_v48  ;;  %v9929_v19 = vpop.eup %9928  ;;  %v12941_v46 = vld [vmem:[#allocation52_spill] sm:$0xff]  ;;  %v12945_v48 = vld [vmem:[#allocation59_spill] sm:$0xff] }
 0x6d2   :  { %v5881_v10 = vpop.f32.mrf.mxu3  ;;  %v6235_v60 = vmul.f32 %v9929_v19, %v6203_v5  ;;  %v9931_v2 = vpop.eup %9930 }
 0x6d3   :  { %v5911_v12 = vadd.f32 %v5910_v9, %v5881_v10  ;;  %9934 = vtanh.f32 %v6111_v1  ;;  %v9933_v45 = vpop.eup %9932  ;;  %v6211_v9 = vsub.f32 1.0, %v12940_v26  ;;  %v6167_v10 = vmul.f32 %v12937_v4, %v12941_v46 }
 0x6d4   :  { %v6267_v30 = vadd.f32 %v6235_v60, %v6171_v6  ;;  %v6231_v50 = vmul.f32 %v9931_v2, %v6199_v47  ;;  %v6175_v1 = vmul.f32 %v12939_v35, %v12945_v48  ;;  %v12947_v6 = vld [vmem:[#allocation67_spill] sm:$0xff] }
 0x6d5   :  { %v5968_v62 = vpop.f32.mrf.mxu2  ;;  %v5940_v28 = vadd.f32 %v5939_v58, %v5911_v12  ;;  %v5912_v8 = vpop.f32.mrf.mxu0  ;;  %v6179_v12 = vmul.f32 %v12940_v26, %v12942_v57  ;;  %v6183_v60 = vmul.f32 %v12946_v63, %v12947_v6 }
 0x6d6   :  { %v5941_v27 = vpop.f32.mrf.mxu1  ;;  %v6321_v7 = vmul.f32 %v12227_v25, %v6267_v30  ;;  %v6263_v29 = vadd.f32 %v6231_v50, %v6167_v10 }
 0x6d7   :  { %v5969_v20 = vadd.f32 %v5968_v62, %v5940_v28  ;;  %v6223_v62 = vmul.f32 %v9933_v45, %v6191_v11 }
 0x6d8   :  { %v6329_v15 = vadd.f32 %v6321_v7, %v6311_v32  ;;  %v12948_v32 = vld [vmem:[#allocation129_spill] sm:$0xff] }
 0x6d9   :  { %v6115_v61 = vadd.f32 %v5969_v20, %v12935_v22  ;;  %v9935_v58 = vpop.eup %9934  ;;  %v6255_v20 = vadd.f32 %v6223_v62, %v6159_v34  ;;  %v6215_v22 = vsub.f32 1.0, %v12946_v63 }
 0x6da   :  { %v5883_v17 = vpop.f32.mrf.mxu3  ;;  %v6239_v28 = vmul.f32 %v9935_v58, %v6207_v16 }
 0x6db   :  { %9936 = vtanh.f32 %v6115_v61  ;;  %v5913_v49 = vadd.f32 %v5912_v8, %v5883_v17  ;;  %v6307_v61 = vmul.f32 %v12214_v54, %v6263_v29 }
 0x6dc   :  { %v6271_v52 = vadd.f32 %v6239_v28, %v6175_v1 }
 0x6dd   :  { %v5970_v14 = vpop.f32.mrf.mxu2  ;;  %v5942_v43 = vadd.f32 %v5941_v27, %v5913_v49  ;;  %v6011_v39 = vpop.f32.mrf.mxu0  ;;  %v6289_v49 = vmul.f32 %v12220_v21, %v6255_v20 }
 0x6de   :  { %v12341_v13 = vpop.f32.mrf.mxu1  ;;  %v6325_v51 = vmul.f32 %v12227_v25, %v6271_v52 }
 0x6df   :  { %v5971_v44 = vadd.f32 %v5970_v14, %v5942_v43  ;;  %v6315_v14 = vadd.f32 %v6307_v61, %v6289_v49 }
 0x6e1   :  { %v9937_v38 = vpop.eup %9936  ;;  %v6119_v53 = vadd.f32 %v5971_v44, %v12944_v0  ;;  %v6333_v43 = vadd.f32 %v6325_v51, %v6315_v14  ;;  %v12953_v14 = vld [vmem:[#allocation88_spill] sm:$0xff] }
 0x6e2   :  { %v6243_v8 = vmul.f32 %v9937_v38, %v6211_v9  ;;  %v5982_v27 = vpop.f32.mrf.mxu3 }
 0x6e3   :  { %9938 = vtanh.f32 %v6119_v53  ;;  %v6012_v50 = vadd.f32 %v6011_v39, %v5982_v27  ;;  %v12949_v39 = vld [vmem:[#allocation123_spill] sm:$0xff] }
 0x6e4   :  { %v6275_v5 = vadd.f32 %v6243_v8, %v6179_v12 }
 0x6e5   :  { %v6069_v19 = vpop.f32.mrf.mxu2  ;;  %v6013_v3 = vpop.f32.mrf.mxu0  ;;  %v6041_v18 = vadd.f32 %v12341_v13, %v6012_v50  ;;  %v12958_v50 = vld [vmem:[#allocation36_spill] sm:$0xff] }
 0x6e6   :  { %v6042_v31 = vpop.f32.mrf.mxu1  ;;  %v6339_v55 = vmul.f32 %v12244_v41, %v6275_v5 }
 0x6e7   :  { %v6070_v7 = vadd.f32 %v6069_v19, %v6041_v18 }
 0x6e8   :  { %v12360_v36 = vadd.f32 %v6339_v55, %v6329_v15  ;;  %v12950_v55 = vld [vmem:[#allocation135_spill] sm:$0xff] }
 0x6e9   :  { %v9939_v17 = vpop.eup %9938  ;;  %v6092_v27 = vadd.f32 %v6070_v7, %v12949_v39 }
 0x6ea   :  { %6355 = vst [vmem:[#allocation13 + $0x10] sm:$0xff] %v12360_v36  ;;  %v6247_v4 = vmul.f32 %v9939_v17, %v6215_v22  ;;  %v5984_v47 = vpop.f32.mrf.mxu3  ;;  %v12951_v17 = vld [vmem:[#allocation132_spill] sm:$0xff] }
 0x6eb   :  { %v6014_v48 = vadd.f32 %v6013_v3, %v5984_v47 }
 0x6ec   :  { %v6279_v2 = vadd.f32 %v6247_v4, %v6183_v60  ;;  %v12952_v4 = vld [vmem:[#allocation126_spill] sm:$0xff] }
 0x6ed   :  { %v6071_v33 = vpop.f32.mrf.mxu2  ;;  %v6016_v37 = vpop.f32.mrf.mxu0  ;;  %v6043_v15 = vadd.f32 %v6042_v31, %v6014_v48  ;;  %v6196_v31 = vsub.f32 1.0, %v12953_v14 }
 0x6ee   :  { %v6045_v11 = vpop.f32.mrf.mxu1  ;;  %v6343_v45 = vmul.f32 %v12244_v41, %v6279_v2 }
 0x6ef   :  { %v6072_v61 = vadd.f32 %v6071_v33, %v6043_v15 }
 0x6f0   :  { %v12368_v30 = vadd.f32 %v6343_v45, %v6333_v43  ;;  %v12955_v45 = vld [vmem:[#allocation138_spill] sm:$0xff] }
 0x6f1   :  { %v6096_v47 = vadd.f32 %v6072_v61, %v12952_v4 }
 0x6f2   :  { %6359 = vst [vmem:[#allocation13 + $0x30] sm:$0xff] %v12368_v30  ;;  %v5987_v35 = vpop.f32.mrf.mxu3 }
 0x6f3   :  { %v6017_v10 = vadd.f32 %v6016_v37, %v5987_v35 }
 0x6f5   :  { %v6074_v16 = vpop.f32.mrf.mxu2  ;;  %v6018_v26 = vpop.f32.mrf.mxu0  ;;  %v6046_v12 = vadd.f32 %v6045_v11, %v6017_v10  ;;  %v12954_v11 = vld [vmem:[#allocation80_spill] sm:$0xff] }
 0x6f6   :  { %v6047_v9 = vpop.f32.mrf.mxu1  ;;  %v6188_v43 = vsub.f32 1.0, %v12954_v11 }
 0x6f7   :  { %v6075_v0 = vadd.f32 %v6074_v16, %v6046_v12 }
 0x6f9   :  { %v6100_v29 = vadd.f32 %v6075_v0, %v12948_v32 }
 0x6fa   :  { %v5989_v58 = vpop.f32.mrf.mxu3 }
 0x6fb   :  { %v6019_v53 = vadd.f32 %v6018_v26, %v5989_v58  ;;  %9940 = vtanh.f32 %v6100_v29  ;;  %v12956_v26 = vld [vmem:[#allocation96_spill] sm:$0xff] }
 0x6fc   :  { %9942 = vtanh.f32 %v6092_v27 }
 0x6fd   :  { %v6076_v44 = vpop.f32.mrf.mxu2  ;;  %v6021_v23 = vpop.f32.mrf.mxu0  ;;  %v6048_v5 = vadd.f32 %v6047_v9, %v6019_v53  ;;  %v6204_v9 = vsub.f32 1.0, %v12956_v26 }
 0x6fe   :  { %v6050_v46 = vpop.f32.mrf.mxu1 }
 0x6ff   :  { %v6077_v22 = vadd.f32 %v6076_v44, %v6048_v5  ;;  %v12962_v5 = vld [vmem:[#allocation84_spill] sm:$0xff] }
 0x701   :  { %v6104_v49 = vadd.f32 %v6077_v22, %v12951_v17  ;;  %v9941_v37 = vpop.eup %9940 }
 0x702   :  { %v5992_v57 = vpop.f32.mrf.mxu3  ;;  %v9943_v33 = vpop.eup %9942  ;;  %v6228_v10 = vmul.f32 %v9941_v37, %v6196_v31  ;;  %v12968_v37 = vld [vmem:[#allocation143_spill] sm:$0xff] }
 0x703   :  { %v6022_v38 = vadd.f32 %v6021_v23, %v5992_v57  ;;  %v12957_v23 = vld [vmem:[#allocation41_spill] sm:$0xff]  ;;  %v6156_v57 = vmul.f32 %v12954_v11, %v12958_v50  ;;  %v6220_v12 = vmul.f32 %v9943_v33, %v6188_v43  ;;  %v12970_v50 = vld [vmem:[#allocation107_spill] sm:$0xff] }
 0x705   :  { %v6079_v56 = vpop.f32.mrf.mxu2  ;;  %v6051_v34 = vadd.f32 %v6050_v46, %v6022_v38  ;;  %v6023_v62 = vpop.f32.mrf.mxu0  ;;  %v6164_v46 = vmul.f32 %v12953_v14, %v12957_v23  ;;  %v12959_v38 = vld [vmem:[#allocation141_spill] sm:$0xff]  ;;  %v6252_v29 = vadd.f32 %v6220_v12, %v6156_v57  ;;  %v12967_v14 = vld [vmem:[#allocation38_spill] sm:$0xff]  ;;  %v6216_v57 = vsub.f32 1.0, %v12970_v50 }
 0x706   :  { %v6052_v1 = vpop.f32.mrf.mxu1  ;;  %v6160_v31 = vmul.f32 %v12962_v5, %v12967_v14 }
 0x707   :  { %v6080_v28 = vadd.f32 %v6079_v56, %v6051_v34  ;;  %v12960_v56 = vld [vmem:[#allocation47_spill] sm:$0xff]  ;;  %v6260_v48 = vadd.f32 %v6228_v10, %v6164_v46 }
 0x708   :  { %v6172_v34 = vmul.f32 %v12956_v26, %v12960_v56 }
 0x709   :  { %v6108_v13 = vadd.f32 %v6080_v28, %v12950_v55 }
 0x70a   :  { %v5994_v8 = vpop.f32.mrf.mxu3 }
 0x70b   :  { %v6024_v20 = vadd.f32 %v6023_v62, %v5994_v8  ;;  %9944 = vtanh.f32 %v6108_v13  ;;  %v12964_v13 = vld [vmem:[#allocation104_spill] sm:$0xff] }
 0x70c   :  { %9946 = vtanh.f32 %v6104_v49  ;;  %v12966_v49 = vld [vmem:[#allocation53_spill] sm:$0xff] }
 0x70d   :  { %v6081_v52 = vpop.f32.mrf.mxu2  ;;  %v6053_v63 = vadd.f32 %v6052_v1, %v6024_v20  ;;  %v6026_v19 = vpop.f32.mrf.mxu0  ;;  %9948 = vtanh.f32 %v6096_v47  ;;  %v12961_v1 = vld [vmem:[#allocation92_spill] sm:$0xff]  ;;  %v6192_v20 = vsub.f32 1.0, %v12962_v5  ;;  %v6286_v47 = vmul.f32 %v12220_v21, %v6252_v29 }
 0x70e   :  { %v6055_v6 = vpop.f32.mrf.mxu1  ;;  %v6200_v28 = vsub.f32 1.0, %v12961_v1 }
 0x70f   :  { %v6082_v3 = vadd.f32 %v6081_v52, %v6053_v63  ;;  %v12963_v52 = vld [vmem:[#allocation101_spill] sm:$0xff]  ;;  %v6212_v63 = vsub.f32 1.0, %v12964_v13 }
 0x710   :  { %v6208_v55 = vsub.f32 1.0, %v12963_v52 }
 0x711   :  { %v6112_v35 = vadd.f32 %v6082_v3, %v12955_v45  ;;  %v9945_v58 = vpop.eup %9944  ;;  %v6304_v3 = vmul.f32 %v12214_v54, %v6260_v48  ;;  %v12969_v45 = vld [vmem:[#allocation50_spill] sm:$0xff] }
 0x712   :  { %v5997_v60 = vpop.f32.mrf.mxu3  ;;  %v6236_v62 = vmul.f32 %v9945_v58, %v6204_v9  ;;  %v9947_v32 = vpop.eup %9946 }
 0x713   :  { %v6027_v51 = vadd.f32 %v6026_v19, %v5997_v60  ;;  %9950 = vtanh.f32 %v6112_v35  ;;  %v9949_v27 = vpop.eup %9948  ;;  %v6232_v17 = vmul.f32 %v9947_v32, %v6200_v28  ;;  %v6176_v35 = vmul.f32 %v12963_v52, %v12969_v45 }
 0x714   :  { %v6268_v15 = vadd.f32 %v6236_v62, %v6172_v34  ;;  %v6312_v26 = vadd.f32 %v6304_v3, %v6286_v47 }
 0x715   :  { %v6084_v2 = vpop.f32.mrf.mxu2  ;;  %v6056_v16 = vadd.f32 %v6055_v6, %v6027_v51  ;;  %v6028_v0 = vpop.f32.mrf.mxu0  ;;  %v12965_v6 = vld [vmem:[#allocation44_spill] sm:$0xff]  ;;  %v6180_v51 = vmul.f32 %v12964_v13, %v12966_v49 }
 0x716   :  { %v6057_v8 = vpop.f32.mrf.mxu1  ;;  %v6168_v60 = vmul.f32 %v12961_v1, %v12965_v6  ;;  %v6322_v43 = vmul.f32 %v12227_v25, %v6268_v15 }
 0x717   :  { %v6085_v44 = vadd.f32 %v6084_v2, %v6056_v16  ;;  %v6224_v2 = vmul.f32 %v9949_v27, %v6192_v20 }
 0x718   :  { %v6264_v9 = vadd.f32 %v6232_v17, %v6168_v60  ;;  %v6330_v23 = vadd.f32 %v6322_v43, %v6312_v26 }
 0x719   :  { %v6116_v18 = vadd.f32 %v6085_v44, %v12959_v38  ;;  %v9951_v61 = vpop.eup %9950  ;;  %v6256_v44 = vadd.f32 %v6224_v2, %v6160_v31 }
 0x71a   :  { %v5999_v53 = vpop.f32.mrf.mxu3  ;;  %v6240_v16 = vmul.f32 %v9951_v61, %v6208_v55  ;;  %v6308_v12 = vmul.f32 %v12214_v54, %v6264_v9 }
 0x71b   :  { %9952 = vtanh.f32 %v6116_v18  ;;  %v6029_v7 = vadd.f32 %v6028_v0, %v5999_v53  ;;  %v12971_v18 = vld [vmem:[#allocation57_spill] sm:$0xff]  ;;  %v6290_v62 = vmul.f32 %v12220_v21, %v6256_v44 }
 0x71c   :  { %v6272_v46 = vadd.f32 %v6240_v16, %v6176_v35  ;;  %v6184_v56 = vmul.f32 %v12970_v50, %v12971_v18 }
 0x71d   :  { %v6058_v39 = vadd.f32 %v6057_v8, %v6029_v7  ;;  %v6086_v22 = vpop.f32.mrf.mxu2  ;;  %v6316_v7 = vadd.f32 %v6308_v12, %v6290_v62 }
 0x71e   :  { %v6326_v0 = vmul.f32 %v12227_v25, %v6272_v46 }
 0x71f   :  { %v6087_v19 = vadd.f32 %v6086_v22, %v6058_v39 }
 0x720   :  { %v6334_v1 = vadd.f32 %v6326_v0, %v6316_v7 }
 0x721   :  { %v9953_v4 = vpop.eup %9952  ;;  %v6120_v11 = vadd.f32 %v6087_v19, %v12968_v37 }
 0x722   :  { %v6244_v33 = vmul.f32 %v9953_v4, %v6212_v63 }
 0x723   :  { %9954 = vtanh.f32 %v6120_v11 }
 0x724   :  { %v6276_v58 = vadd.f32 %v6244_v33, %v6180_v51 }
 0x726   :  { %v6340_v10 = vmul.f32 %v12244_v41, %v6276_v58 }
 0x728   :  { %v12407_v38 = vadd.f32 %v6340_v10, %v6330_v23 }
 0x729   :  { %v9955_v34 = vpop.eup %9954 }
 0x72a   :  { %6356 = vst [vmem:[#allocation13 + $0x18] sm:$0xff] %v12407_v38  ;;  %v6248_v53 = vmul.f32 %v9955_v34, %v6216_v57 }
 0x72c   :  { %v6280_v48 = vadd.f32 %v6248_v53, %v6184_v56 }
 0x72e   :  { %v6344_v28 = vmul.f32 %v12244_v41, %v6280_v48 }
 0x730   :  { %v12415_v8 = vadd.f32 %v6344_v28, %v6334_v1 }
 0x732   :  { %6360 = vst [vmem:[#allocation13 + $0x38] sm:$0xff] %v12415_v8 }
 0x733   :  { %10123 = dma.done.wait [#allocation5 + $0x2], 8192 }
 0x734   :  { %10124 = vsyncadd [#allocation5 + $0x2], 4294959104  ;;  %v8896_v54 = vld [vmem:[#allocation4 + $0x70] sm:$0xf]  ;;  %v9560_v32 = vld [vmem:[#allocation4 + $0x74] sm:$0xf0] }
 0x735   :  { %v8960_v29 = vld [vmem:[#allocation4 + $0xf0] sm:$0xf]  ;;  %v8897_v21 = vor.u32 %v9560_v32, %v8896_v54  ;;  %v9576_v5 = vld [vmem:[#allocation4 + $0xf4] sm:$0xf0]  ;;  %v8888_v25 = vld [vmem:[#allocation4 + $0x60] sm:$0xf] }
 0x736   :  { %v9558_v20 = vld [vmem:[#allocation4 + $0x64] sm:$0xf0]  ;;  %v8961_v39 = vor.u32 %v9576_v5, %v8960_v29  ;;  %v8952_v27 = vld [vmem:[#allocation4 + $0xe0] sm:$0xf]  ;;  %v8880_v55 = vld [vmem:[#allocation4 + $0x50] sm:$0xf] }
 0x737   :  { %v9574_v15 = vld [vmem:[#allocation4 + $0xe4] sm:$0xf0]  ;;  %6766 = vmatpush.bf16.msra.mxu3 %v8897_v21  ;;  %v8889_v52 = vor.u32 %v9558_v20, %v8888_v25  ;;  %v9556_v13 = vld [vmem:[#allocation4 + $0x54] sm:$0xf0]  ;;  %v8944_v63 = vld [vmem:[#allocation4 + $0xd0] sm:$0xf] }
 0x738   :  { %6780 = vmatpush.bf16.msrb.mxu0 %v8961_v39  ;;  %v8953_v41 = vor.u32 %v9574_v15, %v8952_v27  ;;  %v9572_v22 = vld [vmem:[#allocation4 + $0xd4] sm:$0xf0]  ;;  %v8881_v61 = vor.u32 %v9556_v13, %v8880_v55  ;;  %v8872_v3 = vld [vmem:[#allocation4 + $0x40] sm:$0xf]  ;;  %v9554_v6 = vld [vmem:[#allocation4 + $0x44] sm:$0xf0] }
 0x739   :  { %v8945_v19 = vor.u32 %v9572_v22, %v8944_v63  ;;  %v8936_v60 = vld [vmem:[#allocation4 + $0xc0] sm:$0xf]  ;;  %v9570_v17 = vld [vmem:[#allocation4 + $0xc4] sm:$0xf0]  ;;  %v8873_v49 = vor.u32 %v9554_v6, %v8872_v3  ;;  %v8864_v4 = vld [vmem:[#allocation4 + $0x30] sm:$0xf] }
 0x73a   :  { %v8937_v51 = vor.u32 %v9570_v17, %v8936_v60  ;;  %v9552_v47 = vld [vmem:[#allocation4 + $0x34] sm:$0xf0]  ;;  %v8928_v14 = vld [vmem:[#allocation4 + $0xb0] sm:$0xf]  ;;  %v8856_v11 = vld [vmem:[#allocation4 + $0x20] sm:$0xf] }
 0x73b   :  { %6767 = vmatpush.bf16.msra.mxu3 %v8889_v52  ;;  %v9568_v31 = vld [vmem:[#allocation4 + $0xb4] sm:$0xf0]  ;;  %v8865_v2 = vor.u32 %v9552_v47, %v8864_v4  ;;  %v9550_v43 = vld [vmem:[#allocation4 + $0x24] sm:$0xf0]  ;;  %v8920_v45 = vld [vmem:[#allocation4 + $0xa0] sm:$0xf] }
 0x73c   :  { %6781 = vmatpush.bf16.msrb.mxu0 %v8953_v41  ;;  %v8929_v37 = vor.u32 %v9568_v31, %v8928_v14  ;;  %v9566_v35 = vld [vmem:[#allocation4 + $0xa4] sm:$0xf0]  ;;  %v9575_v16 = vld [vmem:[#allocation4 + $0xf4] sm:$0xf]  ;;  %v8962_v33 = vld [vmem:[#allocation4 + $0xf8] sm:$0xf0]  ;;  %v8857_v26 = vor.u32 %v9550_v43, %v8856_v11 }
 0x73d   :  { %v8848_v9 = vld [vmem:[#allocation4 + $0x10] sm:$0xf]  ;;  %v8965_v58 = vor.u32 %v9575_v16, %v8962_v33  ;;  %v8921_v44 = vor.u32 %v9566_v35, %v8920_v45  ;;  %v9548_v23 = vld [vmem:[#allocation4 + $0x14] sm:$0xf0]  ;;  %v9559_v50 = vld [vmem:[#allocation4 + $0x74] sm:$0xf] }
 0x73e   :  { %v8912_v46 = vld [vmem:[#allocation4 + $0x90] sm:$0xf]  ;;  %v9564_v10 = vld [vmem:[#allocation4 + $0x94] sm:$0xf0]  ;;  %v8898_v57 = vld [vmem:[#allocation4 + $0x78] sm:$0xf0]  ;;  %v8849_v62 = vor.u32 %v9548_v23, %v8848_v9 }
 0x73f   :  { %6768 = vmatpush.bf16.msra.mxu3 %v8881_v61  ;;  %6836 = vmatpush.bf16.msrb.mxu2 %v8965_v58  ;;  %v9573_v12 = vld [vmem:[#allocation4 + $0xe4] sm:$0xf]  ;;  %v8840_v18 = vld [vmem:[#allocation4] sm:$0xf]  ;;  %v8901_v56 = vor.u32 %v9559_v50, %v8898_v57  ;;  %v8954_v34 = vld [vmem:[#allocation4 + $0xe8] sm:$0xf0]  ;;  %v8913_v1 = vor.u32 %v9564_v10, %v8912_v46 }
 0x740   :  { %6782 = vmatpush.bf16.msrb.mxu0 %v8945_v19  ;;  %v9546_v0 = vld [vmem:[#allocation4 + $0x4] sm:$0xf0]  ;;  %v8904_v53 = vld [vmem:[#allocation4 + $0x80] sm:$0xf]  ;;  %v8957_v48 = vor.u32 %v9573_v12, %v8954_v34  ;;  %v9024_v28 = vld [vmem:[#allocation4 + $0x170] sm:$0xf] }
 0x741   :  { %v9562_v7 = vld [vmem:[#allocation4 + $0x84] sm:$0xf0]  ;;  %v9592_v54 = vld [vmem:[#allocation4 + $0x174] sm:$0xf0]  ;;  %v9088_v32 = vld [vmem:[#allocation4 + $0x1f0] sm:$0xf]  ;;  %6822 = vmatpush.bf16.msrb.mxu1 %v8901_v56  ;;  %v8841_v52 = vor.u32 %v9546_v0, %v8840_v18 }
 0x742   :  { %v9557_v29 = vld [vmem:[#allocation4 + $0x64] sm:$0xf]  ;;  %v8890_v21 = vld [vmem:[#allocation4 + $0x68] sm:$0xf0]  ;;  %v9571_v5 = vld [vmem:[#allocation4 + $0xd4] sm:$0xf]  ;;  %v8905_v63 = vor.u32 %v9562_v7, %v8904_v53  ;;  %v9025_v22 = vor.u32 %v9592_v54, %v9024_v28 }
 0x743   :  { %6769 = vmatpush.bf16.msra.mxu3 %v8873_v49  ;;  %6837 = vmatpush.bf16.msrb.mxu2 %v8957_v48  ;;  %v9608_v25 = vld [vmem:[#allocation4 + $0x1f4] sm:$0xf0]  ;;  %v6364_v20 = vmax.f32 %v12249_v24, 0.0  ;;  %v6368_v39 = vmax.f32 %v12258_v40, 0.0  ;;  %v8893_v27 = vor.u32 %v9557_v29, %v8890_v21  ;;  %v8946_v15 = vld [vmem:[#allocation4 + $0xd8] sm:$0xf0] }
 0x744   :  { %6783 = vmatpush.bf16.msrb.mxu0 %v8937_v51  ;;  %v6365_v41 = vmax.f32 %v12311_v42, 0.0  ;;  %v6369_v55 = vmax.f32 %v12319_v59, 0.0  ;;  %v8949_v13 = vor.u32 %v9571_v5, %v8946_v15  ;;  %v9016_v61 = vld [vmem:[#allocation4 + $0x160] sm:$0xf]  ;;  %v9590_v19 = vld [vmem:[#allocation4 + $0x164] sm:$0xf0]  ;;  %v9089_v3 = vor.u32 %v9608_v25, %v9088_v32 }
 0x745   :  { %6823 = vmatpush.bf16.msrb.mxu1 %v8893_v27  ;;  %v9080_v6 = vld [vmem:[#allocation4 + $0x1e0] sm:$0xf]  ;;  %v9555_v24 = vld [vmem:[#allocation4 + $0x54] sm:$0xf]  ;;  %v8882_v40 = vld [vmem:[#allocation4 + $0x58] sm:$0xf0]  ;;  %v12422_v17 = vpack.c.bf16 %v6368_v39, %v6364_v20  ;;  %v9017_v47 = vor.u32 %v9590_v19, %v9016_v61 }
 0x746   :  { %v9606_v60 = vld [vmem:[#allocation4 + $0x1e4] sm:$0xf0]  ;;  %v8885_v49 = vor.u32 %v9555_v24, %v8882_v40  ;;  %v9569_v51 = vld [vmem:[#allocation4 + $0xc4] sm:$0xf]  ;;  %v8938_v42 = vld [vmem:[#allocation4 + $0xc8] sm:$0xf0]  ;;  %v12424_v59 = vpack.c.bf16 %v6369_v55, %v6365_v41 }
 0x747   :  { %6770 = vmatpush.bf16.msra.mxu3 %v8865_v2  ;;  %6838 = vmatpush.bf16.msrb.mxu2 %v8949_v13  ;;  %v8941_v4 = vor.u32 %v9569_v51, %v8938_v42  ;;  %v9008_v14 = vld [vmem:[#allocation4 + $0x150] sm:$0xf]  ;;  %v9588_v31 = vld [vmem:[#allocation4 + $0x154] sm:$0xf0]  ;;  %v9081_v2 = vor.u32 %v9606_v60, %v9080_v6  ;;  %v8874_v11 = vld [vmem:[#allocation4 + $0x48] sm:$0xf0] }
 0x748   :  { %6784 = vmatpush.bf16.msrb.mxu0 %v8929_v37  ;;  %v9553_v37 = vld [vmem:[#allocation4 + $0x44] sm:$0xf]  ;;  %v9567_v43 = vld [vmem:[#allocation4 + $0xb4] sm:$0xf]  ;;  %v9072_v45 = vld [vmem:[#allocation4 + $0x1d0] sm:$0xf]  ;;  %v9009_v9 = vor.u32 %v9588_v31, %v9008_v14 }
 0x749   :  { %6824 = vmatpush.bf16.msrb.mxu1 %v8885_v49  ;;  %v9604_v35 = vld [vmem:[#allocation4 + $0x1d4] sm:$0xf0]  ;;  %v8877_v16 = vor.u32 %v9553_v37, %v8874_v11  ;;  %v8930_v33 = vld [vmem:[#allocation4 + $0xb8] sm:$0xf0]  ;;  %v9000_v58 = vld [vmem:[#allocation4 + $0x140] sm:$0xf] }
 0x74a   :  { %v9073_v23 = vor.u32 %v9604_v35, %v9072_v45  ;;  %v9551_v46 = vld [vmem:[#allocation4 + $0x34] sm:$0xf]  ;;  %v8866_v10 = vld [vmem:[#allocation4 + $0x38] sm:$0xf0]  ;;  %v9565_v50 = vld [vmem:[#allocation4 + $0xa4] sm:$0xf] }
 0x74b   :  { %6771 = vmatpush.bf16.msra.mxu3 %v8857_v26  ;;  %6839 = vmatpush.bf16.msrb.mxu2 %v8941_v4  ;;  %v8933_v26 = vor.u32 %v9567_v43, %v8930_v33  ;;  %v9064_v57 = vld [vmem:[#allocation4 + $0x1c0] sm:$0xf]  ;;  %v9602_v12 = vld [vmem:[#allocation4 + $0x1c4] sm:$0xf0]  ;;  %v8869_v18 = vor.u32 %v9551_v46, %v8866_v10  ;;  %v8922_v56 = vld [vmem:[#allocation4 + $0xa8] sm:$0xf0] }
 0x74c   :  { %6785 = vmatpush.bf16.msrb.mxu0 %v8921_v44  ;;  %v9586_v44 = vld [vmem:[#allocation4 + $0x144] sm:$0xf0]  ;;  %v8925_v34 = vor.u32 %v9565_v50, %v8922_v56  ;;  %v8992_v0 = vld [vmem:[#allocation4 + $0x130] sm:$0xf]  ;;  %v9584_v53 = vld [vmem:[#allocation4 + $0x134] sm:$0xf0]  ;;  %v9065_v7 = vor.u32 %v9602_v12, %v9064_v57 }
 0x74d   :  { %6825 = vmatpush.bf16.msrb.mxu1 %v8877_v16  ;;  %v9549_v48 = vld [vmem:[#allocation4 + $0x24] sm:$0xf]  ;;  %v9563_v28 = vld [vmem:[#allocation4 + $0x94] sm:$0xf]  ;;  %v9056_v54 = vld [vmem:[#allocation4 + $0x1b0] sm:$0xf]  ;;  %v8993_v25 = vor.u32 %v9584_v53, %v8992_v0 }
 0x74e   :  { %v9600_v32 = vld [vmem:[#allocation4 + $0x1b4] sm:$0xf0]  ;;  %v8914_v21 = vld [vmem:[#allocation4 + $0x98] sm:$0xf0]  ;;  %v8984_v20 = vld [vmem:[#allocation4 + $0x120] sm:$0xf] }
 0x74f   :  { %6772 = vmatpush.bf16.msra.mxu3 %v8849_v62  ;;  %6840 = vmatpush.bf16.msrb.mxu2 %v8933_v26  ;;  %v9001_v62 = vor.u32 %v9586_v44, %v9000_v58  ;;  %v8917_v5 = vor.u32 %v9563_v28, %v8914_v21  ;;  %v9582_v39 = vld [vmem:[#allocation4 + $0x124] sm:$0xf0]  ;;  %v9057_v27 = vor.u32 %v9600_v32, %v9056_v54  ;;  %v9547_v15 = vld [vmem:[#allocation4 + $0x14] sm:$0xf]  ;;  %v9561_v41 = vld [vmem:[#allocation4 + $0x84] sm:$0xf] }
 0x750   :  { %6786 = vmatpush.bf16.msrb.mxu0 %v8913_v1  ;;  %v8858_v1 = vld [vmem:[#allocation4 + $0x28] sm:$0xf0]  ;;  %v9048_v55 = vld [vmem:[#allocation4 + $0x1a0] sm:$0xf]  ;;  %v9598_v13 = vld [vmem:[#allocation4 + $0x1a4] sm:$0xf0]  ;;  %v8985_v19 = vor.u32 %v9582_v39, %v8984_v20 }
 0x751   :  { %6826 = vmatpush.bf16.msrb.mxu1 %v8869_v18  ;;  %v8861_v29 = vor.u32 %v9549_v48, %v8858_v1  ;;  %v9049_v6 = vor.u32 %v9598_v13, %v9048_v55  ;;  %v9580_v24 = vld [vmem:[#allocation4 + $0x114] sm:$0xf0]  ;;  %v9545_v40 = vld [vmem:[#allocation4 + $0x4] sm:$0xf]  ;;  %v8842_v60 = vld [vmem:[#allocation4 + $0x8] sm:$0xf0] }
 0x752   :  { %v9040_v49 = vld [vmem:[#allocation4 + $0x190] sm:$0xf]  ;;  %v9596_v51 = vld [vmem:[#allocation4 + $0x194] sm:$0xf0]  ;;  %v8845_v42 = vor.u32 %v9545_v40, %v8842_v60  ;;  %v8968_v14 = vld [vmem:[#allocation4 + $0x100] sm:$0xf] }
 0x753   :  { %6773 = vmatpush.bf16.msra.mxu3 %v8841_v52  ;;  %6841 = vmatpush.bf16.msrb.mxu2 %v8925_v34  ;;  %v8850_v52 = vld [vmem:[#allocation4 + $0x18] sm:$0xf0]  ;;  %v9578_v31 = vld [vmem:[#allocation4 + $0x104] sm:$0xf0]  ;;  %v9591_v11 = vld [vmem:[#allocation4 + $0x174] sm:$0xf] }
 0x754   :  { %6787 = vmatpush.bf16.msrb.mxu0 %v8905_v63  ;;  %v8853_v63 = vor.u32 %v9547_v15, %v8850_v52  ;;  %v9594_v37 = vld [vmem:[#allocation4 + $0x184] sm:$0xf0]  ;;  %v9026_v43 = vld [vmem:[#allocation4 + $0x178] sm:$0xf0]  ;;  %v9607_v45 = vld [vmem:[#allocation4 + $0x1f4] sm:$0xf]  ;;  %v8969_v26 = vor.u32 %v9578_v31, %v8968_v14 }
 0x755   :  { %6827 = vmatpush.bf16.msrb.mxu1 %v8861_v29  ;;  %v9090_v35 = vld [vmem:[#allocation4 + $0x1f8] sm:$0xf0]  ;;  %v6366_v16 = vmax.f32 %v12360_v36, 0.0  ;;  %v6370_v33 = vmax.f32 %v12368_v30, 0.0  ;;  %v6371_v58 = vmax.f32 %v12415_v8, 0.0  ;;  %v9611_v31 = vld [vmem:[%s12510_s11 + $0x10] sm:$0xff] }
 0x756   :  { %6774 = vmatmul.bf16.vlgmr.msra.gmra.mxu3 %v12422_v17  ;;  %v9589_v46 = vld [vmem:[#allocation4 + $0x164] sm:$0xf]  ;;  %v9018_v10 = vld [vmem:[#allocation4 + $0x168] sm:$0xf0]  ;;  %v9587_v18 = vld [vmem:[#allocation4 + $0x154] sm:$0xf] }
 0x757   :  { %6794 = vmatpush.bf16.msrb.mxu3 %v9025_v22  ;;  %6788 = vmatmul.bf16.vlgmr.msrb.gmra.mxu0 %v12424_v59  ;;  %v8906_v22 = vld [vmem:[#allocation4 + $0x88] sm:$0xf0]  ;;  %v6438_v50 = vpack.c.bf16 %v6370_v33, %v6366_v16  ;;  %v9605_v57 = vld [vmem:[#allocation4 + $0x1e4] sm:$0xf]  ;;  %v9021_v30 = vor.u32 %v9589_v46, %v9018_v10  ;;  %v9010_v8 = vld [vmem:[#allocation4 + $0x158] sm:$0xf0] }
 0x758   :  { %6808 = vmatpush.bf16.msra.mxu0 %v9089_v3  ;;  %6842 = vmatpush.bf16.msrb.mxu2 %v8917_v5  ;;  %v8909_v61 = vor.u32 %v9561_v41, %v8906_v22  ;;  %v8976_v3 = vld [vmem:[#allocation4 + $0x110] sm:$0xf]  ;;  %v9082_v12 = vld [vmem:[#allocation4 + $0x1e8] sm:$0xf0]  ;;  %v9603_v56 = vld [vmem:[#allocation4 + $0x1d4] sm:$0xf] }
 0x759   :  { %6828 = vmatpush.bf16.msrb.mxu1 %v8853_v63  ;;  %v8977_v4 = vor.u32 %v9580_v24, %v8976_v3  ;;  %v9074_v34 = vld [vmem:[#allocation4 + $0x1d8] sm:$0xf0]  ;;  %v9585_v0 = vld [vmem:[#allocation4 + $0x144] sm:$0xf]  ;;  %v9002_v53 = vld [vmem:[#allocation4 + $0x148] sm:$0xf0] }
 0x75a   :  { %v9066_v48 = vld [vmem:[#allocation4 + $0x1c8] sm:$0xf0]  ;;  %v9005_v1 = vor.u32 %v9585_v0, %v9002_v53  ;;  %v9583_v54 = vld [vmem:[#allocation4 + $0x134] sm:$0xf]  ;;  %v8994_v32 = vld [vmem:[#allocation4 + $0x138] sm:$0xf0] }
 0x75b   :  { %6795 = vmatpush.bf16.msrb.mxu3 %v9017_v47  ;;  %v9041_v47 = vor.u32 %v9596_v51, %v9040_v49  ;;  %v9599_v29 = vld [vmem:[#allocation4 + $0x1b4] sm:$0xf]  ;;  %v9058_v21 = vld [vmem:[#allocation4 + $0x1b8] sm:$0xf0]  ;;  %v8997_v5 = vor.u32 %v9583_v54, %v8994_v32  ;;  %v9581_v20 = vld [vmem:[#allocation4 + $0x124] sm:$0xf] }
 0x75c   :  { %6809 = vmatpush.bf16.msra.mxu0 %v9081_v2  ;;  %6843 = vmatpush.bf16.msrb.mxu2 %v8909_v61  ;;  %v9032_v2 = vld [vmem:[#allocation4 + $0x180] sm:$0xf]  ;;  %v8986_v39 = vld [vmem:[#allocation4 + $0x128] sm:$0xf0]  ;;  %v9579_v55 = vld [vmem:[#allocation4 + $0x114] sm:$0xf] }
 0x75d   :  { %6829 = vmatpush.bf16.msrb.mxu1 %v8845_v42  ;;  %v9033_v44 = vor.u32 %v9594_v37, %v9032_v2  ;;  %v9050_v15 = vld [vmem:[#allocation4 + $0x1a8] sm:$0xf0]  ;;  %v8989_v52 = vor.u32 %v9581_v20, %v8986_v39  ;;  %v8978_v13 = vld [vmem:[#allocation4 + $0x118] sm:$0xf0]  ;;  %v9595_v63 = vld [vmem:[#allocation4 + $0x194] sm:$0xf] }
 0x75e   :  { %v9042_v22 = vld [vmem:[#allocation4 + $0x198] sm:$0xf0]  ;;  %v8981_v61 = vor.u32 %v9579_v55, %v8978_v13  ;;  %v9577_v3 = vld [vmem:[#allocation4 + $0x104] sm:$0xf]  ;;  %v9034_v40 = vld [vmem:[#allocation4 + $0x188] sm:$0xf0] }
 0x75f   :  { %6796 = vmatpush.bf16.msrb.mxu3 %v9009_v9  ;;  %6844 = vmatmul.bf16.vlgmr.msrb.gmra.mxu2 %v12424_v59  ;;  %v6367_v9 = vmax.f32 %v12407_v38, 0.0  ;;  %v9093_v59 = vor.u32 %v9607_v45, %v9090_v35  ;;  %v9085_v38 = vor.u32 %v9605_v57, %v9082_v12  ;;  %v9593_v24 = vld [vmem:[#allocation4 + $0x184] sm:$0xf]  ;;  %v9616_v51 = vld [vmem:[%s12510_s11 + $0x38] sm:$0xff]  ;;  %v9615_v42 = vld [vmem:[%s12510_s11 + $0x30] sm:$0xff]  ;;  %s7054_s19 = sshll.u32 %s12513_s14, 4  ;;  %s7055_s19 = int_to_ptr.hbm [resolvable:$true] %s7054_s19 }
 0x760   :  { %6810 = vmatpush.bf16.msra.mxu0 %v9073_v23  ;;  %v9029_v23 = vor.u32 %v9591_v11, %v9026_v43  ;;  %6830 = vmatmul.bf16.vlgmr.msrb.gmra.mxu1 %v12422_v17  ;;  %v9013_v17 = vor.u32 %v9587_v18, %v9010_v8  ;;  %v9037_v49 = vor.u32 %v9593_v24, %v9034_v40  ;;  %v9612_v14 = vld [vmem:[%s12510_s11 + $0x18] sm:$0xff]  ;;  %v9610_v2 = vld [vmem:[%s12510_s11 + $0x8] sm:$0xff]  ;;  %v9609_v43 = vld [vmem:[%s12510_s11] sm:$0xff]  ;;  %s10134_s20 = smov 512   ;;  %s10135_s21 = smov 32  }
 0x761   :  { %v6439_v36 = vpack.c.bf16 %v6371_v58, %v6367_v9  ;;  %7016 = vmatpush.bf16.msra.mxu1 %v9616_v51  ;;  %v9624_v45 = vld [vmem:[%s12510_s11 + $0x78] sm:$0xff]  ;;  %v9623_v35 = vld [vmem:[%s12510_s11 + $0x70] sm:$0xff]  ;;  %v6440_v33 = vld [vmem:[%s12509_s10] sm:$0x3] }
 0x762   :  { %7030 = vmatpush.bf16.msra.mxu2 %v9624_v45  ;;  %v9622_v9 = vld [vmem:[%s12510_s11 + $0x68] sm:$0xff]  ;;  %v9621_v58 = vld [vmem:[%s12510_s11 + $0x60] sm:$0xff]  ;;  %v9620_v46 = vld [vmem:[%s12510_s11 + $0x58] sm:$0xff] }
 0x763   :  { %6797 = vmatpush.bf16.msrb.mxu3 %v9001_v62  ;;  %v9077_v62 = vor.u32 %v9603_v56, %v9074_v34  ;;  %v9619_v57 = vld [vmem:[%s12510_s11 + $0x50] sm:$0xff] }
 0x764   :  { %6811 = vmatpush.bf16.msra.mxu0 %v9065_v7  ;;  %v9601_v7 = vld [vmem:[#allocation4 + $0x1c4] sm:$0xf] }
 0x765   :  { %v9069_v28 = vor.u32 %v9601_v7, %v9066_v48  ;;  %7017 = vmatpush.bf16.msra.mxu1 %v9615_v42 }
 0x766   :  { %7031 = vmatpush.bf16.msra.mxu2 %v9623_v35 }
 0x767   :  { %6798 = vmatpush.bf16.msrb.mxu3 %v8993_v25  ;;  %v9061_v25 = vor.u32 %v9599_v29, %v9058_v21 }
 0x768   :  { %6812 = vmatpush.bf16.msra.mxu0 %v9057_v27  ;;  %v9597_v27 = vld [vmem:[#allocation4 + $0x1a4] sm:$0xf] }
 0x769   :  { %v9053_v41 = vor.u32 %v9597_v27, %v9050_v15 }
 0x76a   :  { %7032 = vmatpush.bf16.msra.mxu2 %v9622_v9 }
 0x76b   :  { %6799 = vmatpush.bf16.msrb.mxu3 %v8985_v19  ;;  %v9045_v19 = vor.u32 %v9595_v63, %v9042_v22 }
 0x76c   :  { %6813 = vmatpush.bf16.msra.mxu0 %v9049_v6  ;;  %v8970_v6 = vld [vmem:[#allocation4 + $0x108] sm:$0xf0] }
 0x76d   :  { %v8973_v60 = vor.u32 %v9577_v3, %v8970_v6  ;;  %v9956_v3 = vld [vmem:[%s12511_s12] ss:$0 sm:$0xff] }
 0x76e   :  { %7033 = vmatpush.bf16.msra.mxu2 %v9621_v58 }
 0x76f   :  { %6800 = vmatpush.bf16.msrb.mxu3 %v8977_v4  ;;  %v9614_v4 = vld [vmem:[%s12510_s11 + $0x28] sm:$0xff] }
 0x770   :  { %6814 = vmatpush.bf16.msra.mxu0 %v9041_v47  ;;  %7018 = vmatpush.bf16.msra.mxu1 %v9614_v4  ;;  %v9613_v47 = vld [vmem:[%s12510_s11 + $0x20] sm:$0xff] }
 0x772   :  { %7034 = vmatpush.bf16.msra.mxu2 %v9620_v46 }
 0x773   :  { %6801 = vmatpush.bf16.msrb.mxu3 %v8969_v26 }
 0x774   :  { %6815 = vmatpush.bf16.msra.mxu0 %v9033_v44  ;;  %7019 = vmatpush.bf16.msra.mxu1 %v9613_v47  ;;  %v6442_v44 = vperm.slane %v6440_v33, 0 }
 0x776   :  { %6802 = vmatmul.bf16.vlgmr.msrb.gmra.mxu3 %v6438_v50  ;;  %7035 = vmatpush.bf16.msra.mxu2 %v9619_v57 }
 0x777   :  { %6850 = vmatpush.bf16.msra.mxu3 %v9029_v23  ;;  %6816 = vmatmul.bf16.vlgmr.msra.gmra.mxu0 %v6439_v36 }
 0x778   :  { %6864 = vmatpush.bf16.msrb.mxu0 %v9093_v59  ;;  %7020 = vmatpush.bf16.msra.mxu1 %v9612_v14 }
 0x77b   :  { %6851 = vmatpush.bf16.msra.mxu3 %v9021_v30  ;;  %v9618_v30 = vld [vmem:[%s12510_s11 + $0x48] sm:$0xff] }
 0x77c   :  { %6865 = vmatpush.bf16.msrb.mxu0 %v9085_v38  ;;  %7021 = vmatpush.bf16.msra.mxu1 %v9611_v31 }
 0x77d   :  { %7036 = vmatpush.bf16.msra.mxu2 %v9618_v30 }
 0x77f   :  { %6852 = vmatpush.bf16.msra.mxu3 %v9013_v17  ;;  %v9617_v17 = vld [vmem:[%s12510_s11 + $0x40] sm:$0xff]  ;;  %s10133_s11 = smov [#allocation13]  }
 0x780   :  { %6866 = vmatpush.bf16.msrb.mxu0 %v9077_v62  ;;  %7022 = vmatpush.bf16.msra.mxu1 %v9610_v2  ;;  %s7052_s4 = sshll.u32 %s10133_s11, 4  ;;  %s7053_s4 = int_to_ptr.vmem [resolvable:$true] %s7052_s4 }
 0x781   :  { %7037 = vmatpush.bf16.msra.mxu2 %v9617_v17  ;;  %7060 = dma.vmem_to_hbm [thread:$0]  %s7053_s4, 1024, %s7055_s19, [#allocation8], %s10134_s20, %s10134_s20, %s10135_s21  }
 0x783   :  { %6853 = vmatpush.bf16.msra.mxu3 %v9005_v1  ;;  %v6443_v1 = vperm.slane %v6440_v33, 1 }
 0x784   :  { %6867 = vmatpush.bf16.msrb.mxu0 %v9069_v28  ;;  %7023 = vmatpush.bf16.msra.mxu1 %v9609_v43 }
 0x787   :  { %6854 = vmatpush.bf16.msra.mxu3 %v8997_v5 }
 0x788   :  { %6868 = vmatpush.bf16.msrb.mxu0 %v9061_v25 }
 0x78b   :  { %6855 = vmatpush.bf16.msra.mxu3 %v8989_v52 }
 0x78c   :  { %6869 = vmatpush.bf16.msrb.mxu0 %v9053_v41 }
 0x78f   :  { %6856 = vmatpush.bf16.msra.mxu3 %v8981_v61 }
 0x790   :  { %6870 = vmatpush.bf16.msrb.mxu0 %v9045_v19 }
 0x793   :  { %6857 = vmatpush.bf16.msra.mxu3 %v8973_v60 }
 0x794   :  { %6871 = vmatpush.bf16.msrb.mxu0 %v9037_v49 }
 0x796   :  { %6858 = vmatmul.bf16.vlgmr.msra.gmra.mxu3 %v6438_v50 }
 0x797   :  { %6872 = vmatmul.bf16.vlgmr.msrb.gmra.mxu0 %v6439_v36 }
 0x7d4   :  { %v6789_v37 = vpop.f32.mrf.mxu0 }
 0x7d9   :  { %v6775_v11 = vpop.f32.mrf.mxu3 }
 0x7da   :  { %v6776_v23 = vadd.f32 %v6775_v11, %v6442_v44 }
 0x7dc   :  { %v6791_v16 = vpop.f32.mrf.mxu0  ;;  %v6790_v50 = vadd.f32 %v6789_v37, %v6776_v23 }
 0x7dd   :  { %v6831_v48 = vpop.f32.mrf.mxu1 }
 0x7de   :  { %v6832_v54 = vadd.f32 %v6831_v48, %v6443_v1 }
 0x7e1   :  { %v6777_v26 = vpop.f32.mrf.mxu3 }
 0x7e2   :  { %v6778_v12 = vadd.f32 %v6777_v26, %v6442_v44  ;;  %v6845_v28 = vpop.f32.mrf.mxu2 }
 0x7e3   :  { %v6846_v5 = vadd.f32 %v6845_v28, %v6832_v54 }
 0x7e4   :  { %v6792_v38 = vadd.f32 %v6791_v16, %v6778_v12 }
 0x7e5   :  { %v6833_v32 = vpop.f32.mrf.mxu1 }
 0x7e6   :  { %v6834_v25 = vadd.f32 %v6833_v32, %v6443_v1 }
 0x7ea   :  { %v6847_v20 = vpop.f32.mrf.mxu2 }
 0x7eb   :  { %v6848_v27 = vadd.f32 %v6847_v20, %v6834_v25 }
 0x7f4   :  { %v6817_v59 = vpop.f32.mrf.mxu0 }
 0x7f9   :  { %v6803_v10 = vpop.f32.mrf.mxu3 }
 0x7fa   :  { %v6804_v36 = vadd.f32 %v6803_v10, %v6790_v50 }
 0x7fc   :  { %v6819_v8 = vpop.f32.mrf.mxu0  ;;  %v6818_v56 = vadd.f32 %v6817_v59, %v6804_v36 }
 0x7fe   :  { %v6878_v0 = vmax.f32 %v6818_v56, 0.0 }
 0x801   :  { %v6805_v18 = vpop.f32.mrf.mxu3 }
 0x802   :  { %v6806_v34 = vadd.f32 %v6805_v18, %v6792_v38 }
 0x804   :  { %v6820_v62 = vadd.f32 %v6819_v8, %v6806_v34 }
 0x806   :  { %v6880_v53 = vmax.f32 %v6820_v62, 0.0 }
 0x808   :  { %v6914_v7 = vpack.c.bf16 %v6880_v53, %v6878_v0 }
 0x80a   :  { %7024 = vmatmul.bf16.vlgmr.msra.gmra.mxu1 %v6914_v7 }
 0x814   :  { %v6873_v29 = vpop.f32.mrf.mxu0 }
 0x819   :  { %v6859_v21 = vpop.f32.mrf.mxu3 }
 0x81a   :  { %v6860_v39 = vadd.f32 %v6859_v21, %v6846_v5 }
 0x81c   :  { %v6874_v52 = vadd.f32 %v6873_v29, %v6860_v39  ;;  %v6875_v55 = vpop.f32.mrf.mxu0 }
 0x81e   :  { %v6879_v63 = vmax.f32 %v6874_v52, 0.0 }
 0x821   :  { %v6861_v15 = vpop.f32.mrf.mxu3 }
 0x822   :  { %v6862_v41 = vadd.f32 %v6861_v15, %v6848_v27 }
 0x824   :  { %v6876_v13 = vadd.f32 %v6875_v55, %v6862_v41 }
 0x826   :  { %v6881_v22 = vmax.f32 %v6876_v13, 0.0 }
 0x828   :  { %v6915_v61 = vpack.c.bf16 %v6881_v22, %v6879_v63 }
 0x82a   :  { %7038 = vmatmul.bf16.vlgmr.msra.gmra.mxu2 %v6915_v61 }
 0x887   :  { %v7025_v19 = vpop.f32.mrf.mxu1 }
 0x888   :  { %v7026_v6 = vadd.f32 %v9956_v3, %v7025_v19 }
 0x88f   :  { %v7027_v60 = vpop.f32.mrf.mxu1 }
 0x890   :  { %v7028_v49 = vadd.f32 %v9956_v3, %v7027_v60 }
 0x8ad   :  { %v7039_v24 = vpop.f32.mrf.mxu2 }
 0x8ae   :  { %v7040_v40 = vadd.f32 %v7039_v24, %v7026_v6 }
 0x8b0   :  { %7044 = vst.msk [vmem:[%s12512_s13] sm:$0xff] %vm297_vm1, %v7040_v40 }
 0x8b5   :  { %v7041_v51 = vpop.f32.mrf.mxu2 }
 0x8b6   :  { %v7042_v42 = vadd.f32 %v7041_v51, %v7028_v49 }
 0x8b8   :  { %7045 = vst.msk [vmem:[%s12512_s13 + $0x8] sm:$0xff] %vm297_vm1, %v7042_v42 }
 0x8b9   :  { %10125 = dma.done.wait [#allocation8], 1024  }
 0x8ba   :  { %10126 = vsyncadd [#allocation8], 4294966272 }
 0x8bb   :  { %7067 = vsyncpa [#allocation7], 1 }
 0x8bc   :  { %7068 = vsyncpa [#allocation12], 1 }
 0x8bd   :  { %7069 = vsyncpa [#allocation8], 1 }
 0x8be   :  { %7070 = vsyncpa [#allocation9], 1 }
 0x8bf   :  { %7071 = vsyncmov [#allocation5] }
 0x8c2   :  { %s7072_s12 = vpop.sfrf %7071 }
 0x8c3   :  { %p9158_p0 = scmp.ne.s32.totalorder %s7072_s12, 0 }
 0x8c5   :  { %7076 = shalt.err (%p9158_p0)  }
 0x8c6   :  { %7078 = vsyncmov [#allocation5 + $0x1] }
 0x8c9   :  { %s7079_s5 = vpop.sfrf %7078 }
 0x8ca   :  { %p9159_p1 = scmp.ne.s32.totalorder %s7079_s5, 0 }
 0x8cc   :  { %7083 = shalt.err (%p9159_p1)  }
 0x8cd   :  { %7085 = vsyncmov [#allocation5 + $0x2] }
 0x8d0   :  { %s7086_s26 = vpop.sfrf %7085 }
 0x8d1   :  { %p9160_p2 = scmp.ne.s32.totalorder %s7086_s26, 0 }
 0x8d3   :  { %7090 = shalt.err (%p9160_p2)  }

</bundles_post_ra>
